<compile_context>
chip_gen: v7x
topology: tpu7x:2x2x1
jax: 0.10.0
libtpu: 0.0.40
codegen_flags: <defaults>
</compile_context>

<pallas_src>
import math

import jax
import jax.numpy as jnp
from jax import lax
from jax.experimental import pallas as pl
from jax.experimental.pallas import tpu as pltpu


NUM_CHARS = 16
EMBED_DIM = 32
HIDDEN_DIM = 64      # present in the PyTorch ctor, unused by its forward
NUM_LAYERS = 2
NHEAD = 2
HEAD_DIM = EMBED_DIM // NHEAD
DFF = 2048           # nn.Transformer default dim_feedforward
LN_EPS = 1e-5

# Fixed ordering of the packed weight arrays handed to the fused kernel.
_WEIGHT_ORDER = (
    "enc_qkv_w", "enc_qkv_b", "enc_wo", "enc_bo",
    "enc_l1_w", "enc_l1_b", "enc_l2_w", "enc_l2_b",
    "enc_n1_g", "enc_n1_b", "enc_n2_g", "enc_n2_b",
    "dec_sa_qkv_w", "dec_sa_qkv_b", "dec_sa_wo", "dec_sa_bo",
    "dec_ca_q_w", "dec_ca_q_b", "dec_ca_kv_w", "dec_ca_kv_b",
    "dec_ca_wo", "dec_ca_bo",
    "dec_l1_w", "dec_l1_b", "dec_l2_w", "dec_l2_b",
    "dec_n1_g", "dec_n1_b", "dec_n2_g", "dec_n2_b", "dec_n3_g", "dec_n3_b",
    "enc_fn_g", "enc_fn_b", "dec_fn_g", "dec_fn_b",
    "fc_w", "fc_b",
)


# ------------------------------ fused kernel ---------------------------------

def _fused_transformer_kernel(x_ref, *refs):
    *w_refs, out_ref = refs
    w = dict(zip(_WEIGHT_ORDER, w_refs))

    E, H, hd = EMBED_DIM, NHEAD, HEAD_DIM
    scale = 1.0 / math.sqrt(hd)

    def linear(h, w_val, b_val, relu=False):
        y = jnp.dot(h, w_val, preferred_element_type=jnp.float32) + b_val
        if relu:
            y = jnp.maximum(y, 0.0)
        return y

    def layer_norm(h, g, b):
        mu = jnp.mean(h, axis=-1, keepdims=True)
        c = h - mu
        var = jnp.mean(c * c, axis=-1, keepdims=True)
        return (c * lax.rsqrt(var + LN_EPS)) * g + b

    def mha(q, k, v, wo, bo):
        # q: (Sq, E), k/v: (Sk, E). Heads split by lane slicing; the output
        # projection is folded into the per-head loop:
        #   concat_h(head_h) @ Wo + bo == sum_h head_h @ Wo[h*hd:(h+1)*hd, :] + bo
        o = None
        for h_ in range(H):
            sl = slice(h_ * hd, (h_ + 1) * hd)
            qs, ks, vs = q[:, sl], k[:, sl], v[:, sl]
            s = lax.dot_general(qs, ks, (((1,), (1,)), ((), ())),
                                preferred_element_type=jnp.float32) * scale
            s = s - jnp.max(s, axis=-1, keepdims=True)
            p = jnp.exp(s)
            p = p * pl.reciprocal(jnp.sum(p, axis=-1, keepdims=True), approx=True)
            ctx = jnp.dot(p, vs, preferred_element_type=jnp.float32)        # (Sq, hd)
            contrib = jnp.dot(ctx, wo[sl, :], preferred_element_type=jnp.float32)
            o = contrib if o is None else o + contrib
        return o + bo

    x = x_ref[0]                                   # (S, E) for this batch element

    # ------------------------------ encoder ----------------------------------
    h = x
    for l in range(NUM_LAYERS):
        qkv = linear(h, w["enc_qkv_w"][l], w["enc_qkv_b"][l])
        a = mha(qkv[:, 0:E], qkv[:, E:2 * E], qkv[:, 2 * E:3 * E],
                w["enc_wo"][l], w["enc_bo"][l])
        h = layer_norm(h + a, w["enc_n1_g"][l], w["enc_n1_b"][l])
        f = linear(linear(h, w["enc_l1_w"][l], w["enc_l1_b"][l], relu=True),
                   w["enc_l2_w"][l], w["enc_l2_b"][l])
        h = layer_norm(h + f, w["enc_n2_g"][l], w["enc_n2_b"][l])
    memory = layer_norm(h, w["enc_fn_g"][...], w["enc_fn_b"][...])

    # --------------------------- decoder (tgt = x) ----------------------------
    t = x
    for l in range(NUM_LAYERS):
        qkv = linear(t, w["dec_sa_qkv_w"][l], w["dec_sa_qkv_b"][l])
        a = mha(qkv[:, 0:E], qkv[:, E:2 * E], qkv[:, 2 * E:3 * E],
                w["dec_sa_wo"][l], w["dec_sa_bo"][l])
        t = layer_norm(t + a, w["dec_n1_g"][l], w["dec_n1_b"][l])

        q = linear(t, w["dec_ca_q_w"][l], w["dec_ca_q_b"][l])
        kv = linear(memory, w["dec_ca_kv_w"][l], w["dec_ca_kv_b"][l])
        c = mha(q, kv[:, 0:E], kv[:, E:2 * E],
                w["dec_ca_wo"][l], w["dec_ca_bo"][l])
        t = layer_norm(t + c, w["dec_n2_g"][l], w["dec_n2_b"][l])

        f = linear(linear(t, w["dec_l1_w"][l], w["dec_l1_b"][l], relu=True),
                   w["dec_l2_w"][l], w["dec_l2_b"][l])
        t = layer_norm(t + f, w["dec_n3_g"][l], w["dec_n3_b"][l])
    dec_out = layer_norm(t, w["dec_fn_g"][...], w["dec_fn_b"][...])

    # ----------------------- output[-1] -> classifier -------------------------
    last = dec_out[-1:, :]                                       # (1, E)
    logits = linear(last, w["fc_w"][...], w["fc_b"][...])        # (1, num_chars)
    out_ref[...] = logits.reshape(1, 1, NUM_CHARS)


# -------------------------------- wrapper ------------------------------------

def _resident_spec(shape):
    # Full-array block whose index never changes across the batch grid axis,
    # so the weight is DMA'd into VMEM once and stays resident.
    zeros = (0,) * len(shape)
    return pl.BlockSpec(shape, lambda b, _z=zeros: _z)


@jax.jit
def transformer_forward(params, x_tokens):
    B, S = x_tokens.shape
    E = EMBED_DIM

    # Embedding lookup (single tiny XLA gather inside the same jit program).
    emb = jnp.take(params["embedding"], x_tokens, axis=0).astype(jnp.float32)  # (B,S,E)

    weights = [params[name] for name in _WEIGHT_ORDER]

    in_specs = [pl.BlockSpec((1, S, E), lambda b: (b, 0, 0))]
    in_specs += [_resident_spec(tuple(wv.shape)) for wv in weights]

    out = pl.pallas_call(
        _fused_transformer_kernel,
        out_shape=jax.ShapeDtypeStruct((B, 1, NUM_CHARS), jnp.float32),
        grid=(B,),
        in_specs=in_specs,
        out_specs=pl.BlockSpec((1, 1, NUM_CHARS), lambda b: (b, 0, 0)),
        compiler_params=pltpu.CompilerParams(
            dimension_semantics=("parallel",)),   # v7x: one batch elem per TC
    )(emb, *weights)
    return out.reshape(B, NUM_CHARS)


# --------------------------- parameter construction --------------------------

def init_params(key):
    keys = iter(jax.random.split(key, 64))

    def nrm(shape, scale=0.05):
        return (scale * jax.random.normal(next(keys), shape)).astype(jnp.float32)

    def zeros(shape):
        return jnp.zeros(shape, jnp.float32)

    def ones(shape):
        return jnp.ones(shape, jnp.float32)

    E, L = EMBED_DIM, NUM_LAYERS
    p = {"embedding": nrm((NUM_CHARS, E), scale=1.0)}

    # encoder layers (stacked over L)
    p["enc_qkv_w"] = nrm((L, E, 3 * E)); p["enc_qkv_b"] = zeros((L, 1, 3 * E))
    p["enc_wo"] = nrm((L, E, E));        p["enc_bo"] = zeros((L, 1, E))
    p["enc_l1_w"] = nrm((L, E, DFF));    p["enc_l1_b"] = zeros((L, 1, DFF))
    p["enc_l2_w"] = nrm((L, DFF, E));    p["enc_l2_b"] = zeros((L, 1, E))
    p["enc_n1_g"] = ones((L, 1, E));     p["enc_n1_b"] = zeros((L, 1, E))
    p["enc_n2_g"] = ones((L, 1, E));     p["enc_n2_b"] = zeros((L, 1, E))

    # decoder layers (stacked over L)
    p["dec_sa_qkv_w"] = nrm((L, E, 3 * E)); p["dec_sa_qkv_b"] = zeros((L, 1, 3 * E))
    p["dec_sa_wo"] = nrm((L, E, E));        p["dec_sa_bo"] = zeros((L, 1, E))
    p["dec_ca_q_w"] = nrm((L, E, E));       p["dec_ca_q_b"] = zeros((L, 1, E))
    p["dec_ca_kv_w"] = nrm((L, E, 2 * E));  p["dec_ca_kv_b"] = zeros((L, 1, 2 * E))
    p["dec_ca_wo"] = nrm((L, E, E));        p["dec_ca_bo"] = zeros((L, 1, E))
    p["dec_l1_w"] = nrm((L, E, DFF));       p["dec_l1_b"] = zeros((L, 1, DFF))
    p["dec_l2_w"] = nrm((L, DFF, E));       p["dec_l2_b"] = zeros((L, 1, E))
    p["dec_n1_g"] = ones((L, 1, E));        p["dec_n1_b"] = zeros((L, 1, E))
    p["dec_n2_g"] = ones((L, 1, E));        p["dec_n2_b"] = zeros((L, 1, E))
    p["dec_n3_g"] = ones((L, 1, E));        p["dec_n3_b"] = zeros((L, 1, E))

    # final norms + classifier
    p["enc_fn_g"] = ones((1, E)); p["enc_fn_b"] = zeros((1, E))
    p["dec_fn_g"] = ones((1, E)); p["dec_fn_b"] = zeros((1, E))
    p["fc_w"] = nrm((E, NUM_CHARS)); p["fc_b"] = zeros((1, NUM_CHARS))
    return p


# ------------------------- pure-JAX reference (check) ------------------------

def _reference_forward(params, x_tokens):
    E, H, hd = EMBED_DIM, NHEAD, HEAD_DIM
    scale = 1.0 / math.sqrt(hd)
    emb = jnp.take(params["embedding"], x_tokens, axis=0).astype(jnp.float32)  # (B,S,E)

    def ln(h, g, b):
        mu = jnp.mean(h, -1, keepdims=True)
        c = h - mu
        var = jnp.mean(c * c, -1, keepdims=True)
        return c / jnp.sqrt(var + LN_EPS) * g + b

    def mha(q, k, v, wo, bo):
        outs = []
        for h_ in range(H):
            sl = slice(h_ * hd, (h_ + 1) * hd)
            s = (q[:, sl] @ k[:, sl].T) * scale
            p = jax.nn.softmax(s, axis=-1)
            outs.append(p @ v[:, sl])
        return jnp.concatenate(outs, -1) @ wo + bo

    def one_batch(x):
        h = x
        for l in range(NUM_LAYERS):
            qkv = h @ params["enc_qkv_w"][l] + params["enc_qkv_b"][l]
            a = mha(qkv[:, :E], qkv[:, E:2 * E], qkv[:, 2 * E:],
                    params["enc_wo"][l], params["enc_bo"][l])
            h = ln(h + a, params["enc_n1_g"][l], params["enc_n1_b"][l])
            f = jnp.maximum(h @ params["enc_l1_w"][l] + params["enc_l1_b"][l], 0.0)
            f = f @ params["enc_l2_w"][l] + params["enc_l2_b"][l]
            h = ln(h + f, params["enc_n2_g"][l], params["enc_n2_b"][l])
        mem = ln(h, params["enc_fn_g"], params["enc_fn_b"])

        t = x
        for l in range(NUM_LAYERS):
            qkv = t @ params["dec_sa_qkv_w"][l] + params["dec_sa_qkv_b"][l]
            a = mha(qkv[:, :E], qkv[:, E:2 * E], qkv[:, 2 * E:],
                    params["dec_sa_wo"][l], params["dec_sa_bo"][l])
            t = ln(t + a, params["dec_n1_g"][l], params["dec_n1_b"][l])
            q = t @ params["dec_ca_q_w"][l] + params["dec_ca_q_b"][l]
            kv = mem @ params["dec_ca_kv_w"][l] + params["dec_ca_kv_b"][l]
            c = mha(q, kv[:, :E], kv[:, E:],
                    params["dec_ca_wo"][l], params["dec_ca_bo"][l])
            t = ln(t + c, params["dec_n2_g"][l], params["dec_n2_b"][l])
            f = jnp.maximum(t @ params["dec_l1_w"][l] + params["dec_l1_b"][l], 0.0)
            f = f @ params["dec_l2_w"][l] + params["dec_l2_b"][l]
            t = ln(t + f, params["dec_n3_g"][l], params["dec_n3_b"][l])
        dec = ln(t, params["dec_fn_g"], params["dec_fn_b"])
        return dec[-1] @ params["fc_w"] + params["fc_b"][0]

    return jax.vmap(one_batch)(emb)


# ----------------------------------- main -------------------------------------

if __name__ == "__main__":
    key = jax.random.PRNGKey(0)
    pkey, xkey = jax.random.split(key)
    params = init_params(pkey)

    B, S = 2, 8
    x_tokens = jax.random.randint(xkey, (B, S), 0, NUM_CHARS, dtype=jnp.int32)

    logits = transformer_forward(params, x_tokens)
    jax.block_until_ready(logits)

    assert logits.shape == (B, NUM_CHARS), logits.shape
    assert logits.dtype == jnp.float32

    ref = _reference_forward(params, x_tokens)
    max_err = float(jnp.max(jnp.abs(logits - ref)))
    assert max_err < 5e-2, f"mismatch vs reference: {max_err}"

    print("KERNEL_OK")
</pallas_src>

<mosaic_0001>
module attributes {stable_mosaic.version = 11 : i64} {
  func.func @_fused_transformer_kernel(%arg0: i32, %arg1: memref<1x8x32xf32, #tpu.memory_space<vmem>>, %arg2: memref<2x32x96xf32, #tpu.memory_space<vmem>>, %arg3: memref<2x1x96xf32, #tpu.memory_space<vmem>>, %arg4: memref<2x32x32xf32, #tpu.memory_space<vmem>>, %arg5: memref<2x1x32xf32, #tpu.memory_space<vmem>>, %arg6: memref<2x32x2048xf32, #tpu.memory_space<vmem>>, %arg7: memref<2x1x2048xf32, #tpu.memory_space<vmem>>, %arg8: memref<2x2048x32xf32, #tpu.memory_space<vmem>>, %arg9: memref<2x1x32xf32, #tpu.memory_space<vmem>>, %arg10: memref<2x1x32xf32, #tpu.memory_space<vmem>>, %arg11: memref<2x1x32xf32, #tpu.memory_space<vmem>>, %arg12: memref<2x1x32xf32, #tpu.memory_space<vmem>>, %arg13: memref<2x1x32xf32, #tpu.memory_space<vmem>>, %arg14: memref<2x32x96xf32, #tpu.memory_space<vmem>>, %arg15: memref<2x1x96xf32, #tpu.memory_space<vmem>>, %arg16: memref<2x32x32xf32, #tpu.memory_space<vmem>>, %arg17: memref<2x1x32xf32, #tpu.memory_space<vmem>>, %arg18: memref<2x32x32xf32, #tpu.memory_space<vmem>>, %arg19: memref<2x1x32xf32, #tpu.memory_space<vmem>>, %arg20: memref<2x32x64xf32, #tpu.memory_space<vmem>>, %arg21: memref<2x1x64xf32, #tpu.memory_space<vmem>>, %arg22: memref<2x32x32xf32, #tpu.memory_space<vmem>>, %arg23: memref<2x1x32xf32, #tpu.memory_space<vmem>>, %arg24: memref<2x32x2048xf32, #tpu.memory_space<vmem>>, %arg25: memref<2x1x2048xf32, #tpu.memory_space<vmem>>, %arg26: memref<2x2048x32xf32, #tpu.memory_space<vmem>>, %arg27: memref<2x1x32xf32, #tpu.memory_space<vmem>>, %arg28: memref<2x1x32xf32, #tpu.memory_space<vmem>>, %arg29: memref<2x1x32xf32, #tpu.memory_space<vmem>>, %arg30: memref<2x1x32xf32, #tpu.memory_space<vmem>>, %arg31: memref<2x1x32xf32, #tpu.memory_space<vmem>>, %arg32: memref<2x1x32xf32, #tpu.memory_space<vmem>>, %arg33: memref<2x1x32xf32, #tpu.memory_space<vmem>>, %arg34: memref<1x32xf32, #tpu.memory_space<vmem>>, %arg35: memref<1x32xf32, #tpu.memory_space<vmem>>, %arg36: memref<1x32xf32, #tpu.memory_space<vmem>>, %arg37: memref<1x32xf32, #tpu.memory_space<vmem>>, %arg38: memref<32x16xf32, #tpu.memory_space<vmem>>, %arg39: memref<1x16xf32, #tpu.memory_space<vmem>>, %arg40: memref<1x1x16xf32, #tpu.memory_space<vmem>>) attributes {dimension_semantics = [#tpu.dimension_semantics<parallel>], iteration_bounds = array<i64: 2>, scalar_prefetch = 0 : i64, scratch_operands = 0 : i64, tpu.core_type = #tpu.core_type<tc>, window_params = [{transform_indices = @transform_0, window_bounds = array<i64: 1, 8, 32>}, {pipeline_mode = #tpu.pipeline_mode<synchronous>, transform_indices = @transform_1, window_bounds = array<i64: 2, 32, 96>}, {pipeline_mode = #tpu.pipeline_mode<synchronous>, transform_indices = @transform_2, window_bounds = array<i64: 2, 1, 96>}, {pipeline_mode = #tpu.pipeline_mode<synchronous>, transform_indices = @transform_3, window_bounds = array<i64: 2, 32, 32>}, {pipeline_mode = #tpu.pipeline_mode<synchronous>, transform_indices = @transform_4, window_bounds = array<i64: 2, 1, 32>}, {pipeline_mode = #tpu.pipeline_mode<synchronous>, transform_indices = @transform_5, window_bounds = array<i64: 2, 32, 2048>}, {pipeline_mode = #tpu.pipeline_mode<synchronous>, transform_indices = @transform_6, window_bounds = array<i64: 2, 1, 2048>}, {pipeline_mode = #tpu.pipeline_mode<synchronous>, transform_indices = @transform_7, window_bounds = array<i64: 2, 2048, 32>}, {pipeline_mode = #tpu.pipeline_mode<synchronous>, transform_indices = @transform_8, window_bounds = array<i64: 2, 1, 32>}, {pipeline_mode = #tpu.pipeline_mode<synchronous>, transform_indices = @transform_9, window_bounds = array<i64: 2, 1, 32>}, {pipeline_mode = #tpu.pipeline_mode<synchronous>, transform_indices = @transform_10, window_bounds = array<i64: 2, 1, 32>}, {pipeline_mode = #tpu.pipeline_mode<synchronous>, transform_indices = @transform_11, window_bounds = array<i64: 2, 1, 32>}, {pipeline_mode = #tpu.pipeline_mode<synchronous>, transform_indices = @transform_12, window_bounds = array<i64: 2, 1, 32>}, {pipeline_mode = #tpu.pipeline_mode<synchronous>, transform_indices = @transform_13, window_bounds = array<i64: 2, 32, 96>}, {pipeline_mode = #tpu.pipeline_mode<synchronous>, transform_indices = @transform_14, window_bounds = array<i64: 2, 1, 96>}, {pipeline_mode = #tpu.pipeline_mode<synchronous>, transform_indices = @transform_15, window_bounds = array<i64: 2, 32, 32>}, {pipeline_mode = #tpu.pipeline_mode<synchronous>, transform_indices = @transform_16, window_bounds = array<i64: 2, 1, 32>}, {pipeline_mode = #tpu.pipeline_mode<synchronous>, transform_indices = @transform_17, window_bounds = array<i64: 2, 32, 32>}, {pipeline_mode = #tpu.pipeline_mode<synchronous>, transform_indices = @transform_18, window_bounds = array<i64: 2, 1, 32>}, {pipeline_mode = #tpu.pipeline_mode<synchronous>, transform_indices = @transform_19, window_bounds = array<i64: 2, 32, 64>}, {pipeline_mode = #tpu.pipeline_mode<synchronous>, transform_indices = @transform_20, window_bounds = array<i64: 2, 1, 64>}, {pipeline_mode = #tpu.pipeline_mode<synchronous>, transform_indices = @transform_21, window_bounds = array<i64: 2, 32, 32>}, {pipeline_mode = #tpu.pipeline_mode<synchronous>, transform_indices = @transform_22, window_bounds = array<i64: 2, 1, 32>}, {pipeline_mode = #tpu.pipeline_mode<synchronous>, transform_indices = @transform_23, window_bounds = array<i64: 2, 32, 2048>}, {pipeline_mode = #tpu.pipeline_mode<synchronous>, transform_indices = @transform_24, window_bounds = array<i64: 2, 1, 2048>}, {pipeline_mode = #tpu.pipeline_mode<synchronous>, transform_indices = @transform_25, window_bounds = array<i64: 2, 2048, 32>}, {pipeline_mode = #tpu.pipeline_mode<synchronous>, transform_indices = @transform_26, window_bounds = array<i64: 2, 1, 32>}, {pipeline_mode = #tpu.pipeline_mode<synchronous>, transform_indices = @transform_27, window_bounds = array<i64: 2, 1, 32>}, {pipeline_mode = #tpu.pipeline_mode<synchronous>, transform_indices = @transform_28, window_bounds = array<i64: 2, 1, 32>}, {pipeline_mode = #tpu.pipeline_mode<synchronous>, transform_indices = @transform_29, window_bounds = array<i64: 2, 1, 32>}, {pipeline_mode = #tpu.pipeline_mode<synchronous>, transform_indices = @transform_30, window_bounds = array<i64: 2, 1, 32>}, {pipeline_mode = #tpu.pipeline_mode<synchronous>, transform_indices = @transform_31, window_bounds = array<i64: 2, 1, 32>}, {pipeline_mode = #tpu.pipeline_mode<synchronous>, transform_indices = @transform_32, window_bounds = array<i64: 2, 1, 32>}, {pipeline_mode = #tpu.pipeline_mode<synchronous>, transform_indices = @transform_33, window_bounds = array<i64: 1, 32>}, {pipeline_mode = #tpu.pipeline_mode<synchronous>, transform_indices = @transform_34, window_bounds = array<i64: 1, 32>}, {pipeline_mode = #tpu.pipeline_mode<synchronous>, transform_indices = @transform_35, window_bounds = array<i64: 1, 32>}, {pipeline_mode = #tpu.pipeline_mode<synchronous>, transform_indices = @transform_36, window_bounds = array<i64: 1, 32>}, {pipeline_mode = #tpu.pipeline_mode<synchronous>, transform_indices = @transform_37, window_bounds = array<i64: 32, 16>}, {pipeline_mode = #tpu.pipeline_mode<synchronous>, transform_indices = @transform_38, window_bounds = array<i64: 1, 16>}, {transform_indices = @transform_39, window_bounds = array<i64: 1, 1, 16>}]} {
    %c0 = arith.constant 0 : index
    %c0_0 = arith.constant 0 : index
    %c0_1 = arith.constant 0 : index
    %0 = vector.load %arg1[%c0, %c0_0, %c0_1] : memref<1x8x32xf32, #tpu.memory_space<vmem>>, vector<1x8x32xf32>
    %1 = vector.shape_cast %0 : vector<1x8x32xf32> to vector<8x32xf32>
    %c0_2 = arith.constant 0 : index
    %c0_3 = arith.constant 0 : index
    %c0_4 = arith.constant 0 : index
    %2 = vector.load %arg2[%c0_2, %c0_3, %c0_4] : memref<2x32x96xf32, #tpu.memory_space<vmem>>, vector<1x32x96xf32>
    %3 = vector.shape_cast %2 : vector<1x32x96xf32> to vector<32x96xf32>
    %c0_5 = arith.constant 0 : index
    %c0_6 = arith.constant 0 : index
    %c0_7 = arith.constant 0 : index
    %4 = vector.load %arg3[%c0_5, %c0_6, %c0_7] : memref<2x1x96xf32, #tpu.memory_space<vmem>>, vector<1x1x96xf32>
    %5 = vector.shape_cast %4 : vector<1x1x96xf32> to vector<1x96xf32>
    %cst = arith.constant dense<0.000000e+00> : vector<8x96xf32>
    %6 = tpu.matmul %1, %3, %cst {dimension_numbers = #tpu.dot_dimension_numbers<[1], [0], [0], [1], [0, 0, 1, 1], [], []>} : vector<8x32xf32>, vector<32x96xf32>, vector<8x96xf32> -> vector<8x96xf32>
    %7 = vector.broadcast %5 : vector<1x96xf32> to vector<8x96xf32>
    %8 = arith.addf %6, %7 : vector<8x96xf32>
    %9 = vector.extract_strided_slice %8 {offsets = [0, 0], sizes = [8, 32], strides = [1, 1]} : vector<8x96xf32> to vector<8x32xf32>
    %10 = vector.extract_strided_slice %8 {offsets = [0, 32], sizes = [8, 32], strides = [1, 1]} : vector<8x96xf32> to vector<8x32xf32>
    %11 = vector.extract_strided_slice %8 {offsets = [0, 64], sizes = [8, 32], strides = [1, 1]} : vector<8x96xf32> to vector<8x32xf32>
    %c0_8 = arith.constant 0 : index
    %c0_9 = arith.constant 0 : index
    %c0_10 = arith.constant 0 : index
    %12 = vector.load %arg4[%c0_8, %c0_9, %c0_10] : memref<2x32x32xf32, #tpu.memory_space<vmem>>, vector<1x32x32xf32>
    %13 = vector.shape_cast %12 : vector<1x32x32xf32> to vector<32x32xf32>
    %c0_11 = arith.constant 0 : index
    %c0_12 = arith.constant 0 : index
    %c0_13 = arith.constant 0 : index
    %14 = vector.load %arg5[%c0_11, %c0_12, %c0_13] : memref<2x1x32xf32, #tpu.memory_space<vmem>>, vector<1x1x32xf32>
    %15 = vector.shape_cast %14 : vector<1x1x32xf32> to vector<1x32xf32>
    %16 = vector.extract_strided_slice %9 {offsets = [0, 0], sizes = [8, 16], strides = [1, 1]} : vector<8x32xf32> to vector<8x16xf32>
    %17 = vector.extract_strided_slice %10 {offsets = [0, 0], sizes = [8, 16], strides = [1, 1]} : vector<8x32xf32> to vector<8x16xf32>
    %18 = vector.extract_strided_slice %11 {offsets = [0, 0], sizes = [8, 16], strides = [1, 1]} : vector<8x32xf32> to vector<8x16xf32>
    %cst_14 = arith.constant dense<0.000000e+00> : vector<8x8xf32>
    %19 = tpu.matmul %16, %17, %cst_14 {dimension_numbers = #tpu.dot_dimension_numbers<[1], [1], [0], [0], [0, 0, 1, 0], [], []>} : vector<8x16xf32>, vector<8x16xf32>, vector<8x8xf32> -> vector<8x8xf32>
    %cst_15 = arith.constant 2.500000e-01 : f32
    %20 = vector.broadcast %cst_15 : f32 to vector<8x8xf32>
    %21 = arith.mulf %19, %20 : vector<8x8xf32>
    %cst_16 = arith.constant dense<0xFF800000> : vector<8xf32>
    %22 = vector.multi_reduction <maximumf>, %21, %cst_16 [1] : vector<8x8xf32> to vector<8xf32>
    %23 = vector.shape_cast %22 : vector<8xf32> to vector<8x1xf32>
    %24 = vector.broadcast %23 : vector<8x1xf32> to vector<8x8xf32>
    %25 = arith.subf %21, %24 : vector<8x8xf32>
    %26 = math.exp %25 : vector<8x8xf32>
    %cst_17 = arith.constant dense<0.000000e+00> : vector<8xf32>
    %27 = vector.multi_reduction <add>, %26, %cst_17 [1] : vector<8x8xf32> to vector<8xf32>
    %28 = vector.shape_cast %27 : vector<8xf32> to vector<8x1xf32>
    %29 = tpu.reciprocal %28 {approx = true} : vector<8x1xf32> -> vector<8x1xf32>
    %30 = vector.broadcast %29 : vector<8x1xf32> to vector<8x8xf32>
    %31 = arith.mulf %26, %30 : vector<8x8xf32>
    %cst_18 = arith.constant dense<0.000000e+00> : vector<8x16xf32>
    %32 = tpu.matmul %31, %18, %cst_18 {dimension_numbers = #tpu.dot_dimension_numbers<[1], [0], [0], [1], [0, 0, 1, 1], [], []>} : vector<8x8xf32>, vector<8x16xf32>, vector<8x16xf32> -> vector<8x16xf32>
    %33 = vector.extract_strided_slice %13 {offsets = [0, 0], sizes = [16, 32], strides = [1, 1]} : vector<32x32xf32> to vector<16x32xf32>
    %cst_19 = arith.constant dense<0.000000e+00> : vector<8x32xf32>
    %34 = tpu.matmul %32, %33, %cst_19 {dimension_numbers = #tpu.dot_dimension_numbers<[1], [0], [0], [1], [0, 0, 1, 1], [], []>} : vector<8x16xf32>, vector<16x32xf32>, vector<8x32xf32> -> vector<8x32xf32>
    %35 = vector.extract_strided_slice %9 {offsets = [0, 16], sizes = [8, 16], strides = [1, 1]} : vector<8x32xf32> to vector<8x16xf32>
    %36 = vector.extract_strided_slice %10 {offsets = [0, 16], sizes = [8, 16], strides = [1, 1]} : vector<8x32xf32> to vector<8x16xf32>
    %37 = vector.extract_strided_slice %11 {offsets = [0, 16], sizes = [8, 16], strides = [1, 1]} : vector<8x32xf32> to vector<8x16xf32>
    %cst_20 = arith.constant dense<0.000000e+00> : vector<8x8xf32>
    %38 = tpu.matmul %35, %36, %cst_20 {dimension_numbers = #tpu.dot_dimension_numbers<[1], [1], [0], [0], [0, 0, 1, 0], [], []>} : vector<8x16xf32>, vector<8x16xf32>, vector<8x8xf32> -> vector<8x8xf32>
    %cst_21 = arith.constant 2.500000e-01 : f32
    %39 = vector.broadcast %cst_21 : f32 to vector<8x8xf32>
    %40 = arith.mulf %38, %39 : vector<8x8xf32>
    %cst_22 = arith.constant dense<0xFF800000> : vector<8xf32>
    %41 = vector.multi_reduction <maximumf>, %40, %cst_22 [1] : vector<8x8xf32> to vector<8xf32>
    %42 = vector.shape_cast %41 : vector<8xf32> to vector<8x1xf32>
    %43 = vector.broadcast %42 : vector<8x1xf32> to vector<8x8xf32>
    %44 = arith.subf %40, %43 : vector<8x8xf32>
    %45 = math.exp %44 : vector<8x8xf32>
    %cst_23 = arith.constant dense<0.000000e+00> : vector<8xf32>
    %46 = vector.multi_reduction <add>, %45, %cst_23 [1] : vector<8x8xf32> to vector<8xf32>
    %47 = vector.shape_cast %46 : vector<8xf32> to vector<8x1xf32>
    %48 = tpu.reciprocal %47 {approx = true} : vector<8x1xf32> -> vector<8x1xf32>
    %49 = vector.broadcast %48 : vector<8x1xf32> to vector<8x8xf32>
    %50 = arith.mulf %45, %49 : vector<8x8xf32>
    %cst_24 = arith.constant dense<0.000000e+00> : vector<8x16xf32>
    %51 = tpu.matmul %50, %37, %cst_24 {dimension_numbers = #tpu.dot_dimension_numbers<[1], [0], [0], [1], [0, 0, 1, 1], [], []>} : vector<8x8xf32>, vector<8x16xf32>, vector<8x16xf32> -> vector<8x16xf32>
    %52 = vector.extract_strided_slice %13 {offsets = [16, 0], sizes = [16, 32], strides = [1, 1]} : vector<32x32xf32> to vector<16x32xf32>
    %cst_25 = arith.constant dense<0.000000e+00> : vector<8x32xf32>
    %53 = tpu.matmul %51, %52, %cst_25 {dimension_numbers = #tpu.dot_dimension_numbers<[1], [0], [0], [1], [0, 0, 1, 1], [], []>} : vector<8x16xf32>, vector<16x32xf32>, vector<8x32xf32> -> vector<8x32xf32>
    %54 = arith.addf %34, %53 : vector<8x32xf32>
    %55 = vector.broadcast %15 : vector<1x32xf32> to vector<8x32xf32>
    %56 = arith.addf %54, %55 : vector<8x32xf32>
    %57 = arith.addf %1, %56 : vector<8x32xf32>
    %c0_26 = arith.constant 0 : index
    %c0_27 = arith.constant 0 : index
    %c0_28 = arith.constant 0 : index
    %58 = vector.load %arg10[%c0_26, %c0_27, %c0_28] : memref<2x1x32xf32, #tpu.memory_space<vmem>>, vector<1x1x32xf32>
    %59 = vector.shape_cast %58 : vector<1x1x32xf32> to vector<1x32xf32>
    %c0_29 = arith.constant 0 : index
    %c0_30 = arith.constant 0 : index
    %c0_31 = arith.constant 0 : index
    %60 = vector.load %arg11[%c0_29, %c0_30, %c0_31] : memref<2x1x32xf32, #tpu.memory_space<vmem>>, vector<1x1x32xf32>
    %61 = vector.shape_cast %60 : vector<1x1x32xf32> to vector<1x32xf32>
    %cst_32 = arith.constant dense<0.000000e+00> : vector<8xf32>
    %62 = vector.multi_reduction <add>, %57, %cst_32 [1] : vector<8x32xf32> to vector<8xf32>
    %63 = vector.shape_cast %62 : vector<8xf32> to vector<8x1xf32>
    %cst_33 = arith.constant 3.200000e+01 : f32
    %64 = vector.broadcast %cst_33 : f32 to vector<8x1xf32>
    %65 = arith.divf %63, %64 : vector<8x1xf32>
    %66 = vector.broadcast %65 : vector<8x1xf32> to vector<8x32xf32>
    %67 = arith.subf %57, %66 : vector<8x32xf32>
    %68 = arith.mulf %67, %67 : vector<8x32xf32>
    %cst_34 = arith.constant dense<0.000000e+00> : vector<8xf32>
    %69 = vector.multi_reduction <add>, %68, %cst_34 [1] : vector<8x32xf32> to vector<8xf32>
    %70 = vector.shape_cast %69 : vector<8xf32> to vector<8x1xf32>
    %cst_35 = arith.constant 3.200000e+01 : f32
    %71 = vector.broadcast %cst_35 : f32 to vector<8x1xf32>
    %72 = arith.divf %70, %71 : vector<8x1xf32>
    %cst_36 = arith.constant 9.99999974E-6 : f32
    %73 = vector.broadcast %cst_36 : f32 to vector<8x1xf32>
    %74 = arith.addf %72, %73 : vector<8x1xf32>
    %75 = math.rsqrt %74 : vector<8x1xf32>
    %76 = vector.broadcast %75 : vector<8x1xf32> to vector<8x32xf32>
    %77 = arith.mulf %67, %76 : vector<8x32xf32>
    %78 = vector.broadcast %59 : vector<1x32xf32> to vector<8x32xf32>
    %79 = arith.mulf %77, %78 : vector<8x32xf32>
    %80 = vector.broadcast %61 : vector<1x32xf32> to vector<8x32xf32>
    %81 = arith.addf %79, %80 : vector<8x32xf32>
    %c0_37 = arith.constant 0 : index
    %c0_38 = arith.constant 0 : index
    %c0_39 = arith.constant 0 : index
    %82 = vector.load %arg6[%c0_37, %c0_38, %c0_39] : memref<2x32x2048xf32, #tpu.memory_space<vmem>>, vector<1x32x2048xf32>
    %83 = vector.shape_cast %82 : vector<1x32x2048xf32> to vector<32x2048xf32>
    %c0_40 = arith.constant 0 : index
    %c0_41 = arith.constant 0 : index
    %c0_42 = arith.constant 0 : index
    %84 = vector.load %arg7[%c0_40, %c0_41, %c0_42] : memref<2x1x2048xf32, #tpu.memory_space<vmem>>, vector<1x1x2048xf32>
    %85 = vector.shape_cast %84 : vector<1x1x2048xf32> to vector<1x2048xf32>
    %cst_43 = arith.constant dense<0.000000e+00> : vector<8x2048xf32>
    %86 = tpu.matmul %81, %83, %cst_43 {dimension_numbers = #tpu.dot_dimension_numbers<[1], [0], [0], [1], [0, 0, 1, 1], [], []>} : vector<8x32xf32>, vector<32x2048xf32>, vector<8x2048xf32> -> vector<8x2048xf32>
    %87 = vector.broadcast %85 : vector<1x2048xf32> to vector<8x2048xf32>
    %88 = arith.addf %86, %87 : vector<8x2048xf32>
    %cst_44 = arith.constant 0.000000e+00 : f32
    %89 = vector.broadcast %cst_44 : f32 to vector<8x2048xf32>
    %90 = arith.maximumf %88, %89 : vector<8x2048xf32>
    %c0_45 = arith.constant 0 : index
    %c0_46 = arith.constant 0 : index
    %c0_47 = arith.constant 0 : index
    %91 = vector.load %arg8[%c0_45, %c0_46, %c0_47] : memref<2x2048x32xf32, #tpu.memory_space<vmem>>, vector<1x2048x32xf32>
    %92 = vector.shape_cast %91 : vector<1x2048x32xf32> to vector<2048x32xf32>
    %c0_48 = arith.constant 0 : index
    %c0_49 = arith.constant 0 : index
    %c0_50 = arith.constant 0 : index
    %93 = vector.load %arg9[%c0_48, %c0_49, %c0_50] : memref<2x1x32xf32, #tpu.memory_space<vmem>>, vector<1x1x32xf32>
    %94 = vector.shape_cast %93 : vector<1x1x32xf32> to vector<1x32xf32>
    %cst_51 = arith.constant dense<0.000000e+00> : vector<8x32xf32>
    %95 = tpu.matmul %90, %92, %cst_51 {dimension_numbers = #tpu.dot_dimension_numbers<[1], [0], [0], [1], [0, 0, 1, 1], [], []>} : vector<8x2048xf32>, vector<2048x32xf32>, vector<8x32xf32> -> vector<8x32xf32>
    %96 = vector.broadcast %94 : vector<1x32xf32> to vector<8x32xf32>
    %97 = arith.addf %95, %96 : vector<8x32xf32>
    %98 = arith.addf %81, %97 : vector<8x32xf32>
    %c0_52 = arith.constant 0 : index
    %c0_53 = arith.constant 0 : index
    %c0_54 = arith.constant 0 : index
    %99 = vector.load %arg12[%c0_52, %c0_53, %c0_54] : memref<2x1x32xf32, #tpu.memory_space<vmem>>, vector<1x1x32xf32>
    %100 = vector.shape_cast %99 : vector<1x1x32xf32> to vector<1x32xf32>
    %c0_55 = arith.constant 0 : index
    %c0_56 = arith.constant 0 : index
    %c0_57 = arith.constant 0 : index
    %101 = vector.load %arg13[%c0_55, %c0_56, %c0_57] : memref<2x1x32xf32, #tpu.memory_space<vmem>>, vector<1x1x32xf32>
    %102 = vector.shape_cast %101 : vector<1x1x32xf32> to vector<1x32xf32>
    %cst_58 = arith.constant dense<0.000000e+00> : vector<8xf32>
    %103 = vector.multi_reduction <add>, %98, %cst_58 [1] : vector<8x32xf32> to vector<8xf32>
    %104 = vector.shape_cast %103 : vector<8xf32> to vector<8x1xf32>
    %cst_59 = arith.constant 3.200000e+01 : f32
    %105 = vector.broadcast %cst_59 : f32 to vector<8x1xf32>
    %106 = arith.divf %104, %105 : vector<8x1xf32>
    %107 = vector.broadcast %106 : vector<8x1xf32> to vector<8x32xf32>
    %108 = arith.subf %98, %107 : vector<8x32xf32>
    %109 = arith.mulf %108, %108 : vector<8x32xf32>
    %cst_60 = arith.constant dense<0.000000e+00> : vector<8xf32>
    %110 = vector.multi_reduction <add>, %109, %cst_60 [1] : vector<8x32xf32> to vector<8xf32>
    %111 = vector.shape_cast %110 : vector<8xf32> to vector<8x1xf32>
    %cst_61 = arith.constant 3.200000e+01 : f32
    %112 = vector.broadcast %cst_61 : f32 to vector<8x1xf32>
    %113 = arith.divf %111, %112 : vector<8x1xf32>
    %cst_62 = arith.constant 9.99999974E-6 : f32
    %114 = vector.broadcast %cst_62 : f32 to vector<8x1xf32>
    %115 = arith.addf %113, %114 : vector<8x1xf32>
    %116 = math.rsqrt %115 : vector<8x1xf32>
    %117 = vector.broadcast %116 : vector<8x1xf32> to vector<8x32xf32>
    %118 = arith.mulf %108, %117 : vector<8x32xf32>
    %119 = vector.broadcast %100 : vector<1x32xf32> to vector<8x32xf32>
    %120 = arith.mulf %118, %119 : vector<8x32xf32>
    %121 = vector.broadcast %102 : vector<1x32xf32> to vector<8x32xf32>
    %122 = arith.addf %120, %121 : vector<8x32xf32>
    %c1 = arith.constant 1 : index
    %c0_63 = arith.constant 0 : index
    %c0_64 = arith.constant 0 : index
    %123 = vector.load %arg2[%c1, %c0_63, %c0_64] : memref<2x32x96xf32, #tpu.memory_space<vmem>>, vector<1x32x96xf32>
    %124 = vector.shape_cast %123 : vector<1x32x96xf32> to vector<32x96xf32>
    %c1_65 = arith.constant 1 : index
    %c0_66 = arith.constant 0 : index
    %c0_67 = arith.constant 0 : index
    %125 = vector.load %arg3[%c1_65, %c0_66, %c0_67] : memref<2x1x96xf32, #tpu.memory_space<vmem>>, vector<1x1x96xf32>
    %126 = vector.shape_cast %125 : vector<1x1x96xf32> to vector<1x96xf32>
    %cst_68 = arith.constant dense<0.000000e+00> : vector<8x96xf32>
    %127 = tpu.matmul %122, %124, %cst_68 {dimension_numbers = #tpu.dot_dimension_numbers<[1], [0], [0], [1], [0, 0, 1, 1], [], []>} : vector<8x32xf32>, vector<32x96xf32>, vector<8x96xf32> -> vector<8x96xf32>
    %128 = vector.broadcast %126 : vector<1x96xf32> to vector<8x96xf32>
    %129 = arith.addf %127, %128 : vector<8x96xf32>
    %130 = vector.extract_strided_slice %129 {offsets = [0, 0], sizes = [8, 32], strides = [1, 1]} : vector<8x96xf32> to vector<8x32xf32>
    %131 = vector.extract_strided_slice %129 {offsets = [0, 32], sizes = [8, 32], strides = [1, 1]} : vector<8x96xf32> to vector<8x32xf32>
    %132 = vector.extract_strided_slice %129 {offsets = [0, 64], sizes = [8, 32], strides = [1, 1]} : vector<8x96xf32> to vector<8x32xf32>
    %c1_69 = arith.constant 1 : index
    %c0_70 = arith.constant 0 : index
    %c0_71 = arith.constant 0 : index
    %133 = vector.load %arg4[%c1_69, %c0_70, %c0_71] : memref<2x32x32xf32, #tpu.memory_space<vmem>>, vector<1x32x32xf32>
    %134 = vector.shape_cast %133 : vector<1x32x32xf32> to vector<32x32xf32>
    %c1_72 = arith.constant 1 : index
    %c0_73 = arith.constant 0 : index
    %c0_74 = arith.constant 0 : index
    %135 = vector.load %arg5[%c1_72, %c0_73, %c0_74] : memref<2x1x32xf32, #tpu.memory_space<vmem>>, vector<1x1x32xf32>
    %136 = vector.shape_cast %135 : vector<1x1x32xf32> to vector<1x32xf32>
    %137 = vector.extract_strided_slice %130 {offsets = [0, 0], sizes = [8, 16], strides = [1, 1]} : vector<8x32xf32> to vector<8x16xf32>
    %138 = vector.extract_strided_slice %131 {offsets = [0, 0], sizes = [8, 16], strides = [1, 1]} : vector<8x32xf32> to vector<8x16xf32>
    %139 = vector.extract_strided_slice %132 {offsets = [0, 0], sizes = [8, 16], strides = [1, 1]} : vector<8x32xf32> to vector<8x16xf32>
    %cst_75 = arith.constant dense<0.000000e+00> : vector<8x8xf32>
    %140 = tpu.matmul %137, %138, %cst_75 {dimension_numbers = #tpu.dot_dimension_numbers<[1], [1], [0], [0], [0, 0, 1, 0], [], []>} : vector<8x16xf32>, vector<8x16xf32>, vector<8x8xf32> -> vector<8x8xf32>
    %cst_76 = arith.constant 2.500000e-01 : f32
    %141 = vector.broadcast %cst_76 : f32 to vector<8x8xf32>
    %142 = arith.mulf %140, %141 : vector<8x8xf32>
    %cst_77 = arith.constant dense<0xFF800000> : vector<8xf32>
    %143 = vector.multi_reduction <maximumf>, %142, %cst_77 [1] : vector<8x8xf32> to vector<8xf32>
    %144 = vector.shape_cast %143 : vector<8xf32> to vector<8x1xf32>
    %145 = vector.broadcast %144 : vector<8x1xf32> to vector<8x8xf32>
    %146 = arith.subf %142, %145 : vector<8x8xf32>
    %147 = math.exp %146 : vector<8x8xf32>
    %cst_78 = arith.constant dense<0.000000e+00> : vector<8xf32>
    %148 = vector.multi_reduction <add>, %147, %cst_78 [1] : vector<8x8xf32> to vector<8xf32>
    %149 = vector.shape_cast %148 : vector<8xf32> to vector<8x1xf32>
    %150 = tpu.reciprocal %149 {approx = true} : vector<8x1xf32> -> vector<8x1xf32>
    %151 = vector.broadcast %150 : vector<8x1xf32> to vector<8x8xf32>
    %152 = arith.mulf %147, %151 : vector<8x8xf32>
    %cst_79 = arith.constant dense<0.000000e+00> : vector<8x16xf32>
    %153 = tpu.matmul %152, %139, %cst_79 {dimension_numbers = #tpu.dot_dimension_numbers<[1], [0], [0], [1], [0, 0, 1, 1], [], []>} : vector<8x8xf32>, vector<8x16xf32>, vector<8x16xf32> -> vector<8x16xf32>
    %154 = vector.extract_strided_slice %134 {offsets = [0, 0], sizes = [16, 32], strides = [1, 1]} : vector<32x32xf32> to vector<16x32xf32>
    %cst_80 = arith.constant dense<0.000000e+00> : vector<8x32xf32>
    %155 = tpu.matmul %153, %154, %cst_80 {dimension_numbers = #tpu.dot_dimension_numbers<[1], [0], [0], [1], [0, 0, 1, 1], [], []>} : vector<8x16xf32>, vector<16x32xf32>, vector<8x32xf32> -> vector<8x32xf32>
    %156 = vector.extract_strided_slice %130 {offsets = [0, 16], sizes = [8, 16], strides = [1, 1]} : vector<8x32xf32> to vector<8x16xf32>
    %157 = vector.extract_strided_slice %131 {offsets = [0, 16], sizes = [8, 16], strides = [1, 1]} : vector<8x32xf32> to vector<8x16xf32>
    %158 = vector.extract_strided_slice %132 {offsets = [0, 16], sizes = [8, 16], strides = [1, 1]} : vector<8x32xf32> to vector<8x16xf32>
    %cst_81 = arith.constant dense<0.000000e+00> : vector<8x8xf32>
    %159 = tpu.matmul %156, %157, %cst_81 {dimension_numbers = #tpu.dot_dimension_numbers<[1], [1], [0], [0], [0, 0, 1, 0], [], []>} : vector<8x16xf32>, vector<8x16xf32>, vector<8x8xf32> -> vector<8x8xf32>
    %cst_82 = arith.constant 2.500000e-01 : f32
    %160 = vector.broadcast %cst_82 : f32 to vector<8x8xf32>
    %161 = arith.mulf %159, %160 : vector<8x8xf32>
    %cst_83 = arith.constant dense<0xFF800000> : vector<8xf32>
    %162 = vector.multi_reduction <maximumf>, %161, %cst_83 [1] : vector<8x8xf32> to vector<8xf32>
    %163 = vector.shape_cast %162 : vector<8xf32> to vector<8x1xf32>
    %164 = vector.broadcast %163 : vector<8x1xf32> to vector<8x8xf32>
    %165 = arith.subf %161, %164 : vector<8x8xf32>
    %166 = math.exp %165 : vector<8x8xf32>
    %cst_84 = arith.constant dense<0.000000e+00> : vector<8xf32>
    %167 = vector.multi_reduction <add>, %166, %cst_84 [1] : vector<8x8xf32> to vector<8xf32>
    %168 = vector.shape_cast %167 : vector<8xf32> to vector<8x1xf32>
    %169 = tpu.reciprocal %168 {approx = true} : vector<8x1xf32> -> vector<8x1xf32>
    %170 = vector.broadcast %169 : vector<8x1xf32> to vector<8x8xf32>
    %171 = arith.mulf %166, %170 : vector<8x8xf32>
    %cst_85 = arith.constant dense<0.000000e+00> : vector<8x16xf32>
    %172 = tpu.matmul %171, %158, %cst_85 {dimension_numbers = #tpu.dot_dimension_numbers<[1], [0], [0], [1], [0, 0, 1, 1], [], []>} : vector<8x8xf32>, vector<8x16xf32>, vector<8x16xf32> -> vector<8x16xf32>
    %173 = vector.extract_strided_slice %134 {offsets = [16, 0], sizes = [16, 32], strides = [1, 1]} : vector<32x32xf32> to vector<16x32xf32>
    %cst_86 = arith.constant dense<0.000000e+00> : vector<8x32xf32>
    %174 = tpu.matmul %172, %173, %cst_86 {dimension_numbers = #tpu.dot_dimension_numbers<[1], [0], [0], [1], [0, 0, 1, 1], [], []>} : vector<8x16xf32>, vector<16x32xf32>, vector<8x32xf32> -> vector<8x32xf32>
    %175 = arith.addf %155, %174 : vector<8x32xf32>
    %176 = vector.broadcast %136 : vector<1x32xf32> to vector<8x32xf32>
    %177 = arith.addf %175, %176 : vector<8x32xf32>
    %178 = arith.addf %122, %177 : vector<8x32xf32>
    %c1_87 = arith.constant 1 : index
    %c0_88 = arith.constant 0 : index
    %c0_89 = arith.constant 0 : index
    %179 = vector.load %arg10[%c1_87, %c0_88, %c0_89] : memref<2x1x32xf32, #tpu.memory_space<vmem>>, vector<1x1x32xf32>
    %180 = vector.shape_cast %179 : vector<1x1x32xf32> to vector<1x32xf32>
    %c1_90 = arith.constant 1 : index
    %c0_91 = arith.constant 0 : index
    %c0_92 = arith.constant 0 : index
    %181 = vector.load %arg11[%c1_90, %c0_91, %c0_92] : memref<2x1x32xf32, #tpu.memory_space<vmem>>, vector<1x1x32xf32>
    %182 = vector.shape_cast %181 : vector<1x1x32xf32> to vector<1x32xf32>
    %cst_93 = arith.constant dense<0.000000e+00> : vector<8xf32>
    %183 = vector.multi_reduction <add>, %178, %cst_93 [1] : vector<8x32xf32> to vector<8xf32>
    %184 = vector.shape_cast %183 : vector<8xf32> to vector<8x1xf32>
    %cst_94 = arith.constant 3.200000e+01 : f32
    %185 = vector.broadcast %cst_94 : f32 to vector<8x1xf32>
    %186 = arith.divf %184, %185 : vector<8x1xf32>
    %187 = vector.broadcast %186 : vector<8x1xf32> to vector<8x32xf32>
    %188 = arith.subf %178, %187 : vector<8x32xf32>
    %189 = arith.mulf %188, %188 : vector<8x32xf32>
    %cst_95 = arith.constant dense<0.000000e+00> : vector<8xf32>
    %190 = vector.multi_reduction <add>, %189, %cst_95 [1] : vector<8x32xf32> to vector<8xf32>
    %191 = vector.shape_cast %190 : vector<8xf32> to vector<8x1xf32>
    %cst_96 = arith.constant 3.200000e+01 : f32
    %192 = vector.broadcast %cst_96 : f32 to vector<8x1xf32>
    %193 = arith.divf %191, %192 : vector<8x1xf32>
    %cst_97 = arith.constant 9.99999974E-6 : f32
    %194 = vector.broadcast %cst_97 : f32 to vector<8x1xf32>
    %195 = arith.addf %193, %194 : vector<8x1xf32>
    %196 = math.rsqrt %195 : vector<8x1xf32>
    %197 = vector.broadcast %196 : vector<8x1xf32> to vector<8x32xf32>
    %198 = arith.mulf %188, %197 : vector<8x32xf32>
    %199 = vector.broadcast %180 : vector<1x32xf32> to vector<8x32xf32>
    %200 = arith.mulf %198, %199 : vector<8x32xf32>
    %201 = vector.broadcast %182 : vector<1x32xf32> to vector<8x32xf32>
    %202 = arith.addf %200, %201 : vector<8x32xf32>
    %c1_98 = arith.constant 1 : index
    %c0_99 = arith.constant 0 : index
    %c0_100 = arith.constant 0 : index
    %203 = vector.load %arg6[%c1_98, %c0_99, %c0_100] : memref<2x32x2048xf32, #tpu.memory_space<vmem>>, vector<1x32x2048xf32>
    %204 = vector.shape_cast %203 : vector<1x32x2048xf32> to vector<32x2048xf32>
    %c1_101 = arith.constant 1 : index
    %c0_102 = arith.constant 0 : index
    %c0_103 = arith.constant 0 : index
    %205 = vector.load %arg7[%c1_101, %c0_102, %c0_103] : memref<2x1x2048xf32, #tpu.memory_space<vmem>>, vector<1x1x2048xf32>
    %206 = vector.shape_cast %205 : vector<1x1x2048xf32> to vector<1x2048xf32>
    %cst_104 = arith.constant dense<0.000000e+00> : vector<8x2048xf32>
    %207 = tpu.matmul %202, %204, %cst_104 {dimension_numbers = #tpu.dot_dimension_numbers<[1], [0], [0], [1], [0, 0, 1, 1], [], []>} : vector<8x32xf32>, vector<32x2048xf32>, vector<8x2048xf32> -> vector<8x2048xf32>
    %208 = vector.broadcast %206 : vector<1x2048xf32> to vector<8x2048xf32>
    %209 = arith.addf %207, %208 : vector<8x2048xf32>
    %cst_105 = arith.constant 0.000000e+00 : f32
    %210 = vector.broadcast %cst_105 : f32 to vector<8x2048xf32>
    %211 = arith.maximumf %209, %210 : vector<8x2048xf32>
    %c1_106 = arith.constant 1 : index
    %c0_107 = arith.constant 0 : index
    %c0_108 = arith.constant 0 : index
    %212 = vector.load %arg8[%c1_106, %c0_107, %c0_108] : memref<2x2048x32xf32, #tpu.memory_space<vmem>>, vector<1x2048x32xf32>
    %213 = vector.shape_cast %212 : vector<1x2048x32xf32> to vector<2048x32xf32>
    %c1_109 = arith.constant 1 : index
    %c0_110 = arith.constant 0 : index
    %c0_111 = arith.constant 0 : index
    %214 = vector.load %arg9[%c1_109, %c0_110, %c0_111] : memref<2x1x32xf32, #tpu.memory_space<vmem>>, vector<1x1x32xf32>
    %215 = vector.shape_cast %214 : vector<1x1x32xf32> to vector<1x32xf32>
    %cst_112 = arith.constant dense<0.000000e+00> : vector<8x32xf32>
    %216 = tpu.matmul %211, %213, %cst_112 {dimension_numbers = #tpu.dot_dimension_numbers<[1], [0], [0], [1], [0, 0, 1, 1], [], []>} : vector<8x2048xf32>, vector<2048x32xf32>, vector<8x32xf32> -> vector<8x32xf32>
    %217 = vector.broadcast %215 : vector<1x32xf32> to vector<8x32xf32>
    %218 = arith.addf %216, %217 : vector<8x32xf32>
    %219 = arith.addf %202, %218 : vector<8x32xf32>
    %c1_113 = arith.constant 1 : index
    %c0_114 = arith.constant 0 : index
    %c0_115 = arith.constant 0 : index
    %220 = vector.load %arg12[%c1_113, %c0_114, %c0_115] : memref<2x1x32xf32, #tpu.memory_space<vmem>>, vector<1x1x32xf32>
    %221 = vector.shape_cast %220 : vector<1x1x32xf32> to vector<1x32xf32>
    %c1_116 = arith.constant 1 : index
    %c0_117 = arith.constant 0 : index
    %c0_118 = arith.constant 0 : index
    %222 = vector.load %arg13[%c1_116, %c0_117, %c0_118] : memref<2x1x32xf32, #tpu.memory_space<vmem>>, vector<1x1x32xf32>
    %223 = vector.shape_cast %222 : vector<1x1x32xf32> to vector<1x32xf32>
    %cst_119 = arith.constant dense<0.000000e+00> : vector<8xf32>
    %224 = vector.multi_reduction <add>, %219, %cst_119 [1] : vector<8x32xf32> to vector<8xf32>
    %225 = vector.shape_cast %224 : vector<8xf32> to vector<8x1xf32>
    %cst_120 = arith.constant 3.200000e+01 : f32
    %226 = vector.broadcast %cst_120 : f32 to vector<8x1xf32>
    %227 = arith.divf %225, %226 : vector<8x1xf32>
    %228 = vector.broadcast %227 : vector<8x1xf32> to vector<8x32xf32>
    %229 = arith.subf %219, %228 : vector<8x32xf32>
    %230 = arith.mulf %229, %229 : vector<8x32xf32>
    %cst_121 = arith.constant dense<0.000000e+00> : vector<8xf32>
    %231 = vector.multi_reduction <add>, %230, %cst_121 [1] : vector<8x32xf32> to vector<8xf32>
    %232 = vector.shape_cast %231 : vector<8xf32> to vector<8x1xf32>
    %cst_122 = arith.constant 3.200000e+01 : f32
    %233 = vector.broadcast %cst_122 : f32 to vector<8x1xf32>
    %234 = arith.divf %232, %233 : vector<8x1xf32>
    %cst_123 = arith.constant 9.99999974E-6 : f32
    %235 = vector.broadcast %cst_123 : f32 to vector<8x1xf32>
    %236 = arith.addf %234, %235 : vector<8x1xf32>
    %237 = math.rsqrt %236 : vector<8x1xf32>
    %238 = vector.broadcast %237 : vector<8x1xf32> to vector<8x32xf32>
    %239 = arith.mulf %229, %238 : vector<8x32xf32>
    %240 = vector.broadcast %221 : vector<1x32xf32> to vector<8x32xf32>
    %241 = arith.mulf %239, %240 : vector<8x32xf32>
    %242 = vector.broadcast %223 : vector<1x32xf32> to vector<8x32xf32>
    %243 = arith.addf %241, %242 : vector<8x32xf32>
    %c0_124 = arith.constant 0 : index
    %c0_125 = arith.constant 0 : index
    %244 = vector.load %arg34[%c0_124, %c0_125] : memref<1x32xf32, #tpu.memory_space<vmem>>, vector<1x32xf32>
    %c0_126 = arith.constant 0 : index
    %c0_127 = arith.constant 0 : index
    %245 = vector.load %arg35[%c0_126, %c0_127] : memref<1x32xf32, #tpu.memory_space<vmem>>, vector<1x32xf32>
    %cst_128 = arith.constant dense<0.000000e+00> : vector<8xf32>
    %246 = vector.multi_reduction <add>, %243, %cst_128 [1] : vector<8x32xf32> to vector<8xf32>
    %247 = vector.shape_cast %246 : vector<8xf32> to vector<8x1xf32>
    %cst_129 = arith.constant 3.200000e+01 : f32
    %248 = vector.broadcast %cst_129 : f32 to vector<8x1xf32>
    %249 = arith.divf %247, %248 : vector<8x1xf32>
    %250 = vector.broadcast %249 : vector<8x1xf32> to vector<8x32xf32>
    %251 = arith.subf %243, %250 : vector<8x32xf32>
    %252 = arith.mulf %251, %251 : vector<8x32xf32>
    %cst_130 = arith.constant dense<0.000000e+00> : vector<8xf32>
    %253 = vector.multi_reduction <add>, %252, %cst_130 [1] : vector<8x32xf32> to vector<8xf32>
    %254 = vector.shape_cast %253 : vector<8xf32> to vector<8x1xf32>
    %cst_131 = arith.constant 3.200000e+01 : f32
    %255 = vector.broadcast %cst_131 : f32 to vector<8x1xf32>
    %256 = arith.divf %254, %255 : vector<8x1xf32>
    %cst_132 = arith.constant 9.99999974E-6 : f32
    %257 = vector.broadcast %cst_132 : f32 to vector<8x1xf32>
    %258 = arith.addf %256, %257 : vector<8x1xf32>
    %259 = math.rsqrt %258 : vector<8x1xf32>
    %260 = vector.broadcast %259 : vector<8x1xf32> to vector<8x32xf32>
    %261 = arith.mulf %251, %260 : vector<8x32xf32>
    %262 = vector.broadcast %244 : vector<1x32xf32> to vector<8x32xf32>
    %263 = arith.mulf %261, %262 : vector<8x32xf32>
    %264 = vector.broadcast %245 : vector<1x32xf32> to vector<8x32xf32>
    %265 = arith.addf %263, %264 : vector<8x32xf32>
    %c0_133 = arith.constant 0 : index
    %c0_134 = arith.constant 0 : index
    %c0_135 = arith.constant 0 : index
    %266 = vector.load %arg14[%c0_133, %c0_134, %c0_135] : memref<2x32x96xf32, #tpu.memory_space<vmem>>, vector<1x32x96xf32>
    %267 = vector.shape_cast %266 : vector<1x32x96xf32> to vector<32x96xf32>
    %c0_136 = arith.constant 0 : index
    %c0_137 = arith.constant 0 : index
    %c0_138 = arith.constant 0 : index
    %268 = vector.load %arg15[%c0_136, %c0_137, %c0_138] : memref<2x1x96xf32, #tpu.memory_space<vmem>>, vector<1x1x96xf32>
    %269 = vector.shape_cast %268 : vector<1x1x96xf32> to vector<1x96xf32>
    %cst_139 = arith.constant dense<0.000000e+00> : vector<8x96xf32>
    %270 = tpu.matmul %1, %267, %cst_139 {dimension_numbers = #tpu.dot_dimension_numbers<[1], [0], [0], [1], [0, 0, 1, 1], [], []>} : vector<8x32xf32>, vector<32x96xf32>, vector<8x96xf32> -> vector<8x96xf32>
    %271 = vector.broadcast %269 : vector<1x96xf32> to vector<8x96xf32>
    %272 = arith.addf %270, %271 : vector<8x96xf32>
    %273 = vector.extract_strided_slice %272 {offsets = [0, 0], sizes = [8, 32], strides = [1, 1]} : vector<8x96xf32> to vector<8x32xf32>
    %274 = vector.extract_strided_slice %272 {offsets = [0, 32], sizes = [8, 32], strides = [1, 1]} : vector<8x96xf32> to vector<8x32xf32>
    %275 = vector.extract_strided_slice %272 {offsets = [0, 64], sizes = [8, 32], strides = [1, 1]} : vector<8x96xf32> to vector<8x32xf32>
    %c0_140 = arith.constant 0 : index
    %c0_141 = arith.constant 0 : index
    %c0_142 = arith.constant 0 : index
    %276 = vector.load %arg16[%c0_140, %c0_141, %c0_142] : memref<2x32x32xf32, #tpu.memory_space<vmem>>, vector<1x32x32xf32>
    %277 = vector.shape_cast %276 : vector<1x32x32xf32> to vector<32x32xf32>
    %c0_143 = arith.constant 0 : index
    %c0_144 = arith.constant 0 : index
    %c0_145 = arith.constant 0 : index
    %278 = vector.load %arg17[%c0_143, %c0_144, %c0_145] : memref<2x1x32xf32, #tpu.memory_space<vmem>>, vector<1x1x32xf32>
    %279 = vector.shape_cast %278 : vector<1x1x32xf32> to vector<1x32xf32>
    %280 = vector.extract_strided_slice %273 {offsets = [0, 0], sizes = [8, 16], strides = [1, 1]} : vector<8x32xf32> to vector<8x16xf32>
    %281 = vector.extract_strided_slice %274 {offsets = [0, 0], sizes = [8, 16], strides = [1, 1]} : vector<8x32xf32> to vector<8x16xf32>
    %282 = vector.extract_strided_slice %275 {offsets = [0, 0], sizes = [8, 16], strides = [1, 1]} : vector<8x32xf32> to vector<8x16xf32>
    %cst_146 = arith.constant dense<0.000000e+00> : vector<8x8xf32>
    %283 = tpu.matmul %280, %281, %cst_146 {dimension_numbers = #tpu.dot_dimension_numbers<[1], [1], [0], [0], [0, 0, 1, 0], [], []>} : vector<8x16xf32>, vector<8x16xf32>, vector<8x8xf32> -> vector<8x8xf32>
    %cst_147 = arith.constant 2.500000e-01 : f32
    %284 = vector.broadcast %cst_147 : f32 to vector<8x8xf32>
    %285 = arith.mulf %283, %284 : vector<8x8xf32>
    %cst_148 = arith.constant dense<0xFF800000> : vector<8xf32>
    %286 = vector.multi_reduction <maximumf>, %285, %cst_148 [1] : vector<8x8xf32> to vector<8xf32>
    %287 = vector.shape_cast %286 : vector<8xf32> to vector<8x1xf32>
    %288 = vector.broadcast %287 : vector<8x1xf32> to vector<8x8xf32>
    %289 = arith.subf %285, %288 : vector<8x8xf32>
    %290 = math.exp %289 : vector<8x8xf32>
    %cst_149 = arith.constant dense<0.000000e+00> : vector<8xf32>
    %291 = vector.multi_reduction <add>, %290, %cst_149 [1] : vector<8x8xf32> to vector<8xf32>
    %292 = vector.shape_cast %291 : vector<8xf32> to vector<8x1xf32>
    %293 = tpu.reciprocal %292 {approx = true} : vector<8x1xf32> -> vector<8x1xf32>
    %294 = vector.broadcast %293 : vector<8x1xf32> to vector<8x8xf32>
    %295 = arith.mulf %290, %294 : vector<8x8xf32>
    %cst_150 = arith.constant dense<0.000000e+00> : vector<8x16xf32>
    %296 = tpu.matmul %295, %282, %cst_150 {dimension_numbers = #tpu.dot_dimension_numbers<[1], [0], [0], [1], [0, 0, 1, 1], [], []>} : vector<8x8xf32>, vector<8x16xf32>, vector<8x16xf32> -> vector<8x16xf32>
    %297 = vector.extract_strided_slice %277 {offsets = [0, 0], sizes = [16, 32], strides = [1, 1]} : vector<32x32xf32> to vector<16x32xf32>
    %cst_151 = arith.constant dense<0.000000e+00> : vector<8x32xf32>
    %298 = tpu.matmul %296, %297, %cst_151 {dimension_numbers = #tpu.dot_dimension_numbers<[1], [0], [0], [1], [0, 0, 1, 1], [], []>} : vector<8x16xf32>, vector<16x32xf32>, vector<8x32xf32> -> vector<8x32xf32>
    %299 = vector.extract_strided_slice %273 {offsets = [0, 16], sizes = [8, 16], strides = [1, 1]} : vector<8x32xf32> to vector<8x16xf32>
    %300 = vector.extract_strided_slice %274 {offsets = [0, 16], sizes = [8, 16], strides = [1, 1]} : vector<8x32xf32> to vector<8x16xf32>
    %301 = vector.extract_strided_slice %275 {offsets = [0, 16], sizes = [8, 16], strides = [1, 1]} : vector<8x32xf32> to vector<8x16xf32>
    %cst_152 = arith.constant dense<0.000000e+00> : vector<8x8xf32>
    %302 = tpu.matmul %299, %300, %cst_152 {dimension_numbers = #tpu.dot_dimension_numbers<[1], [1], [0], [0], [0, 0, 1, 0], [], []>} : vector<8x16xf32>, vector<8x16xf32>, vector<8x8xf32> -> vector<8x8xf32>
    %cst_153 = arith.constant 2.500000e-01 : f32
    %303 = vector.broadcast %cst_153 : f32 to vector<8x8xf32>
    %304 = arith.mulf %302, %303 : vector<8x8xf32>
    %cst_154 = arith.constant dense<0xFF800000> : vector<8xf32>
    %305 = vector.multi_reduction <maximumf>, %304, %cst_154 [1] : vector<8x8xf32> to vector<8xf32>
    %306 = vector.shape_cast %305 : vector<8xf32> to vector<8x1xf32>
    %307 = vector.broadcast %306 : vector<8x1xf32> to vector<8x8xf32>
    %308 = arith.subf %304, %307 : vector<8x8xf32>
    %309 = math.exp %308 : vector<8x8xf32>
    %cst_155 = arith.constant dense<0.000000e+00> : vector<8xf32>
    %310 = vector.multi_reduction <add>, %309, %cst_155 [1] : vector<8x8xf32> to vector<8xf32>
    %311 = vector.shape_cast %310 : vector<8xf32> to vector<8x1xf32>
    %312 = tpu.reciprocal %311 {approx = true} : vector<8x1xf32> -> vector<8x1xf32>
    %313 = vector.broadcast %312 : vector<8x1xf32> to vector<8x8xf32>
    %314 = arith.mulf %309, %313 : vector<8x8xf32>
    %cst_156 = arith.constant dense<0.000000e+00> : vector<8x16xf32>
    %315 = tpu.matmul %314, %301, %cst_156 {dimension_numbers = #tpu.dot_dimension_numbers<[1], [0], [0], [1], [0, 0, 1, 1], [], []>} : vector<8x8xf32>, vector<8x16xf32>, vector<8x16xf32> -> vector<8x16xf32>
    %316 = vector.extract_strided_slice %277 {offsets = [16, 0], sizes = [16, 32], strides = [1, 1]} : vector<32x32xf32> to vector<16x32xf32>
    %cst_157 = arith.constant dense<0.000000e+00> : vector<8x32xf32>
    %317 = tpu.matmul %315, %316, %cst_157 {dimension_numbers = #tpu.dot_dimension_numbers<[1], [0], [0], [1], [0, 0, 1, 1], [], []>} : vector<8x16xf32>, vector<16x32xf32>, vector<8x32xf32> -> vector<8x32xf32>
    %318 = arith.addf %298, %317 : vector<8x32xf32>
    %319 = vector.broadcast %279 : vector<1x32xf32> to vector<8x32xf32>
    %320 = arith.addf %318, %319 : vector<8x32xf32>
    %321 = arith.addf %1, %320 : vector<8x32xf32>
    %c0_158 = arith.constant 0 : index
    %c0_159 = arith.constant 0 : index
    %c0_160 = arith.constant 0 : index
    %322 = vector.load %arg28[%c0_158, %c0_159, %c0_160] : memref<2x1x32xf32, #tpu.memory_space<vmem>>, vector<1x1x32xf32>
    %323 = vector.shape_cast %322 : vector<1x1x32xf32> to vector<1x32xf32>
    %c0_161 = arith.constant 0 : index
    %c0_162 = arith.constant 0 : index
    %c0_163 = arith.constant 0 : index
    %324 = vector.load %arg29[%c0_161, %c0_162, %c0_163] : memref<2x1x32xf32, #tpu.memory_space<vmem>>, vector<1x1x32xf32>
    %325 = vector.shape_cast %324 : vector<1x1x32xf32> to vector<1x32xf32>
    %cst_164 = arith.constant dense<0.000000e+00> : vector<8xf32>
    %326 = vector.multi_reduction <add>, %321, %cst_164 [1] : vector<8x32xf32> to vector<8xf32>
    %327 = vector.shape_cast %326 : vector<8xf32> to vector<8x1xf32>
    %cst_165 = arith.constant 3.200000e+01 : f32
    %328 = vector.broadcast %cst_165 : f32 to vector<8x1xf32>
    %329 = arith.divf %327, %328 : vector<8x1xf32>
    %330 = vector.broadcast %329 : vector<8x1xf32> to vector<8x32xf32>
    %331 = arith.subf %321, %330 : vector<8x32xf32>
    %332 = arith.mulf %331, %331 : vector<8x32xf32>
    %cst_166 = arith.constant dense<0.000000e+00> : vector<8xf32>
    %333 = vector.multi_reduction <add>, %332, %cst_166 [1] : vector<8x32xf32> to vector<8xf32>
    %334 = vector.shape_cast %333 : vector<8xf32> to vector<8x1xf32>
    %cst_167 = arith.constant 3.200000e+01 : f32
    %335 = vector.broadcast %cst_167 : f32 to vector<8x1xf32>
    %336 = arith.divf %334, %335 : vector<8x1xf32>
    %cst_168 = arith.constant 9.99999974E-6 : f32
    %337 = vector.broadcast %cst_168 : f32 to vector<8x1xf32>
    %338 = arith.addf %336, %337 : vector<8x1xf32>
    %339 = math.rsqrt %338 : vector<8x1xf32>
    %340 = vector.broadcast %339 : vector<8x1xf32> to vector<8x32xf32>
    %341 = arith.mulf %331, %340 : vector<8x32xf32>
    %342 = vector.broadcast %323 : vector<1x32xf32> to vector<8x32xf32>
    %343 = arith.mulf %341, %342 : vector<8x32xf32>
    %344 = vector.broadcast %325 : vector<1x32xf32> to vector<8x32xf32>
    %345 = arith.addf %343, %344 : vector<8x32xf32>
    %c0_169 = arith.constant 0 : index
    %c0_170 = arith.constant 0 : index
    %c0_171 = arith.constant 0 : index
    %346 = vector.load %arg18[%c0_169, %c0_170, %c0_171] : memref<2x32x32xf32, #tpu.memory_space<vmem>>, vector<1x32x32xf32>
    %347 = vector.shape_cast %346 : vector<1x32x32xf32> to vector<32x32xf32>
    %c0_172 = arith.constant 0 : index
    %c0_173 = arith.constant 0 : index
    %c0_174 = arith.constant 0 : index
    %348 = vector.load %arg19[%c0_172, %c0_173, %c0_174] : memref<2x1x32xf32, #tpu.memory_space<vmem>>, vector<1x1x32xf32>
    %349 = vector.shape_cast %348 : vector<1x1x32xf32> to vector<1x32xf32>
    %cst_175 = arith.constant dense<0.000000e+00> : vector<8x32xf32>
    %350 = tpu.matmul %345, %347, %cst_175 {dimension_numbers = #tpu.dot_dimension_numbers<[1], [0], [0], [1], [0, 0, 1, 1], [], []>} : vector<8x32xf32>, vector<32x32xf32>, vector<8x32xf32> -> vector<8x32xf32>
    %351 = vector.broadcast %349 : vector<1x32xf32> to vector<8x32xf32>
    %352 = arith.addf %350, %351 : vector<8x32xf32>
    %c0_176 = arith.constant 0 : index
    %c0_177 = arith.constant 0 : index
    %c0_178 = arith.constant 0 : index
    %353 = vector.load %arg20[%c0_176, %c0_177, %c0_178] : memref<2x32x64xf32, #tpu.memory_space<vmem>>, vector<1x32x64xf32>
    %354 = vector.shape_cast %353 : vector<1x32x64xf32> to vector<32x64xf32>
    %c0_179 = arith.constant 0 : index
    %c0_180 = arith.constant 0 : index
    %c0_181 = arith.constant 0 : index
    %355 = vector.load %arg21[%c0_179, %c0_180, %c0_181] : memref<2x1x64xf32, #tpu.memory_space<vmem>>, vector<1x1x64xf32>
    %356 = vector.shape_cast %355 : vector<1x1x64xf32> to vector<1x64xf32>
    %cst_182 = arith.constant dense<0.000000e+00> : vector<8x64xf32>
    %357 = tpu.matmul %265, %354, %cst_182 {dimension_numbers = #tpu.dot_dimension_numbers<[1], [0], [0], [1], [0, 0, 1, 1], [], []>} : vector<8x32xf32>, vector<32x64xf32>, vector<8x64xf32> -> vector<8x64xf32>
    %358 = vector.broadcast %356 : vector<1x64xf32> to vector<8x64xf32>
    %359 = arith.addf %357, %358 : vector<8x64xf32>
    %360 = vector.extract_strided_slice %359 {offsets = [0, 0], sizes = [8, 32], strides = [1, 1]} : vector<8x64xf32> to vector<8x32xf32>
    %361 = vector.extract_strided_slice %359 {offsets = [0, 32], sizes = [8, 32], strides = [1, 1]} : vector<8x64xf32> to vector<8x32xf32>
    %c0_183 = arith.constant 0 : index
    %c0_184 = arith.constant 0 : index
    %c0_185 = arith.constant 0 : index
    %362 = vector.load %arg22[%c0_183, %c0_184, %c0_185] : memref<2x32x32xf32, #tpu.memory_space<vmem>>, vector<1x32x32xf32>
    %363 = vector.shape_cast %362 : vector<1x32x32xf32> to vector<32x32xf32>
    %c0_186 = arith.constant 0 : index
    %c0_187 = arith.constant 0 : index
    %c0_188 = arith.constant 0 : index
    %364 = vector.load %arg23[%c0_186, %c0_187, %c0_188] : memref<2x1x32xf32, #tpu.memory_space<vmem>>, vector<1x1x32xf32>
    %365 = vector.shape_cast %364 : vector<1x1x32xf32> to vector<1x32xf32>
    %366 = vector.extract_strided_slice %352 {offsets = [0, 0], sizes = [8, 16], strides = [1, 1]} : vector<8x32xf32> to vector<8x16xf32>
    %367 = vector.extract_strided_slice %360 {offsets = [0, 0], sizes = [8, 16], strides = [1, 1]} : vector<8x32xf32> to vector<8x16xf32>
    %368 = vector.extract_strided_slice %361 {offsets = [0, 0], sizes = [8, 16], strides = [1, 1]} : vector<8x32xf32> to vector<8x16xf32>
    %cst_189 = arith.constant dense<0.000000e+00> : vector<8x8xf32>
    %369 = tpu.matmul %366, %367, %cst_189 {dimension_numbers = #tpu.dot_dimension_numbers<[1], [1], [0], [0], [0, 0, 1, 0], [], []>} : vector<8x16xf32>, vector<8x16xf32>, vector<8x8xf32> -> vector<8x8xf32>
    %cst_190 = arith.constant 2.500000e-01 : f32
    %370 = vector.broadcast %cst_190 : f32 to vector<8x8xf32>
    %371 = arith.mulf %369, %370 : vector<8x8xf32>
    %cst_191 = arith.constant dense<0xFF800000> : vector<8xf32>
    %372 = vector.multi_reduction <maximumf>, %371, %cst_191 [1] : vector<8x8xf32> to vector<8xf32>
    %373 = vector.shape_cast %372 : vector<8xf32> to vector<8x1xf32>
    %374 = vector.broadcast %373 : vector<8x1xf32> to vector<8x8xf32>
    %375 = arith.subf %371, %374 : vector<8x8xf32>
    %376 = math.exp %375 : vector<8x8xf32>
    %cst_192 = arith.constant dense<0.000000e+00> : vector<8xf32>
    %377 = vector.multi_reduction <add>, %376, %cst_192 [1] : vector<8x8xf32> to vector<8xf32>
    %378 = vector.shape_cast %377 : vector<8xf32> to vector<8x1xf32>
    %379 = tpu.reciprocal %378 {approx = true} : vector<8x1xf32> -> vector<8x1xf32>
    %380 = vector.broadcast %379 : vector<8x1xf32> to vector<8x8xf32>
    %381 = arith.mulf %376, %380 : vector<8x8xf32>
    %cst_193 = arith.constant dense<0.000000e+00> : vector<8x16xf32>
    %382 = tpu.matmul %381, %368, %cst_193 {dimension_numbers = #tpu.dot_dimension_numbers<[1], [0], [0], [1], [0, 0, 1, 1], [], []>} : vector<8x8xf32>, vector<8x16xf32>, vector<8x16xf32> -> vector<8x16xf32>
    %383 = vector.extract_strided_slice %363 {offsets = [0, 0], sizes = [16, 32], strides = [1, 1]} : vector<32x32xf32> to vector<16x32xf32>
    %cst_194 = arith.constant dense<0.000000e+00> : vector<8x32xf32>
    %384 = tpu.matmul %382, %383, %cst_194 {dimension_numbers = #tpu.dot_dimension_numbers<[1], [0], [0], [1], [0, 0, 1, 1], [], []>} : vector<8x16xf32>, vector<16x32xf32>, vector<8x32xf32> -> vector<8x32xf32>
    %385 = vector.extract_strided_slice %352 {offsets = [0, 16], sizes = [8, 16], strides = [1, 1]} : vector<8x32xf32> to vector<8x16xf32>
    %386 = vector.extract_strided_slice %360 {offsets = [0, 16], sizes = [8, 16], strides = [1, 1]} : vector<8x32xf32> to vector<8x16xf32>
    %387 = vector.extract_strided_slice %361 {offsets = [0, 16], sizes = [8, 16], strides = [1, 1]} : vector<8x32xf32> to vector<8x16xf32>
    %cst_195 = arith.constant dense<0.000000e+00> : vector<8x8xf32>
    %388 = tpu.matmul %385, %386, %cst_195 {dimension_numbers = #tpu.dot_dimension_numbers<[1], [1], [0], [0], [0, 0, 1, 0], [], []>} : vector<8x16xf32>, vector<8x16xf32>, vector<8x8xf32> -> vector<8x8xf32>
    %cst_196 = arith.constant 2.500000e-01 : f32
    %389 = vector.broadcast %cst_196 : f32 to vector<8x8xf32>
    %390 = arith.mulf %388, %389 : vector<8x8xf32>
    %cst_197 = arith.constant dense<0xFF800000> : vector<8xf32>
    %391 = vector.multi_reduction <maximumf>, %390, %cst_197 [1] : vector<8x8xf32> to vector<8xf32>
    %392 = vector.shape_cast %391 : vector<8xf32> to vector<8x1xf32>
    %393 = vector.broadcast %392 : vector<8x1xf32> to vector<8x8xf32>
    %394 = arith.subf %390, %393 : vector<8x8xf32>
    %395 = math.exp %394 : vector<8x8xf32>
    %cst_198 = arith.constant dense<0.000000e+00> : vector<8xf32>
    %396 = vector.multi_reduction <add>, %395, %cst_198 [1] : vector<8x8xf32> to vector<8xf32>
    %397 = vector.shape_cast %396 : vector<8xf32> to vector<8x1xf32>
    %398 = tpu.reciprocal %397 {approx = true} : vector<8x1xf32> -> vector<8x1xf32>
    %399 = vector.broadcast %398 : vector<8x1xf32> to vector<8x8xf32>
    %400 = arith.mulf %395, %399 : vector<8x8xf32>
    %cst_199 = arith.constant dense<0.000000e+00> : vector<8x16xf32>
    %401 = tpu.matmul %400, %387, %cst_199 {dimension_numbers = #tpu.dot_dimension_numbers<[1], [0], [0], [1], [0, 0, 1, 1], [], []>} : vector<8x8xf32>, vector<8x16xf32>, vector<8x16xf32> -> vector<8x16xf32>
    %402 = vector.extract_strided_slice %363 {offsets = [16, 0], sizes = [16, 32], strides = [1, 1]} : vector<32x32xf32> to vector<16x32xf32>
    %cst_200 = arith.constant dense<0.000000e+00> : vector<8x32xf32>
    %403 = tpu.matmul %401, %402, %cst_200 {dimension_numbers = #tpu.dot_dimension_numbers<[1], [0], [0], [1], [0, 0, 1, 1], [], []>} : vector<8x16xf32>, vector<16x32xf32>, vector<8x32xf32> -> vector<8x32xf32>
    %404 = arith.addf %384, %403 : vector<8x32xf32>
    %405 = vector.broadcast %365 : vector<1x32xf32> to vector<8x32xf32>
    %406 = arith.addf %404, %405 : vector<8x32xf32>
    %407 = arith.addf %345, %406 : vector<8x32xf32>
    %c0_201 = arith.constant 0 : index
    %c0_202 = arith.constant 0 : index
    %c0_203 = arith.constant 0 : index
    %408 = vector.load %arg30[%c0_201, %c0_202, %c0_203] : memref<2x1x32xf32, #tpu.memory_space<vmem>>, vector<1x1x32xf32>
    %409 = vector.shape_cast %408 : vector<1x1x32xf32> to vector<1x32xf32>
    %c0_204 = arith.constant 0 : index
    %c0_205 = arith.constant 0 : index
    %c0_206 = arith.constant 0 : index
    %410 = vector.load %arg31[%c0_204, %c0_205, %c0_206] : memref<2x1x32xf32, #tpu.memory_space<vmem>>, vector<1x1x32xf32>
    %411 = vector.shape_cast %410 : vector<1x1x32xf32> to vector<1x32xf32>
    %cst_207 = arith.constant dense<0.000000e+00> : vector<8xf32>
    %412 = vector.multi_reduction <add>, %407, %cst_207 [1] : vector<8x32xf32> to vector<8xf32>
    %413 = vector.shape_cast %412 : vector<8xf32> to vector<8x1xf32>
    %cst_208 = arith.constant 3.200000e+01 : f32
    %414 = vector.broadcast %cst_208 : f32 to vector<8x1xf32>
    %415 = arith.divf %413, %414 : vector<8x1xf32>
    %416 = vector.broadcast %415 : vector<8x1xf32> to vector<8x32xf32>
    %417 = arith.subf %407, %416 : vector<8x32xf32>
    %418 = arith.mulf %417, %417 : vector<8x32xf32>
    %cst_209 = arith.constant dense<0.000000e+00> : vector<8xf32>
    %419 = vector.multi_reduction <add>, %418, %cst_209 [1] : vector<8x32xf32> to vector<8xf32>
    %420 = vector.shape_cast %419 : vector<8xf32> to vector<8x1xf32>
    %cst_210 = arith.constant 3.200000e+01 : f32
    %421 = vector.broadcast %cst_210 : f32 to vector<8x1xf32>
    %422 = arith.divf %420, %421 : vector<8x1xf32>
    %cst_211 = arith.constant 9.99999974E-6 : f32
    %423 = vector.broadcast %cst_211 : f32 to vector<8x1xf32>
    %424 = arith.addf %422, %423 : vector<8x1xf32>
    %425 = math.rsqrt %424 : vector<8x1xf32>
    %426 = vector.broadcast %425 : vector<8x1xf32> to vector<8x32xf32>
    %427 = arith.mulf %417, %426 : vector<8x32xf32>
    %428 = vector.broadcast %409 : vector<1x32xf32> to vector<8x32xf32>
    %429 = arith.mulf %427, %428 : vector<8x32xf32>
    %430 = vector.broadcast %411 : vector<1x32xf32> to vector<8x32xf32>
    %431 = arith.addf %429, %430 : vector<8x32xf32>
    %c0_212 = arith.constant 0 : index
    %c0_213 = arith.constant 0 : index
    %c0_214 = arith.constant 0 : index
    %432 = vector.load %arg24[%c0_212, %c0_213, %c0_214] : memref<2x32x2048xf32, #tpu.memory_space<vmem>>, vector<1x32x2048xf32>
    %433 = vector.shape_cast %432 : vector<1x32x2048xf32> to vector<32x2048xf32>
    %c0_215 = arith.constant 0 : index
    %c0_216 = arith.constant 0 : index
    %c0_217 = arith.constant 0 : index
    %434 = vector.load %arg25[%c0_215, %c0_216, %c0_217] : memref<2x1x2048xf32, #tpu.memory_space<vmem>>, vector<1x1x2048xf32>
    %435 = vector.shape_cast %434 : vector<1x1x2048xf32> to vector<1x2048xf32>
    %cst_218 = arith.constant dense<0.000000e+00> : vector<8x2048xf32>
    %436 = tpu.matmul %431, %433, %cst_218 {dimension_numbers = #tpu.dot_dimension_numbers<[1], [0], [0], [1], [0, 0, 1, 1], [], []>} : vector<8x32xf32>, vector<32x2048xf32>, vector<8x2048xf32> -> vector<8x2048xf32>
    %437 = vector.broadcast %435 : vector<1x2048xf32> to vector<8x2048xf32>
    %438 = arith.addf %436, %437 : vector<8x2048xf32>
    %cst_219 = arith.constant 0.000000e+00 : f32
    %439 = vector.broadcast %cst_219 : f32 to vector<8x2048xf32>
    %440 = arith.maximumf %438, %439 : vector<8x2048xf32>
    %c0_220 = arith.constant 0 : index
    %c0_221 = arith.constant 0 : index
    %c0_222 = arith.constant 0 : index
    %441 = vector.load %arg26[%c0_220, %c0_221, %c0_222] : memref<2x2048x32xf32, #tpu.memory_space<vmem>>, vector<1x2048x32xf32>
    %442 = vector.shape_cast %441 : vector<1x2048x32xf32> to vector<2048x32xf32>
    %c0_223 = arith.constant 0 : index
    %c0_224 = arith.constant 0 : index
    %c0_225 = arith.constant 0 : index
    %443 = vector.load %arg27[%c0_223, %c0_224, %c0_225] : memref<2x1x32xf32, #tpu.memory_space<vmem>>, vector<1x1x32xf32>
    %444 = vector.shape_cast %443 : vector<1x1x32xf32> to vector<1x32xf32>
    %cst_226 = arith.constant dense<0.000000e+00> : vector<8x32xf32>
    %445 = tpu.matmul %440, %442, %cst_226 {dimension_numbers = #tpu.dot_dimension_numbers<[1], [0], [0], [1], [0, 0, 1, 1], [], []>} : vector<8x2048xf32>, vector<2048x32xf32>, vector<8x32xf32> -> vector<8x32xf32>
    %446 = vector.broadcast %444 : vector<1x32xf32> to vector<8x32xf32>
    %447 = arith.addf %445, %446 : vector<8x32xf32>
    %448 = arith.addf %431, %447 : vector<8x32xf32>
    %c0_227 = arith.constant 0 : index
    %c0_228 = arith.constant 0 : index
    %c0_229 = arith.constant 0 : index
    %449 = vector.load %arg32[%c0_227, %c0_228, %c0_229] : memref<2x1x32xf32, #tpu.memory_space<vmem>>, vector<1x1x32xf32>
    %450 = vector.shape_cast %449 : vector<1x1x32xf32> to vector<1x32xf32>
    %c0_230 = arith.constant 0 : index
    %c0_231 = arith.constant 0 : index
    %c0_232 = arith.constant 0 : index
    %451 = vector.load %arg33[%c0_230, %c0_231, %c0_232] : memref<2x1x32xf32, #tpu.memory_space<vmem>>, vector<1x1x32xf32>
    %452 = vector.shape_cast %451 : vector<1x1x32xf32> to vector<1x32xf32>
    %cst_233 = arith.constant dense<0.000000e+00> : vector<8xf32>
    %453 = vector.multi_reduction <add>, %448, %cst_233 [1] : vector<8x32xf32> to vector<8xf32>
    %454 = vector.shape_cast %453 : vector<8xf32> to vector<8x1xf32>
    %cst_234 = arith.constant 3.200000e+01 : f32
    %455 = vector.broadcast %cst_234 : f32 to vector<8x1xf32>
    %456 = arith.divf %454, %455 : vector<8x1xf32>
    %457 = vector.broadcast %456 : vector<8x1xf32> to vector<8x32xf32>
    %458 = arith.subf %448, %457 : vector<8x32xf32>
    %459 = arith.mulf %458, %458 : vector<8x32xf32>
    %cst_235 = arith.constant dense<0.000000e+00> : vector<8xf32>
    %460 = vector.multi_reduction <add>, %459, %cst_235 [1] : vector<8x32xf32> to vector<8xf32>
    %461 = vector.shape_cast %460 : vector<8xf32> to vector<8x1xf32>
    %cst_236 = arith.constant 3.200000e+01 : f32
    %462 = vector.broadcast %cst_236 : f32 to vector<8x1xf32>
    %463 = arith.divf %461, %462 : vector<8x1xf32>
    %cst_237 = arith.constant 9.99999974E-6 : f32
    %464 = vector.broadcast %cst_237 : f32 to vector<8x1xf32>
    %465 = arith.addf %463, %464 : vector<8x1xf32>
    %466 = math.rsqrt %465 : vector<8x1xf32>
    %467 = vector.broadcast %466 : vector<8x1xf32> to vector<8x32xf32>
    %468 = arith.mulf %458, %467 : vector<8x32xf32>
    %469 = vector.broadcast %450 : vector<1x32xf32> to vector<8x32xf32>
    %470 = arith.mulf %468, %469 : vector<8x32xf32>
    %471 = vector.broadcast %452 : vector<1x32xf32> to vector<8x32xf32>
    %472 = arith.addf %470, %471 : vector<8x32xf32>
    %c1_238 = arith.constant 1 : index
    %c0_239 = arith.constant 0 : index
    %c0_240 = arith.constant 0 : index
    %473 = vector.load %arg14[%c1_238, %c0_239, %c0_240] : memref<2x32x96xf32, #tpu.memory_space<vmem>>, vector<1x32x96xf32>
    %474 = vector.shape_cast %473 : vector<1x32x96xf32> to vector<32x96xf32>
    %c1_241 = arith.constant 1 : index
    %c0_242 = arith.constant 0 : index
    %c0_243 = arith.constant 0 : index
    %475 = vector.load %arg15[%c1_241, %c0_242, %c0_243] : memref<2x1x96xf32, #tpu.memory_space<vmem>>, vector<1x1x96xf32>
    %476 = vector.shape_cast %475 : vector<1x1x96xf32> to vector<1x96xf32>
    %cst_244 = arith.constant dense<0.000000e+00> : vector<8x96xf32>
    %477 = tpu.matmul %472, %474, %cst_244 {dimension_numbers = #tpu.dot_dimension_numbers<[1], [0], [0], [1], [0, 0, 1, 1], [], []>} : vector<8x32xf32>, vector<32x96xf32>, vector<8x96xf32> -> vector<8x96xf32>
    %478 = vector.broadcast %476 : vector<1x96xf32> to vector<8x96xf32>
    %479 = arith.addf %477, %478 : vector<8x96xf32>
    %480 = vector.extract_strided_slice %479 {offsets = [0, 0], sizes = [8, 32], strides = [1, 1]} : vector<8x96xf32> to vector<8x32xf32>
    %481 = vector.extract_strided_slice %479 {offsets = [0, 32], sizes = [8, 32], strides = [1, 1]} : vector<8x96xf32> to vector<8x32xf32>
    %482 = vector.extract_strided_slice %479 {offsets = [0, 64], sizes = [8, 32], strides = [1, 1]} : vector<8x96xf32> to vector<8x32xf32>
    %c1_245 = arith.constant 1 : index
    %c0_246 = arith.constant 0 : index
    %c0_247 = arith.constant 0 : index
    %483 = vector.load %arg16[%c1_245, %c0_246, %c0_247] : memref<2x32x32xf32, #tpu.memory_space<vmem>>, vector<1x32x32xf32>
    %484 = vector.shape_cast %483 : vector<1x32x32xf32> to vector<32x32xf32>
    %c1_248 = arith.constant 1 : index
    %c0_249 = arith.constant 0 : index
    %c0_250 = arith.constant 0 : index
    %485 = vector.load %arg17[%c1_248, %c0_249, %c0_250] : memref<2x1x32xf32, #tpu.memory_space<vmem>>, vector<1x1x32xf32>
    %486 = vector.shape_cast %485 : vector<1x1x32xf32> to vector<1x32xf32>
    %487 = vector.extract_strided_slice %480 {offsets = [0, 0], sizes = [8, 16], strides = [1, 1]} : vector<8x32xf32> to vector<8x16xf32>
    %488 = vector.extract_strided_slice %481 {offsets = [0, 0], sizes = [8, 16], strides = [1, 1]} : vector<8x32xf32> to vector<8x16xf32>
    %489 = vector.extract_strided_slice %482 {offsets = [0, 0], sizes = [8, 16], strides = [1, 1]} : vector<8x32xf32> to vector<8x16xf32>
    %cst_251 = arith.constant dense<0.000000e+00> : vector<8x8xf32>
    %490 = tpu.matmul %487, %488, %cst_251 {dimension_numbers = #tpu.dot_dimension_numbers<[1], [1], [0], [0], [0, 0, 1, 0], [], []>} : vector<8x16xf32>, vector<8x16xf32>, vector<8x8xf32> -> vector<8x8xf32>
    %cst_252 = arith.constant 2.500000e-01 : f32
    %491 = vector.broadcast %cst_252 : f32 to vector<8x8xf32>
    %492 = arith.mulf %490, %491 : vector<8x8xf32>
    %cst_253 = arith.constant dense<0xFF800000> : vector<8xf32>
    %493 = vector.multi_reduction <maximumf>, %492, %cst_253 [1] : vector<8x8xf32> to vector<8xf32>
    %494 = vector.shape_cast %493 : vector<8xf32> to vector<8x1xf32>
    %495 = vector.broadcast %494 : vector<8x1xf32> to vector<8x8xf32>
    %496 = arith.subf %492, %495 : vector<8x8xf32>
    %497 = math.exp %496 : vector<8x8xf32>
    %cst_254 = arith.constant dense<0.000000e+00> : vector<8xf32>
    %498 = vector.multi_reduction <add>, %497, %cst_254 [1] : vector<8x8xf32> to vector<8xf32>
    %499 = vector.shape_cast %498 : vector<8xf32> to vector<8x1xf32>
    %500 = tpu.reciprocal %499 {approx = true} : vector<8x1xf32> -> vector<8x1xf32>
    %501 = vector.broadcast %500 : vector<8x1xf32> to vector<8x8xf32>
    %502 = arith.mulf %497, %501 : vector<8x8xf32>
    %cst_255 = arith.constant dense<0.000000e+00> : vector<8x16xf32>
    %503 = tpu.matmul %502, %489, %cst_255 {dimension_numbers = #tpu.dot_dimension_numbers<[1], [0], [0], [1], [0, 0, 1, 1], [], []>} : vector<8x8xf32>, vector<8x16xf32>, vector<8x16xf32> -> vector<8x16xf32>
    %504 = vector.extract_strided_slice %484 {offsets = [0, 0], sizes = [16, 32], strides = [1, 1]} : vector<32x32xf32> to vector<16x32xf32>
    %cst_256 = arith.constant dense<0.000000e+00> : vector<8x32xf32>
    %505 = tpu.matmul %503, %504, %cst_256 {dimension_numbers = #tpu.dot_dimension_numbers<[1], [0], [0], [1], [0, 0, 1, 1], [], []>} : vector<8x16xf32>, vector<16x32xf32>, vector<8x32xf32> -> vector<8x32xf32>
    %506 = vector.extract_strided_slice %480 {offsets = [0, 16], sizes = [8, 16], strides = [1, 1]} : vector<8x32xf32> to vector<8x16xf32>
    %507 = vector.extract_strided_slice %481 {offsets = [0, 16], sizes = [8, 16], strides = [1, 1]} : vector<8x32xf32> to vector<8x16xf32>
    %508 = vector.extract_strided_slice %482 {offsets = [0, 16], sizes = [8, 16], strides = [1, 1]} : vector<8x32xf32> to vector<8x16xf32>
    %cst_257 = arith.constant dense<0.000000e+00> : vector<8x8xf32>
    %509 = tpu.matmul %506, %507, %cst_257 {dimension_numbers = #tpu.dot_dimension_numbers<[1], [1], [0], [0], [0, 0, 1, 0], [], []>} : vector<8x16xf32>, vector<8x16xf32>, vector<8x8xf32> -> vector<8x8xf32>
    %cst_258 = arith.constant 2.500000e-01 : f32
    %510 = vector.broadcast %cst_258 : f32 to vector<8x8xf32>
    %511 = arith.mulf %509, %510 : vector<8x8xf32>
    %cst_259 = arith.constant dense<0xFF800000> : vector<8xf32>
    %512 = vector.multi_reduction <maximumf>, %511, %cst_259 [1] : vector<8x8xf32> to vector<8xf32>
    %513 = vector.shape_cast %512 : vector<8xf32> to vector<8x1xf32>
    %514 = vector.broadcast %513 : vector<8x1xf32> to vector<8x8xf32>
    %515 = arith.subf %511, %514 : vector<8x8xf32>
    %516 = math.exp %515 : vector<8x8xf32>
    %cst_260 = arith.constant dense<0.000000e+00> : vector<8xf32>
    %517 = vector.multi_reduction <add>, %516, %cst_260 [1] : vector<8x8xf32> to vector<8xf32>
    %518 = vector.shape_cast %517 : vector<8xf32> to vector<8x1xf32>
    %519 = tpu.reciprocal %518 {approx = true} : vector<8x1xf32> -> vector<8x1xf32>
    %520 = vector.broadcast %519 : vector<8x1xf32> to vector<8x8xf32>
    %521 = arith.mulf %516, %520 : vector<8x8xf32>
    %cst_261 = arith.constant dense<0.000000e+00> : vector<8x16xf32>
    %522 = tpu.matmul %521, %508, %cst_261 {dimension_numbers = #tpu.dot_dimension_numbers<[1], [0], [0], [1], [0, 0, 1, 1], [], []>} : vector<8x8xf32>, vector<8x16xf32>, vector<8x16xf32> -> vector<8x16xf32>
    %523 = vector.extract_strided_slice %484 {offsets = [16, 0], sizes = [16, 32], strides = [1, 1]} : vector<32x32xf32> to vector<16x32xf32>
    %cst_262 = arith.constant dense<0.000000e+00> : vector<8x32xf32>
    %524 = tpu.matmul %522, %523, %cst_262 {dimension_numbers = #tpu.dot_dimension_numbers<[1], [0], [0], [1], [0, 0, 1, 1], [], []>} : vector<8x16xf32>, vector<16x32xf32>, vector<8x32xf32> -> vector<8x32xf32>
    %525 = arith.addf %505, %524 : vector<8x32xf32>
    %526 = vector.broadcast %486 : vector<1x32xf32> to vector<8x32xf32>
    %527 = arith.addf %525, %526 : vector<8x32xf32>
    %528 = arith.addf %472, %527 : vector<8x32xf32>
    %c1_263 = arith.constant 1 : index
    %c0_264 = arith.constant 0 : index
    %c0_265 = arith.constant 0 : index
    %529 = vector.load %arg28[%c1_263, %c0_264, %c0_265] : memref<2x1x32xf32, #tpu.memory_space<vmem>>, vector<1x1x32xf32>
    %530 = vector.shape_cast %529 : vector<1x1x32xf32> to vector<1x32xf32>
    %c1_266 = arith.constant 1 : index
    %c0_267 = arith.constant 0 : index
    %c0_268 = arith.constant 0 : index
    %531 = vector.load %arg29[%c1_266, %c0_267, %c0_268] : memref<2x1x32xf32, #tpu.memory_space<vmem>>, vector<1x1x32xf32>
    %532 = vector.shape_cast %531 : vector<1x1x32xf32> to vector<1x32xf32>
    %cst_269 = arith.constant dense<0.000000e+00> : vector<8xf32>
    %533 = vector.multi_reduction <add>, %528, %cst_269 [1] : vector<8x32xf32> to vector<8xf32>
    %534 = vector.shape_cast %533 : vector<8xf32> to vector<8x1xf32>
    %cst_270 = arith.constant 3.200000e+01 : f32
    %535 = vector.broadcast %cst_270 : f32 to vector<8x1xf32>
    %536 = arith.divf %534, %535 : vector<8x1xf32>
    %537 = vector.broadcast %536 : vector<8x1xf32> to vector<8x32xf32>
    %538 = arith.subf %528, %537 : vector<8x32xf32>
    %539 = arith.mulf %538, %538 : vector<8x32xf32>
    %cst_271 = arith.constant dense<0.000000e+00> : vector<8xf32>
    %540 = vector.multi_reduction <add>, %539, %cst_271 [1] : vector<8x32xf32> to vector<8xf32>
    %541 = vector.shape_cast %540 : vector<8xf32> to vector<8x1xf32>
    %cst_272 = arith.constant 3.200000e+01 : f32
    %542 = vector.broadcast %cst_272 : f32 to vector<8x1xf32>
    %543 = arith.divf %541, %542 : vector<8x1xf32>
    %cst_273 = arith.constant 9.99999974E-6 : f32
    %544 = vector.broadcast %cst_273 : f32 to vector<8x1xf32>
    %545 = arith.addf %543, %544 : vector<8x1xf32>
    %546 = math.rsqrt %545 : vector<8x1xf32>
    %547 = vector.broadcast %546 : vector<8x1xf32> to vector<8x32xf32>
    %548 = arith.mulf %538, %547 : vector<8x32xf32>
    %549 = vector.broadcast %530 : vector<1x32xf32> to vector<8x32xf32>
    %550 = arith.mulf %548, %549 : vector<8x32xf32>
    %551 = vector.broadcast %532 : vector<1x32xf32> to vector<8x32xf32>
    %552 = arith.addf %550, %551 : vector<8x32xf32>
    %c1_274 = arith.constant 1 : index
    %c0_275 = arith.constant 0 : index
    %c0_276 = arith.constant 0 : index
    %553 = vector.load %arg18[%c1_274, %c0_275, %c0_276] : memref<2x32x32xf32, #tpu.memory_space<vmem>>, vector<1x32x32xf32>
    %554 = vector.shape_cast %553 : vector<1x32x32xf32> to vector<32x32xf32>
    %c1_277 = arith.constant 1 : index
    %c0_278 = arith.constant 0 : index
    %c0_279 = arith.constant 0 : index
    %555 = vector.load %arg19[%c1_277, %c0_278, %c0_279] : memref<2x1x32xf32, #tpu.memory_space<vmem>>, vector<1x1x32xf32>
    %556 = vector.shape_cast %555 : vector<1x1x32xf32> to vector<1x32xf32>
    %cst_280 = arith.constant dense<0.000000e+00> : vector<8x32xf32>
    %557 = tpu.matmul %552, %554, %cst_280 {dimension_numbers = #tpu.dot_dimension_numbers<[1], [0], [0], [1], [0, 0, 1, 1], [], []>} : vector<8x32xf32>, vector<32x32xf32>, vector<8x32xf32> -> vector<8x32xf32>
    %558 = vector.broadcast %556 : vector<1x32xf32> to vector<8x32xf32>
    %559 = arith.addf %557, %558 : vector<8x32xf32>
    %c1_281 = arith.constant 1 : index
    %c0_282 = arith.constant 0 : index
    %c0_283 = arith.constant 0 : index
    %560 = vector.load %arg20[%c1_281, %c0_282, %c0_283] : memref<2x32x64xf32, #tpu.memory_space<vmem>>, vector<1x32x64xf32>
    %561 = vector.shape_cast %560 : vector<1x32x64xf32> to vector<32x64xf32>
    %c1_284 = arith.constant 1 : index
    %c0_285 = arith.constant 0 : index
    %c0_286 = arith.constant 0 : index
    %562 = vector.load %arg21[%c1_284, %c0_285, %c0_286] : memref<2x1x64xf32, #tpu.memory_space<vmem>>, vector<1x1x64xf32>
    %563 = vector.shape_cast %562 : vector<1x1x64xf32> to vector<1x64xf32>
    %cst_287 = arith.constant dense<0.000000e+00> : vector<8x64xf32>
    %564 = tpu.matmul %265, %561, %cst_287 {dimension_numbers = #tpu.dot_dimension_numbers<[1], [0], [0], [1], [0, 0, 1, 1], [], []>} : vector<8x32xf32>, vector<32x64xf32>, vector<8x64xf32> -> vector<8x64xf32>
    %565 = vector.broadcast %563 : vector<1x64xf32> to vector<8x64xf32>
    %566 = arith.addf %564, %565 : vector<8x64xf32>
    %567 = vector.extract_strided_slice %566 {offsets = [0, 0], sizes = [8, 32], strides = [1, 1]} : vector<8x64xf32> to vector<8x32xf32>
    %568 = vector.extract_strided_slice %566 {offsets = [0, 32], sizes = [8, 32], strides = [1, 1]} : vector<8x64xf32> to vector<8x32xf32>
    %c1_288 = arith.constant 1 : index
    %c0_289 = arith.constant 0 : index
    %c0_290 = arith.constant 0 : index
    %569 = vector.load %arg22[%c1_288, %c0_289, %c0_290] : memref<2x32x32xf32, #tpu.memory_space<vmem>>, vector<1x32x32xf32>
    %570 = vector.shape_cast %569 : vector<1x32x32xf32> to vector<32x32xf32>
    %c1_291 = arith.constant 1 : index
    %c0_292 = arith.constant 0 : index
    %c0_293 = arith.constant 0 : index
    %571 = vector.load %arg23[%c1_291, %c0_292, %c0_293] : memref<2x1x32xf32, #tpu.memory_space<vmem>>, vector<1x1x32xf32>
    %572 = vector.shape_cast %571 : vector<1x1x32xf32> to vector<1x32xf32>
    %573 = vector.extract_strided_slice %559 {offsets = [0, 0], sizes = [8, 16], strides = [1, 1]} : vector<8x32xf32> to vector<8x16xf32>
    %574 = vector.extract_strided_slice %567 {offsets = [0, 0], sizes = [8, 16], strides = [1, 1]} : vector<8x32xf32> to vector<8x16xf32>
    %575 = vector.extract_strided_slice %568 {offsets = [0, 0], sizes = [8, 16], strides = [1, 1]} : vector<8x32xf32> to vector<8x16xf32>
    %cst_294 = arith.constant dense<0.000000e+00> : vector<8x8xf32>
    %576 = tpu.matmul %573, %574, %cst_294 {dimension_numbers = #tpu.dot_dimension_numbers<[1], [1], [0], [0], [0, 0, 1, 0], [], []>} : vector<8x16xf32>, vector<8x16xf32>, vector<8x8xf32> -> vector<8x8xf32>
    %cst_295 = arith.constant 2.500000e-01 : f32
    %577 = vector.broadcast %cst_295 : f32 to vector<8x8xf32>
    %578 = arith.mulf %576, %577 : vector<8x8xf32>
    %cst_296 = arith.constant dense<0xFF800000> : vector<8xf32>
    %579 = vector.multi_reduction <maximumf>, %578, %cst_296 [1] : vector<8x8xf32> to vector<8xf32>
    %580 = vector.shape_cast %579 : vector<8xf32> to vector<8x1xf32>
    %581 = vector.broadcast %580 : vector<8x1xf32> to vector<8x8xf32>
    %582 = arith.subf %578, %581 : vector<8x8xf32>
    %583 = math.exp %582 : vector<8x8xf32>
    %cst_297 = arith.constant dense<0.000000e+00> : vector<8xf32>
    %584 = vector.multi_reduction <add>, %583, %cst_297 [1] : vector<8x8xf32> to vector<8xf32>
    %585 = vector.shape_cast %584 : vector<8xf32> to vector<8x1xf32>
    %586 = tpu.reciprocal %585 {approx = true} : vector<8x1xf32> -> vector<8x1xf32>
    %587 = vector.broadcast %586 : vector<8x1xf32> to vector<8x8xf32>
    %588 = arith.mulf %583, %587 : vector<8x8xf32>
    %cst_298 = arith.constant dense<0.000000e+00> : vector<8x16xf32>
    %589 = tpu.matmul %588, %575, %cst_298 {dimension_numbers = #tpu.dot_dimension_numbers<[1], [0], [0], [1], [0, 0, 1, 1], [], []>} : vector<8x8xf32>, vector<8x16xf32>, vector<8x16xf32> -> vector<8x16xf32>
    %590 = vector.extract_strided_slice %570 {offsets = [0, 0], sizes = [16, 32], strides = [1, 1]} : vector<32x32xf32> to vector<16x32xf32>
    %cst_299 = arith.constant dense<0.000000e+00> : vector<8x32xf32>
    %591 = tpu.matmul %589, %590, %cst_299 {dimension_numbers = #tpu.dot_dimension_numbers<[1], [0], [0], [1], [0, 0, 1, 1], [], []>} : vector<8x16xf32>, vector<16x32xf32>, vector<8x32xf32> -> vector<8x32xf32>
    %592 = vector.extract_strided_slice %559 {offsets = [0, 16], sizes = [8, 16], strides = [1, 1]} : vector<8x32xf32> to vector<8x16xf32>
    %593 = vector.extract_strided_slice %567 {offsets = [0, 16], sizes = [8, 16], strides = [1, 1]} : vector<8x32xf32> to vector<8x16xf32>
    %594 = vector.extract_strided_slice %568 {offsets = [0, 16], sizes = [8, 16], strides = [1, 1]} : vector<8x32xf32> to vector<8x16xf32>
    %cst_300 = arith.constant dense<0.000000e+00> : vector<8x8xf32>
    %595 = tpu.matmul %592, %593, %cst_300 {dimension_numbers = #tpu.dot_dimension_numbers<[1], [1], [0], [0], [0, 0, 1, 0], [], []>} : vector<8x16xf32>, vector<8x16xf32>, vector<8x8xf32> -> vector<8x8xf32>
    %cst_301 = arith.constant 2.500000e-01 : f32
    %596 = vector.broadcast %cst_301 : f32 to vector<8x8xf32>
    %597 = arith.mulf %595, %596 : vector<8x8xf32>
    %cst_302 = arith.constant dense<0xFF800000> : vector<8xf32>
    %598 = vector.multi_reduction <maximumf>, %597, %cst_302 [1] : vector<8x8xf32> to vector<8xf32>
    %599 = vector.shape_cast %598 : vector<8xf32> to vector<8x1xf32>
    %600 = vector.broadcast %599 : vector<8x1xf32> to vector<8x8xf32>
    %601 = arith.subf %597, %600 : vector<8x8xf32>
    %602 = math.exp %601 : vector<8x8xf32>
    %cst_303 = arith.constant dense<0.000000e+00> : vector<8xf32>
    %603 = vector.multi_reduction <add>, %602, %cst_303 [1] : vector<8x8xf32> to vector<8xf32>
    %604 = vector.shape_cast %603 : vector<8xf32> to vector<8x1xf32>
    %605 = tpu.reciprocal %604 {approx = true} : vector<8x1xf32> -> vector<8x1xf32>
    %606 = vector.broadcast %605 : vector<8x1xf32> to vector<8x8xf32>
    %607 = arith.mulf %602, %606 : vector<8x8xf32>
    %cst_304 = arith.constant dense<0.000000e+00> : vector<8x16xf32>
    %608 = tpu.matmul %607, %594, %cst_304 {dimension_numbers = #tpu.dot_dimension_numbers<[1], [0], [0], [1], [0, 0, 1, 1], [], []>} : vector<8x8xf32>, vector<8x16xf32>, vector<8x16xf32> -> vector<8x16xf32>
    %609 = vector.extract_strided_slice %570 {offsets = [16, 0], sizes = [16, 32], strides = [1, 1]} : vector<32x32xf32> to vector<16x32xf32>
    %cst_305 = arith.constant dense<0.000000e+00> : vector<8x32xf32>
    %610 = tpu.matmul %608, %609, %cst_305 {dimension_numbers = #tpu.dot_dimension_numbers<[1], [0], [0], [1], [0, 0, 1, 1], [], []>} : vector<8x16xf32>, vector<16x32xf32>, vector<8x32xf32> -> vector<8x32xf32>
    %611 = arith.addf %591, %610 : vector<8x32xf32>
    %612 = vector.broadcast %572 : vector<1x32xf32> to vector<8x32xf32>
    %613 = arith.addf %611, %612 : vector<8x32xf32>
    %614 = arith.addf %552, %613 : vector<8x32xf32>
    %c1_306 = arith.constant 1 : index
    %c0_307 = arith.constant 0 : index
    %c0_308 = arith.constant 0 : index
    %615 = vector.load %arg30[%c1_306, %c0_307, %c0_308] : memref<2x1x32xf32, #tpu.memory_space<vmem>>, vector<1x1x32xf32>
    %616 = vector.shape_cast %615 : vector<1x1x32xf32> to vector<1x32xf32>
    %c1_309 = arith.constant 1 : index
    %c0_310 = arith.constant 0 : index
    %c0_311 = arith.constant 0 : index
    %617 = vector.load %arg31[%c1_309, %c0_310, %c0_311] : memref<2x1x32xf32, #tpu.memory_space<vmem>>, vector<1x1x32xf32>
    %618 = vector.shape_cast %617 : vector<1x1x32xf32> to vector<1x32xf32>
    %cst_312 = arith.constant dense<0.000000e+00> : vector<8xf32>
    %619 = vector.multi_reduction <add>, %614, %cst_312 [1] : vector<8x32xf32> to vector<8xf32>
    %620 = vector.shape_cast %619 : vector<8xf32> to vector<8x1xf32>
    %cst_313 = arith.constant 3.200000e+01 : f32
    %621 = vector.broadcast %cst_313 : f32 to vector<8x1xf32>
    %622 = arith.divf %620, %621 : vector<8x1xf32>
    %623 = vector.broadcast %622 : vector<8x1xf32> to vector<8x32xf32>
    %624 = arith.subf %614, %623 : vector<8x32xf32>
    %625 = arith.mulf %624, %624 : vector<8x32xf32>
    %cst_314 = arith.constant dense<0.000000e+00> : vector<8xf32>
    %626 = vector.multi_reduction <add>, %625, %cst_314 [1] : vector<8x32xf32> to vector<8xf32>
    %627 = vector.shape_cast %626 : vector<8xf32> to vector<8x1xf32>
    %cst_315 = arith.constant 3.200000e+01 : f32
    %628 = vector.broadcast %cst_315 : f32 to vector<8x1xf32>
    %629 = arith.divf %627, %628 : vector<8x1xf32>
    %cst_316 = arith.constant 9.99999974E-6 : f32
    %630 = vector.broadcast %cst_316 : f32 to vector<8x1xf32>
    %631 = arith.addf %629, %630 : vector<8x1xf32>
    %632 = math.rsqrt %631 : vector<8x1xf32>
    %633 = vector.broadcast %632 : vector<8x1xf32> to vector<8x32xf32>
    %634 = arith.mulf %624, %633 : vector<8x32xf32>
    %635 = vector.broadcast %616 : vector<1x32xf32> to vector<8x32xf32>
    %636 = arith.mulf %634, %635 : vector<8x32xf32>
    %637 = vector.broadcast %618 : vector<1x32xf32> to vector<8x32xf32>
    %638 = arith.addf %636, %637 : vector<8x32xf32>
    %c1_317 = arith.constant 1 : index
    %c0_318 = arith.constant 0 : index
    %c0_319 = arith.constant 0 : index
    %639 = vector.load %arg24[%c1_317, %c0_318, %c0_319] : memref<2x32x2048xf32, #tpu.memory_space<vmem>>, vector<1x32x2048xf32>
    %640 = vector.shape_cast %639 : vector<1x32x2048xf32> to vector<32x2048xf32>
    %c1_320 = arith.constant 1 : index
    %c0_321 = arith.constant 0 : index
    %c0_322 = arith.constant 0 : index
    %641 = vector.load %arg25[%c1_320, %c0_321, %c0_322] : memref<2x1x2048xf32, #tpu.memory_space<vmem>>, vector<1x1x2048xf32>
    %642 = vector.shape_cast %641 : vector<1x1x2048xf32> to vector<1x2048xf32>
    %cst_323 = arith.constant dense<0.000000e+00> : vector<8x2048xf32>
    %643 = tpu.matmul %638, %640, %cst_323 {dimension_numbers = #tpu.dot_dimension_numbers<[1], [0], [0], [1], [0, 0, 1, 1], [], []>} : vector<8x32xf32>, vector<32x2048xf32>, vector<8x2048xf32> -> vector<8x2048xf32>
    %644 = vector.broadcast %642 : vector<1x2048xf32> to vector<8x2048xf32>
    %645 = arith.addf %643, %644 : vector<8x2048xf32>
    %cst_324 = arith.constant 0.000000e+00 : f32
    %646 = vector.broadcast %cst_324 : f32 to vector<8x2048xf32>
    %647 = arith.maximumf %645, %646 : vector<8x2048xf32>
    %c1_325 = arith.constant 1 : index
    %c0_326 = arith.constant 0 : index
    %c0_327 = arith.constant 0 : index
    %648 = vector.load %arg26[%c1_325, %c0_326, %c0_327] : memref<2x2048x32xf32, #tpu.memory_space<vmem>>, vector<1x2048x32xf32>
    %649 = vector.shape_cast %648 : vector<1x2048x32xf32> to vector<2048x32xf32>
    %c1_328 = arith.constant 1 : index
    %c0_329 = arith.constant 0 : index
    %c0_330 = arith.constant 0 : index
    %650 = vector.load %arg27[%c1_328, %c0_329, %c0_330] : memref<2x1x32xf32, #tpu.memory_space<vmem>>, vector<1x1x32xf32>
    %651 = vector.shape_cast %650 : vector<1x1x32xf32> to vector<1x32xf32>
    %cst_331 = arith.constant dense<0.000000e+00> : vector<8x32xf32>
    %652 = tpu.matmul %647, %649, %cst_331 {dimension_numbers = #tpu.dot_dimension_numbers<[1], [0], [0], [1], [0, 0, 1, 1], [], []>} : vector<8x2048xf32>, vector<2048x32xf32>, vector<8x32xf32> -> vector<8x32xf32>
    %653 = vector.broadcast %651 : vector<1x32xf32> to vector<8x32xf32>
    %654 = arith.addf %652, %653 : vector<8x32xf32>
    %655 = arith.addf %638, %654 : vector<8x32xf32>
    %c1_332 = arith.constant 1 : index
    %c0_333 = arith.constant 0 : index
    %c0_334 = arith.constant 0 : index
    %656 = vector.load %arg32[%c1_332, %c0_333, %c0_334] : memref<2x1x32xf32, #tpu.memory_space<vmem>>, vector<1x1x32xf32>
    %657 = vector.shape_cast %656 : vector<1x1x32xf32> to vector<1x32xf32>
    %c1_335 = arith.constant 1 : index
    %c0_336 = arith.constant 0 : index
    %c0_337 = arith.constant 0 : index
    %658 = vector.load %arg33[%c1_335, %c0_336, %c0_337] : memref<2x1x32xf32, #tpu.memory_space<vmem>>, vector<1x1x32xf32>
    %659 = vector.shape_cast %658 : vector<1x1x32xf32> to vector<1x32xf32>
    %cst_338 = arith.constant dense<0.000000e+00> : vector<8xf32>
    %660 = vector.multi_reduction <add>, %655, %cst_338 [1] : vector<8x32xf32> to vector<8xf32>
    %661 = vector.shape_cast %660 : vector<8xf32> to vector<8x1xf32>
    %cst_339 = arith.constant 3.200000e+01 : f32
    %662 = vector.broadcast %cst_339 : f32 to vector<8x1xf32>
    %663 = arith.divf %661, %662 : vector<8x1xf32>
    %664 = vector.broadcast %663 : vector<8x1xf32> to vector<8x32xf32>
    %665 = arith.subf %655, %664 : vector<8x32xf32>
    %666 = arith.mulf %665, %665 : vector<8x32xf32>
    %cst_340 = arith.constant dense<0.000000e+00> : vector<8xf32>
    %667 = vector.multi_reduction <add>, %666, %cst_340 [1] : vector<8x32xf32> to vector<8xf32>
    %668 = vector.shape_cast %667 : vector<8xf32> to vector<8x1xf32>
    %cst_341 = arith.constant 3.200000e+01 : f32
    %669 = vector.broadcast %cst_341 : f32 to vector<8x1xf32>
    %670 = arith.divf %668, %669 : vector<8x1xf32>
    %cst_342 = arith.constant 9.99999974E-6 : f32
    %671 = vector.broadcast %cst_342 : f32 to vector<8x1xf32>
    %672 = arith.addf %670, %671 : vector<8x1xf32>
    %673 = math.rsqrt %672 : vector<8x1xf32>
    %674 = vector.broadcast %673 : vector<8x1xf32> to vector<8x32xf32>
    %675 = arith.mulf %665, %674 : vector<8x32xf32>
    %676 = vector.broadcast %657 : vector<1x32xf32> to vector<8x32xf32>
    %677 = arith.mulf %675, %676 : vector<8x32xf32>
    %678 = vector.broadcast %659 : vector<1x32xf32> to vector<8x32xf32>
    %679 = arith.addf %677, %678 : vector<8x32xf32>
    %c0_343 = arith.constant 0 : index
    %c0_344 = arith.constant 0 : index
    %680 = vector.load %arg36[%c0_343, %c0_344] : memref<1x32xf32, #tpu.memory_space<vmem>>, vector<1x32xf32>
    %c0_345 = arith.constant 0 : index
    %c0_346 = arith.constant 0 : index
    %681 = vector.load %arg37[%c0_345, %c0_346] : memref<1x32xf32, #tpu.memory_space<vmem>>, vector<1x32xf32>
    %cst_347 = arith.constant dense<0.000000e+00> : vector<8xf32>
    %682 = vector.multi_reduction <add>, %679, %cst_347 [1] : vector<8x32xf32> to vector<8xf32>
    %683 = vector.shape_cast %682 : vector<8xf32> to vector<8x1xf32>
    %cst_348 = arith.constant 3.200000e+01 : f32
    %684 = vector.broadcast %cst_348 : f32 to vector<8x1xf32>
    %685 = arith.divf %683, %684 : vector<8x1xf32>
    %686 = vector.broadcast %685 : vector<8x1xf32> to vector<8x32xf32>
    %687 = arith.subf %679, %686 : vector<8x32xf32>
    %688 = arith.mulf %687, %687 : vector<8x32xf32>
    %cst_349 = arith.constant dense<0.000000e+00> : vector<8xf32>
    %689 = vector.multi_reduction <add>, %688, %cst_349 [1] : vector<8x32xf32> to vector<8xf32>
    %690 = vector.shape_cast %689 : vector<8xf32> to vector<8x1xf32>
    %cst_350 = arith.constant 3.200000e+01 : f32
    %691 = vector.broadcast %cst_350 : f32 to vector<8x1xf32>
    %692 = arith.divf %690, %691 : vector<8x1xf32>
    %cst_351 = arith.constant 9.99999974E-6 : f32
    %693 = vector.broadcast %cst_351 : f32 to vector<8x1xf32>
    %694 = arith.addf %692, %693 : vector<8x1xf32>
    %695 = math.rsqrt %694 : vector<8x1xf32>
    %696 = vector.broadcast %695 : vector<8x1xf32> to vector<8x32xf32>
    %697 = arith.mulf %687, %696 : vector<8x32xf32>
    %698 = vector.broadcast %680 : vector<1x32xf32> to vector<8x32xf32>
    %699 = arith.mulf %697, %698 : vector<8x32xf32>
    %700 = vector.broadcast %681 : vector<1x32xf32> to vector<8x32xf32>
    %701 = arith.addf %699, %700 : vector<8x32xf32>
    %702 = vector.extract_strided_slice %701 {offsets = [7, 0], sizes = [1, 32], strides = [1, 1]} : vector<8x32xf32> to vector<1x32xf32>
    %c0_352 = arith.constant 0 : index
    %c0_353 = arith.constant 0 : index
    %703 = vector.load %arg38[%c0_352, %c0_353] : memref<32x16xf32, #tpu.memory_space<vmem>>, vector<32x16xf32>
    %c0_354 = arith.constant 0 : index
    %c0_355 = arith.constant 0 : index
    %704 = vector.load %arg39[%c0_354, %c0_355] : memref<1x16xf32, #tpu.memory_space<vmem>>, vector<1x16xf32>
    %cst_356 = arith.constant dense<0.000000e+00> : vector<1x16xf32>
    %705 = tpu.matmul %702, %703, %cst_356 {dimension_numbers = #tpu.dot_dimension_numbers<[1], [0], [0], [1], [0, 0, 1, 1], [], []>} : vector<1x32xf32>, vector<32x16xf32>, vector<1x16xf32> -> vector<1x16xf32>
    %706 = arith.addf %705, %704 : vector<1x16xf32>
    %707 = vector.shape_cast %706 : vector<1x16xf32> to vector<1x1x16xf32>
    %c0_357 = arith.constant 0 : index
    %c0_358 = arith.constant 0 : index
    %c0_359 = arith.constant 0 : index
    %708 = vector.load %arg40[%c0_357, %c0_358, %c0_359] : memref<1x1x16xf32, #tpu.memory_space<vmem>>, vector<1x1x16xf32>
    tpu.vector_store %arg40[%c0_357, %c0_358, %c0_359], %707 {strides = array<i32>} : memref<1x1x16xf32, #tpu.memory_space<vmem>>, vector<1x1x16xf32>,
    return
  }
  func.func @transform_0(%arg0: i32) -> (i32, i32, i32) {
    %c0_i32 = arith.constant 0 : i32
    %c0_i32_0 = arith.constant 0 : i32
    %c0_i32_1 = arith.constant 0 : i32
    return %arg0, %c0_i32, %c0_i32_0 : i32, i32, i32
  }
  func.func @transform_1(%arg0: i32) -> (i32, i32, i32) {
    %c0_i32 = arith.constant 0 : i32
    %c0_i32_0 = arith.constant 0 : i32
    %c0_i32_1 = arith.constant 0 : i32
    %c0_i32_2 = arith.constant 0 : i32
    return %c0_i32, %c0_i32_0, %c0_i32_1 : i32, i32, i32
  }
  func.func @transform_2(%arg0: i32) -> (i32, i32, i32) {
    %c0_i32 = arith.constant 0 : i32
    %c0_i32_0 = arith.constant 0 : i32
    %c0_i32_1 = arith.constant 0 : i32
    %c0_i32_2 = arith.constant 0 : i32
    return %c0_i32, %c0_i32_0, %c0_i32_1 : i32, i32, i32
  }
  func.func @transform_3(%arg0: i32) -> (i32, i32, i32) {
    %c0_i32 = arith.constant 0 : i32
    %c0_i32_0 = arith.constant 0 : i32
    %c0_i32_1 = arith.constant 0 : i32
    %c0_i32_2 = arith.constant 0 : i32
    return %c0_i32, %c0_i32_0, %c0_i32_1 : i32, i32, i32
  }
  func.func @transform_4(%arg0: i32) -> (i32, i32, i32) {
    %c0_i32 = arith.constant 0 : i32
    %c0_i32_0 = arith.constant 0 : i32
    %c0_i32_1 = arith.constant 0 : i32
    %c0_i32_2 = arith.constant 0 : i32
    return %c0_i32, %c0_i32_0, %c0_i32_1 : i32, i32, i32
  }
  func.func @transform_5(%arg0: i32) -> (i32, i32, i32) {
    %c0_i32 = arith.constant 0 : i32
    %c0_i32_0 = arith.constant 0 : i32
    %c0_i32_1 = arith.constant 0 : i32
    %c0_i32_2 = arith.constant 0 : i32
    return %c0_i32, %c0_i32_0, %c0_i32_1 : i32, i32, i32
  }
  func.func @transform_6(%arg0: i32) -> (i32, i32, i32) {
    %c0_i32 = arith.constant 0 : i32
    %c0_i32_0 = arith.constant 0 : i32
    %c0_i32_1 = arith.constant 0 : i32
    %c0_i32_2 = arith.constant 0 : i32
    return %c0_i32, %c0_i32_0, %c0_i32_1 : i32, i32, i32
  }
  func.func @transform_7(%arg0: i32) -> (i32, i32, i32) {
    %c0_i32 = arith.constant 0 : i32
    %c0_i32_0 = arith.constant 0 : i32
    %c0_i32_1 = arith.constant 0 : i32
    %c0_i32_2 = arith.constant 0 : i32
    return %c0_i32, %c0_i32_0, %c0_i32_1 : i32, i32, i32
  }
  func.func @transform_8(%arg0: i32) -> (i32, i32, i32) {
    %c0_i32 = arith.constant 0 : i32
    %c0_i32_0 = arith.constant 0 : i32
    %c0_i32_1 = arith.constant 0 : i32
    %c0_i32_2 = arith.constant 0 : i32
    return %c0_i32, %c0_i32_0, %c0_i32_1 : i32, i32, i32
  }
  func.func @transform_9(%arg0: i32) -> (i32, i32, i32) {
    %c0_i32 = arith.constant 0 : i32
    %c0_i32_0 = arith.constant 0 : i32
    %c0_i32_1 = arith.constant 0 : i32
    %c0_i32_2 = arith.constant 0 : i32
    return %c0_i32, %c0_i32_0, %c0_i32_1 : i32, i32, i32
  }
  func.func @transform_10(%arg0: i32) -> (i32, i32, i32) {
    %c0_i32 = arith.constant 0 : i32
    %c0_i32_0 = arith.constant 0 : i32
    %c0_i32_1 = arith.constant 0 : i32
    %c0_i32_2 = arith.constant 0 : i32
    return %c0_i32, %c0_i32_0, %c0_i32_1 : i32, i32, i32
  }
  func.func @transform_11(%arg0: i32) -> (i32, i32, i32) {
    %c0_i32 = arith.constant 0 : i32
    %c0_i32_0 = arith.constant 0 : i32
    %c0_i32_1 = arith.constant 0 : i32
    %c0_i32_2 = arith.constant 0 : i32
    return %c0_i32, %c0_i32_0, %c0_i32_1 : i32, i32, i32
  }
  func.func @transform_12(%arg0: i32) -> (i32, i32, i32) {
    %c0_i32 = arith.constant 0 : i32
    %c0_i32_0 = arith.constant 0 : i32
    %c0_i32_1 = arith.constant 0 : i32
    %c0_i32_2 = arith.constant 0 : i32
    return %c0_i32, %c0_i32_0, %c0_i32_1 : i32, i32, i32
  }
  func.func @transform_13(%arg0: i32) -> (i32, i32, i32) {
    %c0_i32 = arith.constant 0 : i32
    %c0_i32_0 = arith.constant 0 : i32
    %c0_i32_1 = arith.constant 0 : i32
    %c0_i32_2 = arith.constant 0 : i32
    return %c0_i32, %c0_i32_0, %c0_i32_1 : i32, i32, i32
  }
  func.func @transform_14(%arg0: i32) -> (i32, i32, i32) {
    %c0_i32 = arith.constant 0 : i32
    %c0_i32_0 = arith.constant 0 : i32
    %c0_i32_1 = arith.constant 0 : i32
    %c0_i32_2 = arith.constant 0 : i32
    return %c0_i32, %c0_i32_0, %c0_i32_1 : i32, i32, i32
  }
  func.func @transform_15(%arg0: i32) -> (i32, i32, i32) {
    %c0_i32 = arith.constant 0 : i32
    %c0_i32_0 = arith.constant 0 : i32
    %c0_i32_1 = arith.constant 0 : i32
    %c0_i32_2 = arith.constant 0 : i32
    return %c0_i32, %c0_i32_0, %c0_i32_1 : i32, i32, i32
  }
  func.func @transform_16(%arg0: i32) -> (i32, i32, i32) {
    %c0_i32 = arith.constant 0 : i32
    %c0_i32_0 = arith.constant 0 : i32
    %c0_i32_1 = arith.constant 0 : i32
    %c0_i32_2 = arith.constant 0 : i32
    return %c0_i32, %c0_i32_0, %c0_i32_1 : i32, i32, i32
  }
  func.func @transform_17(%arg0: i32) -> (i32, i32, i32) {
    %c0_i32 = arith.constant 0 : i32
    %c0_i32_0 = arith.constant 0 : i32
    %c0_i32_1 = arith.constant 0 : i32
    %c0_i32_2 = arith.constant 0 : i32
    return %c0_i32, %c0_i32_0, %c0_i32_1 : i32, i32, i32
  }
  func.func @transform_18(%arg0: i32) -> (i32, i32, i32) {
    %c0_i32 = arith.constant 0 : i32
    %c0_i32_0 = arith.constant 0 : i32
    %c0_i32_1 = arith.constant 0 : i32
    %c0_i32_2 = arith.constant 0 : i32
    return %c0_i32, %c0_i32_0, %c0_i32_1 : i32, i32, i32
  }
  func.func @transform_19(%arg0: i32) -> (i32, i32, i32) {
    %c0_i32 = arith.constant 0 : i32
    %c0_i32_0 = arith.constant 0 : i32
    %c0_i32_1 = arith.constant 0 : i32
    %c0_i32_2 = arith.constant 0 : i32
    return %c0_i32, %c0_i32_0, %c0_i32_1 : i32, i32, i32
  }
  func.func @transform_20(%arg0: i32) -> (i32, i32, i32) {
    %c0_i32 = arith.constant 0 : i32
    %c0_i32_0 = arith.constant 0 : i32
    %c0_i32_1 = arith.constant 0 : i32
    %c0_i32_2 = arith.constant 0 : i32
    return %c0_i32, %c0_i32_0, %c0_i32_1 : i32, i32, i32
  }
  func.func @transform_21(%arg0: i32) -> (i32, i32, i32) {
    %c0_i32 = arith.constant 0 : i32
    %c0_i32_0 = arith.constant 0 : i32
    %c0_i32_1 = arith.constant 0 : i32
    %c0_i32_2 = arith.constant 0 : i32
    return %c0_i32, %c0_i32_0, %c0_i32_1 : i32, i32, i32
  }
  func.func @transform_22(%arg0: i32) -> (i32, i32, i32) {
    %c0_i32 = arith.constant 0 : i32
    %c0_i32_0 = arith.constant 0 : i32
    %c0_i32_1 = arith.constant 0 : i32
    %c0_i32_2 = arith.constant 0 : i32
    return %c0_i32, %c0_i32_0, %c0_i32_1 : i32, i32, i32
  }
  func.func @transform_23(%arg0: i32) -> (i32, i32, i32) {
    %c0_i32 = arith.constant 0 : i32
    %c0_i32_0 = arith.constant 0 : i32
    %c0_i32_1 = arith.constant 0 : i32
    %c0_i32_2 = arith.constant 0 : i32
    return %c0_i32, %c0_i32_0, %c0_i32_1 : i32, i32, i32
  }
  func.func @transform_24(%arg0: i32) -> (i32, i32, i32) {
    %c0_i32 = arith.constant 0 : i32
    %c0_i32_0 = arith.constant 0 : i32
    %c0_i32_1 = arith.constant 0 : i32
    %c0_i32_2 = arith.constant 0 : i32
    return %c0_i32, %c0_i32_0, %c0_i32_1 : i32, i32, i32
  }
  func.func @transform_25(%arg0: i32) -> (i32, i32, i32) {
    %c0_i32 = arith.constant 0 : i32
    %c0_i32_0 = arith.constant 0 : i32
    %c0_i32_1 = arith.constant 0 : i32
    %c0_i32_2 = arith.constant 0 : i32
    return %c0_i32, %c0_i32_0, %c0_i32_1 : i32, i32, i32
  }
  func.func @transform_26(%arg0: i32) -> (i32, i32, i32) {
    %c0_i32 = arith.constant 0 : i32
    %c0_i32_0 = arith.constant 0 : i32
    %c0_i32_1 = arith.constant 0 : i32
    %c0_i32_2 = arith.constant 0 : i32
    return %c0_i32, %c0_i32_0, %c0_i32_1 : i32, i32, i32
  }
  func.func @transform_27(%arg0: i32) -> (i32, i32, i32) {
    %c0_i32 = arith.constant 0 : i32
    %c0_i32_0 = arith.constant 0 : i32
    %c0_i32_1 = arith.constant 0 : i32
    %c0_i32_2 = arith.constant 0 : i32
    return %c0_i32, %c0_i32_0, %c0_i32_1 : i32, i32, i32
  }
  func.func @transform_28(%arg0: i32) -> (i32, i32, i32) {
    %c0_i32 = arith.constant 0 : i32
    %c0_i32_0 = arith.constant 0 : i32
    %c0_i32_1 = arith.constant 0 : i32
    %c0_i32_2 = arith.constant 0 : i32
    return %c0_i32, %c0_i32_0, %c0_i32_1 : i32, i32, i32
  }
  func.func @transform_29(%arg0: i32) -> (i32, i32, i32) {
    %c0_i32 = arith.constant 0 : i32
    %c0_i32_0 = arith.constant 0 : i32
    %c0_i32_1 = arith.constant 0 : i32
    %c0_i32_2 = arith.constant 0 : i32
    return %c0_i32, %c0_i32_0, %c0_i32_1 : i32, i32, i32
  }
  func.func @transform_30(%arg0: i32) -> (i32, i32, i32) {
    %c0_i32 = arith.constant 0 : i32
    %c0_i32_0 = arith.constant 0 : i32
    %c0_i32_1 = arith.constant 0 : i32
    %c0_i32_2 = arith.constant 0 : i32
    return %c0_i32, %c0_i32_0, %c0_i32_1 : i32, i32, i32
  }
  func.func @transform_31(%arg0: i32) -> (i32, i32, i32) {
    %c0_i32 = arith.constant 0 : i32
    %c0_i32_0 = arith.constant 0 : i32
    %c0_i32_1 = arith.constant 0 : i32
    %c0_i32_2 = arith.constant 0 : i32
    return %c0_i32, %c0_i32_0, %c0_i32_1 : i32, i32, i32
  }
  func.func @transform_32(%arg0: i32) -> (i32, i32, i32) {
    %c0_i32 = arith.constant 0 : i32
    %c0_i32_0 = arith.constant 0 : i32
    %c0_i32_1 = arith.constant 0 : i32
    %c0_i32_2 = arith.constant 0 : i32
    return %c0_i32, %c0_i32_0, %c0_i32_1 : i32, i32, i32
  }
  func.func @transform_33(%arg0: i32) -> (i32, i32) {
    %c0_i32 = arith.constant 0 : i32
    %c0_i32_0 = arith.constant 0 : i32
    %c0_i32_1 = arith.constant 0 : i32
    return %c0_i32, %c0_i32_0 : i32, i32
  }
  func.func @transform_34(%arg0: i32) -> (i32, i32) {
    %c0_i32 = arith.constant 0 : i32
    %c0_i32_0 = arith.constant 0 : i32
    %c0_i32_1 = arith.constant 0 : i32
    return %c0_i32, %c0_i32_0 : i32, i32
  }
  func.func @transform_35(%arg0: i32) -> (i32, i32) {
    %c0_i32 = arith.constant 0 : i32
    %c0_i32_0 = arith.constant 0 : i32
    %c0_i32_1 = arith.constant 0 : i32
    return %c0_i32, %c0_i32_0 : i32, i32
  }
  func.func @transform_36(%arg0: i32) -> (i32, i32) {
    %c0_i32 = arith.constant 0 : i32
    %c0_i32_0 = arith.constant 0 : i32
    %c0_i32_1 = arith.constant 0 : i32
    return %c0_i32, %c0_i32_0 : i32, i32
  }
  func.func @transform_37(%arg0: i32) -> (i32, i32) {
    %c0_i32 = arith.constant 0 : i32
    %c0_i32_0 = arith.constant 0 : i32
    %c0_i32_1 = arith.constant 0 : i32
    return %c0_i32, %c0_i32_0 : i32, i32
  }
  func.func @transform_38(%arg0: i32) -> (i32, i32) {
    %c0_i32 = arith.constant 0 : i32
    %c0_i32_0 = arith.constant 0 : i32
    %c0_i32_1 = arith.constant 0 : i32
    return %c0_i32, %c0_i32_0 : i32, i32
  }
  func.func @transform_39(%arg0: i32) -> (i32, i32, i32) {
    %c0_i32 = arith.constant 0 : i32
    %c0_i32_0 = arith.constant 0 : i32
    %c0_i32_1 = arith.constant 0 : i32
    return %arg0, %c0_i32, %c0_i32_0 : i32, i32, i32
  }
}

</mosaic_0001>

<bundles_post_ra>
// kernel: transformer_forward.1
= control target key start
LH: loop header
LB: loop body
LE: loop exit
PB: predicated region body
PF: predicated region fallthrough
CT: control target
= control target key end

     0   :  { %s15565_s6 = smov 1   ;;  %s15566_s10 = smov 2   ;;  %s18014_s0 = inlined_call_operand.smem [shape: u32[40], index: -1, kind: input, shape index: {}] }
   0x1   :  { %s15621_s5 = sld [smem:[%s18014_s0]]   ;;  %s15567_s14 = smov 3  }
   0x2   :  { %s15626_s9 = sld [smem:[%s18014_s0 + %s15565_s6]]   ;;  %s15568_s18 = smov 4  }
   0x3   :  { %s15631_s13 = sld [smem:[%s18014_s0 + %s15566_s10]]   ;;  %s15569_s22 = smov 5  }
   0x4   :  { %s15636_s17 = sld [smem:[%s18014_s0 + %s15567_s14]]   ;;  %s15570_s26 = smov 6  }
   0x5   :  { %s15641_s21 = sld [smem:[%s18014_s0 + %s15568_s18]]   ;;  %s15571_s30 = smov 7  }
   0x6   :  { %s15646_s25 = sld [smem:[%s18014_s0 + %s15569_s22]]   ;;  %s15572_s4 = smov 8  }
   0x7   :  { %18070 = sst [smem:[#allocation5_spill]] %s15621_s5  ;;  %s15573_s10 = smov 9  }
   0x8   :  { %18071 = sst [smem:[#allocation6_spill]] %s15626_s9  ;;  %s15574_s15 = smov 10  }
   0x9   :  { %18072 = sst [smem:[#allocation7_spill]] %s15631_s13  ;;  %s15575_s20 = smov 11  }
   0xa   :  { %18073 = sst [smem:[#allocation8_spill]] %s15636_s17  ;;  %s15577_s1 = smov 13  }
   0xb   :  { %18074 = sst [smem:[#allocation9_spill]] %s15641_s21  ;;  %s15578_s7 = smov 14  }
   0xc   :  { %18075 = sst [smem:[#allocation10_spill]] %s15646_s25  ;;  %s15580_s22 = smov 16  }
   0xd   :  { %s15651_s29 = sld [smem:[%s18014_s0 + %s15570_s26]]   ;;  %s15576_s26 = smov 12  }
   0xe   :  { %s15656_s3 = sld [smem:[%s18014_s0 + %s15571_s30]]   ;;  %s15581_s28 = smov 17  }
   0xf   :  { %s15661_s8 = sld [smem:[%s18014_s0 + %s15572_s4]]  }
  0x10   :  { %s15666_s14 = sld [smem:[%s18014_s0 + %s15573_s10]]  }
  0x11   :  { %s15671_s19 = sld [smem:[%s18014_s0 + %s15574_s15]]   ;;  %s15579_s15 = smov 15  }
  0x12   :  { %s15676_s24 = sld [smem:[%s18014_s0 + %s15575_s20]]  }
  0x13   :  { %18076 = sst [smem:[#allocation11_spill]] %s15651_s29 }
  0x14   :  { %18077 = sst [smem:[#allocation12_spill]] %s15656_s3 }
  0x15   :  { %18078 = sst [smem:[#allocation13_spill]] %s15661_s8 }
  0x16   :  { %18079 = sst [smem:[#allocation14_spill]] %s15666_s14 }
  0x17   :  { %18080 = sst [smem:[#allocation15_spill]] %s15671_s19 }
  0x18   :  { %18081 = sst [smem:[#allocation16_spill]] %s15676_s24 }
  0x19   :  { %s15681_s30 = sld [smem:[%s18014_s0 + %s15576_s26]]  }
  0x1a   :  { %s15686_s6 = sld [smem:[%s18014_s0 + %s15577_s1]]  }
  0x1b   :  { %s15691_s12 = sld [smem:[%s18014_s0 + %s15578_s7]]   ;;  %s15582_s7 = smov 18  }
  0x1c   :  { %s15696_s20 = sld [smem:[%s18014_s0 + %s15579_s15]]   ;;  %s15583_s15 = smov 19  }
  0x1d   :  { %s15701_s27 = sld [smem:[%s18014_s0 + %s15580_s22]]   ;;  %s15584_s22 = smov 20  }
  0x1e   :  { %s15706_s4 = sld [smem:[%s18014_s0 + %s15581_s28]]   ;;  %s15585_s28 = smov 21  }
  0x1f   :  { %18082 = sst [smem:[#allocation17_spill]] %s15681_s30 }
  0x20   :  { %18083 = sst [smem:[#allocation18_spill]] %s15686_s6 }
  0x21   :  { %18084 = sst [smem:[#allocation19_spill]] %s15691_s12 }
  0x22   :  { %18085 = sst [smem:[#allocation20_spill]] %s15696_s20 }
  0x23   :  { %18086 = sst [smem:[#allocation21_spill]] %s15701_s27 }
  0x24   :  { %18087 = sst [smem:[#allocation22_spill]] %s15706_s4 }
  0x25   :  { %s15711_s12 = sld [smem:[%s18014_s0 + %s15582_s7]]   ;;  %s15586_s7 = smov 22  }
  0x26   :  { %s15716_s20 = sld [smem:[%s18014_s0 + %s15583_s15]]   ;;  %s15587_s15 = smov 23  }
  0x27   :  { %s15721_s27 = sld [smem:[%s18014_s0 + %s15584_s22]]   ;;  %s15588_s22 = smov 24  }
  0x28   :  { %s15726_s4 = sld [smem:[%s18014_s0 + %s15585_s28]]   ;;  %s15589_s28 = smov 25  }
  0x2b   :  { %18088 = sst [smem:[#allocation23_spill]] %s15711_s12 }
  0x2c   :  { %18089 = sst [smem:[#allocation24_spill]] %s15716_s20 }
  0x2d   :  { %18090 = sst [smem:[#allocation25_spill]] %s15721_s27 }
  0x2e   :  { %18091 = sst [smem:[#allocation26_spill]] %s15726_s4 }
  0x2f   :  { %s15731_s12 = sld [smem:[%s18014_s0 + %s15586_s7]]   ;;  %s15590_s7 = smov 26  }
  0x30   :  { %s15736_s20 = sld [smem:[%s18014_s0 + %s15587_s15]]   ;;  %s15591_s15 = smov 27  }
  0x31   :  { %s15741_s27 = sld [smem:[%s18014_s0 + %s15588_s22]]   ;;  %s15592_s22 = smov 28  }
  0x32   :  { %s15746_s4 = sld [smem:[%s18014_s0 + %s15589_s28]]   ;;  %s15593_s28 = smov 29  }
  0x35   :  { %18092 = sst [smem:[#allocation27_spill]] %s15731_s12 }
  0x36   :  { %18093 = sst [smem:[#allocation28_spill]] %s15736_s20 }
  0x37   :  { %18094 = sst [smem:[#allocation29_spill]] %s15741_s27 }
  0x38   :  { %18095 = sst [smem:[#allocation30_spill]] %s15746_s4 }
  0x39   :  { %s15751_s12 = sld [smem:[%s18014_s0 + %s15590_s7]]   ;;  %s15594_s7 = smov 30  }
  0x3a   :  { %s15756_s20 = sld [smem:[%s18014_s0 + %s15591_s15]]   ;;  %s15595_s15 = smov 31  }
  0x3b   :  { %s15761_s27 = sld [smem:[%s18014_s0 + %s15592_s22]]   ;;  %s15596_s22 = smov 32  }
  0x3c   :  { %s15766_s4 = sld [smem:[%s18014_s0 + %s15593_s28]]   ;;  %s15597_s28 = smov 33  }
  0x3f   :  { %18096 = sst [smem:[#allocation31_spill]] %s15751_s12 }
  0x40   :  { %18097 = sst [smem:[#allocation32_spill]] %s15756_s20 }
  0x41   :  { %18098 = sst [smem:[#allocation33_spill]] %s15761_s27 }
  0x42   :  { %18099 = sst [smem:[#allocation34_spill]] %s15766_s4 }
  0x43   :  { %s15771_s12 = sld [smem:[%s18014_s0 + %s15594_s7]]   ;;  %s15598_s7 = smov 34  }
  0x44   :  { %s15776_s20 = sld [smem:[%s18014_s0 + %s15595_s15]]   ;;  %s15599_s15 = smov 35  }
  0x45   :  { %s15781_s27 = sld [smem:[%s18014_s0 + %s15596_s22]]   ;;  %s15600_s22 = smov 36  }
  0x46   :  { %s15786_s4 = sld [smem:[%s18014_s0 + %s15597_s28]]   ;;  %s15601_s28 = smov 37  }
  0x49   :  { %18100 = sst [smem:[#allocation35_spill]] %s15771_s12 }
  0x4a   :  { %18101 = sst [smem:[#allocation36_spill]] %s15776_s20 }
  0x4b   :  { %18102 = sst [smem:[#allocation37_spill]] %s15781_s27 }
  0x4c   :  { %18103 = sst [smem:[#allocation38_spill]] %s15786_s4 }
  0x4d   :  { %s15791_s12 = sld [smem:[%s18014_s0 + %s15598_s7]]   ;;  %s15602_s7 = smov 38  }
  0x4e   :  { %s15796_s20 = sld [smem:[%s18014_s0 + %s15599_s15]]   ;;  %s15603_s15 = smov 39  }
  0x4f   :  { %s15801_s27 = sld [smem:[%s18014_s0 + %s15600_s22]]  }
  0x50   :  { %s15806_s4 = sld [smem:[%s18014_s0 + %s15601_s28]]  }
  0x53   :  { %18104 = sst [smem:[#allocation39_spill]] %s15791_s12 }
  0x54   :  { %18105 = sst [smem:[#allocation40_spill]] %s15796_s20 }
  0x55   :  { %s15811_s12 = sld [smem:[%s18014_s0 + %s15602_s7]]  }
  0x56   :  { %18106 = sst [smem:[#allocation41_spill]] %s15806_s4 }
  0x57   :  { %s15816_s20 = sld [smem:[%s18014_s0 + %s15603_s15]]  }
  0x5b   :  { %18107 = sst [smem:[#allocation42_spill]] %s15811_s12 }
  0x5d   :  { %18108 = sst [smem:[#allocation43_spill]] %s15816_s20 }
  0x5e   :  { %84 = vsyncpa [#allocation3], 0 }
  0x5f   :  { %86 = vsyncpa [#allocation3 + $0x1], 0  ;;  %s15818_s22 = smov 0   ;;  %s15820_s23 = smov 0  }
  0x60   :  { %s15822_s26 = smov 0   ;;  %s15824_s28 = smov 0  }
  0x61 LB: > { %s18109_s6 = sld [smem:[#allocation18_spill]]  ;;  %s18110_s4 = sld [smem:[#allocation41_spill]]  ;;  %s15555_s23 = sphi %s15820_s23, %s18176_s23   ;;  %s15551_s22 = sphi %s15818_s22, %s18175_s22   ;;  %s15563_s28 = sphi %s15824_s28, %s18172_s28   ;;  %s15559_s26 = sphi %s15822_s26, %s18174_s26  }
  0x62   : > { %s18111_s30 = sld [smem:[#allocation17_spill]]  ;;  %s18112_s29 = sld [smem:[#allocation11_spill]] }
  0x63   : > { %s18113_s25 = sld [smem:[#allocation10_spill]]  ;;  %s18114_s24 = sld [smem:[#allocation16_spill]] }
  0x64   : > { %s18115_s21 = sld [smem:[#allocation9_spill]]  ;;  %s18116_s19 = sld [smem:[#allocation15_spill]] }
  0x65   : > { %s18117_s17 = sld [smem:[#allocation8_spill]]  ;;  %s18118_s14 = sld [smem:[#allocation14_spill]] }
  0x66   : > { %s18119_s13 = sld [smem:[#allocation7_spill]]  ;;  %s18120_s9 = sld [smem:[#allocation6_spill]] }
  0x67   : > { %s18121_s8 = sld [smem:[#allocation13_spill]]  ;;  %s18122_s3 = sld [smem:[#allocation12_spill]] }
  0x68   : > { %18123 = sst [smem:[#allocation44_spill]] %s15551_s22  ;;  %s15839_s0 = sadd.s32 4294967295, %s15563_s28  }
  0x69   : > { %18124 = sst [smem:[#allocation45_spill]] %s15559_s26  ;;  %s11590_s1 = sadd.s32 4294967294, %s15563_s28  }
  0x6a   : > { %18125 = sst [smem:[#allocation46_spill]] %s15839_s0  ;;  %s15843_s2 = sadd.s32 1, %s15563_s28  }
  0x6b   : > { %18126 = sst [smem:[#allocation47_spill]] %s15843_s2  ;;  %s923_s7 = sadd.s32 1, %s15559_s26 }
  0x6c   : > { %s920_s10 = ssub.s32 %s15563_s28, %s15843_s2  ;;  %p933_p0 = scmp.ne.s32.totalorder %s15559_s26, %s15555_s23 }
  0x6d   : > { %p921_p1 = scmp.eq.s32.totalorder %s920_s10, 0  ;;  %p934_p2 = scmp.eq.s32.totalorder %s15839_s0, 1 }
  0x6e   : > { %p939_p3 = scmp.ne.s32.totalorder %s15555_s23, %s15551_s22  ;;  %p940_p4 = scmp.eq.s32.totalorder %s11590_s1, 1 }
  0x6f   : > { %s15854_s11 = scalar_select %p921_p1, %s15559_s26, %s923_s7  }
  0x70   : > { %p15856_p5 = por %p934_p2, %p933_p0  ;;  %p15860_p6 = por %p940_p4, %p939_p3 }
  0x71   : > { %18127 = sst [smem:[#allocation48_spill]] %s15854_s11  ;;  %p11593_p7 = scmp.ge.s32.totalorder %s15563_s28, 1 }
  0x72   : > { %s18128_s15 = scalar_select %p15856_p5, 1, 0 }
  0x73   : > { %s18130_s16 = scalar_select %p15860_p6, 1, 0 }
  0x74   : > { %18129 = sst [smem:[#allocation49_spill]] %s18128_s15  ;;  %p1079_p8 = scmp.lt.s32.totalorder %s15563_s28, 3 }
  0x75   : > { %18131 = sst [smem:[#allocation50_spill]] %s18130_s16 }
  0x76   : > { %p1080_p9 = pnand %p11593_p7, %p1079_p8 }
  0x77   : > { %v1178_v0 = vld [vmem:[%s18120_s9] sm:$0xff] (!%p1080_p9)  ;;  %v1179_v1 = vld [vmem:[%s18120_s9 + $0x8] sm:$0xff] (!%p1080_p9)  ;;  %v1180_v2 = vld [vmem:[%s18120_s9 + $0x10] sm:$0xff] (!%p1080_p9)  ;;  %s18132_s5 = sld [smem:[#allocation5_spill]] (!%p1080_p9)  ;;  %v15604_v3 = vmov (!%p1080_p9), 0.0|0.0   ;;  %vm15605_vm0 = vmmov (!%p1080_p9), 0  }
  0x78   : > { %1083 = sbr.rel (%p1080_p9) target bundleno = 13697 (0x3581), region = 176  ;;  %13972 = vmatprep.subr.bf16.mxu0 (!%p1080_p9), %v15604_v3  ;;  %v13973_v4 = vpack.c.bf16 (!%p1080_p9), %v1179_v1, %v1178_v0  ;;  %v1181_v5 = vld [vmem:[%s18120_s9 + $0x18] sm:$0xff] (!%p1080_p9)  ;;  %v15606_v6 = vmov (!%p1080_p9), 0.0   ;;  %p1173_p10 = scmp.lt.s32.totalorder (!%p1080_p9), %s15839_s0, 1  ;;  %vm1189_vm1 = vcmask (!%p1080_p9), 261120   ;;  %vm1271_vm2 = vcmask (!%p1080_p9), 130048  }
  0x79   : > { %13677 = vmatprep.mubr.msk.f32.mxu0 (!%p1080_p9), %vm15605_vm0, %v15606_v6  ;;  %13680 = vmatprep.subr.mxu1 (!%p1080_p9), %v15606_v6  ;;  %v13976_v7 = vpack.c.bf16 (!%p1080_p9), %v1181_v5, %v1180_v2  ;;  %v11595_v9 = vld [vmem:[%s18119_s13] ss:$0 sm:$0xff] (!%p1080_p9)  ;;  %s18034_s10 = smov (!%p1080_p9), 64   ;;  %vm1347_vm3 = vcmask (!%p1080_p9), 64512   ;;  %v1265_v40 = vld [vmem:[%s18117_s17 + $0x10] sm:$0xff] (!%p1080_p9)  ;;  %v1266_v41 = vld [vmem:[%s18117_s17 + $0x18] sm:$0xff] (!%p1080_p9) }
  0x7a   : > { %13682 = vmatprep.mubr.msk.f32.mxu1 (!%p1080_p9), %vm15605_vm0, %v15606_v6  ;;  %13974 = vmatpush3.bf16.msra.mxu0 (!%p1080_p9), %v13973_v4  ;;  %v13979_v42 = vpack.c.bf16 (!%p1080_p9), %v1266_v41, %v1265_v40  ;;  %v1263_v45 = vld [vmem:[%s18117_s17] sm:$0xff] (!%p1080_p9)  ;;  %v1264_v46 = vld [vmem:[%s18117_s17 + $0x8] sm:$0xff] (!%p1080_p9)  ;;  %v1788_v5 = vld [vmem:[%s18113_s25 + $0x18] sm:$0xff] (!%p1080_p9)  ;;  %s18152_s11 = sld [smem:[#allocation34_spill]] (!%p1080_p9)  ;;  %s18153_s26 = sld [smem:[#allocation35_spill]] (!%p1080_p9)  ;;  %vm11481_vm4 = vcmask (!%p1080_p9), 122880  }
  0x7b   : > { %13975 = vmatprep.subr.bf16.mxu0 (!%p1080_p9), %v15604_v3  ;;  %v13982_v48 = vpack.c.bf16 (!%p1080_p9), %v1264_v46, %v1263_v45  ;;  %v11605_v54 = vld [vmem:[%s18115_s21] ss:$0 sm:$0xff] (!%p1080_p9)  ;;  %v1786_v2 = vld [vmem:[%s18113_s25 + $0x8] sm:$0xff] (!%p1080_p9)  ;;  %s18163_s22 = sld [smem:[#allocation37_spill]] (!%p1080_p9) }
  0x7c   : > { %v1802_v4 = vld [vmem:[%s18113_s25 + $0x88] sm:$0xff] (!%p1080_p9)  ;;  %v1789_v40 = vld [vmem:[%s18113_s25 + $0x20] sm:$0xff] (!%p1080_p9) }
  0x7d   : > { %v1805_v41 = vld [vmem:[%s18113_s25 + $0xa0] sm:$0xff] (!%p1080_p9)  ;;  %v1822_v45 = vld [vmem:[%s18113_s25 + $0x128] sm:$0xff] (!%p1080_p9) }
  0x7e   : > { %13977 = vmatpush3.bf16.msra.mxu0 (!%p1080_p9), %v13976_v7  ;;  %v13984_v7 = vpack.c.bf16 (!%p1080_p9), %v1802_v4, %v1786_v2  ;;  %v1838_v46 = vld [vmem:[%s18113_s25 + $0x1a8] sm:$0xff] (!%p1080_p9)  ;;  %v1809_v2 = vld [vmem:[%s18113_s25 + $0xc0] sm:$0xff] (!%p1080_p9) }
  0x7f   : > { %s1174_s18 = scalar_select %p1173_p10, %s15839_s0, 1  ;;  %13978 = vmatprep.subr.bf16.mxu0 %v15604_v3 }
  0x80   : > { %s18154_s2 = smov %s18153_s26 }
  0x81   : > { %s11594_s1 = sshll.u32 %s1174_s18, 3  ;;  %s18040_s18 = smov 96  }
  0x82   : > { %s15880_s7 = scalar_lea.vmem %s18132_s5, %s11594_s1  ;;  %s18042_s1 = smov 80  }
  0x83   : > { %v15883_v8 = vld [vmem:[%s15880_s7] sm:$0xff]  ;;  %s18138_s5 = smov 96   ;;  %s18164_s12 = smov %s18163_s22 }
  0x84   : > { %13678 = vmatmul.mubr.msk.f32.vlgmr.msra.gmra.mrb[0].mxu0 %vm1189_vm1, %v15883_v8 }
  0x85   : > { %13704 = vmatprep.mubr.msk.f32.mxu0 %vm15605_vm0, %v15606_v6  ;;  %13980 = vmatpush3.bf16.msra.mxu0 %v13979_v42 }
  0x86   : > { %13985 = vmatprep.subr.bf16.mxu0 %v13984_v7  ;;  %v1795_v7 = vld [vmem:[%s18113_s25 + $0x50] sm:$0xff] }
 0x157   : > { %v1259_v10 = vpop.f32.mrb[0].mxu0 }
 0x158   : > { %v1260_v11 = vadd.f32 %v11595_v9, %v1259_v10  ;;  %v13679_v12 = vpop.f32.mrb[1].mxu0  ;;  %v1785_v9 = vld [vmem:[%s18113_s25] sm:$0xff] }
 0x159   : > { %v1801_v10 = vld [vmem:[%s18113_s25 + $0x80] sm:$0xff] }
 0x15a   : > { %1359 = vrot.lane.b32.xlu1 %v1260_v11, %s18034_s10  ;;  %1269 = vrot.lane.b32.xlu0 %v1260_v11, %s18040_s18  ;;  %s18036_s10 = smov 112   ;;  %v13986_v12 = vpack.c.bf16 %v1801_v10, %v1785_v9  ;;  %v1826_v9 = vld [vmem:[%s18113_s25 + $0x148] sm:$0xff] }
 0x15b   : > { %v1842_v10 = vld [vmem:[%s18113_s25 + $0x1c8] sm:$0xff] }
 0x15e   : > { %1437 = vrot.lane.b32.xlu1 %v1260_v11, %s18042_s1 }
 0x1cc   : > { %v1270_v13 = vpop.permute.xlu0 %1269  ;;  %v1360_v14 = vpop.permute.xlu1 %1359 }
 0x1cd   : > { %13681 = vmatpush3.xpose.msk.msra.mxu1 %vm1271_vm2, %v1270_v13  ;;  %v1787_v13 = vld [vmem:[%s18113_s25 + $0x10] sm:$0xff] }
 0x1ce   : > { %13685 = vmatprep.subr.mxu1 %v15606_v6 }
 0x1d0   : > { %13683 = vmatmul.mubr.msk.f32.vlgmr.msra.gmra.mrb[0].mxu1 %vm1271_vm2, %v1260_v11  ;;  %v1438_v24 = vpop.permute.xlu1 %1437 }
 0x1d1   : > { %13686 = vmatpush3.msra.mxu1 %v1360_v14  ;;  %13687 = vmatprep.mubr.msk.f32.mxu1 %vm15605_vm0, %v15606_v6  ;;  %v1803_v14 = vld [vmem:[%s18113_s25 + $0x90] sm:$0xff] }
 0x1d2   : > { %13690 = vmatprep.subr.mxu1 %v15606_v6 }
 0x2a3   : > { %v1342_v15 = vpop.f32.mrb[0].mxu1 }
 0x2a4   : > { %v1346_v16 = vmul.f32 0.25, %v1342_v15  ;;  %v13684_v17 = vpop.f32.mrb[1].mxu1  ;;  %v13994_v15 = vpack.c.bf16 %v1803_v14, %v1787_v13 }
 0x2a5   : > { %v1834_v17 = vld [vmem:[%s18113_s25 + $0x188] sm:$0xff] }
 0x2a6   : > { %v1348_v18 = vsel %vm1347_vm3, %v1346_v16, -inf }
 0x2a7   : > { %1349 = vmax.xlane.f32.xlu0 %v1348_v18  ;;  %v1820_v18 = vld [vmem:[%s18113_s25 + $0x118] sm:$0xff] }
 0x334   : > { %v1350_v19 = vpop.xlane.xlu0 %1349 }
 0x335   : > { %v1351_v20 = vsub.f32 %v1346_v16, %v1350_v19  ;;  %v1818_v16 = vld [vmem:[%s18113_s25 + $0x108] sm:$0xff] }
 0x336   : > { %v13988_v19 = vpack.c.bf16 %v1834_v17, %v1818_v16  ;;  %v1841_v16 = vld [vmem:[%s18113_s25 + $0x1c0] sm:$0xff]  ;;  %v14020_v17 = vpack.c.bf16 %v1842_v10, %v1826_v9  ;;  %v2541_v9 = vld [vmem:[%s18122_s3 + $0xa8] sm:$0xff] }
 0x337   : > { %v1352_v21 = vmul.f32 1.442695, %v1351_v20  ;;  %v1836_v20 = vld [vmem:[%s18113_s25 + $0x198] sm:$0xff]  ;;  %v2572_v10 = vld [vmem:[%s18122_s3 + $0x1a0] sm:$0xff] }
 0x339   : > { %15428 = vpow2.f32 %v1352_v21  ;;  %v1817_v21 = vld [vmem:[%s18113_s25 + $0x100] sm:$0xff] }
 0x343   : > { %v15429_v22 = vpop.eup %15428 }
 0x344   : > { %v1354_v23 = vsel %vm1347_vm3, %v15429_v22, 0.0 }
 0x345   : > { %1355 = vadd.xlane.f32.xlu1 %v1354_v23  ;;  %v13996_v23 = vpack.c.bf16 %v1836_v20, %v1820_v18  ;;  %v1843_v20 = vld [vmem:[%s18113_s25 + $0x1d0] sm:$0xff] }
 0x356   : > { %1435 = vrot.lane.b32.xlu1 %v1260_v11, %s18036_s10  ;;  %s18038_s10 = smov 48  }
 0x3d2   : > { %v1356_v25 = vpop.xlane.xlu1 %1355 }
 0x3d3   : > { %15430 = vrcp.f32 %v1356_v25  ;;  %v1819_v25 = vld [vmem:[%s18113_s25 + $0x110] sm:$0xff] }
 0x3d6   : > { %v1436_v28 = vpop.permute.xlu1 %1435 }
 0x3dd   : > { %v15431_v26 = vpop.eup %15430 }
 0x3de   : > { %v1358_v27 = vmul.f32 %v15431_v26, %v15429_v22  ;;  %v1833_v22 = vld [vmem:[%s18113_s25 + $0x180] sm:$0xff]  ;;  %v1835_v26 = vld [vmem:[%s18113_s25 + $0x190] sm:$0xff] }
 0x3e0   : > { %13688 = vmatmul.mubr.msk.f32.vlgmr.msra.gmra.mrb[2].mxu1 %vm1347_vm3, %v1358_v27  ;;  %v13998_v27 = vpack.c.bf16 %v1835_v26, %v1819_v25 }
 0x3e1   : > { %13691 = vmatpush3.xpose.msk.msra.mxu1 %vm1271_vm2, %v1438_v24  ;;  %13692 = vmatprep.mubr.msk.f32.mxu1 %vm15605_vm0, %v15606_v6  ;;  %v13990_v24 = vpack.c.bf16 %v1833_v22, %v1817_v21  ;;  %v1798_v21 = vld [vmem:[%s18113_s25 + $0x68] sm:$0xff] }
 0x3e2   : > { %13695 = vmatprep.subr.mxu1 %v15606_v6  ;;  %v1814_v22 = vld [vmem:[%s18113_s25 + $0xe8] sm:$0xff] }
 0x3e4   : > { %13693 = vmatmul.mubr.msk.f32.vlgmr.msra.gmra.mrb[4].mxu1 %vm1271_vm2, %v1436_v28  ;;  %v1790_v28 = vld [vmem:[%s18113_s25 + $0x28] sm:$0xff] }
 0x3e5   : > { %13697 = vmatprep.mubr.msk.f32.mxu1 %vm15605_vm0, %v15606_v6 }
 0x4b3   : > { %v1431_v29 = vpop.f32.mrb[2].mxu1 }
 0x4b4   : > { %v13689_v30 = vpop.f32.mrb[3].mxu1 }
 0x4b5   : > { %v1792_v30 = vld [vmem:[%s18113_s25 + $0x38] sm:$0xff] }
 0x4b7   : > { %v1509_v31 = vpop.f32.mrb[4].mxu1 }
 0x4b8   : > { %v1513_v32 = vmul.f32 0.25, %v1509_v31  ;;  %v13694_v33 = vpop.f32.mrb[5].mxu1 }
 0x4ba   : > { %v1514_v34 = vsel %vm1347_vm3, %v1513_v32, -inf }
 0x4bb   : > { %1515 = vmax.xlane.f32.xlu1 %v1514_v34 }
 0x548   : > { %v1516_v35 = vpop.xlane.xlu1 %1515 }
 0x549   : > { %v1517_v36 = vsub.f32 %v1513_v32, %v1516_v35  ;;  %v1808_v32 = vld [vmem:[%s18113_s25 + $0xb8] sm:$0xff] }
 0x54a   : > { %v14008_v33 = vpack.c.bf16 %v1808_v32, %v1792_v30  ;;  %v1815_v32 = vld [vmem:[%s18113_s25 + $0xf0] sm:$0xff] }
 0x54b   : > { %v1518_v37 = vmul.f32 1.442695, %v1517_v36 }
 0x54d   : > { %15432 = vpow2.f32 %v1518_v37  ;;  %v11606_v37 = vld [vmem:[%s18118_s14] ss:$0 sm:$0xff] }
 0x557   : > { %v15433_v38 = vpop.eup %15432 }
 0x558   : > { %v1520_v39 = vsel %vm1347_vm3, %v15433_v38, 0.0 }
 0x559   : > { %1521 = vadd.xlane.f32.xlu0 %v1520_v39  ;;  %v11607_v39 = vld [vmem:[%s18116_s19] ss:$0 sm:$0xff] }
 0x56f   : > { %1525 = vrot.lane.b32.xlu0 %v1260_v11, %s18038_s10  ;;  %s18133_s10 = smov 112  }
 0x5e6   : > { %v1522_v43 = vpop.xlane.xlu0 %1521 }
 0x5e7   : > { %15434 = vrcp.f32 %v1522_v43  ;;  %v1791_v43 = vld [vmem:[%s18113_s25 + $0x30] sm:$0xff] }
 0x5ea   : > { %v1526_v44 = vpop.permute.xlu0 %1525 }
 0x5eb   : > { %13696 = vmatpush3.msra.mxu1 %v1526_v44  ;;  %v1807_v44 = vld [vmem:[%s18113_s25 + $0xb0] sm:$0xff] }
 0x5ec   : > { %13981 = vmatprep.subr.bf16.mxu1 %v15604_v3 }
 0x5f1   : > { %v15435_v47 = vpop.eup %15434 }
 0x5f2   : > { %v1524_v49 = vmul.f32 %v15435_v47, %v15433_v38  ;;  %v1824_v47 = vld [vmem:[%s18113_s25 + $0x138] sm:$0xff] }
 0x5f4   : > { %13698 = vmatmul.mubr.msk.f32.vlgmr.msra.gmra.mrb[6].mxu1 %vm1347_vm3, %v1524_v49 }
 0x5f5   : > { %13983 = vmatpush3.bf16.msra.mxu1 %v13982_v48  ;;  %13711 = vmatprep.mubr.msk.f32.mxu1 %vm15605_vm0, %v15606_v6  ;;  %v1840_v48 = vld [vmem:[%s18113_s25 + $0x1b8] sm:$0xff] }
 0x5f8   : > { %13712 = vmatmul.mubr.msk.f32.vlgmr.msra.gmra.mrb[8].mxu1 %vm1271_vm2, %v1431_v29  ;;  %v1806_v29 = vld [vmem:[%s18113_s25 + $0xa8] sm:$0xff] }
 0x5f9   : > { %2071 = vmatprep.mubr.f32.mxu1 %v15606_v6  ;;  %v14000_v31 = vpack.c.bf16 %v1806_v29, %v1790_v28  ;;  %v1813_v28 = vld [vmem:[%s18113_s25 + $0xe0] sm:$0xff]  ;;  %v14032_v29 = vpack.c.bf16 %v1814_v22, %v1798_v21  ;;  %v2543_v21 = vld [vmem:[%s18122_s3 + $0xb8] sm:$0xff]  ;;  %v2574_v22 = vld [vmem:[%s18122_s3 + $0x1b0] sm:$0xff] }
 0x6c7   : > { %v1597_v50 = vpop.f32.mrb[6].mxu1 }
 0x6c8   : > { %v13699_v51 = vpop.f32.mrb[7].mxu1  ;;  %13705 = vmatmul.mubr.msk.f32.vlgmr.msra.gmra.mrb[2].mxu0 %vm1271_vm2, %v1597_v50  ;;  %v14002_v50 = vpack.c.bf16 %v1805_v41, %v1789_v40  ;;  %v1845_v40 = vld [vmem:[%s18113_s25 + $0x1e0] sm:$0xff] }
 0x6c9   : > { %2000 = vmatprep.mubr.f32.mxu0 %v15606_v6  ;;  %13987 = vmatpush1.bf16.msra.mxu0 %v13986_v12  ;;  %v14010_v51 = vpack.c.bf16 %v1807_v44, %v1791_v43  ;;  %v1844_v12 = vld [vmem:[%s18113_s25 + $0x1d8] sm:$0xff]  ;;  %v1831_v43 = vld [vmem:[%s18113_s25 + $0x170] sm:$0xff] }
 0x6ca   : > { %13989 = vmatprep.subr.bf16.mxu0 %v13988_v19  ;;  %v1827_v19 = vld [vmem:[%s18113_s25 + $0x150] sm:$0xff] }
 0x6cb   : > { %v1743_v52 = vpop.f32.mrb[8].mxu1  ;;  %v14030_v26 = vpack.c.bf16 %v1843_v20, %v1827_v19  ;;  %v1847_v44 = vld [vmem:[%s18113_s25 + $0x1f0] sm:$0xff]  ;;  %v2557_v19 = vld [vmem:[%s18122_s3 + $0x128] sm:$0xff] }
 0x6cc   : > { %v13713_v53 = vpop.f32.mrb[9].mxu1  ;;  %v2542_v20 = vld [vmem:[%s18122_s3 + $0xb0] sm:$0xff] }
 0x6cd   : > { %13991 = vmatpush1.bf16.msra.mxu0 %v13990_v24  ;;  %v1837_v53 = vld [vmem:[%s18113_s25 + $0x1a0] sm:$0xff]  ;;  %v1816_v24 = vld [vmem:[%s18113_s25 + $0xf8] sm:$0xff] }
 0x6ce   : > { %14001 = vmatprep.subr.bf16.mxu0 %v14000_v31  ;;  %v1799_v31 = vld [vmem:[%s18113_s25 + $0x70] sm:$0xff] }
 0x79b   : > { %v1670_v55 = vpop.f32.mrb[2].mxu0 }
 0x79c   : > { %v1744_v56 = vadd.f32 %v1743_v52, %v1670_v55  ;;  %v13706_v57 = vpop.f32.mrb[3].mxu0  ;;  %v1821_v52 = vld [vmem:[%s18113_s25 + $0x120] sm:$0xff]  ;;  %v14004_v55 = vpack.c.bf16 %v1838_v46, %v1822_v45  ;;  %v2537_v46 = vld [vmem:[%s18122_s3 + $0x88] sm:$0xff] }
 0x79d   : > { %v1823_v57 = vld [vmem:[%s18113_s25 + $0x130] sm:$0xff]  ;;  %v2536_v45 = vld [vmem:[%s18122_s3 + $0x80] sm:$0xff] }
 0x79e   : > { %v1753_v58 = vadd.f32 %v11605_v54, %v1744_v56  ;;  %v14012_v56 = vpack.c.bf16 %v1840_v48, %v1824_v47  ;;  %v2568_v47 = vld [vmem:[%s18122_s3 + $0x180] sm:$0xff]  ;;  %v2569_v48 = vld [vmem:[%s18122_s3 + $0x188] sm:$0xff] }
 0x7a0   : > { %v1754_v59 = vadd.f32 %v1753_v58, %v15883_v8  ;;  %v1804_v8 = vld [vmem:[%s18113_s25 + $0x98] sm:$0xff]  ;;  %v1839_v58 = vld [vmem:[%s18113_s25 + $0x1b0] sm:$0xff] }
 0x7a1   : > { %v13992_v11 = vpack.c.bf16 %v1804_v8, %v1788_v5  ;;  %v1811_v8 = vld [vmem:[%s18113_s25 + $0xd0] sm:$0xff] }
 0x7a2   : > { %v1757_v60 = vsel %vm1189_vm1, %v1754_v59, 0.0  ;;  %v14026_v14 = vpack.c.bf16 %v1811_v8, %v1795_v7  ;;  %v2555_v7 = vld [vmem:[%s18122_s3 + $0x118] sm:$0xff]  ;;  %v2540_v8 = vld [vmem:[%s18122_s3 + $0xa0] sm:$0xff] }
 0x7a3   : > { %1758 = vadd.xlane.f32.xlu0 %v1757_v60  ;;  %13993 = vmatprep.subr.bf16.mxu1 %v13992_v11  ;;  %v1810_v60 = vld [vmem:[%s18113_s25 + $0xc8] sm:$0xff]  ;;  %v1828_v11 = vld [vmem:[%s18113_s25 + $0x158] sm:$0xff] }
 0x7a4   : > { %13995 = vmatpush1.bf16.msra.mxu1 %v13994_v15  ;;  %v1825_v15 = vld [vmem:[%s18113_s25 + $0x140] sm:$0xff]  ;;  %v14028_v18 = vpack.c.bf16 %v1844_v12, %v1828_v11  ;;  %v2573_v11 = vld [vmem:[%s18122_s3 + $0x1a8] sm:$0xff] }
 0x7a5   : > { %13997 = vmatprep.subr.bf16.mxu1 %v13996_v23  ;;  %v1800_v23 = vld [vmem:[%s18113_s25 + $0x78] sm:$0xff]  ;;  %v14022_v25 = vpack.c.bf16 %v1841_v16, %v1825_v15  ;;  %v2525_v15 = vld [vmem:[%s18122_s3 + $0x28] sm:$0xff]  ;;  %v14056_v16 = vpack.c.bf16 %v2541_v9, %v2540_v8  ;;  %v2550_v9 = vld [vmem:[%s18122_s3 + $0xf0] sm:$0xff] }
 0x7a6   : > { %v14040_v30 = vpack.c.bf16 %v1816_v24, %v1800_v23  ;;  %v2575_v23 = vld [vmem:[%s18122_s3 + $0x1b8] sm:$0xff] }
 0x7a8   : > { %13999 = vmatpush1.bf16.msra.mxu1 %v13998_v27  ;;  %v1797_v27 = vld [vmem:[%s18113_s25 + $0x60] sm:$0xff] }
 0x7a9   : > { %14009 = vmatprep.subr.bf16.mxu1 %v14008_v33  ;;  %v1830_v33 = vld [vmem:[%s18113_s25 + $0x168] sm:$0xff] }
 0x830   : > { %v1759_v61 = vpop.xlane.xlu0 %1758 }
 0x831   : > { %v1761_v62 = vmul.f32 0.03125, %v1759_v61  ;;  %v1796_v61 = vld [vmem:[%s18113_s25 + $0x58] sm:$0xff] }
 0x833   : > { %v1762_v63 = vsub.f32 %v1754_v59, %v1761_v62  ;;  %v1794_v59 = vld [vmem:[%s18113_s25 + $0x48] sm:$0xff]  ;;  %v1812_v62 = vld [vmem:[%s18113_s25 + $0xd8] sm:$0xff] }
 0x834   : > { %v14016_v4 = vpack.c.bf16 %v1810_v60, %v1794_v59  ;;  %v14024_v5 = vpack.c.bf16 %v1812_v62, %v1796_v61  ;;  %v2539_v59 = vld [vmem:[%s18122_s3 + $0x98] sm:$0xff]  ;;  %v2570_v60 = vld [vmem:[%s18122_s3 + $0x190] sm:$0xff] }
 0x835   : > { %v1763_v0 = vmul.f32 %v1762_v63, %v1762_v63  ;;  %v2571_v61 = vld [vmem:[%s18122_s3 + $0x198] sm:$0xff] }
 0x837   : > { %v1764_v1 = vsel %vm1189_vm1, %v1763_v0, 0.0  ;;  %v14014_v0 = vpack.c.bf16 %v1839_v58, %v1823_v57  ;;  %v2553_v57 = vld [vmem:[%s18122_s3 + $0x108] sm:$0xff]  ;;  %v2538_v58 = vld [vmem:[%s18122_s3 + $0x90] sm:$0xff] }
 0x838   : > { %1765 = vadd.xlane.f32.xlu1 %v1764_v1  ;;  %v1793_v1 = vld [vmem:[%s18113_s25 + $0x40] sm:$0xff] }
 0x839   : > { %v14018_v13 = vpack.c.bf16 %v1809_v2, %v1793_v1  ;;  %v2523_v1 = vld [vmem:[%s18122_s3 + $0x18] sm:$0xff]  ;;  %v14052_v2 = vpack.c.bf16 %v2539_v59, %v2538_v58  ;;  %v2549_v58 = vld [vmem:[%s18122_s3 + $0xe8] sm:$0xff]  ;;  %v2580_v59 = vld [vmem:[%s18122_s3 + $0x1e0] sm:$0xff] }
 0x8c5   : > { %v1766_v34 = vpop.xlane.xlu1 %1765 }
 0x8c6   : > { %v1767_v35 = vmul.f32 0.03125, %v1766_v34  ;;  %v1846_v34 = vld [vmem:[%s18113_s25 + $0x1e8] sm:$0xff] }
 0x8c7   : > { %v14036_v41 = vpack.c.bf16 %v1846_v34, %v1830_v33  ;;  %v2545_v33 = vld [vmem:[%s18122_s3 + $0xc8] sm:$0xff]  ;;  %v2576_v34 = vld [vmem:[%s18122_s3 + $0x1c0] sm:$0xff] }
 0x8c8   : > { %v1768_v36 = vadd.f32 1e-05, %v1767_v35  ;;  %v1832_v35 = vld [vmem:[%s18113_s25 + $0x178] sm:$0xff] }
 0x8ca   : > { %15436 = vrsqrt.f32 %v1768_v36  ;;  %v1848_v36 = vld [vmem:[%s18113_s25 + $0x1f8] sm:$0xff] }
 0x8d4   : > { %v15437_v38 = vpop.eup %15436 }
 0x8d5   : > { %v1770_v42 = vmul.f32 %v15437_v38, %v1762_v63  ;;  %v14006_v63 = vpack.c.bf16 %v1837_v53, %v1821_v52  ;;  %v14042_v38 = vpack.c.bf16 %v1815_v32, %v1799_v31  ;;  %v2521_v52 = vld [vmem:[%s18122_s3 + $0x8] sm:$0xff]  ;;  %v14048_v53 = vpack.c.bf16 %v2537_v46, %v2536_v45  ;;  %v2559_v31 = vld [vmem:[%s18122_s3 + $0x138] sm:$0xff]  ;;  %v2544_v32 = vld [vmem:[%s18122_s3 + $0xc0] sm:$0xff] }
 0x8d6   : > { %v2547_v45 = vld [vmem:[%s18122_s3 + $0xd8] sm:$0xff]  ;;  %v2578_v46 = vld [vmem:[%s18122_s3 + $0x1d0] sm:$0xff] }
 0x8d7   : > { %v1777_v49 = vmul.f32 %v11606_v37, %v1770_v42  ;;  %v14034_v37 = vpack.c.bf16 %v1813_v28, %v1797_v27  ;;  %v14044_v42 = vpack.c.bf16 %v1848_v36, %v1832_v35  ;;  %v2527_v27 = vld [vmem:[%s18122_s3 + $0x38] sm:$0xff]  ;;  %v14060_v28 = vpack.c.bf16 %v2543_v21, %v2542_v20  ;;  %v2577_v35 = vld [vmem:[%s18122_s3 + $0x1c8] sm:$0xff]  ;;  %v2600_v21 = vld [vmem:[%s18122_s3 + $0x280] sm:$0xff] }
 0x8d9   : > { %v15962_v54 = vadd.f32 %v11607_v39, %v1777_v49  ;;  %v1829_v39 = vld [vmem:[%s18113_s25 + $0x160] sm:$0xff] }
 0x8da   : > { %v14038_v49 = vpack.c.bf16 %v1845_v40, %v1829_v39  ;;  %v2529_v39 = vld [vmem:[%s18122_s3 + $0x48] sm:$0xff]  ;;  %v14064_v40 = vpack.c.bf16 %v2545_v33, %v2544_v32 }
 0x8db   : > { %11608 = vmatmul.mubr.msk.f32.vlgmr.msra.gmra.mrb[4].mxu0 %vm1189_vm1, %v15962_v54  ;;  %11609 = vmatmul.mubr.msk.f32.vlgmr.msra.gmra.mrb[10].mxu1 %vm1189_vm1, %v15962_v54 }
 0x8dc   : > { %14003 = vmatpush1.bf16.msra.mxu0 %v14002_v50  ;;  %14011 = vmatpush1.bf16.msra.mxu1 %v14010_v51  ;;  %v14046_v50 = vpack.c.bf16 %v1847_v44, %v1831_v43  ;;  %v2520_v51 = vld [vmem:[%s18122_s3] sm:$0xff]  ;;  %v2561_v43 = vld [vmem:[%s18122_s3 + $0x148] sm:$0xff]  ;;  %v2546_v44 = vld [vmem:[%s18122_s3 + $0xd0] sm:$0xff] }
 0x8dd   : > { %14005 = vmatprep.subr.bf16.mxu0 %v14004_v55  ;;  %14013 = vmatprep.subr.bf16.mxu1 %v14012_v56  ;;  %v14080_v55 = vpack.c.bf16 %v2569_v48, %v2568_v47  ;;  %v2552_v56 = vld [vmem:[%s18122_s3 + $0x100] sm:$0xff]  ;;  %v14050_v62 = vpack.c.bf16 %v2521_v52, %v2520_v51  ;;  %v2579_v47 = vld [vmem:[%s18122_s3 + $0x1d8] sm:$0xff]  ;;  %v14068_v52 = vpack.c.bf16 %v2547_v45, %v2546_v44 }
 0x8de   : > { %2142 = vmatprep.mubr.f32.mxu0 %v15606_v6  ;;  %2213 = vmatprep.mubr.f32.mxu1 %v15606_v6  ;;  %v2531_v51 = vld [vmem:[%s18122_s3 + $0x58] sm:$0xff] }
 0x8e0   : > { %14007 = vmatpush1.bf16.msra.mxu0 %v14006_v63  ;;  %14015 = vmatpush1.bf16.msra.mxu1 %v14014_v0  ;;  %v14082_v63 = vpack.c.bf16 %v2553_v57, %v2552_v56  ;;  %v2522_v0 = vld [vmem:[%s18122_s3 + $0x10] sm:$0xff]  ;;  %v2563_v56 = vld [vmem:[%s18122_s3 + $0x158] sm:$0xff]  ;;  %v2548_v57 = vld [vmem:[%s18122_s3 + $0xe0] sm:$0xff] }
 0x8e1   : > { %14017 = vmatprep.subr.bf16.mxu0 %v14016_v4  ;;  %14025 = vmatprep.subr.bf16.mxu1 %v14024_v5  ;;  %v14084_v4 = vpack.c.bf16 %v2571_v61, %v2570_v60  ;;  %v2554_v5 = vld [vmem:[%s18122_s3 + $0x110] sm:$0xff]  ;;  %v14054_v12 = vpack.c.bf16 %v2523_v1, %v2522_v0  ;;  %v2581_v60 = vld [vmem:[%s18122_s3 + $0x1e8] sm:$0xff]  ;;  %v14072_v0 = vpack.c.bf16 %v2549_v58, %v2548_v57 }
 0x8e2   : > { %v14104_v1 = vpack.c.bf16 %v2581_v60, %v2580_v59 }
 0x8e3   : > { %11610 = vmatmul.mubr.msk.f32.vlgmr.msra.gmra.mrb[6].mxu0 %vm1189_vm1, %v15962_v54  ;;  %11611 = vmatmul.mubr.msk.f32.vlgmr.msra.gmra.mrb[12].mxu1 %vm1189_vm1, %v15962_v54 }
 0x8e4   : > { %14019 = vmatpush1.bf16.msra.mxu0 %v14018_v13  ;;  %14027 = vmatpush1.bf16.msra.mxu1 %v14026_v14  ;;  %v14086_v13 = vpack.c.bf16 %v2555_v7, %v2554_v5  ;;  %v2524_v14 = vld [vmem:[%s18122_s3 + $0x20] sm:$0xff]  ;;  %v2565_v5 = vld [vmem:[%s18122_s3 + $0x168] sm:$0xff] }
 0x8e5   : > { %14021 = vmatprep.subr.bf16.mxu0 %v14020_v17  ;;  %14029 = vmatprep.subr.bf16.mxu1 %v14028_v18  ;;  %v14088_v17 = vpack.c.bf16 %v2573_v11, %v2572_v10  ;;  %v2556_v18 = vld [vmem:[%s18122_s3 + $0x120] sm:$0xff]  ;;  %v14058_v24 = vpack.c.bf16 %v2525_v15, %v2524_v14  ;;  %v2551_v10 = vld [vmem:[%s18122_s3 + $0xf8] sm:$0xff]  ;;  %v2582_v11 = vld [vmem:[%s18122_s3 + $0x1f0] sm:$0xff] }
 0x8e6   : > { %2284 = vmatprep.mubr.f32.mxu0 %v15606_v6  ;;  %2355 = vmatprep.mubr.f32.mxu1 %v15606_v6  ;;  %v2534_v14 = vld [vmem:[%s18122_s3 + $0x70] sm:$0xff]  ;;  %v2535_v15 = vld [vmem:[%s18122_s3 + $0x78] sm:$0xff] }
 0x8e8   : > { %14023 = vmatpush1.bf16.msra.mxu0 %v14022_v25  ;;  %14031 = vmatpush1.bf16.msra.mxu1 %v14030_v26  ;;  %v14090_v25 = vpack.c.bf16 %v2557_v19, %v2556_v18  ;;  %v2526_v26 = vld [vmem:[%s18122_s3 + $0x30] sm:$0xff]  ;;  %v2567_v19 = vld [vmem:[%s18122_s3 + $0x178] sm:$0xff] }
 0x8e9   : > { %14033 = vmatprep.subr.bf16.mxu0 %v14032_v29  ;;  %14041 = vmatprep.subr.bf16.mxu1 %v14040_v30  ;;  %v14092_v29 = vpack.c.bf16 %v2575_v23, %v2574_v22  ;;  %v2558_v30 = vld [vmem:[%s18122_s3 + $0x130] sm:$0xff]  ;;  %v14062_v36 = vpack.c.bf16 %v2527_v27, %v2526_v26  ;;  %v2601_v22 = vld [vmem:[%s18122_s3 + $0x288] sm:$0xff]  ;;  %v2632_v23 = vld [vmem:[%s18122_s3 + $0x380] sm:$0xff]  ;;  %v1853_v27 = vlaneseq }
 0x8ea   : > { %v2566_v18 = vld [vmem:[%s18122_s3 + $0x170] sm:$0xff] }
 0x8eb   : > { %11612 = vmatmul.mubr.msk.f32.vlgmr.msra.gmra.mrb[8].mxu0 %vm1189_vm1, %v15962_v54  ;;  %11613 = vmatmul.mubr.msk.f32.vlgmr.msra.gmra.mrb[14].mxu1 %vm1189_vm1, %v15962_v54  ;;  %v14110_v20 = vpack.c.bf16 %v2567_v19, %v2566_v18  ;;  %v2589_v18 = vld [vmem:[%s18122_s3 + $0x228] sm:$0xff] }
 0x8ec   : > { %14035 = vmatpush1.bf16.msra.mxu0 %v14034_v37  ;;  %14043 = vmatpush1.bf16.msra.mxu1 %v14042_v38  ;;  %v14094_v37 = vpack.c.bf16 %v2559_v31, %v2558_v30  ;;  %v2528_v38 = vld [vmem:[%s18122_s3 + $0x40] sm:$0xff] }
 0x8ed   : > { %14037 = vmatprep.subr.bf16.mxu0 %v14036_v41  ;;  %14045 = vmatprep.subr.bf16.mxu1 %v14044_v42  ;;  %v14096_v41 = vpack.c.bf16 %v2577_v35, %v2576_v34  ;;  %v2560_v42 = vld [vmem:[%s18122_s3 + $0x140] sm:$0xff]  ;;  %v14066_v48 = vpack.c.bf16 %v2529_v39, %v2528_v38 }
 0x8ee   : > { %2426 = vmatprep.mubr.f32.mxu0 %v15606_v6  ;;  %2497 = vmatprep.mubr.f32.mxu1 %v15606_v6  ;;  %v16097_v31 = vld [vmem:[%s18112_s29] sm:$0xff] }
 0x8f0   : > { %14039 = vmatpush1.bf16.msra.mxu0 %v14038_v49  ;;  %14047 = vmatpush1.bf16.msra.mxu1 %v14046_v50  ;;  %v14098_v49 = vpack.c.bf16 %v2561_v43, %v2560_v42  ;;  %v2530_v50 = vld [vmem:[%s18122_s3 + $0x50] sm:$0xff] }
 0x8f1   : > { %14049 = vmatprep.subr.bf16.mxu0 %v14048_v53  ;;  %14081 = vmatprep.subr.bf16.mxu1 %v14080_v55  ;;  %v14100_v53 = vpack.c.bf16 %v2579_v47, %v2578_v46  ;;  %v2562_v55 = vld [vmem:[%s18122_s3 + $0x150] sm:$0xff]  ;;  %v14070_v61 = vpack.c.bf16 %v2531_v51, %v2530_v50  ;;  %v2616_v46 = vld [vmem:[%s18122_s3 + $0x300] sm:$0xff]  ;;  %v2617_v47 = vld [vmem:[%s18122_s3 + $0x308] sm:$0xff] }
 0x8f2   : > { %v14146_v60 = vpack.c.bf16 %v2617_v47, %v2616_v46  ;;  %v2623_v46 = vld [vmem:[%s18122_s3 + $0x338] sm:$0xff]  ;;  %v2608_v47 = vld [vmem:[%s18122_s3 + $0x2c0] sm:$0xff] }
 0x8f3   : > { %11614 = vmatmul.mubr.msk.f32.vlgmr.msra.gmra.mrb[10].mxu0 %vm1189_vm1, %v15962_v54  ;;  %11615 = vmatmul.mubr.msk.f32.vlgmr.msra.gmra.mrb[16].mxu1 %vm1189_vm1, %v15962_v54 }
 0x8f4   : > { %14051 = vmatpush3.bf16.msra.mxu0 %v14050_v62  ;;  %14083 = vmatpush3.bf16.msra.mxu1 %v14082_v63  ;;  %v14102_v62 = vpack.c.bf16 %v2563_v56, %v2562_v55  ;;  %v2532_v63 = vld [vmem:[%s18122_s3 + $0x60] sm:$0xff]  ;;  %v2634_v55 = vld [vmem:[%s18122_s3 + $0x390] sm:$0xff]  ;;  %v2635_v56 = vld [vmem:[%s18122_s3 + $0x398] sm:$0xff] }
 0x8f5   : > { %14053 = vmatprep.subr.bf16.mxu0 %v14052_v2  ;;  %14085 = vmatprep.subr.bf16.mxu1 %v14084_v4  ;;  %v2533_v2 = vld [vmem:[%s18122_s3 + $0x68] sm:$0xff]  ;;  %v2564_v4 = vld [vmem:[%s18122_s3 + $0x160] sm:$0xff] }
 0x8f6   : > { %v14074_v7 = vpack.c.bf16 %v2533_v2, %v2532_v63  ;;  %v14106_v8 = vpack.c.bf16 %v2565_v5, %v2564_v4  ;;  %v14148_v2 = vpack.c.bf16 %v2635_v56, %v2634_v55  ;;  %v2618_v4 = vld [vmem:[%s18122_s3 + $0x310] sm:$0xff]  ;;  %v2619_v5 = vld [vmem:[%s18122_s3 + $0x318] sm:$0xff] }
 0x8f8   : > { %14055 = vmatpush3.bf16.msra.mxu0 %v14054_v12  ;;  %14087 = vmatpush3.bf16.msra.mxu1 %v14086_v13  ;;  %v14076_v12 = vpack.c.bf16 %v2551_v10, %v2550_v9  ;;  %v2583_v13 = vld [vmem:[%s18122_s3 + $0x1f8] sm:$0xff]  ;;  %v2605_v10 = vld [vmem:[%s18122_s3 + $0x2a8] sm:$0xff] }
 0x8f9   : > { %14057 = vmatprep.subr.bf16.mxu0 %v14056_v16  ;;  %14089 = vmatprep.subr.bf16.mxu1 %v14088_v17  ;;  %v14108_v16 = vpack.c.bf16 %v2583_v13, %v2582_v11  ;;  %v14078_v17 = vpack.c.bf16 %v2535_v15, %v2534_v14  ;;  %v2636_v11 = vld [vmem:[%s18122_s3 + $0x3a0] sm:$0xff] }
 0x8fc   : > { %14059 = vmatpush3.bf16.msra.mxu0 %v14058_v24  ;;  %14091 = vmatpush3.bf16.msra.mxu1 %v14090_v25  ;;  %v14112_v24 = vpack.c.bf16 %v2601_v22, %v2600_v21  ;;  %v2633_v25 = vld [vmem:[%s18122_s3 + $0x388] sm:$0xff] }
 0x8fd   : > { %14061 = vmatprep.subr.bf16.mxu0 %v14060_v28  ;;  %14093 = vmatprep.subr.bf16.mxu1 %v14092_v29  ;;  %v14144_v26 = vpack.c.bf16 %v2633_v25, %v2632_v23  ;;  %v16088_v28 = vshrl.u32 %v1853_v27, 7  ;;  %v2620_v23 = vld [vmem:[%s18122_s3 + $0x320] sm:$0xff]  ;;  %v2606_v25 = vld [vmem:[%s18122_s3 + $0x2b0] sm:$0xff] }
 0x8ff   : > { %v16091_v29 = vsub.s32 0, %v16088_v28  ;;  %v16094_v30 = vsub.s32 2, %v16088_v28  ;;  %v16100_v32 = vsub.s32 1, %v16088_v28  ;;  %v16103_v33 = vsub.s32 3, %v16088_v28 }
 0x900   : > { %14063 = vmatpush3.bf16.msra.mxu0 %v14062_v36  ;;  %14095 = vmatpush3.bf16.msra.mxu1 %v14094_v37  ;;  %v16119_v51 = vsub.s32 5, %v16088_v28 }
 0x901   : > { %14065 = vmatprep.subr.bf16.mxu0 %v14064_v40  ;;  %14097 = vmatprep.subr.bf16.mxu1 %v14096_v41  ;;  %v1856_v34 = vrot.slane %v16097_v31, %v16091_v29  ;;  %v1864_v35 = vrot.slane %v16097_v31, %v16094_v30  ;;  %v1860_v36 = vrot.slane %v16097_v31, %v16100_v32  ;;  %v2584_v40 = vld [vmem:[%s18122_s3 + $0x200] sm:$0xff]  ;;  %v2585_v41 = vld [vmem:[%s18122_s3 + $0x208] sm:$0xff] }
 0x902   : > { %v1868_v37 = vrot.slane %v16097_v31, %v16103_v33  ;;  %v14114_v59 = vpack.c.bf16 %v2585_v41, %v2584_v40  ;;  %v2590_v41 = vld [vmem:[%s18122_s3 + $0x230] sm:$0xff] }
 0x904   : > { %14067 = vmatpush3.bf16.msra.mxu0 %v14066_v48  ;;  %14099 = vmatpush3.bf16.msra.mxu1 %v14098_v49  ;;  %v2602_v48 = vld [vmem:[%s18122_s3 + $0x290] sm:$0xff] }
 0x905   : > { %14069 = vmatprep.subr.bf16.mxu0 %v14068_v52  ;;  %14101 = vmatprep.subr.bf16.mxu1 %v14100_v53  ;;  %v16122_v52 = vsub.s32 7, %v16088_v28  ;;  %v2603_v53 = vld [vmem:[%s18122_s3 + $0x298] sm:$0xff] }
 0x907   : > { %v1884_v9 = vrot.slane %v16097_v31, %v16122_v52 }
 0x908   : > { %14071 = vmatpush3.bf16.msra.mxu0 %v14070_v61  ;;  %14103 = vmatpush3.bf16.msra.mxu1 %v14102_v62  ;;  %v2586_v61 = vld [vmem:[%s18122_s3 + $0x210] sm:$0xff]  ;;  %v2587_v62 = vld [vmem:[%s18122_s3 + $0x218] sm:$0xff] }
 0x909   : > { %14073 = vmatprep.subr.bf16.mxu0 %v14072_v0  ;;  %14105 = vmatprep.subr.bf16.mxu1 %v14104_v1  ;;  %v14116_v1 = vpack.c.bf16 %v2603_v53, %v2602_v48  ;;  %v14118_v15 = vpack.c.bf16 %v2587_v62, %v2586_v61  ;;  %v2609_v48 = vld [vmem:[%s18122_s3 + $0x2c8] sm:$0xff] }
 0x90a   : > { %v14128_v62 = vpack.c.bf16 %v2609_v48, %v2608_v47  ;;  %v2647_v47 = vld [vmem:[%s18122_s3 + $0x3f8] sm:$0xff] }
 0x90c   : > { %14075 = vmatpush3.bf16.msra.mxu0 %v14074_v7  ;;  %14107 = vmatpush3.bf16.msra.mxu1 %v14106_v8  ;;  %v2604_v7 = vld [vmem:[%s18122_s3 + $0x2a0] sm:$0xff]  ;;  %v1876_v8 = vrot.slane %v16097_v31, %v16119_v51 }
 0x90d   : > { %14077 = vmatprep.subr.bf16.mxu0 %v14076_v12  ;;  %14109 = vmatprep.subr.bf16.mxu1 %v14108_v16  ;;  %v2637_v12 = vld [vmem:[%s18122_s3 + $0x3a8] sm:$0xff]  ;;  %v14150_v16 = vpack.c.bf16 %v2619_v5, %v2618_v4  ;;  %v14120_v21 = vpack.c.bf16 %v2605_v10, %v2604_v7  ;;  %v2611_v4 = vld [vmem:[%s18122_s3 + $0x2d8] sm:$0xff]  ;;  %v2642_v5 = vld [vmem:[%s18122_s3 + $0x3d0] sm:$0xff] }
 0x90e   : > { %v14152_v22 = vpack.c.bf16 %v2637_v12, %v2636_v11  ;;  %v2643_v7 = vld [vmem:[%s18122_s3 + $0x3d8] sm:$0xff]  ;;  %v2594_v12 = vld [vmem:[%s18122_s3 + $0x250] sm:$0xff] }
 0x910   : > { %14079 = vmatpush3.bf16.msra.mxu0 %v14078_v17  ;;  %14111 = vmatpush3.bf16.msra.mxu1 %v14110_v20  ;;  %v2588_v17 = vld [vmem:[%s18122_s3 + $0x220] sm:$0xff] }
 0x911   : > { %14113 = vmatprep.subr.bf16.mxu0 %v14112_v24  ;;  %14145 = vmatprep.subr.bf16.mxu1 %v14144_v26  ;;  %v2621_v24 = vld [vmem:[%s18122_s3 + $0x328] sm:$0xff] }
 0x912   : > { %v14154_v40 = vpack.c.bf16 %v2621_v24, %v2620_v23  ;;  %v2644_v23 = vld [vmem:[%s18122_s3 + $0x3e0] sm:$0xff]  ;;  %v2645_v24 = vld [vmem:[%s18122_s3 + $0x3e8] sm:$0xff] }
 0x9ae   : > { %v2002_v38 = vpop.f32.mrb[4].mxu0  ;;  %v2073_v39 = vpop.f32.mrb[10].mxu1 }
 0x9af   : > { %v2003_v42 = vadd.f32 %v2002_v38, %v1856_v34  ;;  %v2074_v43 = vadd.f32 %v2073_v39, %v1864_v35  ;;  %v2004_v44 = vpop.f32.mrb[5].mxu0  ;;  %v2075_v45 = vpop.f32.mrb[11].mxu1  ;;  %v2607_v34 = vld [vmem:[%s18122_s3 + $0x2b8] sm:$0xff]  ;;  %v2638_v35 = vld [vmem:[%s18122_s3 + $0x3b0] sm:$0xff]  ;;  %v14122_v39 = vpack.c.bf16 %v2589_v18, %v2588_v17  ;;  %v14164_v18 = vpack.c.bf16 %v2643_v7, %v2642_v5  ;;  %v2696_v5 = vld [vmem:[%s18122_s3 + $0x580] sm:$0xff] }
 0x9b0   : > { %v2005_v49 = vadd.f32 %v2004_v44, %v1860_v36  ;;  %v2076_v50 = vadd.f32 %v2075_v45, %v1868_v37  ;;  %v2639_v36 = vld [vmem:[%s18122_s3 + $0x3b8] sm:$0xff]  ;;  %v2622_v45 = vld [vmem:[%s18122_s3 + $0x330] sm:$0xff]  ;;  %v2697_v7 = vld [vmem:[%s18122_s3 + $0x588] sm:$0xff] }
 0x9b1   : > { %v2504_v63 = vmax.f32 %v2003_v42, 0.0  ;;  %v2506_v0 = vmax.f32 %v2074_v43, 0.0  ;;  %v2591_v42 = vld [vmem:[%s18122_s3 + $0x238] sm:$0xff]  ;;  %v14124_v43 = vpack.c.bf16 %v2607_v34, %v2606_v25  ;;  %v14156_v44 = vpack.c.bf16 %v2639_v36, %v2638_v35  ;;  %v2596_v36 = vld [vmem:[%s18122_s3 + $0x260] sm:$0xff] }
 0x9b2   : > { %v2505_v57 = vmax.f32 %v2005_v49, 0.0  ;;  %v2507_v58 = vmax.f32 %v2076_v50, 0.0  ;;  %v2640_v49 = vld [vmem:[%s18122_s3 + $0x3c0] sm:$0xff]  ;;  %v2641_v50 = vld [vmem:[%s18122_s3 + $0x3c8] sm:$0xff]  ;;  %v14126_v56 = vpack.c.bf16 %v2591_v42, %v2590_v41  ;;  %v16192_v25 = vsub.s32 4, %v16088_v28 }
 0x9b3   : > { %v14168_v41 = vpack.c.bf16 %v2645_v24, %v2644_v23  ;;  %v2628_v42 = vld [vmem:[%s18122_s3 + $0x360] sm:$0xff]  ;;  %v2666_v23 = vld [vmem:[%s18122_s3 + $0x490] sm:$0xff] }
 0x9b4   : > { %2847 = vmatprep.mubr.f32.mxu0 %v2505_v57  ;;  %2917 = vmatprep.mubr.f32.mxu1 %v2507_v58  ;;  %v14158_v57 = vpack.c.bf16 %v2623_v46, %v2622_v45  ;;  %v2592_v58 = vld [vmem:[%s18122_s3 + $0x240] sm:$0xff]  ;;  %v2615_v45 = vld [vmem:[%s18122_s3 + $0x2f8] sm:$0xff]  ;;  %v2646_v46 = vld [vmem:[%s18122_s3 + $0x3f0] sm:$0xff]  ;;  %v1872_v48 = vrot.slane %v16097_v31, %v16192_v25 }
 0x9b5   : > { %2848 = vmatmul.mubr.f32.vlgmr.msra.gmra.mrb[12].mxu0 %v2504_v63  ;;  %2918 = vmatmul.mubr.f32.vlgmr.msra.gmra.mrb[18].mxu1 %v2506_v0  ;;  %v14160_v63 = vpack.c.bf16 %v2641_v50, %v2640_v49  ;;  %v2624_v0 = vld [vmem:[%s18122_s3 + $0x340] sm:$0xff] }
 0x9b6   : > { %v16139_v13 = vpop.f32.mrb[6].mxu0  ;;  %v16141_v14 = vpop.f32.mrb[12].mxu1  ;;  %14115 = vmatpush3.bf16.msra.mxu0 %v14114_v59  ;;  %14147 = vmatpush3.bf16.msra.mxu1 %v14146_v60  ;;  %v2593_v59 = vld [vmem:[%s18122_s3 + $0x248] sm:$0xff] }
 0x9b7   : > { %v2146_v19 = vpop.f32.mrb[7].mxu0  ;;  %v2217_v20 = vpop.f32.mrb[13].mxu1  ;;  %14117 = vmatprep.subr.bf16.mxu0 %v14116_v1  ;;  %14149 = vmatprep.subr.bf16.mxu1 %v14148_v2  ;;  %v2625_v1 = vld [vmem:[%s18122_s3 + $0x348] sm:$0xff]  ;;  %v2610_v2 = vld [vmem:[%s18122_s3 + $0x2d0] sm:$0xff]  ;;  %v14130_v10 = vpack.c.bf16 %v2593_v59, %v2592_v58 }
 0x9b8   : > { %v2147_v26 = vadd.f32 %v2146_v19, %v1876_v8  ;;  %v2218_v27 = vadd.f32 %v2217_v20, %v1884_v9  ;;  %v16176_v8 = vsub.s32 6, %v16088_v28  ;;  %v16179_v9 = vld [vmem:[%s18112_s29 + $0x8] sm:$0xff]  ;;  %v14162_v11 = vpack.c.bf16 %v2625_v1, %v2624_v0  ;;  %v2626_v19 = vld [vmem:[%s18122_s3 + $0x350] sm:$0xff]  ;;  %v2627_v20 = vld [vmem:[%s18122_s3 + $0x358] sm:$0xff] }
 0x9b9   : > { %v14132_v17 = vpack.c.bf16 %v2611_v4, %v2610_v2  ;;  %v14166_v35 = vpack.c.bf16 %v2627_v20, %v2626_v19  ;;  %v2630_v58 = vld [vmem:[%s18122_s3 + $0x370] sm:$0xff]  ;;  %v2631_v0 = vld [vmem:[%s18122_s3 + $0x378] sm:$0xff]  ;;  %v2664_v1 = vld [vmem:[%s18122_s3 + $0x480] sm:$0xff]  ;;  %v1892_v4 = vrot.slane %v16179_v9, %v16100_v32 }
 0x9ba   : > { %v2509_v37 = vmax.f32 %v2147_v26, 0.0  ;;  %v2511_v38 = vmax.f32 %v2218_v27, 0.0  ;;  %14119 = vmatpush3.bf16.msra.mxu0 %v14118_v15  ;;  %14151 = vmatpush3.bf16.msra.mxu1 %v14150_v16  ;;  %v2595_v15 = vld [vmem:[%s18122_s3 + $0x258] sm:$0xff]  ;;  %v1912_v16 = vrot.slane %v16179_v9, %v16176_v8  ;;  %v1880_v59 = vrot.slane %v16097_v31, %v16176_v8  ;;  %v2665_v2 = vld [vmem:[%s18122_s3 + $0x488] sm:$0xff] }
 0x9bb   : > { %14121 = vmatprep.subr.bf16.mxu0 %v14120_v21  ;;  %14153 = vmatprep.subr.bf16.mxu1 %v14152_v22  ;;  %v2612_v21 = vld [vmem:[%s18122_s3 + $0x2e0] sm:$0xff]  ;;  %v2613_v22 = vld [vmem:[%s18122_s3 + $0x2e8] sm:$0xff]  ;;  %v14134_v34 = vpack.c.bf16 %v2595_v15, %v2594_v12  ;;  %v14176_v12 = vpack.c.bf16 %v2665_v2, %v2664_v1  ;;  %v2145_v15 = vadd.f32 %v16139_v13, %v1872_v48  ;;  %v2699_v13 = vld [vmem:[%s18122_s3 + $0x598] sm:$0xff] }
 0x9bc   : > { %2987 = vmatprep.mubr.f32.mxu0 %v2509_v37  ;;  %3057 = vmatprep.mubr.f32.mxu1 %v2511_v38  ;;  %v2597_v37 = vld [vmem:[%s18122_s3 + $0x268] sm:$0xff]  ;;  %v2700_v48 = vld [vmem:[%s18122_s3 + $0x5a0] sm:$0xff]  ;;  %v2670_v1 = vld [vmem:[%s18122_s3 + $0x4b0] sm:$0xff] }
 0x9bd   : > { %v14138_v49 = vpack.c.bf16 %v2597_v37, %v2596_v36  ;;  %v2649_v19 = vld [vmem:[%s18122_s3 + $0x408] sm:$0xff]  ;;  %v2650_v37 = vld [vmem:[%s18122_s3 + $0x410] sm:$0xff]  ;;  %v2671_v2 = vld [vmem:[%s18122_s3 + $0x4b8] sm:$0xff] }
 0x9be   : > { %v16159_v53 = vpop.f32.mrb[8].mxu0  ;;  %v16161_v55 = vpop.f32.mrb[14].mxu1  ;;  %14123 = vmatpush3.bf16.msra.mxu0 %v14122_v39  ;;  %14155 = vmatpush3.bf16.msra.mxu1 %v14154_v40  ;;  %v14136_v40 = vpack.c.bf16 %v2613_v22, %v2612_v21  ;;  %v2680_v21 = vld [vmem:[%s18122_s3 + $0x500] sm:$0xff]  ;;  %v2681_v22 = vld [vmem:[%s18122_s3 + $0x508] sm:$0xff] }
 0x9bf   : > { %v16165_v60 = vpop.f32.mrb[9].mxu0  ;;  %v16167_v61 = vpop.f32.mrb[15].mxu1  ;;  %14125 = vmatprep.subr.bf16.mxu0 %v14124_v43  ;;  %14157 = vmatprep.subr.bf16.mxu1 %v14156_v44  ;;  %v2629_v43 = vld [vmem:[%s18122_s3 + $0x368] sm:$0xff]  ;;  %v2614_v44 = vld [vmem:[%s18122_s3 + $0x2f0] sm:$0xff] }
 0x9c0   : > { %v14170_v50 = vpack.c.bf16 %v2629_v43, %v2628_v42  ;;  %v2289_v20 = vadd.f32 %v16165_v60, %v1892_v4  ;;  %v14210_v60 = vpack.c.bf16 %v2681_v22, %v2680_v21  ;;  %v2702_v4 = vld [vmem:[%s18122_s3 + $0x5b0] sm:$0xff]  ;;  %v2705_v21 = vld [vmem:[%s18122_s3 + $0x5c8] sm:$0xff] }
 0x9c2   : > { %14127 = vmatpush3.bf16.msra.mxu0 %v14126_v56  ;;  %14159 = vmatpush3.bf16.msra.mxu1 %v14158_v57  ;;  %v2598_v56 = vld [vmem:[%s18122_s3 + $0x270] sm:$0xff]  ;;  %v2599_v57 = vld [vmem:[%s18122_s3 + $0x278] sm:$0xff] }
 0x9c3   : > { %14129 = vmatprep.subr.bf16.mxu0 %v14128_v62  ;;  %14161 = vmatprep.subr.bf16.mxu1 %v14160_v63  ;;  %v14140_v62 = vpack.c.bf16 %v2615_v45, %v2614_v44  ;;  %v14172_v63 = vpack.c.bf16 %v2647_v47, %v2646_v46  ;;  %v14142_v31 = vpack.c.bf16 %v2599_v57, %v2598_v56  ;;  %v2683_v44 = vld [vmem:[%s18122_s3 + $0x518] sm:$0xff]  ;;  %v2668_v45 = vld [vmem:[%s18122_s3 + $0x4a0] sm:$0xff]  ;;  %v2669_v46 = vld [vmem:[%s18122_s3 + $0x4a8] sm:$0xff] }
 0x9c4   : > { %v14184_v57 = vpack.c.bf16 %v2669_v46, %v2668_v45  ;;  %v2690_v45 = vld [vmem:[%s18122_s3 + $0x550] sm:$0xff] }
 0x9c6   : > { %v16194_v26 = vpop.f32.mrb[10].mxu0  ;;  %v2499_v27 = vpop.f32.mrb[16].mxu1  ;;  %14131 = vmatpush3.bf16.msra.mxu0 %v14130_v10  ;;  %14163 = vmatpush3.bf16.msra.mxu1 %v14162_v11  ;;  %v1900_v10 = vrot.slane %v16179_v9, %v16103_v33  ;;  %v14174_v11 = vpack.c.bf16 %v2631_v0, %v2630_v58  ;;  %v2652_v58 = vld [vmem:[%s18122_s3 + $0x420] sm:$0xff]  ;;  %v2685_v0 = vld [vmem:[%s18122_s3 + $0x528] sm:$0xff] }
 0x9c7   : > { %v16198_v38 = vadd.f32 %v2499_v27, %v1912_v16  ;;  %v16200_v39 = vpop.f32.mrb[11].mxu0  ;;  %v16202_v28 = vpop.f32.mrb[17].mxu1  ;;  %14133 = vmatprep.subr.bf16.mxu0 %v14132_v17  ;;  %14165 = vmatprep.subr.bf16.mxu1 %v14164_v18  ;;  %v2216_v16 = vadd.f32 %v16141_v14, %v1880_v59  ;;  %v14208_v17 = vpack.c.bf16 %v2697_v7, %v2696_v5  ;;  %v2648_v18 = vld [vmem:[%s18122_s3 + $0x400] sm:$0xff]  ;;  %v2667_v27 = vld [vmem:[%s18122_s3 + $0x498] sm:$0xff]  ;;  %v2653_v59 = vld [vmem:[%s18122_s3 + $0x428] sm:$0xff] }
 0x9c8   : > { %v2360_v24 = vadd.f32 %v16167_v61, %v1900_v10  ;;  %v14178_v14 = vpack.c.bf16 %v2649_v19, %v2648_v18  ;;  %v2513_v61 = vmax.f32 %v2289_v20, 0.0  ;;  %v14180_v42 = vpack.c.bf16 %v2667_v27, %v2666_v23  ;;  %v2703_v5 = vld [vmem:[%s18122_s3 + $0x5b8] sm:$0xff]  ;;  %v2672_v18 = vld [vmem:[%s18122_s3 + $0x4c0] sm:$0xff]  ;;  %v2673_v19 = vld [vmem:[%s18122_s3 + $0x4c8] sm:$0xff] }
 0x9c9   : > { %v2510_v36 = vmax.f32 %v2216_v16, 0.0  ;;  %v14186_v7 = vpack.c.bf16 %v2653_v59, %v2652_v58  ;;  %v14220_v16 = vpack.c.bf16 %v2703_v5, %v2702_v4  ;;  %v2704_v20 = vld [vmem:[%s18122_s3 + $0x5c0] sm:$0xff]  ;;  %v2678_v4 = vld [vmem:[%s18122_s3 + $0x4f0] sm:$0xff]  ;;  %v2679_v5 = vld [vmem:[%s18122_s3 + $0x4f8] sm:$0xff] }
 0x9ca   : > { %14135 = vmatpush3.bf16.msra.mxu0 %v14134_v34  ;;  %14167 = vmatpush3.bf16.msra.mxu1 %v14166_v35  ;;  %v2698_v34 = vld [vmem:[%s18122_s3 + $0x590] sm:$0xff]  ;;  %v2508_v35 = vmax.f32 %v2145_v15, 0.0  ;;  %v2515_v47 = vmax.f32 %v2360_v24, 0.0  ;;  %v14192_v24 = vpack.c.bf16 %v2673_v19, %v2672_v18  ;;  %v2656_v27 = vld [vmem:[%s18122_s3 + $0x440] sm:$0xff]  ;;  %v1896_v19 = vrot.slane %v16179_v9, %v16094_v30 }
 0x9cb   : > { %14137 = vmatprep.subr.bf16.mxu0 %v14136_v40  ;;  %14169 = vmatprep.subr.bf16.mxu1 %v14168_v41  ;;  %v2651_v40 = vld [vmem:[%s18122_s3 + $0x418] sm:$0xff]  ;;  %v2682_v41 = vld [vmem:[%s18122_s3 + $0x510] sm:$0xff]  ;;  %v14212_v43 = vpack.c.bf16 %v2699_v13, %v2698_v34  ;;  %v2657_v34 = vld [vmem:[%s18122_s3 + $0x448] sm:$0xff] }
 0x9cc   : > { %v14214_v56 = vpack.c.bf16 %v2683_v44, %v2682_v41  ;;  %v2686_v15 = vld [vmem:[%s18122_s3 + $0x530] sm:$0xff]  ;;  %v2688_v13 = vld [vmem:[%s18122_s3 + $0x540] sm:$0xff]  ;;  %v14194_v41 = vpack.c.bf16 %v2657_v34, %v2656_v27  ;;  %v2659_v44 = vld [vmem:[%s18122_s3 + $0x458] sm:$0xff] }
 0x9cd   : > { %v2694_v18 = vld [vmem:[%s18122_s3 + $0x570] sm:$0xff]  ;;  %v2760_v27 = vld [vmem:[%s18122_s3 + $0x780] sm:$0xff]  ;;  %v2761_v34 = vld [vmem:[%s18122_s3 + $0x788] sm:$0xff] }
 0x9ce   : > { %14139 = vmatpush3.bf16.msra.mxu0 %v14138_v49  ;;  %14171 = vmatpush3.bf16.msra.mxu1 %v14170_v50  ;;  %v2701_v49 = vld [vmem:[%s18122_s3 + $0x5a8] sm:$0xff]  ;;  %v14182_v50 = vpack.c.bf16 %v2651_v40, %v2650_v37  ;;  %v2706_v37 = vld [vmem:[%s18122_s3 + $0x5d0] sm:$0xff]  ;;  %v2707_v40 = vld [vmem:[%s18122_s3 + $0x5d8] sm:$0xff] }
 0x9cf   : > { %14141 = vmatprep.subr.bf16.mxu0 %v14140_v62  ;;  %14173 = vmatprep.subr.bf16.mxu1 %v14172_v63  ;;  %v2684_v62 = vld [vmem:[%s18122_s3 + $0x520] sm:$0xff]  ;;  %v14216_v63 = vpack.c.bf16 %v2701_v49, %v2700_v48  ;;  %v14228_v46 = vpack.c.bf16 %v2707_v40, %v2706_v37  ;;  %v2677_v49 = vld [vmem:[%s18122_s3 + $0x4e8] sm:$0xff] }
 0x9d0   : > { %v14218_v10 = vpack.c.bf16 %v2685_v0, %v2684_v62  ;;  %v2676_v48 = vld [vmem:[%s18122_s3 + $0x4e0] sm:$0xff]  ;;  %v2713_v40 = vld [vmem:[%s18122_s3 + $0x608] sm:$0xff] }
 0x9d1   : > { %v14200_v59 = vpack.c.bf16 %v2677_v49, %v2676_v48  ;;  %v2660_v62 = vld [vmem:[%s18122_s3 + $0x460] sm:$0xff]  ;;  %v2762_v48 = vld [vmem:[%s18122_s3 + $0x790] sm:$0xff] }
 0x9d2   : > { %14143 = vmatpush3.bf16.msra.mxu0 %v14142_v31  ;;  %14175 = vmatpush3.bf16.msra.mxu1 %v14174_v11  ;;  %v14188_v31 = vpack.c.bf16 %v2671_v2, %v2670_v1  ;;  %v2654_v11 = vld [vmem:[%s18122_s3 + $0x430] sm:$0xff]  ;;  %v2692_v0 = vld [vmem:[%s18122_s3 + $0x560] sm:$0xff]  ;;  %v2693_v2 = vld [vmem:[%s18122_s3 + $0x568] sm:$0xff] }
 0x9d3   : > { %14177 = vmatprep.subr.bf16.mxu0 %v14176_v12  ;;  %14209 = vmatprep.subr.bf16.mxu1 %v14208_v17  ;;  %v2655_v12 = vld [vmem:[%s18122_s3 + $0x438] sm:$0xff]  ;;  %v2712_v37 = vld [vmem:[%s18122_s3 + $0x600] sm:$0xff] }
 0x9d4   : > { %v2687_v17 = vld [vmem:[%s18122_s3 + $0x538] sm:$0xff]  ;;  %v14190_v22 = vpack.c.bf16 %v2655_v12, %v2654_v11  ;;  %v1888_v11 = vrot.slane %v16179_v9, %v16091_v29  ;;  %v14234_v12 = vpack.c.bf16 %v2693_v2, %v2692_v0  ;;  %v2764_v2 = vld [vmem:[%s18122_s3 + $0x7a0] sm:$0xff] }
 0x9d5   : > { %2988 = vmatmul.mubr.f32.vlgmr.msra.gmra.mrb[14].mxu0 %v2508_v35  ;;  %3058 = vmatmul.mubr.f32.vlgmr.msra.gmra.mrb[20].mxu1 %v2510_v36  ;;  %v14222_v23 = vpack.c.bf16 %v2687_v17, %v2686_v15  ;;  %v2689_v35 = vld [vmem:[%s18122_s3 + $0x548] sm:$0xff]  ;;  %v2674_v36 = vld [vmem:[%s18122_s3 + $0x4d0] sm:$0xff]  ;;  %v14204_v15 = vpack.c.bf16 %v2679_v5, %v2678_v4  ;;  %v2663_v17 = vld [vmem:[%s18122_s3 + $0x478] sm:$0xff] }
 0x9d6   : > { %14179 = vmatpush3.bf16.msra.mxu0 %v14178_v14  ;;  %3127 = vmatprep.mubr.f32.mxu0 %v2513_v61  ;;  %v14224_v14 = vpack.c.bf16 %v2705_v21, %v2704_v20  ;;  %v14226_v61 = vpack.c.bf16 %v2689_v35, %v2688_v13  ;;  %v2695_v21 = vld [vmem:[%s18122_s3 + $0x578] sm:$0xff]  ;;  %v1916_v13 = vrot.slane %v16179_v9, %v16122_v52  ;;  %v2765_v4 = vld [vmem:[%s18122_s3 + $0x7a8] sm:$0xff] }
 0x9d7   : > { %14211 = vmatpush3.bf16.msra.mxu1 %v14210_v60  ;;  %3197 = vmatprep.mubr.f32.mxu1 %v2515_v47  ;;  %v2675_v60 = vld [vmem:[%s18122_s3 + $0x4d8] sm:$0xff]  ;;  %v2287_v35 = vadd.f32 %v16159_v53, %v1888_v11  ;;  %v2730_v53 = vld [vmem:[%s18122_s3 + $0x690] sm:$0xff]  ;;  %v2716_v11 = vld [vmem:[%s18122_s3 + $0x620] sm:$0xff] }
 0x9d8   : > { %14181 = vmatprep.subr.bf16.mxu0 %v14180_v42  ;;  %14213 = vmatprep.subr.bf16.mxu1 %v14212_v43  ;;  %v14196_v42 = vpack.c.bf16 %v2675_v60, %v2674_v36  ;;  %v2658_v43 = vld [vmem:[%s18122_s3 + $0x450] sm:$0xff]  ;;  %v2691_v47 = vld [vmem:[%s18122_s3 + $0x558] sm:$0xff]  ;;  %v14238_v36 = vpack.c.bf16 %v2695_v21, %v2694_v18 }
 0x9d9   : > { %v14230_v58 = vpack.c.bf16 %v2691_v47, %v2690_v45  ;;  %v2731_v45 = vld [vmem:[%s18122_s3 + $0x698] sm:$0xff]  ;;  %v14242_v47 = vpack.c.bf16 %v2713_v40, %v2712_v37  ;;  %v2512_v49 = vmax.f32 %v2287_v35, 0.0  ;;  %v2734_v18 = vld [vmem:[%s18122_s3 + $0x6b0] sm:$0xff]  ;;  %v2768_v37 = vld [vmem:[%s18122_s3 + $0x7c0] sm:$0xff] }
 0x9da   : > { %14183 = vmatpush3.bf16.msra.mxu0 %v14182_v50  ;;  %v2708_v50 = vld [vmem:[%s18122_s3 + $0x5e0] sm:$0xff]  ;;  %v2767_v21 = vld [vmem:[%s18122_s3 + $0x7b8] sm:$0xff]  ;;  %v2769_v40 = vld [vmem:[%s18122_s3 + $0x7c8] sm:$0xff] }
 0x9db   : > { %14215 = vmatpush3.bf16.msra.mxu1 %v14214_v56  ;;  %14185 = vmatprep.subr.bf16.mxu0 %v14184_v57  ;;  %v2709_v56 = vld [vmem:[%s18122_s3 + $0x5e8] sm:$0xff]  ;;  %v14198_v57 = vpack.c.bf16 %v2659_v44, %v2658_v43  ;;  %v2751_v35 = vld [vmem:[%s18122_s3 + $0x738] sm:$0xff] }
 0x9dc   : > { %14217 = vmatprep.subr.bf16.mxu1 %v14216_v63  ;;  %v2661_v63 = vld [vmem:[%s18122_s3 + $0x468] sm:$0xff]  ;;  %v14232_v1 = vpack.c.bf16 %v2709_v56, %v2708_v50  ;;  %v2714_v56 = vld [vmem:[%s18122_s3 + $0x610] sm:$0xff] }
 0x9dd   : > { %v2745_v43 = vld [vmem:[%s18122_s3 + $0x708] sm:$0xff] }
 0x9de   : > { %14187 = vmatpush3.bf16.msra.mxu0 %v14186_v7  ;;  %v2710_v7 = vld [vmem:[%s18122_s3 + $0x5f0] sm:$0xff] }
 0x9df   : > { %14219 = vmatpush3.bf16.msra.mxu1 %v14218_v10  ;;  %14189 = vmatprep.subr.bf16.mxu0 %v14188_v31  ;;  %v2711_v10 = vld [vmem:[%s18122_s3 + $0x5f8] sm:$0xff]  ;;  %v14202_v31 = vpack.c.bf16 %v2661_v63, %v2660_v62  ;;  %v2733_v63 = vld [vmem:[%s18122_s3 + $0x6a8] sm:$0xff] }
 0x9e0   : > { %14221 = vmatprep.subr.bf16.mxu1 %v14220_v16  ;;  %v2662_v16 = vld [vmem:[%s18122_s3 + $0x470] sm:$0xff]  ;;  %v14236_v20 = vpack.c.bf16 %v2711_v10, %v2710_v7  ;;  %v2747_v62 = vld [vmem:[%s18122_s3 + $0x718] sm:$0xff] }
 0x9e2   : > { %14191 = vmatpush3.bf16.msra.mxu0 %v14190_v22  ;;  %v2728_v22 = vld [vmem:[%s18122_s3 + $0x680] sm:$0xff] }
 0x9e3   : > { %14223 = vmatpush3.bf16.msra.mxu1 %v14222_v23  ;;  %14193 = vmatprep.subr.bf16.mxu0 %v14192_v24  ;;  %v2729_v23 = vld [vmem:[%s18122_s3 + $0x688] sm:$0xff]  ;;  %v1908_v24 = vrot.slane %v16179_v9, %v16119_v51 }
 0x9e4   : > { %14225 = vmatprep.subr.bf16.mxu1 %v14224_v14  ;;  %v14206_v14 = vpack.c.bf16 %v2663_v17, %v2662_v16  ;;  %v14240_v60 = vpack.c.bf16 %v2729_v23, %v2728_v22  ;;  %v14280_v16 = vpack.c.bf16 %v2765_v4, %v2764_v2  ;;  %v2749_v17 = vld [vmem:[%s18122_s3 + $0x728] sm:$0xff] }
 0x9e5   : > { %v2431_v44 = vadd.f32 %v16200_v39, %v1908_v24  ;;  %v2746_v39 = vld [vmem:[%s18122_s3 + $0x710] sm:$0xff]  ;;  %v2773_v2 = vld [vmem:[%s18122_s3 + $0x7e8] sm:$0xff] }
 0x9e6   : > { %14195 = vmatpush3.bf16.msra.mxu0 %v14194_v41  ;;  %v2358_v41 = vadd.f32 %v16161_v55, %v1896_v19  ;;  %v2763_v55 = vld [vmem:[%s18122_s3 + $0x798] sm:$0xff]  ;;  %v14278_v10 = vpack.c.bf16 %v2747_v62, %v2746_v39  ;;  %v2722_v39 = vld [vmem:[%s18122_s3 + $0x650] sm:$0xff] }
 0x9e7   : > { %14227 = vmatpush3.bf16.msra.mxu1 %v14226_v61  ;;  %14197 = vmatprep.subr.bf16.mxu0 %v14196_v42  ;;  %v14272_v61 = vpack.c.bf16 %v2761_v34, %v2760_v27  ;;  %v2744_v42 = vld [vmem:[%s18122_s3 + $0x700] sm:$0xff]  ;;  %v2517_v0 = vmax.f32 %v2431_v44, 0.0  ;;  %v2735_v19 = vld [vmem:[%s18122_s3 + $0x6b8] sm:$0xff]  ;;  %v2718_v27 = vld [vmem:[%s18122_s3 + $0x630] sm:$0xff] }
 0x9e8   : > { %14229 = vmatprep.subr.bf16.mxu1 %v14228_v46  ;;  %v2502_v46 = vadd.f32 %v16202_v28, %v1916_v13  ;;  %v14274_v50 = vpack.c.bf16 %v2745_v43, %v2744_v42  ;;  %v2732_v28 = vld [vmem:[%s18122_s3 + $0x6a0] sm:$0xff]  ;;  %v14252_v24 = vpack.c.bf16 %v2735_v19, %v2734_v18  ;;  %v2719_v34 = vld [vmem:[%s18122_s3 + $0x638] sm:$0xff]  ;;  %v2750_v13 = vld [vmem:[%s18122_s3 + $0x730] sm:$0xff] }
 0x9e9   : > { %v2720_v43 = vld [vmem:[%s18122_s3 + $0x640] sm:$0xff]  ;;  %v2721_v44 = vld [vmem:[%s18122_s3 + $0x648] sm:$0xff]  ;;  %v2774_v18 = vld [vmem:[%s18122_s3 + $0x7f0] sm:$0xff] }
 0x9ea   : > { %14199 = vmatpush3.bf16.msra.mxu0 %v14198_v57  ;;  %v2715_v57 = vld [vmem:[%s18122_s3 + $0x618] sm:$0xff]  ;;  %v2519_v5 = vmax.f32 %v2502_v46, 0.0  ;;  %v2753_v46 = vld [vmem:[%s18122_s3 + $0x748] sm:$0xff] }
 0x9eb   : > { %14231 = vmatpush3.bf16.msra.mxu1 %v14230_v58  ;;  %14201 = vmatprep.subr.bf16.mxu0 %v14200_v59  ;;  %v2514_v58 = vmax.f32 %v2358_v41, 0.0  ;;  %v14244_v59 = vpack.c.bf16 %v2731_v45, %v2730_v53  ;;  %v14246_v7 = vpack.c.bf16 %v2715_v57, %v2714_v56  ;;  %v14254_v41 = vpack.c.bf16 %v2719_v34, %v2718_v27  ;;  %v2752_v53 = vld [vmem:[%s18122_s3 + $0x740] sm:$0xff]  ;;  %v2775_v19 = vld [vmem:[%s18122_s3 + $0x7f8] sm:$0xff] }
 0x9ec   : > { %14233 = vmatprep.subr.bf16.mxu1 %v14232_v1  ;;  %v14276_v1 = vpack.c.bf16 %v2763_v55, %v2762_v48  ;;  %v14288_v45 = vpack.c.bf16 %v2769_v40, %v2768_v37  ;;  %v2739_v48 = vld [vmem:[%s18122_s3 + $0x6d8] sm:$0xff]  ;;  %v2770_v55 = vld [vmem:[%s18122_s3 + $0x7d0] sm:$0xff]  ;;  %v14290_v56 = vpack.c.bf16 %v2753_v46, %v2752_v53  ;;  %v14300_v34 = vpack.c.bf16 %v2775_v19, %v2774_v18 }
 0x9ed   : > { %v2727_v27 = vld [vmem:[%s18122_s3 + $0x678] sm:$0xff]  ;;  %v2518_v37 = vmax.f32 %v16198_v38, 0.0 }
 0x9ee   : > { %14203 = vmatpush3.bf16.msra.mxu0 %v14202_v31  ;;  %v14248_v31 = vpack.c.bf16 %v2733_v63, %v2732_v28  ;;  %v2755_v28 = vld [vmem:[%s18122_s3 + $0x758] sm:$0xff]  ;;  %v2740_v63 = vld [vmem:[%s18122_s3 + $0x6e0] sm:$0xff] }
 0x9ef   : > { %14235 = vmatpush3.bf16.msra.mxu1 %v14234_v12  ;;  %14205 = vmatprep.subr.bf16.mxu0 %v14204_v15  ;;  %v2717_v12 = vld [vmem:[%s18122_s3 + $0x628] sm:$0xff]  ;;  %v2748_v15 = vld [vmem:[%s18122_s3 + $0x720] sm:$0xff] }
 0x9f0   : > { %14237 = vmatprep.subr.bf16.mxu1 %v14236_v20  ;;  %v2766_v20 = vld [vmem:[%s18122_s3 + $0x7b0] sm:$0xff]  ;;  %v14250_v22 = vpack.c.bf16 %v2717_v12, %v2716_v11  ;;  %v14282_v23 = vpack.c.bf16 %v2749_v17, %v2748_v15  ;;  %v2756_v11 = vld [vmem:[%s18122_s3 + $0x760] sm:$0xff]  ;;  %v2757_v15 = vld [vmem:[%s18122_s3 + $0x768] sm:$0xff] }
 0x9f1   : > { %v2743_v17 = vld [vmem:[%s18122_s3 + $0x6f8] sm:$0xff] }
 0x9f2   : > { %14207 = vmatpush3.bf16.msra.mxu0 %v14206_v14  ;;  %v14284_v14 = vpack.c.bf16 %v2767_v21, %v2766_v20  ;;  %v1904_v21 = vrot.slane %v16179_v9, %v16192_v25 }
 0x9f3   : > { %14239 = vmatpush3.bf16.msra.mxu1 %v14238_v36  ;;  %14241 = vmatprep.subr.bf16.mxu0 %v14240_v60  ;;  %v2736_v36 = vld [vmem:[%s18122_s3 + $0x6c0] sm:$0xff]  ;;  %v2737_v60 = vld [vmem:[%s18122_s3 + $0x6c8] sm:$0xff] }
 0x9f4   : > { %14273 = vmatprep.subr.bf16.mxu1 %v14272_v61  ;;  %v14286_v61 = vpack.c.bf16 %v2751_v35, %v2750_v13  ;;  %v14256_v42 = vpack.c.bf16 %v2737_v60, %v2736_v36  ;;  %v2758_v13 = vld [vmem:[%s18122_s3 + $0x770] sm:$0xff]  ;;  %v2429_v36 = vadd.f32 %v16194_v26, %v1904_v21  ;;  %v11619_v21 = vld [vmem:[%s18120_s9 + $0x20] sm:$0xff] }
 0x9f5   : > { %3128 = vmatmul.mubr.f32.vlgmr.msra.gmra.mrb[16].mxu0 %v2512_v49  ;;  %v2771_v49 = vld [vmem:[%s18122_s3 + $0x7d8] sm:$0xff] }
 0x9f6   : > { %3198 = vmatmul.mubr.f32.vlgmr.msra.gmra.mrb[22].mxu1 %v2514_v58  ;;  %14243 = vmatpush3.bf16.msra.mxu0 %v14242_v47  ;;  %v2738_v47 = vld [vmem:[%s18122_s3 + $0x6d0] sm:$0xff]  ;;  %v2723_v58 = vld [vmem:[%s18122_s3 + $0x658] sm:$0xff]  ;;  %v14292_v62 = vpack.c.bf16 %v2771_v49, %v2770_v55  ;;  %v2516_v9 = vmax.f32 %v2429_v36, 0.0  ;;  %v11617_v36 = vld [vmem:[%s18114_s24] ss:$0 sm:$0xff] }
 0x9f7   : > { %3267 = vmatprep.mubr.f32.mxu0 %v2517_v0  ;;  %14275 = vmatpush3.bf16.msra.mxu1 %v14274_v50  ;;  %v14258_v50 = vpack.c.bf16 %v2721_v44, %v2720_v43  ;;  %v14260_v57 = vpack.c.bf16 %v2739_v48, %v2738_v47  ;;  %v2741_v0 = vld [vmem:[%s18122_s3 + $0x6e8] sm:$0xff]  ;;  %v14262_v4 = vpack.c.bf16 %v2723_v58, %v2722_v39 }
 0x9f8   : > { %3337 = vmatprep.mubr.f32.mxu1 %v2519_v5  ;;  %14245 = vmatprep.subr.bf16.mxu0 %v14244_v59  ;;  %v2754_v59 = vld [vmem:[%s18122_s3 + $0x750] sm:$0xff] }
 0x9f9   : > { %14277 = vmatprep.subr.bf16.mxu1 %v14276_v1  ;;  %v2772_v1 = vld [vmem:[%s18122_s3 + $0x7e0] sm:$0xff]  ;;  %v14294_v5 = vpack.c.bf16 %v2755_v28, %v2754_v59 }
 0x9fa   : > { %14247 = vmatpush3.bf16.msra.mxu0 %v14246_v7  ;;  %v14264_v7 = vpack.c.bf16 %v2741_v0, %v2740_v63  ;;  %v14296_v12 = vpack.c.bf16 %v2773_v2, %v2772_v1 }
 0x9fb   : > { %14279 = vmatpush3.bf16.msra.mxu1 %v14278_v10  ;;  %14249 = vmatprep.subr.bf16.mxu0 %v14248_v31  ;;  %v2724_v10 = vld [vmem:[%s18122_s3 + $0x660] sm:$0xff]  ;;  %v2725_v31 = vld [vmem:[%s18122_s3 + $0x668] sm:$0xff] }
 0x9fc   : > { %14281 = vmatprep.subr.bf16.mxu1 %v14280_v16  ;;  %v2742_v16 = vld [vmem:[%s18122_s3 + $0x6f0] sm:$0xff]  ;;  %v14266_v20 = vpack.c.bf16 %v2725_v31, %v2724_v10 }
 0x9fe   : > { %14251 = vmatpush3.bf16.msra.mxu0 %v14250_v22  ;;  %v14298_v22 = vpack.c.bf16 %v2757_v15, %v2756_v11 }
 0x9ff   : > { %14283 = vmatpush3.bf16.msra.mxu1 %v14282_v23  ;;  %14253 = vmatprep.subr.bf16.mxu0 %v14252_v24  ;;  %v14268_v23 = vpack.c.bf16 %v2743_v17, %v2742_v16  ;;  %v2726_v24 = vld [vmem:[%s18122_s3 + $0x670] sm:$0xff] }
 0xa00   : > { %14285 = vmatprep.subr.bf16.mxu1 %v14284_v14  ;;  %v2759_v14 = vld [vmem:[%s18122_s3 + $0x778] sm:$0xff]  ;;  %v14270_v35 = vpack.c.bf16 %v2727_v27, %v2726_v24  ;;  %v11621_v24 = vld [vmem:[%s18120_s9 + $0x30] sm:$0xff] }
 0xa01   : > { %v14302_v60 = vpack.c.bf16 %v2759_v14, %v2758_v13  ;;  %v11622_v27 = vld [vmem:[%s18120_s9 + $0x38] sm:$0xff] }
 0xa02   : > { %14255 = vmatpush3.bf16.msra.mxu0 %v14254_v41  ;;  %v11616_v41 = vld [vmem:[%s18121_s8] ss:$0 sm:$0xff] }
 0xa03   : > { %14287 = vmatpush3.bf16.msra.mxu1 %v14286_v61  ;;  %14257 = vmatprep.subr.bf16.mxu0 %v14256_v42 }
 0xa04   : > { %14289 = vmatprep.subr.bf16.mxu1 %v14288_v45 }
 0xa06   : > { %14259 = vmatpush3.bf16.msra.mxu0 %v14258_v50 }
 0xa07   : > { %14291 = vmatpush3.bf16.msra.mxu1 %v14290_v56  ;;  %14261 = vmatprep.subr.bf16.mxu0 %v14260_v57 }
 0xa08   : > { %14293 = vmatprep.subr.bf16.mxu1 %v14292_v62 }
 0xa0a   : > { %14263 = vmatpush3.bf16.msra.mxu0 %v14262_v4 }
 0xa0b   : > { %14295 = vmatpush3.bf16.msra.mxu1 %v14294_v5  ;;  %14265 = vmatprep.subr.bf16.mxu0 %v14264_v7 }
 0xa0c   : > { %14297 = vmatprep.subr.bf16.mxu1 %v14296_v12 }
 0xa0e   : > { %14267 = vmatpush3.bf16.msra.mxu0 %v14266_v20 }
 0xa0f   : > { %14299 = vmatpush3.bf16.msra.mxu1 %v14298_v22  ;;  %14269 = vmatprep.subr.bf16.mxu0 %v14268_v23  ;;  %v11620_v22 = vld [vmem:[%s18120_s9 + $0x28] sm:$0xff]  ;;  %s18140_s9 = sld [smem:[#allocation24_spill]] }
 0xa10   : > { %14301 = vmatprep.subr.bf16.mxu1 %v14300_v34  ;;  %v14305_v23 = vpack.c.bf16 %v11620_v22, %v11619_v21  ;;  %v14308_v34 = vpack.c.bf16 %v11622_v27, %v11621_v24 }
 0xa12   : > { %14271 = vmatpush3.bf16.msra.mxu0 %v14270_v35 }
 0xa13   : > { %14303 = vmatpush3.bf16.msra.mxu1 %v14302_v60  ;;  %14304 = vmatprep.subr.bf16.mxu0 %v15604_v3 }
 0xa14   : > { %13725 = vmatprep.subr.mxu1 %v15606_v6 }
 0xa15   : > { %3268 = vmatmul.mubr.f32.vlgmr.msra.gmra.mrb[18].mxu0 %v2516_v9  ;;  %v11618_v9 = vld [vmem:[%s18111_s30] ss:$0 sm:$0xff] }
 0xa16   : > { %3338 = vmatmul.mubr.f32.vlgmr.msra.gmra.mrb[24].mxu1 %v2518_v37  ;;  %13722 = vmatprep.mubr.msk.f32.mxu0 %vm15605_vm0, %v15606_v6 }
 0xa17   : > { %13727 = vmatprep.mubr.msk.f32.mxu1 %vm15605_vm0, %v15606_v6  ;;  %14306 = vmatpush3.bf16.msra.mxu0 %v14305_v23 }
 0xa18   : > { %14307 = vmatprep.subr.bf16.mxu0 %v15604_v3 }
 0xa1b   : > { %14309 = vmatpush3.bf16.msra.mxu0 %v14308_v34 }
 0xa1c   : > { %13735 = vmatprep.subr.mxu0 %v15606_v6 }
 0xa88   : > { %v12471_v26 = vpop.f32.mrb[12].mxu0  ;;  %v12506_v40 = vpop.f32.mrb[18].mxu1 }
 0xa89   : > { %v12472_v61 = vpop.f32.mrb[13].mxu0  ;;  %v12507_v42 = vpop.f32.mrb[19].mxu1 }
 0xa8a   : > { %v12473_v43 = vadd.f32 %v12472_v61, %v12471_v26  ;;  %v12508_v44 = vadd.f32 %v12507_v42, %v12506_v40  ;;  %v11624_v40 = vld [vmem:[%s18119_s13 + $0x1] ss:$0 sm:$0xff]  ;;  %s18141_s13 = sld [smem:[#allocation21_spill]] }
 0xa8c   : > { %v2850_v53 = vadd.f32 %v12473_v43, %v11616_v41 }
 0xa8e   : > { %v2920_v45 = vadd.f32 %v12508_v44, %v2850_v53 }
 0xaa8   : > { %v12541_v38 = vpop.f32.mrb[14].mxu0  ;;  %v12576_v46 = vpop.f32.mrb[20].mxu1 }
 0xaa9   : > { %v12542_v47 = vpop.f32.mrb[15].mxu0  ;;  %v12577_v48 = vpop.f32.mrb[21].mxu1 }
 0xaaa   : > { %v12543_v55 = vadd.f32 %v12542_v47, %v12541_v38  ;;  %v12578_v49 = vadd.f32 %v12577_v48, %v12576_v46 }
 0xaac   : > { %v2990_v50 = vadd.f32 %v12543_v55, %v2920_v45 }
 0xaae   : > { %v3060_v56 = vadd.f32 %v12578_v49, %v2990_v50 }
 0xac8   : > { %v12611_v57 = vpop.f32.mrb[16].mxu0 }
 0xac9   : > { %v12646_v39 = vpop.f32.mrb[22].mxu1  ;;  %v12612_v58 = vpop.f32.mrb[17].mxu0 }
 0xaca   : > { %v12613_v59 = vadd.f32 %v12612_v58, %v12611_v57  ;;  %v12647_v62 = vpop.f32.mrb[23].mxu1 }
 0xacb   : > { %v12648_v28 = vadd.f32 %v12647_v62, %v12646_v39 }
 0xacc   : > { %v3130_v63 = vadd.f32 %v12613_v59, %v3060_v56 }
 0xace   : > { %v3200_v0 = vadd.f32 %v12648_v28, %v3130_v63 }
 0xae8   : > { %v12681_v1 = vpop.f32.mrb[18].mxu0 }
 0xae9   : > { %v12716_v2 = vpop.f32.mrb[24].mxu1  ;;  %v12682_v4 = vpop.f32.mrb[19].mxu0 }
 0xaea   : > { %v12683_v5 = vadd.f32 %v12682_v4, %v12681_v1  ;;  %v12717_v7 = vpop.f32.mrb[25].mxu1 }
 0xaeb   : > { %v12718_v10 = vadd.f32 %v12717_v7, %v12716_v2 }
 0xaec   : > { %v3270_v31 = vadd.f32 %v12683_v5, %v3200_v0 }
 0xaee   : > { %v3340_v11 = vadd.f32 %v12718_v10, %v3270_v31  ;;  %v11626_v31 = vld [vmem:[%s18117_s17 + $0x20] sm:$0xff] }
 0xaf0   : > { %v3343_v12 = vadd.f32 %v3340_v11, %v15962_v54  ;;  %v11627_v11 = vld [vmem:[%s18117_s17 + $0x28] sm:$0xff] }
 0xaf2   : > { %v3346_v15 = vsel %vm1189_vm1, %v3343_v12, 0.0 }
 0xaf3   : > { %3347 = vadd.xlane.f32.xlu1 %v3346_v15 }
 0xb80   : > { %v3348_v16 = vpop.xlane.xlu1 %3347 }
 0xb81   : > { %v3349_v17 = vmul.f32 0.03125, %v3348_v16  ;;  %v14314_v16 = vpack.c.bf16 %v11627_v11, %v11626_v31  ;;  %v11667_v11 = vld [vmem:[%s18113_s25 + $0x2b8] sm:$0xff] }
 0xb83   : > { %v3350_v18 = vsub.f32 %v3343_v12, %v3349_v17 }
 0xb85   : > { %v3351_v19 = vmul.f32 %v3350_v18, %v3350_v18 }
 0xb87   : > { %v3352_v20 = vsel %vm1189_vm1, %v3351_v19, 0.0  ;;  %v11629_v19 = vld [vmem:[%s18117_s17 + $0x38] sm:$0xff] }
 0xb88   : > { %3353 = vadd.xlane.f32.xlu1 %v3352_v20 }
 0xc15   : > { %v3354_v54 = vpop.xlane.xlu1 %3353 }
 0xc16   : > { %v3355_v13 = vmul.f32 0.03125, %v3354_v54  ;;  %v11639_v54 = vld [vmem:[%s18115_s21 + $0x1] ss:$0 sm:$0xff]  ;;  %s18147_s21 = sld [smem:[#allocation33_spill]] }
 0xc18   : > { %v3356_v14 = vadd.f32 1e-05, %v3355_v13 }
 0xc1a   : > { %15438 = vrsqrt.f32 %v3356_v14 }
 0xc24   : > { %v15439_v35 = vpop.eup %15438 }
 0xc25   : > { %v3358_v60 = vmul.f32 %v15439_v35, %v3350_v18  ;;  %v11628_v18 = vld [vmem:[%s18117_s17 + $0x30] sm:$0xff]  ;;  %s18143_s17 = sld [smem:[#allocation39_spill]] }
 0xc26   : > { %v14311_v20 = vpack.c.bf16 %v11629_v19, %v11628_v18  ;;  %v11642_v18 = vld [vmem:[%s18118_s14 + $0x1] ss:$0 sm:$0xff]  ;;  %s18142_s14 = sld [smem:[#allocation38_spill]] }
 0xc27   : > { %v3365_v37 = vmul.f32 %v11617_v36, %v3358_v60 }
 0xc29   : > { %v16388_v26 = vadd.f32 %v11618_v9, %v3365_v37 }
 0xc2b   : > { %13723 = vmatmul.mubr.msk.f32.vlgmr.msra.gmra.mrb[20].mxu0 %vm1189_vm1, %v16388_v26 }
 0xc2c   : > { %13737 = vmatprep.mubr.msk.f32.mxu0 %vm15605_vm0, %v15606_v6 }
 0xcfe   : > { %v3455_v41 = vpop.f32.mrb[20].mxu0 }
 0xcff   : > { %v3456_v61 = vadd.f32 %v11624_v40, %v3455_v41  ;;  %v13724_v42 = vpop.f32.mrb[21].mxu0 }
 0xd01   : > { %3633 = vrot.lane.b32.xlu0 %v3456_v61, %s18042_s1  ;;  %3467 = vrot.lane.b32.xlu1 %v3456_v61, %s18040_s18  ;;  %s18134_s18 = smov 48   ;;  %s18135_s1 = smov 64  }
 0xd05   : > { %3631 = vrot.lane.b32.xlu1 %v3456_v61, %s18133_s10 }
 0xd73   : > { %v3634_v43 = vpop.permute.xlu0 %3633  ;;  %v3468_v44 = vpop.permute.xlu1 %3467 }
 0xd74   : > { %13726 = vmatpush3.xpose.msk.msra.mxu1 %vm1271_vm2, %v3468_v44  ;;  %13736 = vmatpush3.xpose.msk.msra.mxu0 %vm1271_vm2, %v3634_v43  ;;  %v11645_v43 = vld [vmem:[%s18113_s25 + $0x208] sm:$0xff] }
 0xd75   : > { %13730 = vmatprep.subr.mxu1 %v15606_v6  ;;  %14310 = vmatprep.subr.bf16.mxu0 %v15604_v3  ;;  %v11661_v44 = vld [vmem:[%s18113_s25 + $0x288] sm:$0xff] }
 0xd77   : > { %13728 = vmatmul.mubr.msk.f32.vlgmr.msra.gmra.mrb[26].mxu1 %vm1271_vm2, %v3456_v61  ;;  %v3632_v53 = vpop.permute.xlu1 %3631 }
 0xd78   : > { %13738 = vmatmul.mubr.msk.f32.vlgmr.msra.gmra.mrb[22].mxu0 %vm1271_vm2, %v3632_v53  ;;  %13732 = vmatprep.mubr.msk.f32.mxu1 %vm15605_vm0, %v15606_v6  ;;  %v11647_v53 = vld [vmem:[%s18113_s25 + $0x218] sm:$0xff] }
 0xd79   : > { %13749 = vmatprep.mubr.msk.f32.mxu0 %vm15605_vm0, %v15606_v6  ;;  %14312 = vmatpush3.bf16.msra.mxu0 %v14311_v20  ;;  %v11643_v20 = vld [vmem:[%s18116_s19 + $0x1] ss:$0 sm:$0xff]  ;;  %s18144_s19 = sld [smem:[#allocation22_spill]] }
 0xe4a   : > { %v3539_v45 = vpop.f32.mrb[26].mxu1 }
 0xe4b   : > { %v3543_v38 = vmul.f32 0.25, %v3539_v45  ;;  %v13729_v46 = vpop.f32.mrb[27].mxu1  ;;  %v3705_v47 = vpop.f32.mrb[22].mxu0  ;;  %v14316_v45 = vpack.c.bf16 %v11661_v44, %v11645_v43  ;;  %v11698_v43 = vld [vmem:[%s18113_s25 + $0x3b0] sm:$0xff]  ;;  %v11653_v44 = vld [vmem:[%s18113_s25 + $0x248] sm:$0xff] }
 0xe4c   : > { %v3709_v48 = vmul.f32 0.25, %v3705_v47  ;;  %v13739_v55 = vpop.f32.mrb[23].mxu0  ;;  %v11660_v46 = vld [vmem:[%s18113_s25 + $0x280] sm:$0xff] }
 0xe4d   : > { %v3544_v49 = vsel %vm1347_vm3, %v3543_v38, -inf  ;;  %v11646_v55 = vld [vmem:[%s18113_s25 + $0x210] sm:$0xff]  ;;  %14317 = vmatprep.subr.bf16.mxu0 %v14316_v45  ;;  %v11655_v45 = vld [vmem:[%s18113_s25 + $0x258] sm:$0xff] }
 0xe4e   : > { %3545 = vmax.xlane.f32.xlu1 %v3544_v49  ;;  %v3710_v50 = vsel %vm1347_vm3, %v3709_v48, -inf  ;;  %v11662_v49 = vld [vmem:[%s18113_s25 + $0x290] sm:$0xff] }
 0xe4f   : > { %3711 = vmax.xlane.f32.xlu0 %v3710_v50  ;;  %v14326_v50 = vpack.c.bf16 %v11662_v49, %v11646_v55 }
 0xe65   : > { %3721 = vrot.lane.b32.xlu0 %v3456_v61, %s18134_s18 }
 0xedb   : > { %v3546_v56 = vpop.xlane.xlu1 %3545 }
 0xedc   : > { %v3547_v57 = vsub.f32 %v3543_v38, %v3546_v56  ;;  %v3712_v39 = vpop.xlane.xlu0 %3711  ;;  %v11644_v38 = vld [vmem:[%s18113_s25 + $0x200] sm:$0xff]  ;;  %v11677_v56 = vld [vmem:[%s18113_s25 + $0x308] sm:$0xff] }
 0xedd   : > { %v3713_v58 = vsub.f32 %v3709_v48, %v3712_v39  ;;  %v14318_v48 = vpack.c.bf16 %v11660_v46, %v11644_v38  ;;  %v11679_v39 = vld [vmem:[%s18113_s25 + $0x318] sm:$0xff] }
 0xede   : > { %v3548_v59 = vmul.f32 1.442695, %v3547_v57  ;;  %v11693_v57 = vld [vmem:[%s18113_s25 + $0x388] sm:$0xff] }
 0xedf   : > { %v3714_v62 = vmul.f32 1.442695, %v3713_v58  ;;  %v14320_v58 = vpack.c.bf16 %v11693_v57, %v11677_v56  ;;  %v11670_v56 = vld [vmem:[%s18113_s25 + $0x2d0] sm:$0xff]  ;;  %v11685_v57 = vld [vmem:[%s18113_s25 + $0x348] sm:$0xff] }
 0xee0   : > { %15440 = vpow2.f32 %v3548_v59  ;;  %v3722_v12 = vpop.permute.xlu0 %3721  ;;  %v11695_v59 = vld [vmem:[%s18113_s25 + $0x398] sm:$0xff] }
 0xee1   : > { %15442 = vpow2.f32 %v3714_v62  ;;  %v11676_v62 = vld [vmem:[%s18113_s25 + $0x300] sm:$0xff] }
 0xeea   : > { %v15441_v28 = vpop.eup %15440 }
 0xeeb   : > { %v3550_v63 = vsel %vm1347_vm3, %v15441_v28, 0.0  ;;  %v15443_v0 = vpop.eup %15442 }
 0xeec   : > { %3551 = vadd.xlane.f32.xlu1 %v3550_v63  ;;  %v3716_v1 = vsel %vm1347_vm3, %v15443_v0, 0.0  ;;  %v14328_v63 = vpack.c.bf16 %v11695_v59, %v11679_v39  ;;  %v11701_v39 = vld [vmem:[%s18113_s25 + $0x3c8] sm:$0xff]  ;;  %v11703_v59 = vld [vmem:[%s18113_s25 + $0x3d8] sm:$0xff] }
 0xef0   : > { %3717 = vadd.xlane.f32.xlu1 %v3716_v1  ;;  %v11678_v1 = vld [vmem:[%s18113_s25 + $0x310] sm:$0xff] }
 0xf01   : > { %3555 = vrot.lane.b32.xlu1 %v3456_v61, %s18135_s1 }
 0xf79   : > { %v3552_v2 = vpop.xlane.xlu1 %3551 }
 0xf7a   : > { %15444 = vrcp.f32 %v3552_v2  ;;  %v11694_v2 = vld [vmem:[%s18113_s25 + $0x390] sm:$0xff] }
 0xf7d   : > { %v3718_v4 = vpop.xlane.xlu1 %3717 }
 0xf7e   : > { %15446 = vrcp.f32 %v3718_v4  ;;  %v14330_v4 = vpack.c.bf16 %v11694_v2, %v11678_v1  ;;  %v14352_v1 = vpack.c.bf16 %v11701_v39, %v11685_v57  ;;  %v11720_v39 = vld [vmem:[%s18122_s3 + $0x810] sm:$0xff] }
 0xf81   : > { %v3556_v5 = vpop.permute.xlu1 %3555 }
 0xf82   : > { %13731 = vmatpush3.msra.mxu1 %v3556_v5  ;;  %v11649_v5 = vld [vmem:[%s18113_s25 + $0x228] sm:$0xff] }
 0xf83   : > { %13740 = vmatprep.subr.mxu1 %v15606_v6 }
 0xf84   : > { %v15445_v7 = vpop.eup %15444 }
 0xf85   : > { %v3554_v10 = vmul.f32 %v15445_v7, %v15441_v28  ;;  %v11692_v28 = vld [vmem:[%s18113_s25 + $0x380] sm:$0xff]  ;;  %v11665_v7 = vld [vmem:[%s18113_s25 + $0x2a8] sm:$0xff] }
 0xf86   : > { %v14332_v31 = vpack.c.bf16 %v11665_v7, %v11649_v5  ;;  %v11702_v5 = vld [vmem:[%s18113_s25 + $0x3d0] sm:$0xff]  ;;  %v11657_v7 = vld [vmem:[%s18113_s25 + $0x268] sm:$0xff] }
 0xf87   : > { %13733 = vmatmul.mubr.msk.f32.vlgmr.msra.gmra.mrb[28].mxu1 %vm1347_vm3, %v3554_v10  ;;  %v11651_v10 = vld [vmem:[%s18113_s25 + $0x238] sm:$0xff] }
 0xf88   : > { %v15447_v15 = vpop.eup %15446  ;;  %13741 = vmatpush3.msra.mxu1 %v3722_v12  ;;  %13742 = vmatprep.mubr.msk.f32.mxu1 %vm15605_vm0, %v15606_v6  ;;  %v14340_v12 = vpack.c.bf16 %v11667_v11, %v11651_v10  ;;  %v11673_v10 = vld [vmem:[%s18113_s25 + $0x2e8] sm:$0xff]  ;;  %v11675_v11 = vld [vmem:[%s18113_s25 + $0x2f8] sm:$0xff] }
 0xf89   : > { %v3720_v17 = vmul.f32 %v15447_v15, %v15443_v0  ;;  %14313 = vmatprep.subr.bf16.mxu1 %v15604_v3  ;;  %v14322_v0 = vpack.c.bf16 %v11692_v28, %v11676_v62 }
 0xf8b   : > { %13743 = vmatmul.mubr.msk.f32.vlgmr.msra.gmra.mrb[30].mxu1 %vm1347_vm3, %v3720_v17 }
 0xf8c   : > { %14315 = vmatpush3.bf16.msra.mxu1 %v14314_v16  ;;  %13756 = vmatprep.mubr.msk.f32.mxu1 %vm15605_vm0, %v15606_v6 }
0x105a   : > { %v3627_v21 = vpop.f32.mrb[28].mxu1 }
0x105b   : > { %v13734_v22 = vpop.f32.mrb[29].mxu1  ;;  %13757 = vmatmul.mubr.msk.f32.vlgmr.msra.gmra.mrb[32].mxu1 %vm1271_vm2, %v3627_v21  ;;  %v11648_v21 = vld [vmem:[%s18113_s25 + $0x220] sm:$0xff] }
0x105c   : > { %4270 = vmatprep.mubr.f32.mxu1 %v15606_v6  ;;  %v11664_v22 = vld [vmem:[%s18113_s25 + $0x2a0] sm:$0xff] }
0x105e   : > { %v3793_v23 = vpop.f32.mrb[30].mxu1 }
0x105f   : > { %v13744_v24 = vpop.f32.mrb[31].mxu1  ;;  %13750 = vmatmul.mubr.msk.f32.vlgmr.msra.gmra.mrb[24].mxu0 %vm1271_vm2, %v3793_v23 }
0x1060   : > { %4199 = vmatprep.mubr.f32.mxu0 %v15606_v6  ;;  %14319 = vmatpush1.bf16.msra.mxu0 %v14318_v48  ;;  %v11650_v24 = vld [vmem:[%s18113_s25 + $0x230] sm:$0xff]  ;;  %v11668_v48 = vld [vmem:[%s18113_s25 + $0x2c0] sm:$0xff] }
0x1061   : > { %14321 = vmatprep.subr.bf16.mxu0 %v14320_v58  ;;  %v11687_v58 = vld [vmem:[%s18113_s25 + $0x358] sm:$0xff] }
0x1062   : > { %v14360_v2 = vpack.c.bf16 %v11703_v59, %v11687_v58  ;;  %v11721_v58 = vld [vmem:[%s18122_s3 + $0x818] sm:$0xff] }
0x1064   : > { %14323 = vmatpush1.bf16.msra.mxu0 %v14322_v0  ;;  %v11700_v0 = vld [vmem:[%s18113_s25 + $0x3c0] sm:$0xff] }
0x1065   : > { %14333 = vmatprep.subr.bf16.mxu0 %v14332_v31  ;;  %v11659_v31 = vld [vmem:[%s18113_s25 + $0x278] sm:$0xff] }
0x112e   : > { %v3939_v27 = vpop.f32.mrb[32].mxu1 }
0x112f   : > { %v13758_v34 = vpop.f32.mrb[33].mxu1 }
0x1130   : > { %v11681_v34 = vld [vmem:[%s18113_s25 + $0x328] sm:$0xff] }
0x1132   : > { %v3866_v13 = vpop.f32.mrb[24].mxu0 }
0x1133   : > { %v3940_v14 = vadd.f32 %v3939_v27, %v3866_v13  ;;  %v13751_v35 = vpop.f32.mrb[25].mxu0  ;;  %v11666_v27 = vld [vmem:[%s18113_s25 + $0x2b0] sm:$0xff]  ;;  %v11683_v13 = vld [vmem:[%s18113_s25 + $0x338] sm:$0xff] }
0x1135   : > { %v3949_v36 = vadd.f32 %v11639_v54, %v3940_v14  ;;  %v11697_v54 = vld [vmem:[%s18113_s25 + $0x3a8] sm:$0xff]  ;;  %v11699_v14 = vld [vmem:[%s18113_s25 + $0x3b8] sm:$0xff] }
0x1137   : > { %v3950_v60 = vadd.f32 %v3949_v36, %v16388_v26  ;;  %v11663_v26 = vld [vmem:[%s18113_s25 + $0x298] sm:$0xff]  ;;  %v14334_v36 = vpack.c.bf16 %v11664_v22, %v11648_v21  ;;  %v11674_v21 = vld [vmem:[%s18113_s25 + $0x2f0] sm:$0xff]  ;;  %v11689_v22 = vld [vmem:[%s18113_s25 + $0x368] sm:$0xff] }
0x1138   : > { %v14324_v47 = vpack.c.bf16 %v11663_v26, %v11647_v53  ;;  %v11669_v53 = vld [vmem:[%s18113_s25 + $0x2c8] sm:$0xff]  ;;  %v11671_v26 = vld [vmem:[%s18113_s25 + $0x2d8] sm:$0xff] }
0x1139   : > { %v3955_v9 = vsel %vm1189_vm1, %v3950_v60, 0.0  ;;  %v14348_v55 = vpack.c.bf16 %v11669_v53, %v11653_v44  ;;  %v14356_v49 = vpack.c.bf16 %v11671_v26, %v11655_v45  ;;  %v11718_v53 = vld [vmem:[%s18122_s3 + $0x800] sm:$0xff]  ;;  %v11719_v45 = vld [vmem:[%s18122_s3 + $0x808] sm:$0xff] }
0x113a   : > { %3956 = vadd.xlane.f32.xlu1 %v3955_v9  ;;  %14325 = vmatprep.subr.bf16.mxu1 %v14324_v47  ;;  %v11680_v9 = vld [vmem:[%s18113_s25 + $0x320] sm:$0xff] }
0x113b   : > { %14327 = vmatpush1.bf16.msra.mxu1 %v14326_v50  ;;  %v11652_v47 = vld [vmem:[%s18113_s25 + $0x240] sm:$0xff]  ;;  %v11654_v50 = vld [vmem:[%s18113_s25 + $0x250] sm:$0xff] }
0x113c   : > { %14329 = vmatprep.subr.bf16.mxu1 %v14328_v63  ;;  %v14350_v62 = vpack.c.bf16 %v11668_v48, %v11652_v47  ;;  %v14358_v28 = vpack.c.bf16 %v11670_v56, %v11654_v50  ;;  %v11684_v63 = vld [vmem:[%s18113_s25 + $0x340] sm:$0xff]  ;;  %v11751_v47 = vld [vmem:[%s18122_s3 + $0x908] sm:$0xff]  ;;  %v11736_v48 = vld [vmem:[%s18122_s3 + $0x890] sm:$0xff]  ;;  %v14382_v56 = vpack.c.bf16 %v11719_v45, %v11718_v53 }
0x113d   : > { %v11769_v50 = vld [vmem:[%s18122_s3 + $0x998] sm:$0xff]  ;;  %v11759_v53 = vld [vmem:[%s18122_s3 + $0x948] sm:$0xff]  ;;  %v11744_v45 = vld [vmem:[%s18122_s3 + $0x8d0] sm:$0xff] }
0x113f   : > { %14331 = vmatpush1.bf16.msra.mxu1 %v14330_v4  ;;  %v11686_v4 = vld [vmem:[%s18113_s25 + $0x350] sm:$0xff] }
0x1140   : > { %14341 = vmatprep.subr.bf16.mxu1 %v14340_v12  ;;  %v14354_v12 = vpack.c.bf16 %v11700_v0, %v11684_v63  ;;  %v11753_v63 = vld [vmem:[%s18122_s3 + $0x918] sm:$0xff]  ;;  %v11738_v0 = vld [vmem:[%s18122_s3 + $0x8a0] sm:$0xff] }
0x11c7   : > { %v3957_v37 = vpop.xlane.xlu1 %3956 }
0x11c8   : > { %v3958_v40 = vmul.f32 0.03125, %v3957_v37  ;;  %v11696_v37 = vld [vmem:[%s18113_s25 + $0x3a0] sm:$0xff] }
0x11c9   : > { %v14338_v38 = vpack.c.bf16 %v11696_v37, %v11680_v9  ;;  %v11706_v9 = vld [vmem:[%s18113_s25 + $0x3f0] sm:$0xff]  ;;  %v11734_v37 = vld [vmem:[%s18122_s3 + $0x880] sm:$0xff] }
0x11ca   : > { %v3959_v41 = vsub.f32 %v3950_v60, %v3958_v40  ;;  %v14342_v60 = vpack.c.bf16 %v11666_v27, %v11650_v24  ;;  %v11691_v24 = vld [vmem:[%s18113_s25 + $0x378] sm:$0xff] }
0x11cb   : > { %v11707_v27 = vld [vmem:[%s18113_s25 + $0x3f8] sm:$0xff] }
0x11cc   : > { %v3960_v61 = vmul.f32 %v3959_v41, %v3959_v41 }
0x11ce   : > { %v3961_v42 = vsel %vm1189_vm1, %v3960_v61, 0.0  ;;  %v14344_v61 = vpack.c.bf16 %v11699_v14, %v11683_v13  ;;  %v11688_v13 = vld [vmem:[%s18113_s25 + $0x360] sm:$0xff] }
0x11cf   : > { %3962 = vadd.xlane.f32.xlu0 %v3961_v42  ;;  %v11682_v42 = vld [vmem:[%s18113_s25 + $0x330] sm:$0xff]  ;;  %v11704_v14 = vld [vmem:[%s18113_s25 + $0x3e0] sm:$0xff] }
0x11d0   : > { %v14346_v46 = vpack.c.bf16 %v11698_v43, %v11682_v42  ;;  %v11767_v42 = vld [vmem:[%s18122_s3 + $0x988] sm:$0xff]  ;;  %v14370_v43 = vpack.c.bf16 %v11704_v14, %v11688_v13  ;;  %v11757_v13 = vld [vmem:[%s18122_s3 + $0x938] sm:$0xff]  ;;  %v11742_v14 = vld [vmem:[%s18122_s3 + $0x8c0] sm:$0xff] }
0x125c   : > { %v3963_v15 = vpop.xlane.xlu0 %3962 }
0x125d   : > { %v3964_v16 = vmul.f32 0.03125, %v3963_v15  ;;  %v14362_v15 = vpack.c.bf16 %v11702_v5, %v11686_v4  ;;  %v11771_v4 = vld [vmem:[%s18122_s3 + $0x9a8] sm:$0xff]  ;;  %v14386_v5 = vpack.c.bf16 %v11721_v58, %v11720_v39  ;;  %v11761_v39 = vld [vmem:[%s18122_s3 + $0x958] sm:$0xff]  ;;  %v11746_v58 = vld [vmem:[%s18122_s3 + $0x8e0] sm:$0xff] }
0x125f   : > { %v3965_v17 = vadd.f32 1e-05, %v3964_v16  ;;  %v11656_v16 = vld [vmem:[%s18113_s25 + $0x260] sm:$0xff] }
0x1261   : > { %15448 = vrsqrt.f32 %v3965_v17  ;;  %v11672_v17 = vld [vmem:[%s18113_s25 + $0x2e0] sm:$0xff] }
0x126b   : > { %v15449_v19 = vpop.eup %15448 }
0x126c   : > { %v3967_v23 = vmul.f32 %v15449_v19, %v3959_v41  ;;  %v14336_v41 = vpack.c.bf16 %v11697_v54, %v11681_v34  ;;  %v14372_v19 = vpack.c.bf16 %v11675_v11, %v11659_v31  ;;  %v14366_v34 = vpack.c.bf16 %v11672_v17, %v11656_v16  ;;  %v11723_v31 = vld [vmem:[%s18122_s3 + $0x828] sm:$0xff]  ;;  %v11740_v17 = vld [vmem:[%s18122_s3 + $0x8b0] sm:$0xff] }
0x126d   : > { %v11755_v16 = vld [vmem:[%s18122_s3 + $0x928] sm:$0xff] }
0x126e   : > { %v3974_v35 = vmul.f32 %v11642_v18, %v3967_v23  ;;  %v14364_v18 = vpack.c.bf16 %v11673_v10, %v11657_v7  ;;  %v11705_v23 = vld [vmem:[%s18113_s25 + $0x3e8] sm:$0xff]  ;;  %v11722_v10 = vld [vmem:[%s18122_s3 + $0x820] sm:$0xff] }
0x1270   : > { %v16466_v40 = vadd.f32 %v11643_v20, %v3974_v35  ;;  %v11658_v20 = vld [vmem:[%s18113_s25 + $0x270] sm:$0xff]  ;;  %v14368_v35 = vpack.c.bf16 %v11705_v23, %v11689_v22 }
0x1271   : > { %v14374_v54 = vpack.c.bf16 %v11674_v21, %v11658_v20  ;;  %v11773_v20 = vld [vmem:[%s18122_s3 + $0x9b8] sm:$0xff]  ;;  %v14390_v21 = vpack.c.bf16 %v11723_v31, %v11722_v10  ;;  %v11724_v23 = vld [vmem:[%s18122_s3 + $0x830] sm:$0xff]  ;;  %v11763_v10 = vld [vmem:[%s18122_s3 + $0x968] sm:$0xff] }
0x1272   : > { %11710 = vmatmul.mubr.msk.f32.vlgmr.msra.gmra.mrb[26].mxu0 %vm1189_vm1, %v16466_v40  ;;  %11711 = vmatmul.mubr.msk.f32.vlgmr.msra.gmra.mrb[34].mxu1 %vm1189_vm1, %v16466_v40 }
0x1273   : > { %14335 = vmatpush1.bf16.msra.mxu0 %v14334_v36  ;;  %14343 = vmatpush1.bf16.msra.mxu1 %v14342_v60  ;;  %v14376_v36 = vpack.c.bf16 %v11707_v27, %v11691_v24  ;;  %v11690_v60 = vld [vmem:[%s18113_s25 + $0x370] sm:$0xff]  ;;  %v11725_v24 = vld [vmem:[%s18122_s3 + $0x838] sm:$0xff]  ;;  %s18149_s25 = sld [smem:[#allocation26_spill]] }
0x1274   : > { %14337 = vmatprep.subr.bf16.mxu0 %v14336_v41  ;;  %14345 = vmatprep.subr.bf16.mxu1 %v14344_v61  ;;  %v11735_v41 = vld [vmem:[%s18122_s3 + $0x888] sm:$0xff]  ;;  %v11766_v61 = vld [vmem:[%s18122_s3 + $0x980] sm:$0xff]  ;;  %v14378_v44 = vpack.c.bf16 %v11706_v9, %v11690_v60  ;;  %v14394_v9 = vpack.c.bf16 %v11725_v24, %v11724_v23  ;;  %v11764_v23 = vld [vmem:[%s18122_s3 + $0x970] sm:$0xff] }
0x1275   : > { %4341 = vmatprep.mubr.f32.mxu0 %v15606_v6  ;;  %4412 = vmatprep.mubr.f32.mxu1 %v15606_v6  ;;  %v14380_v26 = vpack.c.bf16 %v11735_v41, %v11734_v37  ;;  %v11775_v60 = vld [vmem:[%s18122_s3 + $0x9c8] sm:$0xff]  ;;  %v11726_v41 = vld [vmem:[%s18122_s3 + $0x840] sm:$0xff]  ;;  %v11765_v24 = vld [vmem:[%s18122_s3 + $0x978] sm:$0xff] }
0x1277   : > { %14339 = vmatpush1.bf16.msra.mxu0 %v14338_v38  ;;  %14347 = vmatpush1.bf16.msra.mxu1 %v14346_v46  ;;  %v14412_v38 = vpack.c.bf16 %v11767_v42, %v11766_v61  ;;  %v11750_v46 = vld [vmem:[%s18122_s3 + $0x900] sm:$0xff]  ;;  %v11727_v61 = vld [vmem:[%s18122_s3 + $0x848] sm:$0xff] }
0x1278   : > { %14349 = vmatprep.subr.bf16.mxu0 %v14348_v55  ;;  %14357 = vmatprep.subr.bf16.mxu1 %v14356_v49  ;;  %v11737_v55 = vld [vmem:[%s18122_s3 + $0x898] sm:$0xff]  ;;  %v11768_v49 = vld [vmem:[%s18122_s3 + $0x990] sm:$0xff]  ;;  %v14414_v57 = vpack.c.bf16 %v11751_v47, %v11750_v46  ;;  %v14398_v47 = vpack.c.bf16 %v11727_v61, %v11726_v41 }
0x1279   : > { %v14384_v59 = vpack.c.bf16 %v11737_v55, %v11736_v48  ;;  %v11777_v46 = vld [vmem:[%s18122_s3 + $0x9d8] sm:$0xff]  ;;  %v11728_v55 = vld [vmem:[%s18122_s3 + $0x850] sm:$0xff] }
0x127a   : > { %11712 = vmatmul.mubr.msk.f32.vlgmr.msra.gmra.mrb[28].mxu0 %vm1189_vm1, %v16466_v40  ;;  %11713 = vmatmul.mubr.msk.f32.vlgmr.msra.gmra.mrb[36].mxu1 %vm1189_vm1, %v16466_v40 }
0x127b   : > { %14351 = vmatpush1.bf16.msra.mxu0 %v14350_v62  ;;  %14359 = vmatpush1.bf16.msra.mxu1 %v14358_v28  ;;  %v14416_v62 = vpack.c.bf16 %v11769_v50, %v11768_v49  ;;  %v11752_v28 = vld [vmem:[%s18122_s3 + $0x910] sm:$0xff]  ;;  %v11729_v49 = vld [vmem:[%s18122_s3 + $0x858] sm:$0xff] }
0x127c   : > { %14353 = vmatprep.subr.bf16.mxu0 %v14352_v1  ;;  %14361 = vmatprep.subr.bf16.mxu1 %v14360_v2  ;;  %v11739_v1 = vld [vmem:[%s18122_s3 + $0x8a8] sm:$0xff]  ;;  %v11770_v2 = vld [vmem:[%s18122_s3 + $0x9a0] sm:$0xff]  ;;  %v14418_v7 = vpack.c.bf16 %v11753_v63, %v11752_v28  ;;  %v14402_v63 = vpack.c.bf16 %v11729_v49, %v11728_v55  ;;  %v11800_v55 = vld [vmem:[%s18122_s3 + $0xa90] sm:$0xff] }
0x127d   : > { %4483 = vmatprep.mubr.f32.mxu0 %v15606_v6  ;;  %4554 = vmatprep.mubr.f32.mxu1 %v15606_v6  ;;  %v14388_v11 = vpack.c.bf16 %v11739_v1, %v11738_v0  ;;  %v11779_v28 = vld [vmem:[%s18122_s3 + $0x9e8] sm:$0xff]  ;;  %v11730_v1 = vld [vmem:[%s18122_s3 + $0x860] sm:$0xff] }
0x127f   : > { %14355 = vmatpush1.bf16.msra.mxu0 %v14354_v12  ;;  %14363 = vmatpush1.bf16.msra.mxu1 %v14362_v15  ;;  %v14420_v12 = vpack.c.bf16 %v11771_v4, %v11770_v2  ;;  %v11754_v15 = vld [vmem:[%s18122_s3 + $0x920] sm:$0xff] }
0x1280   : > { %14365 = vmatprep.subr.bf16.mxu0 %v14364_v18  ;;  %14373 = vmatprep.subr.bf16.mxu1 %v14372_v19  ;;  %v11741_v18 = vld [vmem:[%s18122_s3 + $0x8b8] sm:$0xff]  ;;  %v11772_v19 = vld [vmem:[%s18122_s3 + $0x9b0] sm:$0xff]  ;;  %v14422_v22 = vpack.c.bf16 %v11755_v16, %v11754_v15 }
0x1281   : > { %v14392_v27 = vpack.c.bf16 %v11741_v18, %v11740_v17  ;;  %v11749_v15 = vld [vmem:[%s18122_s3 + $0x8f8] sm:$0xff]  ;;  %v11780_v16 = vld [vmem:[%s18122_s3 + $0x9f0] sm:$0xff] }
0x1282   : > { %11714 = vmatmul.mubr.msk.f32.vlgmr.msra.gmra.mrb[30].mxu0 %vm1189_vm1, %v16466_v40  ;;  %11715 = vmatmul.mubr.msk.f32.vlgmr.msra.gmra.mrb[38].mxu1 %vm1189_vm1, %v16466_v40  ;;  %v11781_v18 = vld [vmem:[%s18122_s3 + $0x9f8] sm:$0xff] }
0x1283   : > { %14367 = vmatpush1.bf16.msra.mxu0 %v14366_v34  ;;  %14375 = vmatpush1.bf16.msra.mxu1 %v14374_v54  ;;  %v14424_v34 = vpack.c.bf16 %v11773_v20, %v11772_v19  ;;  %v11756_v54 = vld [vmem:[%s18122_s3 + $0x930] sm:$0xff]  ;;  %v11733_v20 = vld [vmem:[%s18122_s3 + $0x878] sm:$0xff] }
0x1284   : > { %14369 = vmatprep.subr.bf16.mxu0 %v14368_v35  ;;  %14377 = vmatprep.subr.bf16.mxu1 %v14376_v36  ;;  %v11743_v35 = vld [vmem:[%s18122_s3 + $0x8c8] sm:$0xff]  ;;  %v11774_v36 = vld [vmem:[%s18122_s3 + $0x9c0] sm:$0xff]  ;;  %v14426_v37 = vpack.c.bf16 %v11757_v13, %v11756_v54  ;;  %v11732_v19 = vld [vmem:[%s18122_s3 + $0x870] sm:$0xff] }
0x1285   : > { %4625 = vmatprep.mubr.f32.mxu0 %v15606_v6  ;;  %4696 = vmatprep.mubr.f32.mxu1 %v15606_v6  ;;  %v14396_v42 = vpack.c.bf16 %v11743_v35, %v11742_v14  ;;  %v11799_v54 = vld [vmem:[%s18122_s3 + $0xa88] sm:$0xff]  ;;  %v11830_v13 = vld [vmem:[%s18122_s3 + $0xb80] sm:$0xff] }
0x1286   : > { %v11831_v35 = vld [vmem:[%s18122_s3 + $0xb88] sm:$0xff] }
0x1287   : > { %14371 = vmatpush1.bf16.msra.mxu0 %v14370_v43  ;;  %14379 = vmatpush1.bf16.msra.mxu1 %v14378_v44  ;;  %v14428_v43 = vpack.c.bf16 %v11775_v60, %v11774_v36  ;;  %v11758_v44 = vld [vmem:[%s18122_s3 + $0x940] sm:$0xff]  ;;  %v14476_v36 = vpack.c.bf16 %v11831_v35, %v11830_v13  ;;  %v16593_v60 = vld [vmem:[%s18112_s29 + $0x10] sm:$0xff] }
0x1288   : > { %14381 = vmatprep.subr.bf16.mxu0 %v14380_v26  ;;  %14413 = vmatprep.subr.bf16.mxu1 %v14412_v38  ;;  %v11745_v26 = vld [vmem:[%s18122_s3 + $0x8d8] sm:$0xff]  ;;  %v11776_v38 = vld [vmem:[%s18122_s3 + $0x9d0] sm:$0xff]  ;;  %v14430_v48 = vpack.c.bf16 %v11759_v53, %v11758_v44  ;;  %v4059_v41 = vrot.slane %v16593_v60, %v16100_v32  ;;  %v4067_v61 = vrot.slane %v16593_v60, %v16103_v33  ;;  %v11782_v44 = vld [vmem:[%s18122_s3 + $0xa00] sm:$0xff] }
0x1289   : > { %v14400_v50 = vpack.c.bf16 %v11745_v26, %v11744_v45  ;;  %v11783_v53 = vld [vmem:[%s18122_s3 + $0xa08] sm:$0xff]  ;;  %v11818_v13 = vld [vmem:[%s18122_s3 + $0xb20] sm:$0xff]  ;;  %v11804_v35 = vld [vmem:[%s18122_s3 + $0xab0] sm:$0xff] }
0x128a   : > { %11716 = vmatmul.mubr.msk.f32.vlgmr.msra.gmra.mrb[32].mxu0 %vm1189_vm1, %v16466_v40  ;;  %11717 = vmatmul.mubr.msk.f32.vlgmr.msra.gmra.mrb[40].mxu1 %vm1189_vm1, %v16466_v40 }
0x128b   : > { %14383 = vmatpush3.bf16.msra.mxu0 %v14382_v56  ;;  %14415 = vmatpush3.bf16.msra.mxu1 %v14414_v57  ;;  %v14432_v56 = vpack.c.bf16 %v11777_v46, %v11776_v38  ;;  %v11760_v57 = vld [vmem:[%s18122_s3 + $0x950] sm:$0xff] }
0x128c   : > { %14385 = vmatprep.subr.bf16.mxu0 %v14384_v59  ;;  %14417 = vmatprep.subr.bf16.mxu1 %v14416_v62  ;;  %v11747_v59 = vld [vmem:[%s18122_s3 + $0x8e8] sm:$0xff]  ;;  %v11778_v62 = vld [vmem:[%s18122_s3 + $0x9e0] sm:$0xff]  ;;  %v14434_v0 = vpack.c.bf16 %v11761_v39, %v11760_v57  ;;  %v11832_v57 = vld [vmem:[%s18122_s3 + $0xb90] sm:$0xff] }
0x128d   : > { %v14404_v2 = vpack.c.bf16 %v11747_v59, %v11746_v58  ;;  %v14436_v4 = vpack.c.bf16 %v11779_v28, %v11778_v62  ;;  %v11833_v39 = vld [vmem:[%s18122_s3 + $0xb98] sm:$0xff]  ;;  %v14446_v62 = vpack.c.bf16 %v11783_v53, %v11782_v44 }
0x128f   : > { %14387 = vmatpush3.bf16.msra.mxu0 %v14386_v5  ;;  %14419 = vmatpush3.bf16.msra.mxu1 %v14418_v7  ;;  %v11731_v5 = vld [vmem:[%s18122_s3 + $0x868] sm:$0xff]  ;;  %v11762_v7 = vld [vmem:[%s18122_s3 + $0x960] sm:$0xff] }
0x1290   : > { %14389 = vmatprep.subr.bf16.mxu0 %v14388_v11  ;;  %14421 = vmatprep.subr.bf16.mxu1 %v14420_v12  ;;  %v14406_v31 = vpack.c.bf16 %v11731_v5, %v11730_v1  ;;  %v14438_v11 = vpack.c.bf16 %v11763_v10, %v11762_v7  ;;  %v11748_v12 = vld [vmem:[%s18122_s3 + $0x8f0] sm:$0xff]  ;;  %v14480_v5 = vpack.c.bf16 %v11833_v39, %v11832_v57  ;;  %v11817_v10 = vld [vmem:[%s18122_s3 + $0xb18] sm:$0xff] }
0x1291   : > { %v14408_v17 = vpack.c.bf16 %v11749_v15, %v11748_v12  ;;  %v11816_v7 = vld [vmem:[%s18122_s3 + $0xb10] sm:$0xff]  ;;  %v4083_v12 = vrot.slane %v16593_v60, %v16122_v52  ;;  %v11803_v15 = vld [vmem:[%s18122_s3 + $0xaa8] sm:$0xff] }
0x1293   : > { %14391 = vmatpush3.bf16.msra.mxu0 %v14390_v21  ;;  %14423 = vmatpush3.bf16.msra.mxu1 %v14422_v22  ;;  %v14440_v21 = vpack.c.bf16 %v11781_v18, %v11780_v16  ;;  %v14410_v22 = vpack.c.bf16 %v11733_v20, %v11732_v19  ;;  %v11834_v16 = vld [vmem:[%s18122_s3 + $0xba0] sm:$0xff] }
0x1294   : > { %14393 = vmatprep.subr.bf16.mxu0 %v14392_v27  ;;  %14425 = vmatprep.subr.bf16.mxu1 %v14424_v34  ;;  %v14442_v27 = vpack.c.bf16 %v11765_v24, %v11764_v23  ;;  %v11798_v34 = vld [vmem:[%s18122_s3 + $0xa80] sm:$0xff]  ;;  %v11787_v23 = vld [vmem:[%s18122_s3 + $0xa28] sm:$0xff] }
0x1295   : > { %v14444_v14 = vpack.c.bf16 %v11799_v54, %v11798_v34 }
0x1297   : > { %14395 = vmatpush3.bf16.msra.mxu0 %v14394_v9  ;;  %14427 = vmatpush3.bf16.msra.mxu1 %v14426_v37  ;;  %v4055_v9 = vrot.slane %v16593_v60, %v16091_v29  ;;  %v4063_v37 = vrot.slane %v16593_v60, %v16094_v30 }
0x1298   : > { %14397 = vmatprep.subr.bf16.mxu0 %v14396_v42  ;;  %14429 = vmatprep.subr.bf16.mxu1 %v14428_v43 }
0x129b   : > { %14399 = vmatpush3.bf16.msra.mxu0 %v14398_v47  ;;  %14431 = vmatpush3.bf16.msra.mxu1 %v14430_v48  ;;  %v11814_v47 = vld [vmem:[%s18122_s3 + $0xb00] sm:$0xff]  ;;  %v11815_v48 = vld [vmem:[%s18122_s3 + $0xb08] sm:$0xff] }
0x129c   : > { %14401 = vmatprep.subr.bf16.mxu0 %v14400_v50  ;;  %14433 = vmatprep.subr.bf16.mxu1 %v14432_v56  ;;  %v11801_v56 = vld [vmem:[%s18122_s3 + $0xa98] sm:$0xff]  ;;  %v14478_v28 = vpack.c.bf16 %v11815_v48, %v11814_v47  ;;  %v11820_v47 = vld [vmem:[%s18122_s3 + $0xb30] sm:$0xff] }
0x129d   : > { %v11821_v48 = vld [vmem:[%s18122_s3 + $0xb38] sm:$0xff] }
0x129f   : > { %14403 = vmatpush3.bf16.msra.mxu0 %v14402_v63  ;;  %14435 = vmatpush3.bf16.msra.mxu1 %v14434_v0  ;;  %v11784_v63 = vld [vmem:[%s18122_s3 + $0xa10] sm:$0xff]  ;;  %v11785_v0 = vld [vmem:[%s18122_s3 + $0xa18] sm:$0xff] }
0x12a0   : > { %14405 = vmatprep.subr.bf16.mxu0 %v14404_v2  ;;  %14437 = vmatprep.subr.bf16.mxu1 %v14436_v4  ;;  %v14448_v4 = vpack.c.bf16 %v11801_v56, %v11800_v55  ;;  %v14450_v20 = vpack.c.bf16 %v11785_v0, %v11784_v63  ;;  %v11806_v55 = vld [vmem:[%s18122_s3 + $0xac0] sm:$0xff]  ;;  %v11839_v56 = vld [vmem:[%s18122_s3 + $0xbc8] sm:$0xff] }
0x12a3   : > { %14407 = vmatpush3.bf16.msra.mxu0 %v14406_v31  ;;  %14439 = vmatpush3.bf16.msra.mxu1 %v14438_v11  ;;  %v11802_v31 = vld [vmem:[%s18122_s3 + $0xaa0] sm:$0xff]  ;;  %v4075_v11 = vrot.slane %v16593_v60, %v16119_v51 }
0x12a4   : > { %14409 = vmatprep.subr.bf16.mxu0 %v14408_v17  ;;  %14441 = vmatprep.subr.bf16.mxu1 %v14440_v21  ;;  %v11835_v17 = vld [vmem:[%s18122_s3 + $0xba8] sm:$0xff]  ;;  %v14482_v21 = vpack.c.bf16 %v11817_v10, %v11816_v7  ;;  %v14452_v34 = vpack.c.bf16 %v11803_v15, %v11802_v31  ;;  %v11808_v7 = vld [vmem:[%s18122_s3 + $0xad0] sm:$0xff]  ;;  %v11809_v10 = vld [vmem:[%s18122_s3 + $0xad8] sm:$0xff] }
0x12a5   : > { %v14484_v54 = vpack.c.bf16 %v11835_v17, %v11834_v16  ;;  %v11840_v31 = vld [vmem:[%s18122_s3 + $0xbd0] sm:$0xff] }
0x12a6   : > { %v11792_v17 = vld [vmem:[%s18122_s3 + $0xa50] sm:$0xff] }
0x12a7   : > { %14411 = vmatpush3.bf16.msra.mxu0 %v14410_v22  ;;  %14443 = vmatpush3.bf16.msra.mxu1 %v14442_v27  ;;  %v11786_v22 = vld [vmem:[%s18122_s3 + $0xa20] sm:$0xff] }
0x12a8   : > { %14445 = vmatprep.subr.bf16.mxu0 %v14444_v14  ;;  %14477 = vmatprep.subr.bf16.mxu1 %v14476_v36  ;;  %v11819_v14 = vld [vmem:[%s18122_s3 + $0xb28] sm:$0xff]  ;;  %v14454_v44 = vpack.c.bf16 %v11787_v23, %v11786_v22  ;;  %v14464_v22 = vpack.c.bf16 %v11809_v10, %v11808_v7 }
0x12a9   : > { %v14486_v53 = vpack.c.bf16 %v11819_v14, %v11818_v13  ;;  %v11842_v13 = vld [vmem:[%s18122_s3 + $0xbe0] sm:$0xff]  ;;  %v11843_v14 = vld [vmem:[%s18122_s3 + $0xbe8] sm:$0xff] }
0x12aa   : > { %v11863_v7 = vld [vmem:[%s18122_s3 + $0xc88] sm:$0xff] }
0x1345   : > { %v4201_v42 = vpop.f32.mrb[26].mxu0  ;;  %v4272_v43 = vpop.f32.mrb[34].mxu1 }
0x1346   : > { %v4202_v45 = vadd.f32 %v4201_v42, %v4055_v9  ;;  %v4273_v26 = vadd.f32 %v4272_v43, %v4063_v37  ;;  %v4203_v38 = vpop.f32.mrb[27].mxu0  ;;  %v4274_v46 = vpop.f32.mrb[35].mxu1  ;;  %v11805_v37 = vld [vmem:[%s18122_s3 + $0xab8] sm:$0xff] }
0x1347   : > { %v4204_v49 = vadd.f32 %v4203_v38, %v4059_v41  ;;  %v4275_v50 = vadd.f32 %v4274_v46, %v4067_v61  ;;  %v11836_v41 = vld [vmem:[%s18122_s3 + $0xbb0] sm:$0xff]  ;;  %v11837_v61 = vld [vmem:[%s18122_s3 + $0xbb8] sm:$0xff]  ;;  %v14456_v38 = vpack.c.bf16 %v11805_v37, %v11804_v35 }
0x1348   : > { %v4703_v1 = vmax.f32 %v4202_v45, 0.0  ;;  %v4705_v2 = vmax.f32 %v4273_v26, 0.0  ;;  %v11788_v45 = vld [vmem:[%s18122_s3 + $0xa30] sm:$0xff]  ;;  %v11789_v26 = vld [vmem:[%s18122_s3 + $0xa38] sm:$0xff]  ;;  %v14488_v46 = vpack.c.bf16 %v11837_v61, %v11836_v41  ;;  %v11794_v41 = vld [vmem:[%s18122_s3 + $0xa60] sm:$0xff] }
0x1349   : > { %v4704_v58 = vmax.f32 %v4204_v49, 0.0  ;;  %v4706_v59 = vmax.f32 %v4275_v50, 0.0  ;;  %v11807_v49 = vld [vmem:[%s18122_s3 + $0xac8] sm:$0xff]  ;;  %v11838_v50 = vld [vmem:[%s18122_s3 + $0xbc0] sm:$0xff] }
0x134a   : > { %v11795_v61 = vld [vmem:[%s18122_s3 + $0xa68] sm:$0xff] }
0x134b   : > { %5048 = vmatprep.mubr.f32.mxu0 %v4704_v58  ;;  %5118 = vmatprep.mubr.f32.mxu1 %v4706_v59  ;;  %v14458_v58 = vpack.c.bf16 %v11789_v26, %v11788_v45  ;;  %v14490_v59 = vpack.c.bf16 %v11821_v48, %v11820_v47  ;;  %v14500_v45 = vpack.c.bf16 %v11843_v14, %v11842_v13  ;;  %v11826_v26 = vld [vmem:[%s18122_s3 + $0xb60] sm:$0xff]  ;;  %v11813_v47 = vld [vmem:[%s18122_s3 + $0xaf8] sm:$0xff]  ;;  %v11844_v48 = vld [vmem:[%s18122_s3 + $0xbf0] sm:$0xff] }
0x134c   : > { %5049 = vmatmul.mubr.f32.vlgmr.msra.gmra.mrb[34].mxu0 %v4703_v1  ;;  %5119 = vmatmul.mubr.f32.vlgmr.msra.gmra.mrb[42].mxu1 %v4705_v2  ;;  %v14460_v1 = vpack.c.bf16 %v11807_v49, %v11806_v55  ;;  %v14492_v2 = vpack.c.bf16 %v11839_v56, %v11838_v50  ;;  %v11845_v55 = vld [vmem:[%s18122_s3 + $0xbf8] sm:$0xff]  ;;  %v4071_v49 = vrot.slane %v16593_v60, %v16192_v25  ;;  %v11864_v13 = vld [vmem:[%s18122_s3 + $0xc90] sm:$0xff] }
0x134d   : > { %v16623_v18 = vpop.f32.mrb[28].mxu0  ;;  %v16625_v19 = vpop.f32.mrb[36].mxu1  ;;  %14447 = vmatpush3.bf16.msra.mxu0 %v14446_v62  ;;  %14479 = vmatpush3.bf16.msra.mxu1 %v14478_v28  ;;  %v11790_v62 = vld [vmem:[%s18122_s3 + $0xa40] sm:$0xff]  ;;  %v11791_v28 = vld [vmem:[%s18122_s3 + $0xa48] sm:$0xff]  ;;  %v14470_v50 = vpack.c.bf16 %v11795_v61, %v11794_v41  ;;  %v11848_v61 = vld [vmem:[%s18122_s3 + $0xc10] sm:$0xff] }
0x134e   : > { %v4345_v24 = vpop.f32.mrb[29].mxu0  ;;  %v4416_v27 = vpop.f32.mrb[37].mxu1  ;;  %14449 = vmatprep.subr.bf16.mxu0 %v14448_v4  ;;  %14481 = vmatprep.subr.bf16.mxu1 %v14480_v5  ;;  %v11822_v4 = vld [vmem:[%s18122_s3 + $0xb40] sm:$0xff]  ;;  %v11823_v5 = vld [vmem:[%s18122_s3 + $0xb48] sm:$0xff]  ;;  %v14462_v15 = vpack.c.bf16 %v11791_v28, %v11790_v62  ;;  %v11828_v62 = vld [vmem:[%s18122_s3 + $0xb70] sm:$0xff]  ;;  %v4079_v28 = vrot.slane %v16593_v60, %v16176_v8 }
0x134f   : > { %v4346_v36 = vadd.f32 %v4345_v24, %v4075_v11  ;;  %v4417_v9 = vadd.f32 %v4416_v27, %v4083_v12  ;;  %v11841_v11 = vld [vmem:[%s18122_s3 + $0xbd8] sm:$0xff]  ;;  %v14494_v16 = vpack.c.bf16 %v11823_v5, %v11822_v4  ;;  %v11824_v24 = vld [vmem:[%s18122_s3 + $0xb50] sm:$0xff]  ;;  %v11862_v5 = vld [vmem:[%s18122_s3 + $0xc80] sm:$0xff] }
0x1350   : > { %v16660_v12 = vld [vmem:[%s18112_s29 + $0x18] sm:$0xff]  ;;  %v14496_v23 = vpack.c.bf16 %v11841_v11, %v11840_v31  ;;  %v11894_v31 = vld [vmem:[%s18122_s3 + $0xd80] sm:$0xff]  ;;  %v11895_v11 = vld [vmem:[%s18122_s3 + $0xd88] sm:$0xff]  ;;  %s18150_s29 = sld [smem:[#allocation27_spill]] }
0x1351   : > { %v4708_v42 = vmax.f32 %v4346_v36, 0.0  ;;  %v4710_v43 = vmax.f32 %v4417_v9, 0.0  ;;  %14451 = vmatpush3.bf16.msra.mxu0 %v14450_v20  ;;  %14483 = vmatpush3.bf16.msra.mxu1 %v14482_v21  ;;  %v11793_v20 = vld [vmem:[%s18122_s3 + $0xa58] sm:$0xff]  ;;  %v4111_v21 = vrot.slane %v16660_v12, %v16176_v8  ;;  %v4091_v10 = vrot.slane %v16660_v12, %v16100_v32 }
0x1352   : > { %14453 = vmatprep.subr.bf16.mxu0 %v14452_v34  ;;  %14485 = vmatprep.subr.bf16.mxu1 %v14484_v54  ;;  %v11825_v27 = vld [vmem:[%s18122_s3 + $0xb58] sm:$0xff]  ;;  %v11810_v34 = vld [vmem:[%s18122_s3 + $0xae0] sm:$0xff]  ;;  %v11811_v54 = vld [vmem:[%s18122_s3 + $0xae8] sm:$0xff]  ;;  %v14466_v9 = vpack.c.bf16 %v11793_v20, %v11792_v17  ;;  %v14508_v17 = vpack.c.bf16 %v11863_v7, %v11862_v5  ;;  %v4344_v20 = vadd.f32 %v16623_v18, %v4071_v49 }
0x1353   : > { %5188 = vmatprep.mubr.f32.mxu0 %v4708_v42  ;;  %5258 = vmatprep.mubr.f32.mxu1 %v4710_v43  ;;  %v14498_v37 = vpack.c.bf16 %v11825_v27, %v11824_v24  ;;  %v11829_v4 = vld [vmem:[%s18122_s3 + $0xb78] sm:$0xff]  ;;  %v11847_v24 = vld [vmem:[%s18122_s3 + $0xc08] sm:$0xff]  ;;  %v11898_v49 = vld [vmem:[%s18122_s3 + $0xda0] sm:$0xff] }
0x1354   : > { %v11897_v18 = vld [vmem:[%s18122_s3 + $0xd98] sm:$0xff]  ;;  %v11868_v5 = vld [vmem:[%s18122_s3 + $0xcb0] sm:$0xff] }
0x1355   : > { %v16643_v57 = vpop.f32.mrb[30].mxu0  ;;  %v16645_v39 = vpop.f32.mrb[38].mxu1  ;;  %14455 = vmatpush3.bf16.msra.mxu0 %v14454_v44  ;;  %14487 = vmatpush3.bf16.msra.mxu1 %v14486_v53  ;;  %v14468_v53 = vpack.c.bf16 %v11811_v54, %v11810_v34  ;;  %v11878_v34 = vld [vmem:[%s18122_s3 + $0xd00] sm:$0xff]  ;;  %v11879_v54 = vld [vmem:[%s18122_s3 + $0xd08] sm:$0xff]  ;;  %v11869_v7 = vld [vmem:[%s18122_s3 + $0xcb8] sm:$0xff] }
0x1356   : > { %v16649_v63 = vpop.f32.mrb[31].mxu0  ;;  %v16651_v0 = vpop.f32.mrb[39].mxu1  ;;  %14457 = vmatprep.subr.bf16.mxu0 %v14456_v38  ;;  %14489 = vmatprep.subr.bf16.mxu1 %v14488_v46  ;;  %v11827_v38 = vld [vmem:[%s18122_s3 + $0xb68] sm:$0xff]  ;;  %v11812_v46 = vld [vmem:[%s18122_s3 + $0xaf0] sm:$0xff] }
0x1357   : > { %v14502_v56 = vpack.c.bf16 %v11827_v38, %v11826_v26  ;;  %v4488_v27 = vadd.f32 %v16649_v63, %v4091_v10  ;;  %v14542_v63 = vpack.c.bf16 %v11879_v54, %v11878_v34  ;;  %v11900_v10 = vld [vmem:[%s18122_s3 + $0xdb0] sm:$0xff]  ;;  %v11903_v34 = vld [vmem:[%s18122_s3 + $0xdc8] sm:$0xff] }
0x1359   : > { %14459 = vmatpush3.bf16.msra.mxu0 %v14458_v58  ;;  %14491 = vmatpush3.bf16.msra.mxu1 %v14490_v59  ;;  %v11796_v58 = vld [vmem:[%s18122_s3 + $0xa70] sm:$0xff]  ;;  %v11797_v59 = vld [vmem:[%s18122_s3 + $0xa78] sm:$0xff] }
0x135a   : > { %14461 = vmatprep.subr.bf16.mxu0 %v14460_v1  ;;  %14493 = vmatprep.subr.bf16.mxu1 %v14492_v2  ;;  %v14472_v1 = vpack.c.bf16 %v11813_v47, %v11812_v46  ;;  %v14504_v2 = vpack.c.bf16 %v11845_v55, %v11844_v48  ;;  %v14474_v60 = vpack.c.bf16 %v11797_v59, %v11796_v58  ;;  %v11881_v46 = vld [vmem:[%s18122_s3 + $0xd18] sm:$0xff]  ;;  %v11866_v47 = vld [vmem:[%s18122_s3 + $0xca0] sm:$0xff]  ;;  %v11867_v48 = vld [vmem:[%s18122_s3 + $0xca8] sm:$0xff] }
0x135b   : > { %v14516_v59 = vpack.c.bf16 %v11867_v48, %v11866_v47  ;;  %v11888_v47 = vld [vmem:[%s18122_s3 + $0xd50] sm:$0xff] }
0x135d   : > { %v16672_v35 = vpop.f32.mrb[32].mxu0  ;;  %v4698_v36 = vpop.f32.mrb[40].mxu1  ;;  %14463 = vmatpush3.bf16.msra.mxu0 %v14462_v15  ;;  %14495 = vmatpush3.bf16.msra.mxu1 %v14494_v16  ;;  %v4099_v15 = vrot.slane %v16660_v12, %v16103_v33  ;;  %v14506_v16 = vpack.c.bf16 %v11829_v4, %v11828_v62  ;;  %v11850_v62 = vld [vmem:[%s18122_s3 + $0xc20] sm:$0xff]  ;;  %v11883_v4 = vld [vmem:[%s18122_s3 + $0xd28] sm:$0xff] }
0x135e   : > { %v16676_v42 = vadd.f32 %v4698_v36, %v4111_v21  ;;  %v16678_v43 = vpop.f32.mrb[33].mxu0  ;;  %v16680_v44 = vpop.f32.mrb[41].mxu1  ;;  %14465 = vmatprep.subr.bf16.mxu0 %v14464_v22  ;;  %14497 = vmatprep.subr.bf16.mxu1 %v14496_v23  ;;  %v4415_v21 = vadd.f32 %v16625_v19, %v4079_v28  ;;  %v14540_v22 = vpack.c.bf16 %v11895_v11, %v11894_v31  ;;  %v11846_v23 = vld [vmem:[%s18122_s3 + $0xc00] sm:$0xff]  ;;  %v11865_v36 = vld [vmem:[%s18122_s3 + $0xc98] sm:$0xff]  ;;  %v11851_v28 = vld [vmem:[%s18122_s3 + $0xc28] sm:$0xff] }
0x135f   : > { %v4559_v14 = vadd.f32 %v16651_v0, %v4099_v15  ;;  %v14510_v19 = vpack.c.bf16 %v11847_v24, %v11846_v23  ;;  %v4712_v0 = vmax.f32 %v4488_v27, 0.0  ;;  %v14512_v26 = vpack.c.bf16 %v11865_v36, %v11864_v13  ;;  %v11901_v31 = vld [vmem:[%s18122_s3 + $0xdb8] sm:$0xff]  ;;  %v11870_v23 = vld [vmem:[%s18122_s3 + $0xcc0] sm:$0xff]  ;;  %v11871_v24 = vld [vmem:[%s18122_s3 + $0xcc8] sm:$0xff] }
0x1360   : > { %v4709_v41 = vmax.f32 %v4415_v21, 0.0  ;;  %v14518_v11 = vpack.c.bf16 %v11851_v28, %v11850_v62  ;;  %v14552_v21 = vpack.c.bf16 %v11901_v31, %v11900_v10  ;;  %v11902_v27 = vld [vmem:[%s18122_s3 + $0xdc0] sm:$0xff]  ;;  %v11876_v10 = vld [vmem:[%s18122_s3 + $0xcf0] sm:$0xff]  ;;  %v11877_v31 = vld [vmem:[%s18122_s3 + $0xcf8] sm:$0xff] }
0x1361   : > { %14467 = vmatpush3.bf16.msra.mxu0 %v14466_v9  ;;  %14499 = vmatpush3.bf16.msra.mxu1 %v14498_v37  ;;  %v11896_v9 = vld [vmem:[%s18122_s3 + $0xd90] sm:$0xff]  ;;  %v4707_v37 = vmax.f32 %v4344_v20, 0.0  ;;  %v4714_v55 = vmax.f32 %v4559_v14, 0.0  ;;  %v14524_v14 = vpack.c.bf16 %v11871_v24, %v11870_v23  ;;  %v11854_v36 = vld [vmem:[%s18122_s3 + $0xc40] sm:$0xff]  ;;  %v4095_v24 = vrot.slane %v16660_v12, %v16094_v30 }
0x1362   : > { %14469 = vmatprep.subr.bf16.mxu0 %v14468_v53  ;;  %14501 = vmatprep.subr.bf16.mxu1 %v14500_v45  ;;  %v11849_v53 = vld [vmem:[%s18122_s3 + $0xc18] sm:$0xff]  ;;  %v11880_v45 = vld [vmem:[%s18122_s3 + $0xd10] sm:$0xff]  ;;  %v14544_v38 = vpack.c.bf16 %v11897_v18, %v11896_v9  ;;  %v11855_v9 = vld [vmem:[%s18122_s3 + $0xc48] sm:$0xff] }
0x1363   : > { %v14546_v58 = vpack.c.bf16 %v11881_v46, %v11880_v45  ;;  %v11884_v20 = vld [vmem:[%s18122_s3 + $0xd30] sm:$0xff]  ;;  %v11886_v18 = vld [vmem:[%s18122_s3 + $0xd40] sm:$0xff]  ;;  %v14526_v45 = vpack.c.bf16 %v11855_v9, %v11854_v36  ;;  %v11857_v46 = vld [vmem:[%s18122_s3 + $0xc58] sm:$0xff] }
0x1364   : > { %v11892_v23 = vld [vmem:[%s18122_s3 + $0xd70] sm:$0xff]  ;;  %v11958_v36 = vld [vmem:[%s18122_s3 + $0xf80] sm:$0xff]  ;;  %v11959_v9 = vld [vmem:[%s18122_s3 + $0xf88] sm:$0xff] }
0x1365   : > { %14471 = vmatpush3.bf16.msra.mxu0 %v14470_v50  ;;  %14503 = vmatpush3.bf16.msra.mxu1 %v14502_v56  ;;  %v11899_v50 = vld [vmem:[%s18122_s3 + $0xda8] sm:$0xff]  ;;  %v14514_v56 = vpack.c.bf16 %v11849_v53, %v11848_v61  ;;  %v11904_v61 = vld [vmem:[%s18122_s3 + $0xdd0] sm:$0xff]  ;;  %v11905_v53 = vld [vmem:[%s18122_s3 + $0xdd8] sm:$0xff] }
0x1366   : > { %14473 = vmatprep.subr.bf16.mxu0 %v14472_v1  ;;  %14505 = vmatprep.subr.bf16.mxu1 %v14504_v2  ;;  %v11882_v1 = vld [vmem:[%s18122_s3 + $0xd20] sm:$0xff]  ;;  %v14548_v2 = vpack.c.bf16 %v11899_v50, %v11898_v49  ;;  %v14560_v48 = vpack.c.bf16 %v11905_v53, %v11904_v61  ;;  %v11875_v50 = vld [vmem:[%s18122_s3 + $0xce8] sm:$0xff] }
0x1367   : > { %v14550_v15 = vpack.c.bf16 %v11883_v4, %v11882_v1  ;;  %v11874_v49 = vld [vmem:[%s18122_s3 + $0xce0] sm:$0xff]  ;;  %v11911_v53 = vld [vmem:[%s18122_s3 + $0xe08] sm:$0xff] }
0x1368   : > { %v14532_v28 = vpack.c.bf16 %v11875_v50, %v11874_v49  ;;  %v11858_v1 = vld [vmem:[%s18122_s3 + $0xc60] sm:$0xff]  ;;  %v11960_v49 = vld [vmem:[%s18122_s3 + $0xf90] sm:$0xff] }
0x1369   : > { %14475 = vmatpush3.bf16.msra.mxu0 %v14474_v60  ;;  %14507 = vmatpush3.bf16.msra.mxu1 %v14506_v16  ;;  %v14520_v60 = vpack.c.bf16 %v11869_v7, %v11868_v5  ;;  %v11852_v16 = vld [vmem:[%s18122_s3 + $0xc30] sm:$0xff]  ;;  %v11890_v4 = vld [vmem:[%s18122_s3 + $0xd60] sm:$0xff]  ;;  %v11891_v7 = vld [vmem:[%s18122_s3 + $0xd68] sm:$0xff] }
0x136a   : > { %14509 = vmatprep.subr.bf16.mxu0 %v14508_v17  ;;  %14541 = vmatprep.subr.bf16.mxu1 %v14540_v22  ;;  %v11853_v17 = vld [vmem:[%s18122_s3 + $0xc38] sm:$0xff]  ;;  %v11910_v61 = vld [vmem:[%s18122_s3 + $0xe00] sm:$0xff] }
0x136b   : > { %v11885_v22 = vld [vmem:[%s18122_s3 + $0xd38] sm:$0xff]  ;;  %v14522_v54 = vpack.c.bf16 %v11853_v17, %v11852_v16  ;;  %v4087_v16 = vrot.slane %v16660_v12, %v16091_v29  ;;  %v14566_v17 = vpack.c.bf16 %v11891_v7, %v11890_v4  ;;  %v11962_v7 = vld [vmem:[%s18122_s3 + $0xfa0] sm:$0xff] }
0x136c   : > { %5189 = vmatmul.mubr.f32.vlgmr.msra.gmra.mrb[36].mxu0 %v4707_v37  ;;  %5259 = vmatmul.mubr.f32.vlgmr.msra.gmra.mrb[44].mxu1 %v4709_v41  ;;  %v14554_v13 = vpack.c.bf16 %v11885_v22, %v11884_v20  ;;  %v11887_v37 = vld [vmem:[%s18122_s3 + $0xd48] sm:$0xff]  ;;  %v11872_v41 = vld [vmem:[%s18122_s3 + $0xcd0] sm:$0xff]  ;;  %v14536_v20 = vpack.c.bf16 %v11877_v31, %v11876_v10  ;;  %v11861_v22 = vld [vmem:[%s18122_s3 + $0xc78] sm:$0xff] }
0x136d   : > { %14511 = vmatpush3.bf16.msra.mxu0 %v14510_v19  ;;  %5328 = vmatprep.mubr.f32.mxu0 %v4712_v0  ;;  %v14556_v19 = vpack.c.bf16 %v11903_v34, %v11902_v27  ;;  %v14558_v0 = vpack.c.bf16 %v11887_v37, %v11886_v18  ;;  %v11893_v34 = vld [vmem:[%s18122_s3 + $0xd78] sm:$0xff]  ;;  %v4115_v18 = vrot.slane %v16660_v12, %v16122_v52  ;;  %v11963_v10 = vld [vmem:[%s18122_s3 + $0xfa8] sm:$0xff] }
0x136e   : > { %14543 = vmatpush3.bf16.msra.mxu1 %v14542_v63  ;;  %5398 = vmatprep.mubr.f32.mxu1 %v4714_v55  ;;  %v11873_v63 = vld [vmem:[%s18122_s3 + $0xcd8] sm:$0xff]  ;;  %v4486_v37 = vadd.f32 %v16643_v57, %v4087_v16  ;;  %v11928_v57 = vld [vmem:[%s18122_s3 + $0xe90] sm:$0xff]  ;;  %v11914_v16 = vld [vmem:[%s18122_s3 + $0xe20] sm:$0xff] }
0x136f   : > { %14513 = vmatprep.subr.bf16.mxu0 %v14512_v26  ;;  %14545 = vmatprep.subr.bf16.mxu1 %v14544_v38  ;;  %v14528_v26 = vpack.c.bf16 %v11873_v63, %v11872_v41  ;;  %v11856_v38 = vld [vmem:[%s18122_s3 + $0xc50] sm:$0xff]  ;;  %v11889_v55 = vld [vmem:[%s18122_s3 + $0xd58] sm:$0xff]  ;;  %v14570_v41 = vpack.c.bf16 %v11893_v34, %v11892_v23 }
0x1370   : > { %v14562_v62 = vpack.c.bf16 %v11889_v55, %v11888_v47  ;;  %v11929_v47 = vld [vmem:[%s18122_s3 + $0xe98] sm:$0xff]  ;;  %v14574_v55 = vpack.c.bf16 %v11911_v53, %v11910_v61  ;;  %v4711_v50 = vmax.f32 %v4486_v37, 0.0  ;;  %v11932_v23 = vld [vmem:[%s18122_s3 + $0xeb0] sm:$0xff]  ;;  %v11966_v61 = vld [vmem:[%s18122_s3 + $0xfc0] sm:$0xff] }
0x1371   : > { %14515 = vmatpush3.bf16.msra.mxu0 %v14514_v56  ;;  %v11906_v56 = vld [vmem:[%s18122_s3 + $0xde0] sm:$0xff]  ;;  %v11965_v34 = vld [vmem:[%s18122_s3 + $0xfb8] sm:$0xff]  ;;  %v11967_v53 = vld [vmem:[%s18122_s3 + $0xfc8] sm:$0xff] }
0x1372   : > { %14547 = vmatpush3.bf16.msra.mxu1 %v14546_v58  ;;  %14517 = vmatprep.subr.bf16.mxu0 %v14516_v59  ;;  %v11907_v58 = vld [vmem:[%s18122_s3 + $0xde8] sm:$0xff]  ;;  %v14530_v59 = vpack.c.bf16 %v11857_v46, %v11856_v38  ;;  %v11949_v37 = vld [vmem:[%s18122_s3 + $0xf38] sm:$0xff] }
0x1373   : > { %14549 = vmatprep.subr.bf16.mxu1 %v14548_v2  ;;  %v11859_v2 = vld [vmem:[%s18122_s3 + $0xc68] sm:$0xff]  ;;  %v14564_v5 = vpack.c.bf16 %v11907_v58, %v11906_v56  ;;  %v11912_v58 = vld [vmem:[%s18122_s3 + $0xe10] sm:$0xff] }
0x1374   : > { %v11943_v38 = vld [vmem:[%s18122_s3 + $0xf08] sm:$0xff] }
0x1375   : > { %14519 = vmatpush3.bf16.msra.mxu0 %v14518_v11  ;;  %v11908_v11 = vld [vmem:[%s18122_s3 + $0xdf0] sm:$0xff] }
0x1376   : > { %14551 = vmatpush3.bf16.msra.mxu1 %v14550_v15  ;;  %14521 = vmatprep.subr.bf16.mxu0 %v14520_v60  ;;  %v11909_v15 = vld [vmem:[%s18122_s3 + $0xdf8] sm:$0xff]  ;;  %v14534_v60 = vpack.c.bf16 %v11859_v2, %v11858_v1  ;;  %v11931_v2 = vld [vmem:[%s18122_s3 + $0xea8] sm:$0xff] }
0x1377   : > { %14553 = vmatprep.subr.bf16.mxu1 %v14552_v21  ;;  %v11860_v21 = vld [vmem:[%s18122_s3 + $0xc70] sm:$0xff]  ;;  %v14568_v27 = vpack.c.bf16 %v11909_v15, %v11908_v11  ;;  %v11945_v1 = vld [vmem:[%s18122_s3 + $0xf18] sm:$0xff] }
0x1379   : > { %14523 = vmatpush3.bf16.msra.mxu0 %v14522_v54  ;;  %v11926_v54 = vld [vmem:[%s18122_s3 + $0xe80] sm:$0xff] }
0x137a   : > { %14555 = vmatpush3.bf16.msra.mxu1 %v14554_v13  ;;  %14525 = vmatprep.subr.bf16.mxu0 %v14524_v14  ;;  %v11927_v13 = vld [vmem:[%s18122_s3 + $0xe88] sm:$0xff]  ;;  %v4107_v14 = vrot.slane %v16660_v12, %v16119_v51 }
0x137b   : > { %14557 = vmatprep.subr.bf16.mxu1 %v14556_v19  ;;  %v14538_v19 = vpack.c.bf16 %v11861_v22, %v11860_v21  ;;  %v14572_v63 = vpack.c.bf16 %v11927_v13, %v11926_v54  ;;  %v14612_v21 = vpack.c.bf16 %v11963_v10, %v11962_v7  ;;  %v11947_v22 = vld [vmem:[%s18122_s3 + $0xf28] sm:$0xff] }
0x137c   : > { %v4630_v46 = vadd.f32 %v16678_v43, %v4107_v14  ;;  %v11944_v43 = vld [vmem:[%s18122_s3 + $0xf10] sm:$0xff]  ;;  %v11971_v7 = vld [vmem:[%s18122_s3 + $0xfe8] sm:$0xff] }
0x137d   : > { %14527 = vmatpush3.bf16.msra.mxu0 %v14526_v45  ;;  %v4557_v45 = vadd.f32 %v16645_v39, %v4095_v24  ;;  %v11961_v39 = vld [vmem:[%s18122_s3 + $0xf98] sm:$0xff]  ;;  %v14610_v15 = vpack.c.bf16 %v11945_v1, %v11944_v43  ;;  %v11920_v43 = vld [vmem:[%s18122_s3 + $0xe50] sm:$0xff] }
0x137e   : > { %14559 = vmatpush3.bf16.msra.mxu1 %v14558_v0  ;;  %14529 = vmatprep.subr.bf16.mxu0 %v14528_v26  ;;  %v14604_v0 = vpack.c.bf16 %v11959_v9, %v11958_v36  ;;  %v11942_v26 = vld [vmem:[%s18122_s3 + $0xf00] sm:$0xff]  ;;  %v4716_v4 = vmax.f32 %v4630_v46, 0.0  ;;  %v11933_v24 = vld [vmem:[%s18122_s3 + $0xeb8] sm:$0xff]  ;;  %v11916_v36 = vld [vmem:[%s18122_s3 + $0xe30] sm:$0xff] }
0x137f   : > { %14561 = vmatprep.subr.bf16.mxu1 %v14560_v48  ;;  %v4701_v48 = vadd.f32 %v16680_v44, %v4115_v18  ;;  %v14606_v56 = vpack.c.bf16 %v11943_v38, %v11942_v26  ;;  %v11930_v44 = vld [vmem:[%s18122_s3 + $0xea0] sm:$0xff]  ;;  %v14584_v14 = vpack.c.bf16 %v11933_v24, %v11932_v23  ;;  %v11917_v9 = vld [vmem:[%s18122_s3 + $0xe38] sm:$0xff]  ;;  %v11948_v18 = vld [vmem:[%s18122_s3 + $0xf30] sm:$0xff] }
0x1380   : > { %v11918_v38 = vld [vmem:[%s18122_s3 + $0xe40] sm:$0xff]  ;;  %v11919_v46 = vld [vmem:[%s18122_s3 + $0xe48] sm:$0xff]  ;;  %v11972_v23 = vld [vmem:[%s18122_s3 + $0xff0] sm:$0xff] }
0x1381   : > { %14531 = vmatpush3.bf16.msra.mxu0 %v14530_v59  ;;  %v11913_v59 = vld [vmem:[%s18122_s3 + $0xe18] sm:$0xff]  ;;  %v4718_v31 = vmax.f32 %v4701_v48, 0.0  ;;  %v11951_v48 = vld [vmem:[%s18122_s3 + $0xf48] sm:$0xff] }
0x1382   : > { %14563 = vmatpush3.bf16.msra.mxu1 %v14562_v62  ;;  %14533 = vmatprep.subr.bf16.mxu0 %v14532_v28  ;;  %v4713_v62 = vmax.f32 %v4557_v45, 0.0  ;;  %v14576_v28 = vpack.c.bf16 %v11929_v47, %v11928_v57  ;;  %v14578_v11 = vpack.c.bf16 %v11913_v59, %v11912_v58  ;;  %v14586_v45 = vpack.c.bf16 %v11917_v9, %v11916_v36  ;;  %v11950_v57 = vld [vmem:[%s18122_s3 + $0xf40] sm:$0xff]  ;;  %v11973_v24 = vld [vmem:[%s18122_s3 + $0xff8] sm:$0xff] }
0x1383   : > { %14565 = vmatprep.subr.bf16.mxu1 %v14564_v5  ;;  %v14608_v5 = vpack.c.bf16 %v11961_v39, %v11960_v49  ;;  %v14620_v47 = vpack.c.bf16 %v11967_v53, %v11966_v61  ;;  %v11937_v49 = vld [vmem:[%s18122_s3 + $0xed8] sm:$0xff]  ;;  %v11968_v39 = vld [vmem:[%s18122_s3 + $0xfd0] sm:$0xff]  ;;  %v14622_v58 = vpack.c.bf16 %v11951_v48, %v11950_v57  ;;  %v14632_v9 = vpack.c.bf16 %v11973_v24, %v11972_v23  ;;  %v5606_v61 = vld [vmem:[%s18109_s6 + $0x8] sm:$0xff] }
0x1384   : > { %v11925_v36 = vld [vmem:[%s18122_s3 + $0xe78] sm:$0xff] }
0x1385   : > { %14535 = vmatpush3.bf16.msra.mxu0 %v14534_v60  ;;  %v14580_v60 = vpack.c.bf16 %v11931_v2, %v11930_v44  ;;  %v11953_v44 = vld [vmem:[%s18122_s3 + $0xf58] sm:$0xff]  ;;  %v11938_v2 = vld [vmem:[%s18122_s3 + $0xee0] sm:$0xff] }
0x1386   : > { %14567 = vmatpush3.bf16.msra.mxu1 %v14566_v17  ;;  %14537 = vmatprep.subr.bf16.mxu0 %v14536_v20  ;;  %v11915_v17 = vld [vmem:[%s18122_s3 + $0xe28] sm:$0xff]  ;;  %v11946_v20 = vld [vmem:[%s18122_s3 + $0xf20] sm:$0xff] }
0x1387   : > { %14569 = vmatprep.subr.bf16.mxu1 %v14568_v27  ;;  %v11964_v27 = vld [vmem:[%s18122_s3 + $0xfb0] sm:$0xff]  ;;  %v14582_v54 = vpack.c.bf16 %v11915_v17, %v11914_v16  ;;  %v14614_v13 = vpack.c.bf16 %v11947_v22, %v11946_v20  ;;  %v11954_v16 = vld [vmem:[%s18122_s3 + $0xf60] sm:$0xff]  ;;  %v11955_v20 = vld [vmem:[%s18122_s3 + $0xf68] sm:$0xff] }
0x1388   : > { %v11941_v22 = vld [vmem:[%s18122_s3 + $0xef8] sm:$0xff] }
0x1389   : > { %14539 = vmatpush3.bf16.msra.mxu0 %v14538_v19  ;;  %v14616_v19 = vpack.c.bf16 %v11965_v34, %v11964_v27  ;;  %v4103_v34 = vrot.slane %v16660_v12, %v16192_v25 }
0x138a   : > { %14571 = vmatpush3.bf16.msra.mxu1 %v14570_v41  ;;  %14573 = vmatprep.subr.bf16.mxu0 %v14572_v63  ;;  %v11934_v41 = vld [vmem:[%s18122_s3 + $0xec0] sm:$0xff]  ;;  %v11935_v63 = vld [vmem:[%s18122_s3 + $0xec8] sm:$0xff] }
0x138b   : > { %14605 = vmatprep.subr.bf16.mxu1 %v14604_v0  ;;  %v14618_v0 = vpack.c.bf16 %v11949_v37, %v11948_v18  ;;  %v14588_v26 = vpack.c.bf16 %v11935_v63, %v11934_v41  ;;  %v11956_v18 = vld [vmem:[%s18122_s3 + $0xf70] sm:$0xff]  ;;  %v4628_v41 = vadd.f32 %v16672_v35, %v4103_v34  ;;  %v5605_v63 = vld [vmem:[%s18109_s6] sm:$0xff] }
0x138c   : > { %5329 = vmatmul.mubr.f32.vlgmr.msra.gmra.mrb[38].mxu0 %v4711_v50  ;;  %v11969_v50 = vld [vmem:[%s18122_s3 + $0xfd8] sm:$0xff]  ;;  %v14637_v53 = vpack.c.bf16 %v5606_v61, %v5605_v63 }
0x138d   : > { %5399 = vmatmul.mubr.f32.vlgmr.msra.gmra.mrb[46].mxu1 %v4713_v62  ;;  %14575 = vmatpush3.bf16.msra.mxu0 %v14574_v55  ;;  %v11936_v55 = vld [vmem:[%s18122_s3 + $0xed0] sm:$0xff]  ;;  %v11921_v62 = vld [vmem:[%s18122_s3 + $0xe58] sm:$0xff]  ;;  %v14624_v1 = vpack.c.bf16 %v11969_v50, %v11968_v39 }
0x138e   : > { %5468 = vmatprep.mubr.f32.mxu0 %v4716_v4  ;;  %14607 = vmatpush3.bf16.msra.mxu1 %v14606_v56  ;;  %v14590_v56 = vpack.c.bf16 %v11919_v46, %v11918_v38  ;;  %v14592_v59 = vpack.c.bf16 %v11937_v49, %v11936_v55  ;;  %v11939_v4 = vld [vmem:[%s18122_s3 + $0xee8] sm:$0xff]  ;;  %v14594_v10 = vpack.c.bf16 %v11921_v62, %v11920_v43  ;;  %v4717_v38 = vmax.f32 %v16676_v42, 0.0  ;;  %v16861_v46 = vld [vmem:[%s15880_s7] sm:$0xff]  ;;  %s18136_s7 = sld [smem:[#allocation19_spill]] }
0x138f   : > { %5538 = vmatprep.mubr.f32.mxu1 %v4718_v31  ;;  %14577 = vmatprep.subr.bf16.mxu0 %v14576_v28  ;;  %v11952_v28 = vld [vmem:[%s18122_s3 + $0xf50] sm:$0xff] }
0x1390   : > { %14609 = vmatprep.subr.bf16.mxu1 %v14608_v5  ;;  %v11970_v5 = vld [vmem:[%s18122_s3 + $0xfe0] sm:$0xff]  ;;  %v14626_v31 = vpack.c.bf16 %v11953_v44, %v11952_v28 }
0x1391   : > { %14579 = vmatpush3.bf16.msra.mxu0 %v14578_v11  ;;  %v14596_v11 = vpack.c.bf16 %v11939_v4, %v11938_v2  ;;  %v14628_v17 = vpack.c.bf16 %v11971_v7, %v11970_v5 }
0x1392   : > { %14611 = vmatpush3.bf16.msra.mxu1 %v14610_v15  ;;  %14581 = vmatprep.subr.bf16.mxu0 %v14580_v60  ;;  %v11922_v15 = vld [vmem:[%s18122_s3 + $0xe60] sm:$0xff]  ;;  %v11923_v60 = vld [vmem:[%s18122_s3 + $0xe68] sm:$0xff] }
0x1393   : > { %14613 = vmatprep.subr.bf16.mxu1 %v14612_v21  ;;  %v11940_v21 = vld [vmem:[%s18122_s3 + $0xef0] sm:$0xff]  ;;  %v14598_v27 = vpack.c.bf16 %v11923_v60, %v11922_v15 }
0x1394   : > { %v11982_v34 = vld [vmem:[%s18136_s7] ss:$0 sm:$0xff] }
0x1395   : > { %14583 = vmatpush3.bf16.msra.mxu0 %v14582_v54  ;;  %v14630_v54 = vpack.c.bf16 %v11955_v20, %v11954_v16 }
0x1396   : > { %14615 = vmatpush3.bf16.msra.mxu1 %v14614_v13  ;;  %14585 = vmatprep.subr.bf16.mxu0 %v14584_v14  ;;  %v14600_v13 = vpack.c.bf16 %v11941_v22, %v11940_v21  ;;  %v11924_v14 = vld [vmem:[%s18122_s3 + $0xe70] sm:$0xff] }
0x1397   : > { %14617 = vmatprep.subr.bf16.mxu1 %v14616_v19  ;;  %v11957_v19 = vld [vmem:[%s18122_s3 + $0xf78] sm:$0xff]  ;;  %v14602_v37 = vpack.c.bf16 %v11925_v36, %v11924_v14  ;;  %s18137_s3 = smov 80  }
0x1398   : > { %v14634_v12 = vpack.c.bf16 %v11957_v19, %v11956_v18 }
0x1399   : > { %14587 = vmatpush3.bf16.msra.mxu0 %v14586_v45  ;;  %v4715_v45 = vmax.f32 %v4628_v41, 0.0 }
0x139a   : > { %14619 = vmatpush3.bf16.msra.mxu1 %v14618_v0  ;;  %14589 = vmatprep.subr.bf16.mxu0 %v14588_v26  ;;  %v5607_v0 = vld [vmem:[%s18109_s6 + $0x10] sm:$0xff]  ;;  %v5608_v26 = vld [vmem:[%s18109_s6 + $0x18] sm:$0xff] }
0x139b   : > { %14621 = vmatprep.subr.bf16.mxu1 %v14620_v47  ;;  %v14640_v35 = vpack.c.bf16 %v5608_v26, %v5607_v0  ;;  %v11975_v47 = vld [vmem:[%s18121_s8 + $0x1] ss:$0 sm:$0xff]  ;;  %s18139_s8 = sld [smem:[#allocation20_spill]] }
0x139d   : > { %14591 = vmatpush3.bf16.msra.mxu0 %v14590_v56 }
0x139e   : > { %14623 = vmatpush3.bf16.msra.mxu1 %v14622_v58  ;;  %14593 = vmatprep.subr.bf16.mxu0 %v14592_v59 }
0x139f   : > { %14625 = vmatprep.subr.bf16.mxu1 %v14624_v1 }
0x13a1   : > { %14595 = vmatpush3.bf16.msra.mxu0 %v14594_v10 }
0x13a2   : > { %14627 = vmatpush3.bf16.msra.mxu1 %v14626_v31  ;;  %14597 = vmatprep.subr.bf16.mxu0 %v14596_v11 }
0x13a3   : > { %14629 = vmatprep.subr.bf16.mxu1 %v14628_v17 }
0x13a5   : > { %14599 = vmatpush3.bf16.msra.mxu0 %v14598_v27 }
0x13a6   : > { %14631 = vmatpush3.bf16.msra.mxu1 %v14630_v54  ;;  %14601 = vmatprep.subr.bf16.mxu0 %v14600_v13 }
0x13a7   : > { %14633 = vmatprep.subr.bf16.mxu1 %v14632_v9 }
0x13a9   : > { %14603 = vmatpush3.bf16.msra.mxu0 %v14602_v37 }
0x13aa   : > { %14635 = vmatpush3.bf16.msra.mxu1 %v14634_v12  ;;  %14636 = vmatprep.subr.bf16.mxu0 %v15604_v3 }
0x13ab   : > { %13770 = vmatprep.subr.mxu1 %v15606_v6 }
0x13ac   : > { %5469 = vmatmul.mubr.f32.vlgmr.msra.gmra.mrb[40].mxu0 %v4715_v45 }
0x13ad   : > { %5539 = vmatmul.mubr.f32.vlgmr.msra.gmra.mrb[48].mxu1 %v4717_v38  ;;  %14638 = vmatpush3.bf16.msra.mxu0 %v14637_v53 }
0x13ae   : > { %14639 = vmatprep.subr.bf16.mxu0 %v15604_v3  ;;  %13767 = vmatprep.mubr.msk.f32.mxu0 %vm15605_vm0, %v15606_v6 }
0x13af   : > { %13772 = vmatprep.mubr.msk.f32.mxu1 %vm15605_vm0, %v15606_v6 }
0x13b1   : > { %14641 = vmatpush3.bf16.msra.mxu0 %v14640_v35 }
0x13b2   : > { %13780 = vmatprep.subr.mxu0 %v15606_v6 }
0x13b4   : > { %13768 = vmatmul.mubr.msk.f32.vlgmr.msra.gmra.mrb[42].mxu0 %vm1189_vm1, %v16861_v46 }
0x13b5   : > { %13782 = vmatprep.mubr.msk.f32.mxu0 %vm15605_vm0, %v15606_v6 }
0x141f   : > { %v12770_v42 = vpop.f32.mrb[34].mxu0  ;;  %v12805_v57 = vpop.f32.mrb[42].mxu1 }
0x1420   : > { %v12771_v48 = vpop.f32.mrb[35].mxu0  ;;  %v12806_v55 = vpop.f32.mrb[43].mxu1 }
0x1421   : > { %v12772_v49 = vadd.f32 %v12771_v48, %v12770_v42  ;;  %v12807_v39 = vadd.f32 %v12806_v55, %v12805_v57 }
0x1423   : > { %v5051_v50 = vadd.f32 %v12772_v49, %v11975_v47 }
0x1425   : > { %v5121_v56 = vadd.f32 %v12807_v39, %v5051_v50 }
0x143f   : > { %v12840_v58 = vpop.f32.mrb[36].mxu0  ;;  %v12875_v59 = vpop.f32.mrb[44].mxu1 }
0x1440   : > { %v12841_v43 = vpop.f32.mrb[37].mxu0  ;;  %v12876_v62 = vpop.f32.mrb[45].mxu1 }
0x1441   : > { %v12842_v28 = vadd.f32 %v12841_v43, %v12840_v58  ;;  %v12877_v1 = vadd.f32 %v12876_v62, %v12875_v59 }
0x1443   : > { %v5191_v44 = vadd.f32 %v12842_v28, %v5121_v56 }
0x1445   : > { %v5261_v2 = vadd.f32 %v12877_v1, %v5191_v44 }
0x145f   : > { %v12910_v4 = vpop.f32.mrb[38].mxu0 }
0x1460   : > { %v12945_v5 = vpop.f32.mrb[46].mxu1  ;;  %v12911_v7 = vpop.f32.mrb[39].mxu0 }
0x1461   : > { %v12912_v10 = vadd.f32 %v12911_v7, %v12910_v4  ;;  %v12946_v31 = vpop.f32.mrb[47].mxu1 }
0x1462   : > { %v12947_v11 = vadd.f32 %v12946_v31, %v12945_v5  ;;  %v5687_v31 = vld [vmem:[%s18139_s8 + $0x8] sm:$0xff] }
0x1463   : > { %v5331_v15 = vadd.f32 %v12912_v10, %v5261_v2  ;;  %v5686_v10 = vld [vmem:[%s18139_s8] sm:$0xff] }
0x1465   : > { %v5401_v60 = vadd.f32 %v12947_v11, %v5331_v15  ;;  %v14646_v11 = vpack.c.bf16 %v5687_v31, %v5686_v10  ;;  %v5688_v15 = vld [vmem:[%s18139_s8 + $0x10] sm:$0xff]  ;;  %v6205_v10 = vld [vmem:[%s18144_s19] sm:$0xff]  ;;  %v6206_v31 = vld [vmem:[%s18144_s19 + $0x8] sm:$0xff] }
0x147f   : > { %v12980_v16 = vpop.f32.mrb[40].mxu0 }
0x1480   : > { %v13015_v17 = vpop.f32.mrb[48].mxu1  ;;  %v12981_v20 = vpop.f32.mrb[41].mxu0 }
0x1481   : > { %v12982_v21 = vadd.f32 %v12981_v20, %v12980_v16  ;;  %v13016_v22 = vpop.f32.mrb[49].mxu1 }
0x1482   : > { %v13017_v23 = vadd.f32 %v13016_v22, %v13015_v17 }
0x1483   : > { %v5471_v24 = vadd.f32 %v12982_v21, %v5401_v60  ;;  %v5689_v60 = vld [vmem:[%s18139_s8 + $0x18] sm:$0xff] }
0x1484   : > { %v14643_v16 = vpack.c.bf16 %v5689_v60, %v5688_v15  ;;  %v6207_v15 = vld [vmem:[%s18144_s19 + $0x10] sm:$0xff]  ;;  %v6208_v60 = vld [vmem:[%s18144_s19 + $0x18] sm:$0xff] }
0x1485   : > { %v5541_v27 = vadd.f32 %v13017_v23, %v5471_v24  ;;  %v11978_v23 = vld [vmem:[%s18114_s24 + $0x1] ss:$0 sm:$0xff]  ;;  %s18148_s24 = sld [smem:[#allocation23_spill]] }
0x1487   : > { %v5682_v54 = vpop.f32.mrb[42].mxu0  ;;  %v5544_v39 = vadd.f32 %v5541_v27, %v16466_v40  ;;  %v11979_v27 = vld [vmem:[%s18111_s30 + $0x1] ss:$0 sm:$0xff]  ;;  %s18151_s30 = sld [smem:[#allocation28_spill]] }
0x1488   : > { %v5683_v13 = vadd.f32 %v11982_v34, %v5682_v54  ;;  %v13769_v14 = vpop.f32.mrb[43].mxu0 }
0x1489   : > { %v5549_v50 = vsel %vm1189_vm1, %v5544_v39, 0.0 }
0x148a   : > { %5858 = vrot.lane.b32.xlu0 %v5683_v13, %s18137_s3  ;;  %5692 = vrot.lane.b32.xlu1 %v5683_v13, %s18138_s5 }
0x148e   : > { %5856 = vrot.lane.b32.xlu1 %v5683_v13, %s18133_s10 }
0x14fc   : > { %v5859_v36 = vpop.permute.xlu0 %5858  ;;  %v5693_v9 = vpop.permute.xlu1 %5692 }
0x14fd   : > { %13771 = vmatpush3.xpose.msk.msra.mxu1 %vm1271_vm2, %v5693_v9  ;;  %13781 = vmatpush3.xpose.msk.msra.mxu0 %vm1271_vm2, %v5859_v36 }
0x14fe   : > { %13775 = vmatprep.subr.mxu1 %v15606_v6  ;;  %14642 = vmatprep.subr.bf16.mxu0 %v15604_v3 }
0x1500   : > { %13773 = vmatmul.mubr.msk.f32.vlgmr.msra.gmra.mrb[50].mxu1 %vm1271_vm2, %v5683_v13  ;;  %v5857_v18 = vpop.permute.xlu1 %5856 }
0x1501   : > { %13783 = vmatmul.mubr.msk.f32.vlgmr.msra.gmra.mrb[44].mxu0 %vm1271_vm2, %v5857_v18  ;;  %13777 = vmatprep.mubr.msk.f32.mxu1 %vm15605_vm0, %v15606_v6 }
0x1502   : > { %13794 = vmatprep.mubr.msk.f32.mxu0 %vm15605_vm0, %v15606_v6  ;;  %14644 = vmatpush3.bf16.msra.mxu0 %v14643_v16  ;;  %v14652_v16 = vpack.c.bf16 %v6208_v60, %v6207_v15 }
0x1503   : > { %14648 = vmatprep.subr.bf16.mxu0 %v15604_v3 }
0x15d3   : > { %v5764_v19 = vpop.f32.mrb[50].mxu1 }
0x15d4   : > { %v5768_v37 = vmul.f32 0.25, %v5764_v19  ;;  %v13774_v41 = vpop.f32.mrb[51].mxu1  ;;  %v5930_v12 = vpop.f32.mrb[44].mxu0 }
0x15d5   : > { %v5934_v63 = vmul.f32 0.25, %v5930_v12  ;;  %v13784_v61 = vpop.f32.mrb[45].mxu0 }
0x15d6   : > { %v5769_v53 = vsel %vm1347_vm3, %v5768_v37, -inf  ;;  %v6289_v61 = vld [vmem:[%s18140_s9] sm:$0xff] }
0x15d7   : > { %5770 = vmax.xlane.f32.xlu1 %v5769_v53  ;;  %v5935_v45 = vsel %vm1347_vm3, %v5934_v63, -inf  ;;  %v6290_v53 = vld [vmem:[%s18140_s9 + $0x8] sm:$0xff] }
0x15d8   : > { %5936 = vmax.xlane.f32.xlu0 %v5935_v45  ;;  %v14655_v45 = vpack.c.bf16 %v6290_v53, %v6289_v61 }
0x1664   : > { %v5771_v0 = vpop.xlane.xlu1 %5770 }
0x1665   : > { %v5772_v26 = vsub.f32 %v5768_v37, %v5771_v0  ;;  %v5937_v38 = vpop.xlane.xlu0 %5936  ;;  %v6291_v0 = vld [vmem:[%s18140_s9 + $0x10] sm:$0xff] }
0x1666   : > { %v5938_v35 = vsub.f32 %v5934_v63, %v5937_v38 }
0x1667   : > { %v5773_v42 = vmul.f32 1.442695, %v5772_v26  ;;  %v6292_v26 = vld [vmem:[%s18140_s9 + $0x18] sm:$0xff] }
0x1668   : > { %v5939_v57 = vmul.f32 1.442695, %v5938_v35  ;;  %v14658_v38 = vpack.c.bf16 %v6292_v26, %v6291_v0 }
0x1669   : > { %15450 = vpow2.f32 %v5773_v42 }
0x166a   : > { %15452 = vpow2.f32 %v5939_v57  ;;  %v11992_v57 = vld [vmem:[%s18141_s13] ss:$0 sm:$0xff] }
0x1673   : > { %v15451_v47 = vpop.eup %15450 }
0x1674   : > { %v15453_v48 = vpop.eup %15452  ;;  %v5775_v55 = vsel %vm1347_vm3, %v15451_v47, 0.0 }
0x1675   : > { %5776 = vadd.xlane.f32.xlu0 %v5775_v55  ;;  %v5941_v49 = vsel %vm1347_vm3, %v15453_v48, 0.0 }
0x1676   : > { %5942 = vadd.xlane.f32.xlu1 %v5941_v49 }
0x1687   : > { %5946 = vrot.lane.b32.xlu1 %v5683_v13, %s18134_s18 }
0x168b   : > { %5780 = vrot.lane.b32.xlu0 %v5683_v13, %s18135_s1 }
0x16ab   : > { %5550 = vadd.xlane.f32.xlu1 %v5549_v50 }
0x1702   : > { %v5777_v56 = vpop.xlane.xlu0 %5776 }
0x1703   : > { %15454 = vrcp.f32 %v5777_v56  ;;  %v5943_v58 = vpop.xlane.xlu1 %5942 }
0x1704   : > { %15456 = vrcp.f32 %v5943_v58 }
0x1706   : > { %v5781_v59 = vpop.permute.xlu0 %5780 }
0x1707   : > { %13776 = vmatpush3.msra.mxu1 %v5781_v59  ;;  %v5947_v1 = vpop.permute.xlu1 %5946 }
0x1708   : > { %13785 = vmatprep.subr.mxu1 %v15606_v6 }
0x170d   : > { %v15455_v43 = vpop.eup %15454 }
0x170e   : > { %v5779_v62 = vmul.f32 %v15455_v43, %v15451_v47  ;;  %v15457_v28 = vpop.eup %15456 }
0x170f   : > { %v5945_v40 = vmul.f32 %v15457_v28, %v15453_v48 }
0x1710   : > { %13778 = vmatmul.mubr.msk.f32.vlgmr.msra.gmra.mrb[52].mxu1 %vm1347_vm3, %v5779_v62  ;;  %v11980_v62 = vld [vmem:[%s18142_s14] ss:$0 sm:$0xff]  ;;  %s18145_s14 = sld [smem:[#allocation25_spill]] }
0x1711   : > { %13786 = vmatpush3.msra.mxu1 %v5947_v1  ;;  %13787 = vmatprep.mubr.msk.f32.mxu1 %vm15605_vm0, %v15606_v6  ;;  %v11981_v1 = vld [vmem:[%s18143_s17] ss:$0 sm:$0xff]  ;;  %s18146_s17 = sld [smem:[#allocation32_spill]] }
0x1712   : > { %14645 = vmatprep.subr.bf16.mxu1 %v15604_v3 }
0x1714   : > { %13788 = vmatmul.mubr.msk.f32.vlgmr.msra.gmra.mrb[54].mxu1 %vm1347_vm3, %v5945_v40 }
0x1715   : > { %13801 = vmatprep.mubr.msk.f32.mxu1 %vm15605_vm0, %v15606_v6  ;;  %14647 = vmatpush3.bf16.msra.mxu1 %v14646_v11  ;;  %v14649_v11 = vpack.c.bf16 %v6206_v31, %v6205_v10  ;;  %v6374_v10 = vld [vmem:[%s18149_s25 + $0x8] sm:$0xff] }
0x1716   : > { %14654 = vmatprep.subr.bf16.mxu1 %v15604_v3 }
0x1738   : > { %v5551_v44 = vpop.xlane.xlu1 %5550 }
0x1739   : > { %v5552_v2 = vmul.f32 0.03125, %v5551_v44 }
0x173b   : > { %v5553_v4 = vsub.f32 %v5544_v39, %v5552_v2 }
0x173d   : > { %v5554_v5 = vmul.f32 %v5553_v4, %v5553_v4 }
0x173f   : > { %v5555_v7 = vsel %vm1189_vm1, %v5554_v5, 0.0 }
0x1740   : > { %5556 = vadd.xlane.f32.xlu0 %v5555_v7 }
0x17cd   : > { %v5557_v17 = vpop.xlane.xlu0 %5556 }
0x17ce   : > { %v5558_v20 = vmul.f32 0.03125, %v5557_v17 }
0x17d0   : > { %v5559_v21 = vadd.f32 1e-05, %v5558_v20 }
0x17d2   : > { %15458 = vrsqrt.f32 %v5559_v21 }
0x17dc   : > { %v15459_v22 = vpop.eup %15458 }
0x17dd   : > { %v5561_v24 = vmul.f32 %v15459_v22, %v5553_v4  ;;  %v11997_v22 = vld [vmem:[%s18145_s14] ss:$0 sm:$0xff] }
0x17df   : > { %v5568_v34 = vmul.f32 %v11978_v23, %v5561_v24 }
0x17e1   : > { %v5575_v54 = vadd.f32 %v11979_v27, %v5568_v34 }
0x17e3   : > { %v5852_v13 = vpop.f32.mrb[52].mxu1  ;;  %v5578_v14 = vsel %vm1189_vm1, %v5575_v54, 0.0 }
0x17e4   : > { %v13779_v36 = vpop.f32.mrb[53].mxu1  ;;  %13802 = vmatmul.mubr.msk.f32.vlgmr.msra.gmra.mrb[56].mxu1 %vm1271_vm2, %v5852_v13  ;;  %5579 = vadd.xlane.f32.xlu0 %v5578_v14  ;;  %v11994_v14 = vld [vmem:[%s18147_s21] ss:$0 sm:$0xff] }
0x17e5   : > { %13823 = vmatprep.mubr.msk.f32.mxu1 %vm15605_vm0, %v15606_v6  ;;  %14656 = vmatpush3.bf16.msra.mxu1 %v14655_v45 }
0x17e6   : > { %14657 = vmatprep.subr.bf16.mxu1 %v15604_v3 }
0x17e7   : > { %v6018_v9 = vpop.f32.mrb[54].mxu1 }
0x17e8   : > { %v13789_v18 = vpop.f32.mrb[55].mxu1  ;;  %13795 = vmatmul.mubr.msk.f32.vlgmr.msra.gmra.mrb[46].mxu0 %vm1271_vm2, %v6018_v9 }
0x17e9   : > { %13812 = vmatprep.mubr.msk.f32.mxu0 %vm15605_vm0, %v15606_v6  ;;  %14659 = vmatpush3.bf16.msra.mxu1 %v14658_v38  ;;  %v11995_v18 = vld [vmem:[%s18148_s24] ss:$0 sm:$0xff] }
0x17ea   : > { %13831 = vmatprep.subr.mxu1 %v15606_v6  ;;  %14650 = vmatpush3.bf16.msra.mxu0 %v14649_v11 }
0x17eb   : > { %14651 = vmatprep.subr.bf16.mxu0 %v15604_v3 }
0x17ee   : > { %14653 = vmatpush3.bf16.msra.mxu0 %v14652_v16 }
0x17ef   : > { %13826 = vmatprep.subr.mxu0 %v15606_v6 }
0x1871   : > { %v5580_v19 = vpop.xlane.xlu0 %5579 }
0x1872   : > { %v5581_v37 = vmul.f32 0.03125, %v5580_v19 }
0x1874   : > { %v5582_v41 = vsub.f32 %v5575_v54, %v5581_v37  ;;  %v11993_v54 = vld [vmem:[%s18146_s17] ss:$0 sm:$0xff] }
0x1876   : > { %v5583_v12 = vmul.f32 %v5582_v41, %v5582_v41 }
0x1878   : > { %v5584_v63 = vsel %vm1189_vm1, %v5583_v12, 0.0 }
0x1879   : > { %5585 = vadd.xlane.f32.xlu0 %v5584_v63 }
0x18b7   : > { %v6164_v35 = vpop.f32.mrb[56].mxu1 }
0x18b8   : > { %v13803_v42 = vpop.f32.mrb[57].mxu1 }
0x18bb   : > { %v6091_v47 = vpop.f32.mrb[46].mxu0 }
0x18bc   : > { %v6165_v48 = vadd.f32 %v6164_v35, %v6091_v47  ;;  %v13796_v55 = vpop.f32.mrb[47].mxu0 }
0x18be   : > { %v6174_v49 = vadd.f32 %v11992_v57, %v6165_v48 }
0x18c0   : > { %v6175_v39 = vadd.f32 %v16861_v46, %v6174_v49 }
0x18c2   : > { %v6178_v50 = vsel %vm1189_vm1, %v6175_v39, 0.0 }
0x18c3   : > { %6179 = vadd.xlane.f32.xlu1 %v6178_v50 }
0x1906   : > { %v5586_v56 = vpop.xlane.xlu0 %5585 }
0x1907   : > { %v5587_v58 = vmul.f32 0.03125, %v5586_v56 }
0x1909   : > { %v5588_v59 = vadd.f32 1e-05, %v5587_v58 }
0x190b   : > { %15460 = vrsqrt.f32 %v5588_v59 }
0x1915   : > { %v15461_v43 = vpop.eup %15460 }
0x1916   : > { %v5590_v28 = vmul.f32 %v15461_v43, %v5582_v41 }
0x1918   : > { %v5597_v40 = vmul.f32 %v11980_v62, %v5590_v28 }
0x191a   : > { %v16926_v44 = vadd.f32 %v11981_v1, %v5597_v40  ;;  %v6375_v40 = vld [vmem:[%s18149_s25 + $0x10] sm:$0xff] }
0x191c   : > { %13824 = vmatmul.mubr.msk.f32.vlgmr.msra.gmra.mrb[58].mxu1 %vm1189_vm1, %v16926_v44 }
0x191d   : > { %13833 = vmatprep.mubr.msk.f32.mxu1 %vm15605_vm0, %v15606_v6 }
0x1950   : > { %v6180_v46 = vpop.xlane.xlu1 %6179 }
0x1951   : > { %v6181_v2 = vmul.f32 0.03125, %v6180_v46  ;;  %v6376_v46 = vld [vmem:[%s18149_s25 + $0x18] sm:$0xff] }
0x1953   : > { %v6182_v4 = vsub.f32 %v6175_v39, %v6181_v2  ;;  %v14661_v2 = vpack.c.bf16 %v6376_v46, %v6375_v40  ;;  %v6912_v40 = vld [vmem:[%s18151_s30 + $0xa8] sm:$0xff]  ;;  %v6898_v46 = vld [vmem:[%s18151_s30 + $0x38] sm:$0xff] }
0x1955   : > { %v6183_v5 = vmul.f32 %v6182_v4, %v6182_v4 }
0x1957   : > { %v6184_v7 = vsel %vm1189_vm1, %v6183_v5, 0.0 }
0x1958   : > { %6185 = vadd.xlane.f32.xlu1 %v6184_v7  ;;  %v6373_v7 = vld [vmem:[%s18149_s25] sm:$0xff] }
0x1959   : > { %v14664_v11 = vpack.c.bf16 %v6374_v10, %v6373_v7 }
0x19e5   : > { %v6186_v17 = vpop.xlane.xlu1 %6185 }
0x19e6   : > { %v6187_v20 = vmul.f32 0.03125, %v6186_v17 }
0x19e8   : > { %v6188_v21 = vadd.f32 1e-05, %v6187_v20 }
0x19ea   : > { %15462 = vrsqrt.f32 %v6188_v21 }
0x19ef   : > { %v6369_v23 = vpop.f32.mrb[58].mxu1 }
0x19f0   : > { %v6370_v24 = vadd.f32 %v11997_v22, %v6369_v23  ;;  %v13825_v27 = vpop.f32.mrb[59].mxu1  ;;  %v12007_v23 = vld [vmem:[%s18150_s29] ss:$0 sm:$0xff] }
0x19f2   : > { %6544 = vrot.lane.b32.xlu0 %v6370_v24, %s18133_s10 }
0x19f4   : > { %v15463_v34 = vpop.eup %15462 }
0x19f5   : > { %v6190_v13 = vmul.f32 %v15463_v34, %v6182_v4 }
0x19f7   : > { %v6197_v36 = vmul.f32 %v11993_v54, %v6190_v13 }
0x19f9   : > { %v16943_v9 = vadd.f32 %v11994_v14, %v6197_v36 }
0x19fb   : > { %13813 = vmatmul.mubr.msk.f32.vlgmr.msra.gmra.mrb[48].mxu0 %vm1189_vm1, %v16943_v9 }
0x19fc   : > { %13827 = vmatpush3.xpose.msk.msra.mxu0 %vm1271_vm2, %v6370_v24  ;;  %13828 = vmatprep.mubr.msk.f32.mxu0 %vm15605_vm0, %v15606_v6 }
0x19fd   : > { %13836 = vmatprep.subr.mxu0 %v15606_v6 }
0x1a64   : > { %v6545_v12 = vpop.permute.xlu0 %6544 }
0x1ace   : > { %v6285_v19 = vpop.f32.mrb[48].mxu0 }
0x1acf   : > { %v6286_v37 = vadd.f32 %v11995_v18, %v6285_v19  ;;  %v13814_v41 = vpop.f32.mrb[49].mxu0 }
0x1ad1   : > { %6542 = vrot.lane.b32.xlu1 %v6286_v37, %s18133_s10  ;;  %13829 = vmatmul.mubr.msk.f32.vlgmr.msra.gmra.mrb[50].mxu0 %vm1271_vm2, %v6286_v37 }
0x1ad2   : > { %13837 = vmatpush3.xpose.msk.msra.mxu0 %vm1271_vm2, %v6545_v12  ;;  %13838 = vmatprep.mubr.msk.f32.mxu0 %vm15605_vm0, %v15606_v6  ;;  %v6892_v12 = vld [vmem:[%s18151_s30 + $0x8] sm:$0xff] }
0x1ad3   : > { %14660 = vmatprep.subr.bf16.mxu0 %v15604_v3 }
0x1b43   : > { %v6543_v63 = vpop.permute.xlu1 %6542 }
0x1b44   : > { %13839 = vmatmul.mubr.msk.f32.vlgmr.msra.gmra.mrb[52].mxu0 %vm1271_vm2, %v6543_v63  ;;  %v6908_v63 = vld [vmem:[%s18151_s30 + $0x88] sm:$0xff] }
0x1b45   : > { %13850 = vmatprep.mubr.msk.f32.mxu0 %vm15605_vm0, %v15606_v6  ;;  %14662 = vmatpush3.bf16.msra.mxu0 %v14661_v2 }
0x1ba4   : > { %v6450_v61 = vpop.f32.mrb[50].mxu0 }
0x1ba5   : > { %v6454_v53 = vmul.f32 0.25, %v6450_v61  ;;  %v13830_v45 = vpop.f32.mrb[51].mxu0  ;;  %v6894_v61 = vld [vmem:[%s18151_s30 + $0x18] sm:$0xff] }
0x1ba6   : > { %v6891_v45 = vld [vmem:[%s18151_s30] sm:$0xff] }
0x1ba7   : > { %v6455_v0 = vsel %vm1347_vm3, %v6454_v53, -inf }
0x1ba8   : > { %6456 = vmax.xlane.f32.xlu1 %v6455_v0  ;;  %v6907_v0 = vld [vmem:[%s18151_s30 + $0x80] sm:$0xff] }
0x1c17   : > { %v6616_v26 = vpop.f32.mrb[52].mxu0 }
0x1c18   : > { %v6620_v38 = vmul.f32 0.25, %v6616_v26  ;;  %v13840_v35 = vpop.f32.mrb[53].mxu0 }
0x1c19   : > { %v6893_v35 = vld [vmem:[%s18151_s30 + $0x10] sm:$0xff] }
0x1c1a   : > { %v6621_v42 = vsel %vm1347_vm3, %v6620_v38, -inf }
0x1c1b   : > { %6622 = vmax.xlane.f32.xlu0 %v6621_v42  ;;  %v6909_v42 = vld [vmem:[%s18151_s30 + $0x90] sm:$0xff] }
0x1c35   : > { %v6457_v57 = vpop.xlane.xlu1 %6456 }
0x1c36   : > { %v6458_v47 = vsub.f32 %v6454_v53, %v6457_v57  ;;  %v14666_v53 = vpack.c.bf16 %v6908_v63, %v6892_v12  ;;  %v14676_v57 = vpack.c.bf16 %v6909_v42, %v6893_v35  ;;  %v6929_v12 = vld [vmem:[%s18151_s30 + $0x130] sm:$0xff]  ;;  %v6915_v35 = vld [vmem:[%s18151_s30 + $0xc0] sm:$0xff] }
0x1c37   : > { %v6945_v63 = vld [vmem:[%s18151_s30 + $0x1b0] sm:$0xff] }
0x1c38   : > { %v6459_v48 = vmul.f32 1.442695, %v6458_v47  ;;  %14667 = vmatprep.subr.bf16.mxu0 %v14666_v53  ;;  %v6924_v47 = vld [vmem:[%s18151_s30 + $0x108] sm:$0xff] }
0x1c39   : > { %v6916_v53 = vld [vmem:[%s18151_s30 + $0xc8] sm:$0xff] }
0x1c3a   : > { %15464 = vpow2.f32 %v6459_v48  ;;  %v6940_v48 = vld [vmem:[%s18151_s30 + $0x188] sm:$0xff] }
0x1c44   : > { %v15465_v55 = vpop.eup %15464 }
0x1c45   : > { %v6461_v49 = vsel %vm1347_vm3, %v15465_v55, 0.0 }
0x1c46   : > { %6462 = vadd.xlane.f32.xlu0 %v6461_v49  ;;  %v14670_v49 = vpack.c.bf16 %v6940_v48, %v6924_v47  ;;  %v6901_v47 = vld [vmem:[%s18151_s30 + $0x50] sm:$0xff] }
0x1c47   : > { %v6917_v48 = vld [vmem:[%s18151_s30 + $0xd0] sm:$0xff] }
0x1c5c   : > { %6466 = vrot.lane.b32.xlu0 %v6370_v24, %s18138_s5 }
0x1ca8   : > { %v6623_v39 = vpop.xlane.xlu0 %6622 }
0x1ca9   : > { %v6624_v50 = vsub.f32 %v6620_v38, %v6623_v39  ;;  %v14668_v38 = vpack.c.bf16 %v6907_v0, %v6891_v45  ;;  %v6942_v39 = vld [vmem:[%s18151_s30 + $0x198] sm:$0xff] }
0x1caa   : > { %v6918_v45 = vld [vmem:[%s18151_s30 + $0xd8] sm:$0xff] }
0x1cab   : > { %v6625_v56 = vmul.f32 1.442695, %v6624_v50  ;;  %v6923_v50 = vld [vmem:[%s18151_s30 + $0x100] sm:$0xff] }
0x1cad   : > { %15466 = vpow2.f32 %v6625_v56  ;;  %v6939_v56 = vld [vmem:[%s18151_s30 + $0x180] sm:$0xff] }
0x1cb7   : > { %v15467_v58 = vpop.eup %15466 }
0x1cb8   : > { %v6627_v59 = vsel %vm1347_vm3, %v15467_v58, 0.0 }
0x1cb9   : > { %6628 = vadd.xlane.f32.xlu1 %v6627_v59  ;;  %v14672_v59 = vpack.c.bf16 %v6939_v56, %v6923_v50  ;;  %v6950_v50 = vld [vmem:[%s18151_s30 + $0x1d8] sm:$0xff] }
0x1cca   : > { %6632 = vrot.lane.b32.xlu1 %v6370_v24, %s18137_s3 }
0x1cd3   : > { %v6463_v43 = vpop.xlane.xlu0 %6462 }
0x1cd4   : > { %15468 = vrcp.f32 %v6463_v43  ;;  %v6925_v43 = vld [vmem:[%s18151_s30 + $0x110] sm:$0xff] }
0x1cd7   : > { %v6467_v62 = vpop.permute.xlu0 %6466 }
0x1cd8   : > { %13832 = vmatpush3.msra.mxu1 %v6467_v62  ;;  %v6941_v62 = vld [vmem:[%s18151_s30 + $0x190] sm:$0xff] }
0x1cd9   : > { %13841 = vmatprep.subr.mxu1 %v15606_v6 }
0x1cde   : > { %v15469_v28 = vpop.eup %15468 }
0x1cdf   : > { %v6465_v1 = vmul.f32 %v15469_v28, %v15465_v55  ;;  %v6926_v55 = vld [vmem:[%s18151_s30 + $0x118] sm:$0xff]  ;;  %v14680_v28 = vpack.c.bf16 %v6941_v62, %v6925_v43  ;;  %v6947_v43 = vld [vmem:[%s18151_s30 + $0x1c0] sm:$0xff] }
0x1ce1   : > { %13834 = vmatmul.mubr.msk.f32.vlgmr.msra.gmra.mrb[60].mxu1 %vm1347_vm3, %v6465_v1  ;;  %v6896_v1 = vld [vmem:[%s18151_s30 + $0x28] sm:$0xff] }
0x1ce2   : > { %13843 = vmatprep.mubr.msk.f32.mxu1 %vm15605_vm0, %v15606_v6  ;;  %v14682_v2 = vpack.c.bf16 %v6912_v40, %v6896_v1  ;;  %v6933_v1 = vld [vmem:[%s18151_s30 + $0x150] sm:$0xff] }
0x1ce3   : > { %v6949_v40 = vld [vmem:[%s18151_s30 + $0x1d0] sm:$0xff] }
0x1d46   : > { %v6629_v4 = vpop.xlane.xlu1 %6628 }
0x1d47   : > { %15470 = vrcp.f32 %v6629_v4  ;;  %v6914_v4 = vld [vmem:[%s18151_s30 + $0xb8] sm:$0xff] }
0x1d4a   : > { %v6633_v5 = vpop.permute.xlu1 %6632 }
0x1d4b   : > { %13842 = vmatpush3.msra.mxu1 %v6633_v5  ;;  %v14690_v5 = vpack.c.bf16 %v6914_v4, %v6898_v46  ;;  %v6904_v46 = vld [vmem:[%s18151_s30 + $0x68] sm:$0xff]  ;;  %v6906_v4 = vld [vmem:[%s18151_s30 + $0x78] sm:$0xff] }
0x1d4c   : > { %14663 = vmatprep.subr.bf16.mxu1 %v15604_v3 }
0x1d51   : > { %v15471_v31 = vpop.eup %15470 }
0x1d52   : > { %v6631_v15 = vmul.f32 %v15471_v31, %v15467_v58  ;;  %v14678_v58 = vpack.c.bf16 %v6942_v39, %v6926_v55  ;;  %v6932_v55 = vld [vmem:[%s18151_s30 + $0x148] sm:$0xff]  ;;  %v6934_v39 = vld [vmem:[%s18151_s30 + $0x158] sm:$0xff] }
0x1d54   : > { %13844 = vmatmul.mubr.msk.f32.vlgmr.msra.gmra.mrb[62].mxu1 %vm1347_vm3, %v6631_v15 }
0x1d55   : > { %14665 = vmatpush3.bf16.msra.mxu1 %v14664_v11  ;;  %13857 = vmatprep.mubr.msk.f32.mxu1 %vm15605_vm0, %v15606_v6  ;;  %v12008_v11 = vld [vmem:[%s18152_s11] ss:$0 sm:$0xff] }
0x1db4   : > { %v6538_v60 = vpop.f32.mrb[60].mxu1 }
0x1db5   : > { %v13835_v16 = vpop.f32.mrb[61].mxu1  ;;  %13858 = vmatmul.mubr.msk.f32.vlgmr.msra.gmra.mrb[64].mxu1 %vm1271_vm2, %v6538_v60  ;;  %v12009_v60 = vld [vmem:[%s18153_s26] ss:$0 sm:$0xff]  ;;  %s18155_s26 = sld [smem:[#allocation30_spill]] }
0x1db6   : > { %7177 = vmatprep.mubr.f32.mxu1 %v15606_v6  ;;  %v6895_v16 = vld [vmem:[%s18151_s30 + $0x20] sm:$0xff] }
0x1dbb   : > { %s18156_s16 = smov %s18155_s26 }
0x1e27   : > { %v6704_v17 = vpop.f32.mrb[62].mxu1 }
0x1e28   : > { %v13845_v20 = vpop.f32.mrb[63].mxu1  ;;  %13851 = vmatmul.mubr.msk.f32.vlgmr.msra.gmra.mrb[54].mxu0 %vm1271_vm2, %v6704_v17  ;;  %v6911_v17 = vld [vmem:[%s18151_s30 + $0xa0] sm:$0xff] }
0x1e29   : > { %7106 = vmatprep.mubr.f32.mxu0 %v15606_v6  ;;  %14669 = vmatpush1.bf16.msra.mxu0 %v14668_v38  ;;  %v6899_v38 = vld [vmem:[%s18151_s30 + $0x40] sm:$0xff] }
0x1e2a   : > { %14671 = vmatprep.subr.bf16.mxu0 %v14670_v49  ;;  %v6948_v49 = vld [vmem:[%s18151_s30 + $0x1c8] sm:$0xff]  ;;  %v14700_v56 = vpack.c.bf16 %v6915_v35, %v6899_v38  ;;  %v7658_v38 = vld [vmem:[%s18156_s16 + $0x100] sm:$0xff] }
0x1e2b   : > { %v14702_v62 = vpack.c.bf16 %v6948_v49, %v6932_v55  ;;  %v7659_v35 = vld [vmem:[%s18156_s16 + $0x108] sm:$0xff] }
0x1e2c   : > { %v14764_v49 = vpack.c.bf16 %v7659_v35, %v7658_v38  ;;  %v7684_v38 = vld [vmem:[%s18156_s16 + $0x1d0] sm:$0xff]  ;;  %v7685_v35 = vld [vmem:[%s18156_s16 + $0x1d8] sm:$0xff] }
0x1e2d   : > { %14673 = vmatpush1.bf16.msra.mxu0 %v14672_v59  ;;  %v6931_v59 = vld [vmem:[%s18151_s30 + $0x140] sm:$0xff] }
0x1e2e   : > { %14683 = vmatprep.subr.bf16.mxu0 %v14682_v2  ;;  %v6920_v2 = vld [vmem:[%s18151_s30 + $0xe8] sm:$0xff] }
0x1e88   : > { %v6850_v21 = vpop.f32.mrb[64].mxu1 }
0x1e89   : > { %v13859_v22 = vpop.f32.mrb[65].mxu1 }
0x1e8a   : > { %v6913_v22 = vld [vmem:[%s18151_s30 + $0xb0] sm:$0xff] }
0x1efb   : > { %v6777_v24 = vpop.f32.mrb[54].mxu0 }
0x1efc   : > { %v6851_v27 = vadd.f32 %v6850_v21, %v6777_v24  ;;  %v13852_v34 = vpop.f32.mrb[55].mxu0  ;;  %v6897_v21 = vld [vmem:[%s18151_s30 + $0x30] sm:$0xff]  ;;  %v6944_v24 = vld [vmem:[%s18151_s30 + $0x1a8] sm:$0xff] }
0x1efd   : > { %v6946_v34 = vld [vmem:[%s18151_s30 + $0x1b8] sm:$0xff] }
0x1efe   : > { %v6860_v54 = vadd.f32 %v12007_v23, %v6851_v27  ;;  %v6928_v23 = vld [vmem:[%s18151_s30 + $0x128] sm:$0xff]  ;;  %v6930_v27 = vld [vmem:[%s18151_s30 + $0x138] sm:$0xff] }
0x1f00   : > { %v6861_v13 = vadd.f32 %v6860_v54, %v16943_v9  ;;  %v6910_v9 = vld [vmem:[%s18151_s30 + $0x98] sm:$0xff] }
0x1f01   : > { %v14674_v26 = vpack.c.bf16 %v6910_v9, %v6894_v61  ;;  %v6900_v61 = vld [vmem:[%s18151_s30 + $0x48] sm:$0xff]  ;;  %v6902_v9 = vld [vmem:[%s18151_s30 + $0x58] sm:$0xff] }
0x1f02   : > { %v6864_v14 = vsel %vm1189_vm1, %v6861_v13, 0.0  ;;  %v14698_v42 = vpack.c.bf16 %v6916_v53, %v6900_v61 }
0x1f03   : > { %6865 = vadd.xlane.f32.xlu1 %v6864_v14  ;;  %14675 = vmatprep.subr.bf16.mxu1 %v14674_v26  ;;  %v14692_v14 = vpack.c.bf16 %v6913_v22, %v6897_v21  ;;  %v14696_v26 = vpack.c.bf16 %v6945_v63, %v6929_v12  ;;  %v6952_v21 = vld [vmem:[%s18151_s30 + $0x1e8] sm:$0xff]  ;;  %v6938_v22 = vld [vmem:[%s18151_s30 + $0x178] sm:$0xff]  ;;  %v7674_v12 = vld [vmem:[%s18156_s16 + $0x180] sm:$0xff] }
0x1f04   : > { %14677 = vmatpush1.bf16.msra.mxu1 %v14676_v57  ;;  %v14706_v57 = vpack.c.bf16 %v6918_v45, %v6902_v9  ;;  %v7675_v63 = vld [vmem:[%s18156_s16 + $0x188] sm:$0xff]  ;;  %v7626_v9 = vld [vmem:[%s18156_s16] sm:$0xff] }
0x1f05   : > { %14679 = vmatprep.subr.bf16.mxu1 %v14678_v58  ;;  %v14708_v58 = vpack.c.bf16 %v6917_v48, %v6901_v47  ;;  %v7627_v45 = vld [vmem:[%s18156_s16 + $0x8] sm:$0xff]  ;;  %v7676_v47 = vld [vmem:[%s18156_s16 + $0x190] sm:$0xff]  ;;  %v7677_v48 = vld [vmem:[%s18156_s16 + $0x198] sm:$0xff] }
0x1f06   : > { %v14732_v55 = vpack.c.bf16 %v7627_v45, %v7626_v9  ;;  %v7666_v9 = vld [vmem:[%s18156_s16 + $0x140] sm:$0xff]  ;;  %v7667_v45 = vld [vmem:[%s18156_s16 + $0x148] sm:$0xff] }
0x1f08   : > { %14681 = vmatpush1.bf16.msra.mxu1 %v14680_v28  ;;  %v14710_v28 = vpack.c.bf16 %v6950_v50, %v6934_v39  ;;  %v7628_v39 = vld [vmem:[%s18156_s16 + $0x10] sm:$0xff]  ;;  %v7629_v50 = vld [vmem:[%s18156_s16 + $0x18] sm:$0xff] }
0x1f09   : > { %14691 = vmatprep.subr.bf16.mxu1 %v14690_v5  ;;  %v6922_v5 = vld [vmem:[%s18151_s30 + $0xf8] sm:$0xff] }
0x1f90   : > { %v6866_v36 = vpop.xlane.xlu1 %6865 }
0x1f91   : > { %v6867_v18 = vmul.f32 0.03125, %v6866_v36  ;;  %v6927_v36 = vld [vmem:[%s18151_s30 + $0x120] sm:$0xff] }
0x1f93   : > { %v6868_v19 = vsub.f32 %v6861_v13, %v6867_v18  ;;  %v14684_v13 = vpack.c.bf16 %v6911_v17, %v6895_v16  ;;  %v6943_v18 = vld [vmem:[%s18151_s30 + $0x1a0] sm:$0xff]  ;;  %v6905_v16 = vld [vmem:[%s18151_s30 + $0x70] sm:$0xff] }
0x1f94   : > { %v14688_v0 = vpack.c.bf16 %v6943_v18, %v6927_v36  ;;  %v6921_v17 = vld [vmem:[%s18151_s30 + $0xf0] sm:$0xff] }
0x1f95   : > { %v6869_v37 = vmul.f32 %v6868_v19, %v6868_v19  ;;  %v6937_v36 = vld [vmem:[%s18151_s30 + $0x170] sm:$0xff] }
0x1f96   : > { %v6953_v18 = vld [vmem:[%s18151_s30 + $0x1f0] sm:$0xff] }
0x1f97   : > { %v6870_v41 = vsel %vm1189_vm1, %v6869_v37, 0.0  ;;  %v14728_v53 = vpack.c.bf16 %v6953_v18, %v6937_v36  ;;  %v7682_v36 = vld [vmem:[%s18156_s16 + $0x1c0] sm:$0xff]  ;;  %v7683_v18 = vld [vmem:[%s18156_s16 + $0x1c8] sm:$0xff] }
0x1f98   : > { %6871 = vadd.xlane.f32.xlu0 %v6870_v41  ;;  %v14694_v41 = vpack.c.bf16 %v6946_v34, %v6930_v27  ;;  %v14724_v27 = vpack.c.bf16 %v6921_v17, %v6905_v16  ;;  %v6935_v34 = vld [vmem:[%s18151_s30 + $0x160] sm:$0xff]  ;;  %v7680_v16 = vld [vmem:[%s18156_s16 + $0x1b0] sm:$0xff]  ;;  %v7681_v17 = vld [vmem:[%s18156_s16 + $0x1b8] sm:$0xff] }
0x2025   : > { %v6872_v7 = vpop.xlane.xlu0 %6871 }
0x2026   : > { %v6873_v10 = vmul.f32 0.03125, %v6872_v7  ;;  %v14704_v7 = vpack.c.bf16 %v6947_v43, %v6931_v59  ;;  %v7660_v59 = vld [vmem:[%s18156_s16 + $0x110] sm:$0xff]  ;;  %v7661_v43 = vld [vmem:[%s18156_s16 + $0x118] sm:$0xff] }
0x2028   : > { %v6874_v31 = vadd.f32 1e-05, %v6873_v10  ;;  %v14712_v10 = vpack.c.bf16 %v6949_v40, %v6933_v1  ;;  %v7678_v1 = vld [vmem:[%s18156_s16 + $0x1a0] sm:$0xff]  ;;  %v7679_v40 = vld [vmem:[%s18156_s16 + $0x1a8] sm:$0xff] }
0x202a   : > { %15472 = vrsqrt.f32 %v6874_v31  ;;  %v6903_v31 = vld [vmem:[%s18151_s30 + $0x60] sm:$0xff] }
0x2034   : > { %v15473_v15 = vpop.eup %15472 }
0x2035   : > { %v6876_v20 = vmul.f32 %v15473_v15, %v6868_v19  ;;  %v14686_v19 = vpack.c.bf16 %v6944_v24, %v6928_v23  ;;  %v14714_v15 = vpack.c.bf16 %v6920_v2, %v6904_v46  ;;  %v6954_v23 = vld [vmem:[%s18151_s30 + $0x1f8] sm:$0xff]  ;;  %v14736_v46 = vpack.c.bf16 %v7629_v50, %v7628_v39  ;;  %v7668_v39 = vld [vmem:[%s18156_s16 + $0x150] sm:$0xff] }
0x2036   : > { %v14768_v2 = vpack.c.bf16 %v7661_v43, %v7660_v59  ;;  %v7669_v50 = vld [vmem:[%s18156_s16 + $0x158] sm:$0xff]  ;;  %v7686_v59 = vld [vmem:[%s18156_s16 + $0x1e0] sm:$0xff]  ;;  %v7687_v43 = vld [vmem:[%s18156_s16 + $0x1e8] sm:$0xff] }
0x2037   : > { %v6883_v54 = vmul.f32 %v12008_v11, %v6876_v20  ;;  %v6919_v11 = vld [vmem:[%s18151_s30 + $0xe0] sm:$0xff]  ;;  %v6936_v20 = vld [vmem:[%s18151_s30 + $0x168] sm:$0xff] }
0x2038   : > { %v14716_v24 = vpack.c.bf16 %v6919_v11, %v6903_v31  ;;  %v7662_v31 = vld [vmem:[%s18156_s16 + $0x120] sm:$0xff]  ;;  %v7663_v11 = vld [vmem:[%s18156_s16 + $0x128] sm:$0xff] }
0x2039   : > { %v17019_v37 = vadd.f32 %v12009_v60, %v6883_v54  ;;  %v14722_v60 = vpack.c.bf16 %v6922_v5, %v6906_v4  ;;  %v6951_v54 = vld [vmem:[%s18151_s30 + $0x1e0] sm:$0xff]  ;;  %v7631_v5 = vld [vmem:[%s18156_s16 + $0x28] sm:$0xff] }
0x203a   : > { %v14720_v61 = vpack.c.bf16 %v6951_v54, %v6935_v34  ;;  %v7630_v4 = vld [vmem:[%s18156_s16 + $0x20] sm:$0xff]  ;;  %v7664_v34 = vld [vmem:[%s18156_s16 + $0x130] sm:$0xff]  ;;  %v7665_v54 = vld [vmem:[%s18156_s16 + $0x138] sm:$0xff] }
0x203b   : > { %12010 = vmatmul.mubr.msk.f32.vlgmr.msra.gmra.mrb[56].mxu0 %vm1189_vm1, %v17019_v37  ;;  %12011 = vmatmul.mubr.msk.f32.vlgmr.msra.gmra.mrb[66].mxu1 %vm1189_vm1, %v17019_v37 }
0x203c   : > { %14685 = vmatpush1.bf16.msra.mxu0 %v14684_v13  ;;  %14693 = vmatpush1.bf16.msra.mxu1 %v14692_v14  ;;  %v14718_v13 = vpack.c.bf16 %v6952_v21, %v6936_v20  ;;  %v14726_v14 = vpack.c.bf16 %v6954_v23, %v6938_v22  ;;  %v14740_v20 = vpack.c.bf16 %v7631_v5, %v7630_v4  ;;  %v7632_v22 = vld [vmem:[%s18156_s16 + $0x30] sm:$0xff]  ;;  %v7633_v23 = vld [vmem:[%s18156_s16 + $0x38] sm:$0xff]  ;;  %v7670_v4 = vld [vmem:[%s18156_s16 + $0x160] sm:$0xff] }
0x203d   : > { %14687 = vmatprep.subr.bf16.mxu0 %v14686_v19  ;;  %14695 = vmatprep.subr.bf16.mxu1 %v14694_v41  ;;  %v7642_v19 = vld [vmem:[%s18155_s26 + $0x80] sm:$0xff]  ;;  %v7643_v41 = vld [vmem:[%s18156_s16 + $0x88] sm:$0xff]  ;;  %v14772_v21 = vpack.c.bf16 %v7663_v11, %v7662_v31  ;;  %v7656_v31 = vld [vmem:[%s18156_s16 + $0xf0] sm:$0xff]  ;;  %s18157_s26 = sld [smem:[#allocation29_spill]] }
0x203e   : > { %7248 = vmatprep.mubr.f32.mxu0 %v15606_v6  ;;  %7319 = vmatprep.mubr.f32.mxu1 %v15606_v6  ;;  %v7671_v5 = vld [vmem:[%s18156_s16 + $0x168] sm:$0xff]  ;;  %v7657_v11 = vld [vmem:[%s18156_s16 + $0xf8] sm:$0xff] }
0x2040   : > { %14689 = vmatpush1.bf16.msra.mxu0 %v14688_v0  ;;  %14697 = vmatpush1.bf16.msra.mxu1 %v14696_v26  ;;  %v14730_v0 = vpack.c.bf16 %v7643_v41, %v7642_v19  ;;  %v14762_v26 = vpack.c.bf16 %v7675_v63, %v7674_v12  ;;  %v14744_v19 = vpack.c.bf16 %v7633_v23, %v7632_v22  ;;  %v7634_v12 = vld [vmem:[%s18156_s16 + $0x40] sm:$0xff]  ;;  %v7635_v63 = vld [vmem:[%s18156_s16 + $0x48] sm:$0xff]  ;;  %v7672_v23 = vld [vmem:[%s18156_s16 + $0x170] sm:$0xff] }
0x2041   : > { %14699 = vmatprep.subr.bf16.mxu0 %v14698_v42  ;;  %14707 = vmatprep.subr.bf16.mxu1 %v14706_v57  ;;  %v7644_v42 = vld [vmem:[%s18156_s16 + $0x90] sm:$0xff]  ;;  %v7645_v57 = vld [vmem:[%s18156_s16 + $0x98] sm:$0xff]  ;;  %v14776_v41 = vpack.c.bf16 %v7665_v54, %v7664_v34  ;;  %v7706_v34 = vld [vmem:[%s18156_s16 + $0x280] sm:$0xff] }
0x2042   : > { %v7707_v54 = vld [vmem:[%s18156_s16 + $0x288] sm:$0xff] }
0x2043   : > { %12012 = vmatmul.mubr.msk.f32.vlgmr.msra.gmra.mrb[58].mxu0 %vm1189_vm1, %v17019_v37  ;;  %12013 = vmatmul.mubr.msk.f32.vlgmr.msra.gmra.mrb[68].mxu1 %vm1189_vm1, %v17019_v37  ;;  %s18158_s15 = smov %s18157_s26 }
0x2044   : > { %14701 = vmatpush1.bf16.msra.mxu0 %v14700_v56  ;;  %14709 = vmatpush1.bf16.msra.mxu1 %v14708_v58  ;;  %v14734_v56 = vpack.c.bf16 %v7645_v57, %v7644_v42  ;;  %v14766_v58 = vpack.c.bf16 %v7677_v48, %v7676_v47  ;;  %v14748_v42 = vpack.c.bf16 %v7635_v63, %v7634_v12  ;;  %v7636_v47 = vld [vmem:[%s18156_s16 + $0x50] sm:$0xff]  ;;  %v7637_v48 = vld [vmem:[%s18156_s16 + $0x58] sm:$0xff] }
0x2045   : > { %14703 = vmatprep.subr.bf16.mxu0 %v14702_v62  ;;  %14711 = vmatprep.subr.bf16.mxu1 %v14710_v28  ;;  %v7646_v62 = vld [vmem:[%s18156_s16 + $0xa0] sm:$0xff]  ;;  %v7647_v28 = vld [vmem:[%s18156_s16 + $0xa8] sm:$0xff]  ;;  %v14780_v57 = vpack.c.bf16 %v7667_v45, %v7666_v9 }
0x2046   : > { %7390 = vmatprep.mubr.f32.mxu0 %v15606_v6  ;;  %7461 = vmatprep.mubr.f32.mxu1 %v15606_v6  ;;  %v7690_v45 = vld [vmem:[%s18156_s16 + $0x200] sm:$0xff] }
0x2048   : > { %14705 = vmatpush1.bf16.msra.mxu0 %v14704_v7  ;;  %14713 = vmatpush1.bf16.msra.mxu1 %v14712_v10  ;;  %v14738_v7 = vpack.c.bf16 %v7647_v28, %v7646_v62  ;;  %v14770_v10 = vpack.c.bf16 %v7679_v40, %v7678_v1  ;;  %v14752_v62 = vpack.c.bf16 %v7637_v48, %v7636_v47  ;;  %v7638_v1 = vld [vmem:[%s18156_s16 + $0x60] sm:$0xff]  ;;  %v7723_v47 = vld [vmem:[%s18156_s16 + $0x308] sm:$0xff]  ;;  %v7708_v48 = vld [vmem:[%s18156_s16 + $0x290] sm:$0xff] }
0x2049   : > { %14715 = vmatprep.subr.bf16.mxu0 %v14714_v15  ;;  %14723 = vmatprep.subr.bf16.mxu1 %v14722_v60  ;;  %v7648_v15 = vld [vmem:[%s18156_s16 + $0xb0] sm:$0xff]  ;;  %v7649_v60 = vld [vmem:[%s18156_s16 + $0xb8] sm:$0xff]  ;;  %v14784_v28 = vpack.c.bf16 %v7669_v50, %v7668_v39 }
0x204a   : > { %v7709_v39 = vld [vmem:[%s18156_s16 + $0x298] sm:$0xff]  ;;  %v7740_v50 = vld [vmem:[%s18156_s16 + $0x390] sm:$0xff] }
0x204b   : > { %12014 = vmatmul.mubr.msk.f32.vlgmr.msra.gmra.mrb[60].mxu0 %vm1189_vm1, %v17019_v37  ;;  %12015 = vmatmul.mubr.msk.f32.vlgmr.msra.gmra.mrb[70].mxu1 %vm1189_vm1, %v17019_v37 }
0x204c   : > { %14717 = vmatpush1.bf16.msra.mxu0 %v14716_v24  ;;  %14725 = vmatpush1.bf16.msra.mxu1 %v14724_v27  ;;  %v14742_v24 = vpack.c.bf16 %v7649_v60, %v7648_v15  ;;  %v14774_v27 = vpack.c.bf16 %v7681_v17, %v7680_v16  ;;  %v7688_v15 = vld [vmem:[%s18156_s16 + $0x1f0] sm:$0xff]  ;;  %v14758_v60 = vpack.c.bf16 %v7657_v11, %v7656_v31  ;;  %v7689_v16 = vld [vmem:[%s18156_s16 + $0x1f8] sm:$0xff] }
0x204d   : > { %14719 = vmatprep.subr.bf16.mxu0 %v14718_v13  ;;  %14727 = vmatprep.subr.bf16.mxu1 %v14726_v14  ;;  %v7650_v13 = vld [vmem:[%s18156_s16 + $0xc0] sm:$0xff]  ;;  %v7651_v14 = vld [vmem:[%s18156_s16 + $0xc8] sm:$0xff]  ;;  %v7640_v17 = vld [vmem:[%s18156_s16 + $0x70] sm:$0xff] }
0x204e   : > { %7532 = vmatprep.mubr.f32.mxu0 %v15606_v6  ;;  %7603 = vmatprep.mubr.f32.mxu1 %v15606_v6 }
0x2050   : > { %14721 = vmatpush1.bf16.msra.mxu0 %v14720_v61  ;;  %14729 = vmatpush1.bf16.msra.mxu1 %v14728_v53  ;;  %v14746_v61 = vpack.c.bf16 %v7651_v14, %v7650_v13  ;;  %v14778_v53 = vpack.c.bf16 %v7683_v18, %v7682_v36  ;;  %v7738_v13 = vld [vmem:[%s18156_s16 + $0x380] sm:$0xff]  ;;  %v14794_v14 = vpack.c.bf16 %v7707_v54, %v7706_v34  ;;  %v7739_v36 = vld [vmem:[%s18156_s16 + $0x388] sm:$0xff] }
0x2051   : > { %14731 = vmatprep.subr.bf16.mxu0 %v14730_v0  ;;  %14763 = vmatprep.subr.bf16.mxu1 %v14762_v26  ;;  %v7652_v0 = vld [vmem:[%s18156_s16 + $0xd0] sm:$0xff]  ;;  %v7653_v26 = vld [vmem:[%s18156_s16 + $0xd8] sm:$0xff]  ;;  %v14826_v18 = vpack.c.bf16 %v7739_v36, %v7738_v13  ;;  %v7727_v36 = vld [vmem:[%s18156_s16 + $0x328] sm:$0xff] }
0x2053   : > { %12016 = vmatmul.mubr.msk.f32.vlgmr.msra.gmra.mrb[62].mxu0 %vm1189_vm1, %v17019_v37  ;;  %12017 = vmatmul.mubr.msk.f32.vlgmr.msra.gmra.mrb[72].mxu1 %vm1189_vm1, %v17019_v37 }
0x2054   : > { %14733 = vmatpush3.bf16.msra.mxu0 %v14732_v55  ;;  %14765 = vmatpush3.bf16.msra.mxu1 %v14764_v49  ;;  %v14750_v55 = vpack.c.bf16 %v7653_v26, %v7652_v0  ;;  %v14782_v49 = vpack.c.bf16 %v7685_v35, %v7684_v38  ;;  %v7691_v0 = vld [vmem:[%s18156_s16 + $0x208] sm:$0xff] }
0x2055   : > { %14735 = vmatprep.subr.bf16.mxu0 %v14734_v56  ;;  %14767 = vmatprep.subr.bf16.mxu1 %v14766_v58  ;;  %v7654_v56 = vld [vmem:[%s18156_s16 + $0xe0] sm:$0xff]  ;;  %v7655_v58 = vld [vmem:[%s18156_s16 + $0xe8] sm:$0xff] }
0x2056   : > { %v14754_v40 = vpack.c.bf16 %v7655_v58, %v7654_v56  ;;  %v7741_v56 = vld [vmem:[%s18156_s16 + $0x398] sm:$0xff] }
0x2058   : > { %14737 = vmatpush3.bf16.msra.mxu0 %v14736_v46  ;;  %14769 = vmatpush3.bf16.msra.mxu1 %v14768_v2  ;;  %v14786_v46 = vpack.c.bf16 %v7687_v43, %v7686_v59  ;;  %v7639_v2 = vld [vmem:[%s18156_s16 + $0x68] sm:$0xff]  ;;  %v14796_v43 = vpack.c.bf16 %v7691_v0, %v7690_v45 }
0x2059   : > { %14739 = vmatprep.subr.bf16.mxu0 %v14738_v7  ;;  %14771 = vmatprep.subr.bf16.mxu1 %v14770_v10  ;;  %v14756_v7 = vpack.c.bf16 %v7639_v2, %v7638_v1  ;;  %v14788_v10 = vpack.c.bf16 %v7671_v5, %v7670_v4  ;;  %v7693_v1 = vld [vmem:[%s18156_s16 + $0x218] sm:$0xff]  ;;  %v14798_v2 = vpack.c.bf16 %v7709_v39, %v7708_v48  ;;  %v7724_v5 = vld [vmem:[%s18156_s16 + $0x310] sm:$0xff]  ;;  %v7746_v39 = vld [vmem:[%s18156_s16 + $0x3c0] sm:$0xff] }
0x205a   : > { %v14830_v4 = vpack.c.bf16 %v7741_v56, %v7740_v50  ;;  %v7729_v48 = vld [vmem:[%s18156_s16 + $0x338] sm:$0xff]  ;;  %v7747_v50 = vld [vmem:[%s18156_s16 + $0x3c8] sm:$0xff] }
0x205c   : > { %14741 = vmatpush3.bf16.msra.mxu0 %v14740_v20  ;;  %14773 = vmatpush3.bf16.msra.mxu1 %v14772_v21  ;;  %v7641_v20 = vld [vmem:[%s18156_s16 + $0x78] sm:$0xff]  ;;  %v14790_v21 = vpack.c.bf16 %v7689_v16, %v7688_v15  ;;  %v7711_v15 = vld [vmem:[%s18156_s16 + $0x2a8] sm:$0xff] }
0x205d   : > { %14743 = vmatprep.subr.bf16.mxu0 %v14742_v24  ;;  %14775 = vmatprep.subr.bf16.mxu1 %v14774_v27  ;;  %v14760_v22 = vpack.c.bf16 %v7641_v20, %v7640_v17  ;;  %v7673_v24 = vld [vmem:[%s18156_s16 + $0x178] sm:$0xff]  ;;  %v7743_v16 = vld [vmem:[%s18156_s16 + $0x3a8] sm:$0xff] }
0x205e   : > { %v14792_v27 = vpack.c.bf16 %v7673_v24, %v7672_v23  ;;  %v7694_v23 = vld [vmem:[%s18156_s16 + $0x220] sm:$0xff]  ;;  %v7695_v24 = vld [vmem:[%s18156_s16 + $0x228] sm:$0xff] }
0x205f   : > { %v14804_v0 = vpack.c.bf16 %v7695_v24, %v7694_v23 }
0x2060   : > { %14745 = vmatpush3.bf16.msra.mxu0 %v14744_v19  ;;  %14777 = vmatpush3.bf16.msra.mxu1 %v14776_v41  ;;  %v17146_v19 = vld [vmem:[%s18157_s26] sm:$0xff]  ;;  %s18159_s26 = sld [smem:[#allocation31_spill]] }
0x2061   : > { %14747 = vmatprep.subr.bf16.mxu0 %v14746_v61  ;;  %14779 = vmatprep.subr.bf16.mxu1 %v14778_v53  ;;  %v6962_v41 = vrot.slane %v17146_v19, %v16091_v29  ;;  %v6970_v12 = vrot.slane %v17146_v19, %v16094_v30  ;;  %v6966_v63 = vrot.slane %v17146_v19, %v16100_v32 }
0x2062   : > { %v6974_v61 = vrot.slane %v17146_v19, %v16103_v33  ;;  %v6982_v31 = vrot.slane %v17146_v19, %v16119_v51  ;;  %v6990_v11 = vrot.slane %v17146_v19, %v16122_v52 }
0x2064   : > { %14749 = vmatpush3.bf16.msra.mxu0 %v14748_v42  ;;  %14781 = vmatpush3.bf16.msra.mxu1 %v14780_v57  ;;  %v7722_v57 = vld [vmem:[%s18156_s16 + $0x300] sm:$0xff] }
0x2065   : > { %14751 = vmatprep.subr.bf16.mxu0 %v14750_v55  ;;  %14783 = vmatprep.subr.bf16.mxu1 %v14782_v49 }
0x2066   : > { %s18160_s20 = smov %s18159_s26 }
0x2068   : > { %14753 = vmatpush3.bf16.msra.mxu0 %v14752_v62  ;;  %14785 = vmatpush3.bf16.msra.mxu1 %v14784_v28  ;;  %v14828_v62 = vpack.c.bf16 %v7723_v47, %v7722_v57  ;;  %v7692_v28 = vld [vmem:[%s18156_s16 + $0x210] sm:$0xff] }
0x2069   : > { %14755 = vmatprep.subr.bf16.mxu0 %v14754_v40  ;;  %14787 = vmatprep.subr.bf16.mxu1 %v14786_v46  ;;  %v7728_v47 = vld [vmem:[%s18156_s16 + $0x330] sm:$0xff] }
0x206c   : > { %14757 = vmatpush3.bf16.msra.mxu0 %v14756_v7  ;;  %14789 = vmatpush3.bf16.msra.mxu1 %v14788_v10  ;;  %v7725_v7 = vld [vmem:[%s18156_s16 + $0x318] sm:$0xff]  ;;  %v7710_v10 = vld [vmem:[%s18156_s16 + $0x2a0] sm:$0xff] }
0x206d   : > { %14759 = vmatprep.subr.bf16.mxu0 %v14758_v60  ;;  %14791 = vmatprep.subr.bf16.mxu1 %v14790_v21  ;;  %v7742_v60 = vld [vmem:[%s18156_s16 + $0x3a0] sm:$0xff]  ;;  %v14800_v21 = vpack.c.bf16 %v7693_v1, %v7692_v28  ;;  %v14802_v54 = vpack.c.bf16 %v7711_v15, %v7710_v10  ;;  %v7699_v28 = vld [vmem:[%s18156_s16 + $0x248] sm:$0xff]  ;;  %v7717_v10 = vld [vmem:[%s18156_s16 + $0x2d8] sm:$0xff] }
0x206e   : > { %v14834_v13 = vpack.c.bf16 %v7743_v16, %v7742_v60  ;;  %v17213_v15 = vld [vmem:[%s18158_s15 + $0x8] sm:$0xff] }
0x206f   : > { %v7018_v23 = vrot.slane %v17213_v15, %v16176_v8 }
0x2070   : > { %14761 = vmatpush3.bf16.msra.mxu0 %v14760_v22  ;;  %14793 = vmatpush3.bf16.msra.mxu1 %v14792_v27  ;;  %v14832_v22 = vpack.c.bf16 %v7725_v7, %v7724_v5  ;;  %v7731_v5 = vld [vmem:[%s18156_s16 + $0x348] sm:$0xff]  ;;  %v7716_v7 = vld [vmem:[%s18156_s16 + $0x2d0] sm:$0xff] }
0x2071   : > { %14795 = vmatprep.subr.bf16.mxu0 %v14794_v14  ;;  %14827 = vmatprep.subr.bf16.mxu1 %v14826_v18  ;;  %v7726_v14 = vld [vmem:[%s18156_s16 + $0x320] sm:$0xff]  ;;  %v7712_v18 = vld [vmem:[%s18156_s16 + $0x2b0] sm:$0xff]  ;;  %v14814_v24 = vpack.c.bf16 %v7717_v10, %v7716_v7  ;;  %v7771_v10 = vld [vmem:[%s18156_s16 + $0x488] sm:$0xff] }
0x2072   : > { %v7770_v7 = vld [vmem:[%s18156_s16 + $0x480] sm:$0xff] }
0x210e   : > { %v7108_v53 = vpop.f32.mrb[56].mxu0  ;;  %v7179_v9 = vpop.f32.mrb[66].mxu1 }
0x210f   : > { %v7109_v26 = vadd.f32 %v7108_v53, %v6962_v41  ;;  %v7180_v38 = vadd.f32 %v7179_v9, %v6970_v12  ;;  %v7110_v35 = vpop.f32.mrb[57].mxu0  ;;  %v7181_v42 = vpop.f32.mrb[67].mxu1  ;;  %v7745_v53 = vld [vmem:[%s18156_s16 + $0x3b8] sm:$0xff] }
0x2110   : > { %v7111_v55 = vadd.f32 %v7110_v35, %v6966_v63  ;;  %v7182_v49 = vadd.f32 %v7181_v42, %v6974_v61  ;;  %v7713_v63 = vld [vmem:[%s18156_s16 + $0x2b8] sm:$0xff]  ;;  %v7744_v61 = vld [vmem:[%s18156_s16 + $0x3b0] sm:$0xff] }
0x2111   : > { %v7610_v40 = vmax.f32 %v7109_v26, 0.0  ;;  %v7612_v46 = vmax.f32 %v7180_v38, 0.0  ;;  %v14836_v26 = vpack.c.bf16 %v7727_v36, %v7726_v14  ;;  %v7696_v38 = vld [vmem:[%s18156_s16 + $0x230] sm:$0xff]  ;;  %v7697_v35 = vld [vmem:[%s18156_s16 + $0x238] sm:$0xff]  ;;  %v14806_v42 = vpack.c.bf16 %v7713_v63, %v7712_v18  ;;  %v7719_v14 = vld [vmem:[%s18156_s16 + $0x2e8] sm:$0xff] }
0x2112   : > { %v7611_v58 = vmax.f32 %v7111_v55, 0.0  ;;  %v7613_v59 = vmax.f32 %v7182_v49, 0.0  ;;  %v14838_v57 = vpack.c.bf16 %v7745_v53, %v7744_v61  ;;  %v7714_v55 = vld [vmem:[%s18156_s16 + $0x2c0] sm:$0xff]  ;;  %v7715_v49 = vld [vmem:[%s18156_s16 + $0x2c8] sm:$0xff] }
0x2113   : > { %v7750_v36 = vld [vmem:[%s18156_s16 + $0x3e0] sm:$0xff]  ;;  %v7751_v18 = vld [vmem:[%s18156_s16 + $0x3e8] sm:$0xff] }
0x2114   : > { %7953 = vmatprep.mubr.f32.mxu0 %v7611_v58  ;;  %8023 = vmatprep.mubr.f32.mxu1 %v7613_v59  ;;  %v14808_v59 = vpack.c.bf16 %v7697_v35, %v7696_v38  ;;  %v7702_v53 = vld [vmem:[%s18156_s16 + $0x260] sm:$0xff]  ;;  %v14850_v35 = vpack.c.bf16 %v7751_v18, %v7750_v36  ;;  %v7787_v36 = vld [vmem:[%s18156_s16 + $0x508] sm:$0xff]  ;;  %v7772_v18 = vld [vmem:[%s18156_s16 + $0x490] sm:$0xff] }
0x2115   : > { %7954 = vmatmul.mubr.f32.vlgmr.msra.gmra.mrb[64].mxu0 %v7610_v40  ;;  %8024 = vmatmul.mubr.f32.vlgmr.msra.gmra.mrb[74].mxu1 %v7612_v46  ;;  %v14810_v46 = vpack.c.bf16 %v7715_v49, %v7714_v55  ;;  %v7752_v55 = vld [vmem:[%s18156_s16 + $0x3f0] sm:$0xff]  ;;  %v7753_v49 = vld [vmem:[%s18156_s16 + $0x3f8] sm:$0xff] }
0x2116   : > { %v17176_v17 = vpop.f32.mrb[58].mxu0  ;;  %v17178_v20 = vpop.f32.mrb[68].mxu1  ;;  %14797 = vmatpush3.bf16.msra.mxu0 %v14796_v43  ;;  %14829 = vmatpush3.bf16.msra.mxu1 %v14828_v62  ;;  %v14840_v43 = vpack.c.bf16 %v7729_v48, %v7728_v47  ;;  %v7698_v62 = vld [vmem:[%s18156_s16 + $0x240] sm:$0xff]  ;;  %v7720_v47 = vld [vmem:[%s18156_s16 + $0x2f0] sm:$0xff]  ;;  %v7721_v48 = vld [vmem:[%s18156_s16 + $0x2f8] sm:$0xff] }
0x2117   : > { %v7252_v27 = vpop.f32.mrb[59].mxu0  ;;  %v7323_v34 = vpop.f32.mrb[69].mxu1  ;;  %14799 = vmatprep.subr.bf16.mxu0 %v14798_v2  ;;  %14831 = vmatprep.subr.bf16.mxu1 %v14830_v4  ;;  %v14842_v2 = vpack.c.bf16 %v7747_v50, %v7746_v39  ;;  %v7730_v4 = vld [vmem:[%s18156_s16 + $0x340] sm:$0xff]  ;;  %v14812_v60 = vpack.c.bf16 %v7699_v28, %v7698_v62  ;;  %v6978_v39 = vrot.slane %v17146_v19, %v16192_v25  ;;  %v7705_v62 = vld [vmem:[%s18156_s16 + $0x278] sm:$0xff]  ;;  %v7736_v28 = vld [vmem:[%s18156_s16 + $0x370] sm:$0xff] }
0x2118   : > { %v7253_v41 = vadd.f32 %v7252_v27, %v6982_v31  ;;  %v7324_v12 = vadd.f32 %v7323_v34, %v6990_v11  ;;  %v7748_v31 = vld [vmem:[%s18156_s16 + $0x3d0] sm:$0xff]  ;;  %v7749_v11 = vld [vmem:[%s18156_s16 + $0x3d8] sm:$0xff]  ;;  %v14844_v16 = vpack.c.bf16 %v7731_v5, %v7730_v4  ;;  %v14854_v4 = vpack.c.bf16 %v7753_v49, %v7752_v55  ;;  %v7774_v55 = vld [vmem:[%s18156_s16 + $0x4a0] sm:$0xff] }
0x2119   : > { %v14846_v27 = vpack.c.bf16 %v7749_v11, %v7748_v31  ;;  %v7732_v34 = vld [vmem:[%s18156_s16 + $0x350] sm:$0xff]  ;;  %v7737_v5 = vld [vmem:[%s18156_s16 + $0x378] sm:$0xff]  ;;  %v6998_v31 = vrot.slane %v17213_v15, %v16100_v32  ;;  %v7802_v11 = vld [vmem:[%s18156_s16 + $0x580] sm:$0xff] }
0x211a   : > { %v7615_v9 = vmax.f32 %v7253_v41, 0.0  ;;  %v7617_v45 = vmax.f32 %v7324_v12, 0.0  ;;  %14801 = vmatpush3.bf16.msra.mxu0 %v14800_v21  ;;  %14833 = vmatpush3.bf16.msra.mxu1 %v14832_v22  ;;  %v7700_v21 = vld [vmem:[%s18156_s16 + $0x250] sm:$0xff]  ;;  %v7701_v22 = vld [vmem:[%s18156_s16 + $0x258] sm:$0xff]  ;;  %v7775_v49 = vld [vmem:[%s18156_s16 + $0x4a8] sm:$0xff] }
0x211b   : > { %14803 = vmatprep.subr.bf16.mxu0 %v14802_v54  ;;  %14835 = vmatprep.subr.bf16.mxu1 %v14834_v13  ;;  %v7733_v54 = vld [vmem:[%s18156_s16 + $0x358] sm:$0xff]  ;;  %v7718_v13 = vld [vmem:[%s18156_s16 + $0x2e0] sm:$0xff]  ;;  %v14816_v63 = vpack.c.bf16 %v7701_v22, %v7700_v21  ;;  %v14856_v21 = vpack.c.bf16 %v7737_v5, %v7736_v28  ;;  %v14858_v22 = vpack.c.bf16 %v7771_v10, %v7770_v7  ;;  %v7791_v7 = vld [vmem:[%s18156_s16 + $0x528] sm:$0xff] }
0x211c   : > { %8093 = vmatprep.mubr.f32.mxu0 %v7615_v9  ;;  %8163 = vmatprep.mubr.f32.mxu1 %v7617_v45  ;;  %v14848_v61 = vpack.c.bf16 %v7733_v54, %v7732_v34  ;;  %v7703_v9 = vld [vmem:[%s18156_s16 + $0x268] sm:$0xff]  ;;  %v14818_v38 = vpack.c.bf16 %v7719_v14, %v7718_v13  ;;  %v7754_v34 = vld [vmem:[%s18156_s16 + $0x400] sm:$0xff]  ;;  %v14866_v28 = vpack.c.bf16 %v7775_v49, %v7774_v55  ;;  %v7776_v10 = vld [vmem:[%s18156_s16 + $0x4b0] sm:$0xff] }
0x211d   : > { %v14820_v50 = vpack.c.bf16 %v7703_v9, %v7702_v53  ;;  %v7755_v54 = vld [vmem:[%s18156_s16 + $0x408] sm:$0xff]  ;;  %v7786_v14 = vld [vmem:[%s18156_s16 + $0x500] sm:$0xff]  ;;  %v7765_v55 = vld [vmem:[%s18156_s16 + $0x458] sm:$0xff] }
0x211e   : > { %v17196_v56 = vpop.f32.mrb[60].mxu0  ;;  %v17198_v58 = vpop.f32.mrb[70].mxu1  ;;  %14805 = vmatpush3.bf16.msra.mxu0 %v14804_v0  ;;  %14837 = vmatpush3.bf16.msra.mxu1 %v14836_v26  ;;  %v7796_v49 = vld [vmem:[%s18156_s16 + $0x550] sm:$0xff] }
0x211f   : > { %v17202_v1 = vpop.f32.mrb[61].mxu0  ;;  %v17204_v40 = vpop.f32.mrb[71].mxu1  ;;  %14807 = vmatprep.subr.bf16.mxu0 %v14806_v42  ;;  %14839 = vmatprep.subr.bf16.mxu1 %v14838_v57  ;;  %v7734_v42 = vld [vmem:[%s18156_s16 + $0x360] sm:$0xff]  ;;  %v7735_v57 = vld [vmem:[%s18156_s16 + $0x368] sm:$0xff] }
0x2120   : > { %v7395_v13 = vadd.f32 %v17202_v1, %v6998_v31  ;;  %v14892_v1 = vpack.c.bf16 %v7787_v36, %v7786_v14  ;;  %v7777_v31 = vld [vmem:[%s18156_s16 + $0x4b8] sm:$0xff]  ;;  %v7810_v14 = vld [vmem:[%s18156_s16 + $0x5c0] sm:$0xff]  ;;  %v7811_v36 = vld [vmem:[%s18156_s16 + $0x5c8] sm:$0xff] }
0x2122   : > { %14809 = vmatpush3.bf16.msra.mxu0 %v14808_v59  ;;  %14841 = vmatpush3.bf16.msra.mxu1 %v14840_v43  ;;  %v14852_v59 = vpack.c.bf16 %v7735_v57, %v7734_v42  ;;  %v7704_v43 = vld [vmem:[%s18156_s16 + $0x270] sm:$0xff] }
0x2123   : > { %14811 = vmatprep.subr.bf16.mxu0 %v14810_v46  ;;  %14843 = vmatprep.subr.bf16.mxu1 %v14842_v2  ;;  %v6986_v46 = vrot.slane %v17146_v19, %v16176_v8  ;;  %v14822_v2 = vpack.c.bf16 %v7721_v48, %v7720_v47  ;;  %v14824_v19 = vpack.c.bf16 %v7705_v62, %v7704_v43  ;;  %v7788_v42 = vld [vmem:[%s18156_s16 + $0x510] sm:$0xff]  ;;  %v7789_v48 = vld [vmem:[%s18156_s16 + $0x518] sm:$0xff] }
0x2124   : > { %v14896_v62 = vpack.c.bf16 %v7789_v48, %v7788_v42  ;;  %v7813_v42 = vld [vmem:[%s18156_s16 + $0x5d8] sm:$0xff]  ;;  %v7764_v48 = vld [vmem:[%s18156_s16 + $0x450] sm:$0xff] }
0x2126   : > { %v17225_v41 = vpop.f32.mrb[62].mxu0  ;;  %v7605_v12 = vpop.f32.mrb[72].mxu1  ;;  %14813 = vmatpush3.bf16.msra.mxu0 %v14812_v60  ;;  %14845 = vmatpush3.bf16.msra.mxu1 %v14844_v16  ;;  %v7803_v60 = vld [vmem:[%s18156_s16 + $0x588] sm:$0xff]  ;;  %v7006_v16 = vrot.slane %v17213_v15, %v16103_v33 }
0x2127   : > { %v17229_v45 = vadd.f32 %v7605_v12, %v7018_v23  ;;  %v17231_v0 = vpop.f32.mrb[63].mxu0  ;;  %v17233_v26 = vpop.f32.mrb[73].mxu1  ;;  %14815 = vmatprep.subr.bf16.mxu0 %v14814_v24  ;;  %14847 = vmatprep.subr.bf16.mxu1 %v14846_v27  ;;  %v7251_v23 = vadd.f32 %v17176_v17, %v6978_v39  ;;  %v7322_v24 = vadd.f32 %v17178_v20, %v6986_v46  ;;  %v7805_v17 = vld [vmem:[%s18156_s16 + $0x598] sm:$0xff]  ;;  %v7758_v46 = vld [vmem:[%s18156_s16 + $0x420] sm:$0xff] }
0x2128   : > { %v14890_v27 = vpack.c.bf16 %v7803_v60, %v7802_v11  ;;  %v7466_v12 = vadd.f32 %v17204_v40, %v7006_v16  ;;  %v14860_v20 = vpack.c.bf16 %v7755_v54, %v7754_v34  ;;  %v7619_v40 = vmax.f32 %v7395_v13, 0.0  ;;  %v7808_v11 = vld [vmem:[%s18156_s16 + $0x5b0] sm:$0xff]  ;;  %v7809_v60 = vld [vmem:[%s18156_s16 + $0x5b8] sm:$0xff]  ;;  %v7778_v54 = vld [vmem:[%s18156_s16 + $0x4c0] sm:$0xff] }
0x2129   : > { %v7614_v53 = vmax.f32 %v7251_v23, 0.0  ;;  %v7616_v9 = vmax.f32 %v7322_v24, 0.0  ;;  %v7761_v23 = vld [vmem:[%s18156_s16 + $0x438] sm:$0xff]  ;;  %v7792_v24 = vld [vmem:[%s18156_s16 + $0x530] sm:$0xff]  ;;  %v7779_v13 = vld [vmem:[%s18156_s16 + $0x4c8] sm:$0xff] }
0x212a   : > { %14817 = vmatpush3.bf16.msra.mxu0 %v14816_v63  ;;  %14849 = vmatpush3.bf16.msra.mxu1 %v14848_v61  ;;  %v7773_v63 = vld [vmem:[%s18156_s16 + $0x498] sm:$0xff]  ;;  %v7804_v61 = vld [vmem:[%s18156_s16 + $0x590] sm:$0xff]  ;;  %v7621_v39 = vmax.f32 %v7466_v12, 0.0 }
0x212b   : > { %14819 = vmatprep.subr.bf16.mxu0 %v14818_v38  ;;  %14851 = vmatprep.subr.bf16.mxu1 %v14850_v35  ;;  %v7756_v38 = vld [vmem:[%s18156_s16 + $0x410] sm:$0xff]  ;;  %v7757_v35 = vld [vmem:[%s18156_s16 + $0x418] sm:$0xff]  ;;  %v14862_v57 = vpack.c.bf16 %v7773_v63, %v7772_v18  ;;  %v14894_v47 = vpack.c.bf16 %v7805_v17, %v7804_v61  ;;  %v14874_v63 = vpack.c.bf16 %v7779_v13, %v7778_v54  ;;  %v7762_v61 = vld [vmem:[%s18156_s16 + $0x440] sm:$0xff] }
0x212c   : > { %v14864_v43 = vpack.c.bf16 %v7757_v35, %v7756_v38  ;;  %v7793_v34 = vld [vmem:[%s18156_s16 + $0x538] sm:$0xff]  ;;  %v7763_v17 = vld [vmem:[%s18156_s16 + $0x448] sm:$0xff]  ;;  %v7812_v35 = vld [vmem:[%s18156_s16 + $0x5d0] sm:$0xff] }
0x212d   : > { %v14904_v12 = vpack.c.bf16 %v7793_v34, %v7792_v24  ;;  %v7781_v38 = vld [vmem:[%s18156_s16 + $0x4d8] sm:$0xff]  ;;  %v7768_v34 = vld [vmem:[%s18156_s16 + $0x470] sm:$0xff] }
0x212e   : > { %14821 = vmatpush3.bf16.msra.mxu0 %v14820_v50  ;;  %14853 = vmatpush3.bf16.msra.mxu1 %v14852_v59  ;;  %v7806_v50 = vld [vmem:[%s18156_s16 + $0x5a0] sm:$0xff]  ;;  %v7807_v59 = vld [vmem:[%s18156_s16 + $0x5a8] sm:$0xff]  ;;  %v7769_v54 = vld [vmem:[%s18156_s16 + $0x478] sm:$0xff] }
0x212f   : > { %14823 = vmatprep.subr.bf16.mxu0 %v14822_v2  ;;  %14855 = vmatprep.subr.bf16.mxu1 %v14854_v4  ;;  %v7759_v2 = vld [vmem:[%s18156_s16 + $0x428] sm:$0xff]  ;;  %v7790_v4 = vld [vmem:[%s18156_s16 + $0x520] sm:$0xff]  ;;  %v14898_v5 = vpack.c.bf16 %v7807_v59, %v7806_v50  ;;  %v7797_v50 = vld [vmem:[%s18156_s16 + $0x558] sm:$0xff] }
0x2130   : > { %v14868_v16 = vpack.c.bf16 %v7759_v2, %v7758_v46  ;;  %v7782_v59 = vld [vmem:[%s18156_s16 + $0x4e0] sm:$0xff]  ;;  %v14880_v46 = vpack.c.bf16 %v7765_v55, %v7764_v48  ;;  %v14912_v2 = vpack.c.bf16 %v7797_v50, %v7796_v49  ;;  %v7800_v13 = vld [vmem:[%s18156_s16 + $0x570] sm:$0xff]  ;;  %v7851_v55 = vld [vmem:[%s18156_s16 + $0x708] sm:$0xff] }
0x2131   : > { %v7850_v48 = vld [vmem:[%s18156_s16 + $0x700] sm:$0xff] }
0x2132   : > { %14825 = vmatpush3.bf16.msra.mxu0 %v14824_v19  ;;  %14857 = vmatpush3.bf16.msra.mxu1 %v14856_v21  ;;  %v14900_v19 = vpack.c.bf16 %v7791_v7, %v7790_v4  ;;  %v14870_v21 = vpack.c.bf16 %v7777_v31, %v7776_v10  ;;  %v7767_v7 = vld [vmem:[%s18156_s16 + $0x468] sm:$0xff]  ;;  %v7798_v10 = vld [vmem:[%s18156_s16 + $0x560] sm:$0xff] }
0x2133   : > { %14859 = vmatprep.subr.bf16.mxu0 %v14858_v22  ;;  %14891 = vmatprep.subr.bf16.mxu1 %v14890_v27  ;;  %v7760_v22 = vld [vmem:[%s18156_s16 + $0x430] sm:$0xff]  ;;  %v14902_v27 = vpack.c.bf16 %v7809_v60, %v7808_v11  ;;  %v7799_v11 = vld [vmem:[%s18156_s16 + $0x568] sm:$0xff] }
0x2134   : > { %v14872_v18 = vpack.c.bf16 %v7761_v23, %v7760_v22  ;;  %v7784_v60 = vld [vmem:[%s18156_s16 + $0x4f0] sm:$0xff]  ;;  %v6994_v23 = vrot.slane %v17213_v15, %v16091_v29  ;;  %v14916_v24 = vpack.c.bf16 %v7799_v11, %v7798_v10  ;;  %v7839_v10 = vld [vmem:[%s18156_s16 + $0x6a8] sm:$0xff] }
0x2135   : > { %8094 = vmatmul.mubr.f32.vlgmr.msra.gmra.mrb[66].mxu0 %v7614_v53  ;;  %8164 = vmatmul.mubr.f32.vlgmr.msra.gmra.mrb[76].mxu1 %v7616_v9  ;;  %v14906_v53 = vpack.c.bf16 %v7811_v36, %v7810_v14  ;;  %v7795_v9 = vld [vmem:[%s18156_s16 + $0x548] sm:$0xff]  ;;  %v7002_v14 = vrot.slane %v17213_v15, %v16094_v30 }
0x2136   : > { %14861 = vmatpush3.bf16.msra.mxu0 %v14860_v20  ;;  %8233 = vmatprep.mubr.f32.mxu0 %v7619_v40  ;;  %v7794_v20 = vld [vmem:[%s18156_s16 + $0x540] sm:$0xff]  ;;  %v14876_v40 = vpack.c.bf16 %v7763_v17, %v7762_v61  ;;  %v7014_v61 = vrot.slane %v17213_v15, %v16119_v51 }
0x2137   : > { %14893 = vmatpush3.bf16.msra.mxu1 %v14892_v1  ;;  %8303 = vmatprep.mubr.f32.mxu1 %v7621_v39  ;;  %v7780_v1 = vld [vmem:[%s18156_s16 + $0x4d0] sm:$0xff]  ;;  %v14910_v39 = vpack.c.bf16 %v7813_v42, %v7812_v35  ;;  %v7866_v17 = vld [vmem:[%s18156_s16 + $0x780] sm:$0xff] }
0x2138   : > { %14863 = vmatprep.subr.bf16.mxu0 %v14862_v57  ;;  %14895 = vmatprep.subr.bf16.mxu1 %v14894_v47  ;;  %v14908_v57 = vpack.c.bf16 %v7795_v9, %v7794_v20  ;;  %v14878_v47 = vpack.c.bf16 %v7781_v38, %v7780_v1  ;;  %v7867_v20 = vld [vmem:[%s18156_s16 + $0x788] sm:$0xff]  ;;  %v14888_v9 = vpack.c.bf16 %v7769_v54, %v7768_v34  ;;  %v7818_v42 = vld [vmem:[%s18156_s16 + $0x600] sm:$0xff] }
0x2139   : > { %v7393_v1 = vadd.f32 %v17196_v56, %v6994_v23  ;;  %v7537_v49 = vadd.f32 %v17231_v0, %v7014_v61  ;;  %v7836_v56 = vld [vmem:[%s18156_s16 + $0x690] sm:$0xff]  ;;  %v7854_v34 = vld [vmem:[%s18156_s16 + $0x720] sm:$0xff] }
0x213a   : > { %14865 = vmatpush3.bf16.msra.mxu0 %v14864_v43  ;;  %v7783_v43 = vld [vmem:[%s18156_s16 + $0x4e8] sm:$0xff]  ;;  %v7852_v0 = vld [vmem:[%s18156_s16 + $0x710] sm:$0xff] }
0x213b   : > { %14897 = vmatpush3.bf16.msra.mxu1 %v14896_v62  ;;  %14867 = vmatprep.subr.bf16.mxu0 %v14866_v28  ;;  %v7814_v62 = vld [vmem:[%s18156_s16 + $0x5e0] sm:$0xff]  ;;  %v7815_v28 = vld [vmem:[%s18156_s16 + $0x5e8] sm:$0xff]  ;;  %v14882_v4 = vpack.c.bf16 %v7783_v43, %v7782_v59  ;;  %v7868_v43 = vld [vmem:[%s18156_s16 + $0x790] sm:$0xff] }
0x213c   : > { %14899 = vmatprep.subr.bf16.mxu1 %v14898_v5  ;;  %v7766_v5 = vld [vmem:[%s18156_s16 + $0x460] sm:$0xff]  ;;  %v14914_v31 = vpack.c.bf16 %v7815_v28, %v7814_v62  ;;  %v7618_v62 = vmax.f32 %v7393_v1, 0.0  ;;  %v14956_v28 = vpack.c.bf16 %v7851_v55, %v7850_v48 }
0x213d   : > { %v14884_v22 = vpack.c.bf16 %v7767_v7, %v7766_v5  ;;  %v7853_v7 = vld [vmem:[%s18156_s16 + $0x718] sm:$0xff] }
0x213e   : > { %14869 = vmatpush3.bf16.msra.mxu0 %v14868_v16  ;;  %v7785_v16 = vld [vmem:[%s18156_s16 + $0x4f8] sm:$0xff] }
0x213f   : > { %14901 = vmatpush3.bf16.msra.mxu1 %v14900_v19  ;;  %14871 = vmatprep.subr.bf16.mxu0 %v14870_v21  ;;  %v7816_v19 = vld [vmem:[%s18156_s16 + $0x5f0] sm:$0xff]  ;;  %v7817_v21 = vld [vmem:[%s18156_s16 + $0x5f8] sm:$0xff] }
0x2140   : > { %14903 = vmatprep.subr.bf16.mxu1 %v14902_v27  ;;  %v14886_v27 = vpack.c.bf16 %v7785_v16, %v7784_v60  ;;  %v14918_v36 = vpack.c.bf16 %v7817_v21, %v7816_v19  ;;  %v7870_v60 = vld [vmem:[%s18156_s16 + $0x7a0] sm:$0xff]  ;;  %v7871_v16 = vld [vmem:[%s18156_s16 + $0x7a8] sm:$0xff] }
0x2141   : > { %v14962_v54 = vpack.c.bf16 %v7871_v16, %v7870_v60  ;;  %v7878_v60 = vld [vmem:[%s18156_s16 + $0x7e0] sm:$0xff]  ;;  %v7879_v16 = vld [vmem:[%s18156_s16 + $0x7e8] sm:$0xff] }
0x2142   : > { %14873 = vmatpush3.bf16.msra.mxu0 %v14872_v18  ;;  %v7801_v18 = vld [vmem:[%s18156_s16 + $0x578] sm:$0xff] }
0x2143   : > { %14905 = vmatpush3.bf16.msra.mxu1 %v14904_v12  ;;  %14875 = vmatprep.subr.bf16.mxu0 %v14874_v63  ;;  %v7834_v12 = vld [vmem:[%s18156_s16 + $0x680] sm:$0xff]  ;;  %v7835_v63 = vld [vmem:[%s18156_s16 + $0x688] sm:$0xff]  ;;  %v14920_v38 = vpack.c.bf16 %v7801_v18, %v7800_v13  ;;  %v7872_v18 = vld [vmem:[%s18156_s16 + $0x7b0] sm:$0xff] }
0x2144   : > { %14907 = vmatprep.subr.bf16.mxu1 %v14906_v53  ;;  %v7022_v53 = vrot.slane %v17213_v15, %v16122_v52  ;;  %v14922_v35 = vpack.c.bf16 %v7835_v63, %v7834_v12  ;;  %v7855_v13 = vld [vmem:[%s18156_s16 + $0x728] sm:$0xff]  ;;  %v7873_v12 = vld [vmem:[%s18156_s16 + $0x7b8] sm:$0xff] }
0x2145   : > { %v14964_v61 = vpack.c.bf16 %v7855_v13, %v7854_v34  ;;  %v14966_v1 = vpack.c.bf16 %v7873_v12, %v7872_v18  ;;  %v14978_v34 = vpack.c.bf16 %v7879_v16, %v7878_v60  ;;  %v7848_v13 = vld [vmem:[%s18156_s16 + $0x6f0] sm:$0xff]  ;;  %v7881_v18 = vld [vmem:[%s18156_s16 + $0x7f8] sm:$0xff] }
0x2146   : > { %14877 = vmatpush3.bf16.msra.mxu0 %v14876_v40  ;;  %v7819_v40 = vld [vmem:[%s18156_s16 + $0x608] sm:$0xff]  ;;  %v7608_v50 = vadd.f32 %v17233_v26, %v7022_v53  ;;  %v7838_v26 = vld [vmem:[%s18156_s16 + $0x6a0] sm:$0xff]  ;;  %v7825_v53 = vld [vmem:[%s18156_s16 + $0x638] sm:$0xff] }
0x2147   : > { %14909 = vmatpush3.bf16.msra.mxu1 %v14908_v57  ;;  %14879 = vmatprep.subr.bf16.mxu0 %v14878_v47  ;;  %v7464_v57 = vadd.f32 %v17198_v58, %v7002_v14  ;;  %v14954_v47 = vpack.c.bf16 %v7867_v20, %v7866_v17  ;;  %v14924_v59 = vpack.c.bf16 %v7819_v40, %v7818_v42  ;;  %v7869_v58 = vld [vmem:[%s18156_s16 + $0x798] sm:$0xff]  ;;  %v7840_v14 = vld [vmem:[%s18156_s16 + $0x6b0] sm:$0xff]  ;;  %v7843_v42 = vld [vmem:[%s18156_s16 + $0x6c8] sm:$0xff] }
0x2148   : > { %14911 = vmatprep.subr.bf16.mxu1 %v14910_v39  ;;  %v7837_v39 = vld [vmem:[%s18156_s16 + $0x698] sm:$0xff]  ;;  %v14958_v11 = vpack.c.bf16 %v7869_v58, %v7868_v43  ;;  %v7625_v19 = vmax.f32 %v7608_v50, 0.0  ;;  %v14930_v23 = vpack.c.bf16 %v7839_v10, %v7838_v26  ;;  %v7824_v20 = vld [vmem:[%s18156_s16 + $0x630] sm:$0xff]  ;;  %v7874_v40 = vld [vmem:[%s18156_s16 + $0x7c0] sm:$0xff] }
0x2149   : > { %v14926_v5 = vpack.c.bf16 %v7837_v39, %v7836_v56  ;;  %v7827_v56 = vld [vmem:[%s18156_s16 + $0x648] sm:$0xff]  ;;  %v7858_v39 = vld [vmem:[%s18156_s16 + $0x740] sm:$0xff]  ;;  %v7844_v43 = vld [vmem:[%s18156_s16 + $0x6d0] sm:$0xff] }
0x214a   : > { %14881 = vmatpush3.bf16.msra.mxu0 %v14880_v46  ;;  %v7820_v46 = vld [vmem:[%s18156_s16 + $0x610] sm:$0xff]  ;;  %v7845_v58 = vld [vmem:[%s18156_s16 + $0x6d8] sm:$0xff] }
0x214b   : > { %14913 = vmatpush3.bf16.msra.mxu1 %v14912_v2  ;;  %14883 = vmatprep.subr.bf16.mxu0 %v14882_v4  ;;  %v7821_v2 = vld [vmem:[%s18156_s16 + $0x618] sm:$0xff]  ;;  %v7620_v4 = vmax.f32 %v7464_v57, 0.0  ;;  %v7875_v57 = vld [vmem:[%s18156_s16 + $0x7c8] sm:$0xff] }
0x214c   : > { %14915 = vmatprep.subr.bf16.mxu1 %v14914_v31  ;;  %v7623_v31 = vmax.f32 %v7537_v49, 0.0  ;;  %v14928_v21 = vpack.c.bf16 %v7821_v2, %v7820_v46  ;;  %v7826_v49 = vld [vmem:[%s18156_s16 + $0x640] sm:$0xff]  ;;  %v14970_v50 = vpack.c.bf16 %v7875_v57, %v7874_v40  ;;  %v7861_v10 = vld [vmem:[%s18156_s16 + $0x758] sm:$0xff]  ;;  %v7624_v57 = vmax.f32 %v17229_v45, 0.0 }
0x214d   : > { %v14940_v46 = vpack.c.bf16 %v7827_v56, %v7826_v49 }
0x214e   : > { %14885 = vmatpush3.bf16.msra.mxu0 %v14884_v22  ;;  %v14960_v22 = vpack.c.bf16 %v7853_v7, %v7852_v0  ;;  %v14942_v0 = vpack.c.bf16 %v7845_v58, %v7844_v43  ;;  %v7860_v7 = vld [vmem:[%s18156_s16 + $0x750] sm:$0xff] }
0x214f   : > { %14917 = vmatpush3.bf16.msra.mxu1 %v14916_v24  ;;  %14887 = vmatprep.subr.bf16.mxu0 %v14886_v27  ;;  %v7822_v24 = vld [vmem:[%s18156_s16 + $0x620] sm:$0xff]  ;;  %v7823_v27 = vld [vmem:[%s18156_s16 + $0x628] sm:$0xff] }
0x2150   : > { %14919 = vmatprep.subr.bf16.mxu1 %v14918_v36  ;;  %v7841_v36 = vld [vmem:[%s18156_s16 + $0x6b8] sm:$0xff]  ;;  %v14932_v63 = vpack.c.bf16 %v7823_v27, %v7822_v24  ;;  %v7831_v24 = vld [vmem:[%s18156_s16 + $0x668] sm:$0xff]  ;;  %v7862_v27 = vld [vmem:[%s18156_s16 + $0x760] sm:$0xff] }
0x2151   : > { %v14934_v17 = vpack.c.bf16 %v7841_v36, %v7840_v14  ;;  %v7849_v14 = vld [vmem:[%s18156_s16 + $0x6f8] sm:$0xff]  ;;  %v7880_v36 = vld [vmem:[%s18156_s16 + $0x7f0] sm:$0xff] }
0x2152   : > { %14889 = vmatpush3.bf16.msra.mxu0 %v14888_v9  ;;  %v7856_v9 = vld [vmem:[%s18156_s16 + $0x730] sm:$0xff] }
0x2153   : > { %14921 = vmatpush3.bf16.msra.mxu1 %v14920_v38  ;;  %14923 = vmatprep.subr.bf16.mxu0 %v14922_v35  ;;  %v7857_v38 = vld [vmem:[%s18156_s16 + $0x738] sm:$0xff]  ;;  %v7842_v35 = vld [vmem:[%s18156_s16 + $0x6c0] sm:$0xff] }
0x2154   : > { %14955 = vmatprep.subr.bf16.mxu1 %v14954_v47  ;;  %v14936_v47 = vpack.c.bf16 %v7825_v53, %v7824_v20  ;;  %v14968_v48 = vpack.c.bf16 %v7857_v38, %v7856_v9  ;;  %v14938_v55 = vpack.c.bf16 %v7843_v42, %v7842_v35  ;;  %v7832_v20 = vld [vmem:[%s18156_s16 + $0x670] sm:$0xff]  ;;  %v7833_v53 = vld [vmem:[%s18156_s16 + $0x678] sm:$0xff]  ;;  %v14982_v9 = vpack.c.bf16 %v7881_v18, %v7880_v36 }
0x2155   : > { %8234 = vmatmul.mubr.f32.vlgmr.msra.gmra.mrb[68].mxu0 %v7618_v62  ;;  %v7876_v62 = vld [vmem:[%s18156_s16 + $0x7d0] sm:$0xff]  ;;  %v7865_v38 = vld [vmem:[%s18156_s16 + $0x778] sm:$0xff]  ;;  %v14952_v35 = vpack.c.bf16 %v7833_v53, %v7832_v20 }
0x2156   : > { %8304 = vmatmul.mubr.f32.vlgmr.msra.gmra.mrb[78].mxu1 %v7620_v4  ;;  %14925 = vmatpush3.bf16.msra.mxu0 %v14924_v59  ;;  %v7859_v59 = vld [vmem:[%s18156_s16 + $0x748] sm:$0xff]  ;;  %v7828_v4 = vld [vmem:[%s18156_s16 + $0x650] sm:$0xff] }
0x2157   : > { %8373 = vmatprep.mubr.f32.mxu0 %v7623_v31  ;;  %14957 = vmatpush3.bf16.msra.mxu1 %v14956_v28  ;;  %v7877_v28 = vld [vmem:[%s18156_s16 + $0x7d8] sm:$0xff]  ;;  %v14972_v2 = vpack.c.bf16 %v7859_v59, %v7858_v39  ;;  %v7846_v31 = vld [vmem:[%s18156_s16 + $0x6e0] sm:$0xff]  ;;  %v12023_v53 = vld [vmem:[%s18109_s6 + $0x30] sm:$0xff] }
0x2158   : > { %8443 = vmatprep.mubr.f32.mxu1 %v7625_v19  ;;  %14927 = vmatprep.subr.bf16.mxu0 %v14926_v5  ;;  %v7829_v5 = vld [vmem:[%s18156_s16 + $0x658] sm:$0xff]  ;;  %v14974_v26 = vpack.c.bf16 %v7877_v28, %v7876_v62 }
0x2159   : > { %14959 = vmatprep.subr.bf16.mxu1 %v14958_v11  ;;  %v7847_v11 = vld [vmem:[%s18156_s16 + $0x6e8] sm:$0xff]  ;;  %v14944_v19 = vpack.c.bf16 %v7829_v5, %v7828_v4 }
0x215a   : > { %14929 = vmatpush3.bf16.msra.mxu0 %v14928_v21  ;;  %v14976_v21 = vpack.c.bf16 %v7861_v10, %v7860_v7 }
0x215b   : > { %14961 = vmatpush3.bf16.msra.mxu1 %v14960_v22  ;;  %14931 = vmatprep.subr.bf16.mxu0 %v14930_v23  ;;  %v14946_v22 = vpack.c.bf16 %v7847_v11, %v7846_v31  ;;  %v7830_v23 = vld [vmem:[%s18156_s16 + $0x660] sm:$0xff] }
0x215c   : > { %14963 = vmatprep.subr.bf16.mxu1 %v14962_v54  ;;  %v7863_v54 = vld [vmem:[%s18156_s16 + $0x768] sm:$0xff]  ;;  %v14948_v12 = vpack.c.bf16 %v7831_v24, %v7830_v23 }
0x215e   : > { %14933 = vmatpush3.bf16.msra.mxu0 %v14932_v63  ;;  %v7010_v63 = vrot.slane %v17213_v15, %v16192_v25 }
0x215f   : > { %14965 = vmatpush3.bf16.msra.mxu1 %v14964_v61  ;;  %14935 = vmatprep.subr.bf16.mxu0 %v14934_v17  ;;  %v14980_v61 = vpack.c.bf16 %v7863_v54, %v7862_v27  ;;  %v14950_v17 = vpack.c.bf16 %v7849_v14, %v7848_v13 }
0x2160   : > { %14967 = vmatprep.subr.bf16.mxu1 %v14966_v1  ;;  %v7864_v1 = vld [vmem:[%s18156_s16 + $0x770] sm:$0xff]  ;;  %v7535_v42 = vadd.f32 %v17225_v41, %v7010_v63 }
0x2161   : > { %v14984_v40 = vpack.c.bf16 %v7865_v38, %v7864_v1 }
0x2162   : > { %14937 = vmatpush3.bf16.msra.mxu0 %v14936_v47  ;;  %v7622_v15 = vmax.f32 %v7535_v42, 0.0 }
0x2163   : > { %14969 = vmatpush3.bf16.msra.mxu1 %v14968_v48  ;;  %14939 = vmatprep.subr.bf16.mxu0 %v14938_v55  ;;  %v12018_v48 = vld [vmem:[%s18159_s26] ss:$0 sm:$0xff]  ;;  %s18161_s26 = sld [smem:[#allocation36_spill]] }
0x2164   : > { %14971 = vmatprep.subr.bf16.mxu1 %v14970_v50 }
0x2166   : > { %14941 = vmatpush3.bf16.msra.mxu0 %v14940_v46 }
0x2167   : > { %14973 = vmatpush3.bf16.msra.mxu1 %v14972_v2  ;;  %14943 = vmatprep.subr.bf16.mxu0 %v14942_v0 }
0x2168   : > { %14975 = vmatprep.subr.bf16.mxu1 %v14974_v26 }
0x2169   : > { %s18162_s0 = smov %s18161_s26 }
0x216a   : > { %14945 = vmatpush3.bf16.msra.mxu0 %v14944_v19 }
0x216b   : > { %14977 = vmatpush3.bf16.msra.mxu1 %v14976_v21  ;;  %14947 = vmatprep.subr.bf16.mxu0 %v14946_v22 }
0x216c   : > { %14979 = vmatprep.subr.bf16.mxu1 %v14978_v34 }
0x216e   : > { %14949 = vmatpush3.bf16.msra.mxu0 %v14948_v12 }
0x216f   : > { %14981 = vmatpush3.bf16.msra.mxu1 %v14980_v61  ;;  %14951 = vmatprep.subr.bf16.mxu0 %v14950_v17  ;;  %v12021_v61 = vld [vmem:[%s18109_s6 + $0x20] sm:$0xff]  ;;  %v12022_v17 = vld [vmem:[%s18109_s6 + $0x28] sm:$0xff] }
0x2170   : > { %14983 = vmatprep.subr.bf16.mxu1 %v14982_v9  ;;  %v14987_v20 = vpack.c.bf16 %v12022_v17, %v12021_v61  ;;  %v12024_v9 = vld [vmem:[%s18109_s6 + $0x38] sm:$0xff]  ;;  %v12053_v17 = vld [vmem:[%s18140_s9 + $0x20] sm:$0xff] }
0x2171   : > { %v14990_v1 = vpack.c.bf16 %v12024_v9, %v12023_v53  ;;  %v12055_v9 = vld [vmem:[%s18140_s9 + $0x30] sm:$0xff] }
0x2172   : > { %14953 = vmatpush3.bf16.msra.mxu0 %v14952_v35 }
0x2173   : > { %14985 = vmatpush3.bf16.msra.mxu1 %v14984_v40  ;;  %14986 = vmatprep.subr.bf16.mxu0 %v15604_v3  ;;  %v12019_v40 = vld [vmem:[%s18161_s26] ss:$0 sm:$0xff] }
0x2174   : > { %13871 = vmatprep.subr.mxu1 %v15606_v6 }
0x2175   : > { %8374 = vmatmul.mubr.f32.vlgmr.msra.gmra.mrb[70].mxu0 %v7622_v15 }
0x2176   : > { %8444 = vmatmul.mubr.f32.vlgmr.msra.gmra.mrb[80].mxu1 %v7624_v57  ;;  %13868 = vmatprep.mubr.msk.f32.mxu0 %vm15605_vm0, %v15606_v6  ;;  %v12020_v57 = vld [vmem:[%s18163_s22] ss:$0 sm:$0xff]  ;;  %s18167_s22 = sld [smem:[#allocation46_spill]] }
0x2177   : > { %13873 = vmatprep.mubr.msk.f32.mxu1 %vm15605_vm0, %v15606_v6  ;;  %14988 = vmatpush3.bf16.msra.mxu0 %v14987_v20  ;;  %v12054_v20 = vld [vmem:[%s18140_s9 + $0x28] sm:$0xff] }
0x2178   : > { %14989 = vmatprep.subr.bf16.mxu0 %v15604_v3  ;;  %v15005_v53 = vpack.c.bf16 %v12054_v20, %v12053_v17 }
0x217b   : > { %14991 = vmatpush3.bf16.msra.mxu0 %v14990_v1  ;;  %v12056_v1 = vld [vmem:[%s18140_s9 + $0x38] sm:$0xff] }
0x217c   : > { %13881 = vmatprep.subr.mxu0 %v15606_v6  ;;  %s12417_s26 = sshll.u32 %s18167_s22, 4 }
0x21e8   : > { %v13093_v41 = vpop.f32.mrb[64].mxu0  ;;  %v13128_v47 = vpop.f32.mrb[74].mxu1 }
0x21e9   : > { %v13094_v55 = vpop.f32.mrb[65].mxu0  ;;  %v13129_v49 = vpop.f32.mrb[75].mxu1 }
0x21ea   : > { %v13095_v56 = vadd.f32 %v13094_v55, %v13093_v41  ;;  %v13130_v39 = vadd.f32 %v13129_v49, %v13128_v47 }
0x21ec   : > { %v7956_v50 = vadd.f32 %v13095_v56, %v12018_v48  ;;  %v12026_v48 = vld [vmem:[%s18136_s7 + $0x1] ss:$0 sm:$0xff] }
0x21ee   : > { %v8026_v59 = vadd.f32 %v13130_v39, %v7956_v50 }
0x2208   : > { %v13163_v45 = vpop.f32.mrb[66].mxu0  ;;  %v13198_v43 = vpop.f32.mrb[76].mxu1 }
0x2209   : > { %v13164_v58 = vpop.f32.mrb[67].mxu0  ;;  %v13199_v62 = vpop.f32.mrb[77].mxu1 }
0x220a   : > { %v13165_v28 = vadd.f32 %v13164_v58, %v13163_v45  ;;  %v13200_v46 = vadd.f32 %v13199_v62, %v13198_v43 }
0x220c   : > { %v8096_v2 = vadd.f32 %v13165_v28, %v8026_v59 }
0x220e   : > { %v8166_v0 = vadd.f32 %v13200_v46, %v8096_v2 }
0x2228   : > { %v13233_v4 = vpop.f32.mrb[68].mxu0 }
0x2229   : > { %v13268_v5 = vpop.f32.mrb[78].mxu1  ;;  %v13234_v7 = vpop.f32.mrb[69].mxu0 }
0x222a   : > { %v13235_v26 = vadd.f32 %v13234_v7, %v13233_v4  ;;  %v13269_v10 = vpop.f32.mrb[79].mxu1 }
0x222b   : > { %v13270_v31 = vadd.f32 %v13269_v10, %v13268_v5 }
0x222c   : > { %v8236_v11 = vadd.f32 %v13235_v26, %v8166_v0 }
0x222e   : > { %v8306_v60 = vadd.f32 %v13270_v31, %v8236_v11 }
0x2248   : > { %v13303_v16 = vpop.f32.mrb[70].mxu0 }
0x2249   : > { %v13338_v19 = vpop.f32.mrb[80].mxu1  ;;  %v13304_v21 = vpop.f32.mrb[71].mxu0 }
0x224a   : > { %v13305_v22 = vadd.f32 %v13304_v21, %v13303_v16  ;;  %v13339_v23 = vpop.f32.mrb[81].mxu1 }
0x224b   : > { %v13340_v24 = vadd.f32 %v13339_v23, %v13338_v19 }
0x224c   : > { %v8376_v27 = vadd.f32 %v13305_v22, %v8306_v60 }
0x224e   : > { %v8446_v34 = vadd.f32 %v13340_v24, %v8376_v27 }
0x2250   : > { %v8449_v54 = vadd.f32 %v8446_v34, %v17019_v37  ;;  %v12028_v34 = vld [vmem:[%s18139_s8 + $0x20] sm:$0xff] }
0x2252   : > { %v8452_v13 = vsel %vm1189_vm1, %v8449_v54, 0.0 }
0x2253   : > { %8453 = vadd.xlane.f32.xlu0 %v8452_v13 }
0x22e0   : > { %v8454_v14 = vpop.xlane.xlu0 %8453 }
0x22e1   : > { %v8455_v36 = vmul.f32 0.03125, %v8454_v14 }
0x22e3   : > { %v8456_v18 = vsub.f32 %v8449_v54, %v8455_v36  ;;  %v12029_v54 = vld [vmem:[%s18139_s8 + $0x28] sm:$0xff] }
0x22e4   : > { %v14996_v36 = vpack.c.bf16 %v12029_v54, %v12028_v34 }
0x22e5   : > { %v8457_v12 = vmul.f32 %v8456_v18, %v8456_v18 }
0x22e7   : > { %v8458_v63 = vsel %vm1189_vm1, %v8457_v12, 0.0  ;;  %v12030_v12 = vld [vmem:[%s18139_s8 + $0x30] sm:$0xff] }
0x22e8   : > { %8459 = vadd.xlane.f32.xlu1 %v8458_v63  ;;  %v12031_v63 = vld [vmem:[%s18139_s8 + $0x38] sm:$0xff] }
0x22e9   : > { %v14993_v61 = vpack.c.bf16 %v12031_v63, %v12030_v12 }
0x2375   : > { %v8460_v37 = vpop.xlane.xlu1 %8459 }
0x2376   : > { %v8461_v38 = vmul.f32 0.03125, %v8460_v37 }
0x2378   : > { %v8462_v35 = vadd.f32 1e-05, %v8461_v38 }
0x237a   : > { %15474 = vrsqrt.f32 %v8462_v35  ;;  %v15008_v35 = vpack.c.bf16 %v12056_v1, %v12055_v9 }
0x2384   : > { %v15475_v42 = vpop.eup %15474 }
0x2385   : > { %v8464_v15 = vmul.f32 %v15475_v42, %v8456_v18 }
0x2387   : > { %v8471_v41 = vmul.f32 %v12019_v40, %v8464_v15 }
0x2389   : > { %v17419_v47 = vadd.f32 %v12020_v57, %v8471_v41  ;;  %v12041_v41 = vld [vmem:[%s18141_s13 + $0x1] ss:$0 sm:$0xff] }
0x238b   : > { %13869 = vmatmul.mubr.msk.f32.vlgmr.msra.gmra.mrb[72].mxu0 %vm1189_vm1, %v17419_v47 }
0x238c   : > { %13883 = vmatprep.mubr.msk.f32.mxu0 %vm15605_vm0, %v15606_v6 }
0x245e   : > { %v8561_v55 = vpop.f32.mrb[72].mxu0 }
0x245f   : > { %v8562_v49 = vadd.f32 %v12026_v48, %v8561_v55  ;;  %v13870_v56 = vpop.f32.mrb[73].mxu0 }
0x2461   : > { %8739 = vrot.lane.b32.xlu1 %v8562_v49, %s18137_s3  ;;  %8573 = vrot.lane.b32.xlu0 %v8562_v49, %s18138_s5 }
0x2465   : > { %8737 = vrot.lane.b32.xlu1 %v8562_v49, %s18133_s10 }
0x24d3   : > { %v8740_v39 = vpop.permute.xlu1 %8739  ;;  %v8574_v50 = vpop.permute.xlu0 %8573 }
0x24d4   : > { %13872 = vmatpush3.xpose.msk.msra.mxu1 %vm1271_vm2, %v8574_v50  ;;  %13882 = vmatpush3.xpose.msk.msra.mxu0 %vm1271_vm2, %v8740_v39 }
0x24d5   : > { %13876 = vmatprep.subr.mxu1 %v15606_v6  ;;  %14992 = vmatprep.subr.bf16.mxu0 %v15604_v3 }
0x24d7   : > { %v8738_v59 = vpop.permute.xlu1 %8737  ;;  %13874 = vmatmul.mubr.msk.f32.vlgmr.msra.gmra.mrb[82].mxu1 %vm1271_vm2, %v8562_v49 }
0x24d8   : > { %13884 = vmatmul.mubr.msk.f32.vlgmr.msra.gmra.mrb[74].mxu0 %vm1271_vm2, %v8738_v59  ;;  %13878 = vmatprep.mubr.msk.f32.mxu1 %vm15605_vm0, %v15606_v6 }
0x24d9   : > { %13895 = vmatprep.mubr.msk.f32.mxu0 %vm15605_vm0, %v15606_v6  ;;  %14994 = vmatpush3.bf16.msra.mxu0 %v14993_v61 }
0x24da   : > { %14998 = vmatprep.subr.bf16.mxu0 %v15604_v3 }
0x25aa   : > { %v8645_v45 = vpop.f32.mrb[82].mxu1 }
0x25ab   : > { %v8649_v43 = vmul.f32 0.25, %v8645_v45  ;;  %v13875_v58 = vpop.f32.mrb[83].mxu1  ;;  %v8811_v62 = vpop.f32.mrb[74].mxu0 }
0x25ac   : > { %v8815_v28 = vmul.f32 0.25, %v8811_v62  ;;  %v13885_v46 = vpop.f32.mrb[75].mxu0 }
0x25ad   : > { %v8650_v2 = vsel %vm1347_vm3, %v8649_v43, -inf }
0x25ae   : > { %8651 = vmax.xlane.f32.xlu0 %v8650_v2  ;;  %v8816_v0 = vsel %vm1347_vm3, %v8815_v28, -inf }
0x25af   : > { %8817 = vmax.xlane.f32.xlu1 %v8816_v0  ;;  %v12047_v0 = vld [vmem:[%s18144_s19 + $0x28] sm:$0xff] }
0x25c0   : > { %8661 = vrot.lane.b32.xlu1 %v8562_v49, %s18135_s1  ;;  %s1171_s1 = sand.u32 1, %s15555_s23  }
0x263b   : > { %v8652_v4 = vpop.xlane.xlu0 %8651 }
0x263c   : > { %v8653_v5 = vsub.f32 %v8649_v43, %v8652_v4  ;;  %v8818_v7 = vpop.xlane.xlu1 %8817 }
0x263d   : > { %v8819_v26 = vsub.f32 %v8815_v28, %v8818_v7  ;;  %v12049_v7 = vld [vmem:[%s18144_s19 + $0x38] sm:$0xff] }
0x263e   : > { %v8654_v10 = vmul.f32 1.442695, %v8653_v5  ;;  %v12048_v5 = vld [vmem:[%s18144_s19 + $0x30] sm:$0xff] }
0x263f   : > { %v8820_v31 = vmul.f32 1.442695, %v8819_v26  ;;  %v15002_v26 = vpack.c.bf16 %v12049_v7, %v12048_v5 }
0x2640   : > { %15476 = vpow2.f32 %v8654_v10  ;;  %v8662_v11 = vpop.permute.xlu1 %8661 }
0x2641   : > { %13877 = vmatpush3.msra.mxu1 %v8662_v11  ;;  %15478 = vpow2.f32 %v8820_v31 }
0x2642   : > { %13886 = vmatprep.subr.mxu1 %v15606_v6 }
0x264a   : > { %v15477_v60 = vpop.eup %15476 }
0x264b   : > { %v8656_v16 = vsel %vm1347_vm3, %v15477_v60, 0.0  ;;  %v15479_v19 = vpop.eup %15478 }
0x264c   : > { %8657 = vadd.xlane.f32.xlu0 %v8656_v16  ;;  %v8822_v21 = vsel %vm1347_vm3, %v15479_v19, 0.0  ;;  %v12044_v16 = vld [vmem:[%s18146_s17 + $0x1] ss:$0 sm:$0xff] }
0x2650   : > { %8823 = vadd.xlane.f32.xlu0 %v8822_v21  ;;  %v12045_v21 = vld [vmem:[%s18147_s21 + $0x1] ss:$0 sm:$0xff] }
0x2666   : > { %8827 = vrot.lane.b32.xlu0 %v8562_v49, %s18134_s18 }
0x26d9   : > { %v8658_v22 = vpop.xlane.xlu0 %8657 }
0x26da   : > { %15480 = vrcp.f32 %v8658_v22 }
0x26dd   : > { %v8824_v23 = vpop.xlane.xlu0 %8823 }
0x26de   : > { %15482 = vrcp.f32 %v8824_v23 }
0x26e1   : > { %v8828_v13 = vpop.permute.xlu0 %8827 }
0x26e4   : > { %v15481_v24 = vpop.eup %15480 }
0x26e5   : > { %v8660_v27 = vmul.f32 %v15481_v24, %v15477_v60  ;;  %v12051_v24 = vld [vmem:[%s18148_s24 + $0x1] ss:$0 sm:$0xff] }
0x26e7   : > { %13879 = vmatmul.mubr.msk.f32.vlgmr.msra.gmra.mrb[84].mxu1 %vm1347_vm3, %v8660_v27 }
0x26e8   : > { %v15483_v14 = vpop.eup %15482  ;;  %13887 = vmatpush3.msra.mxu1 %v8828_v13  ;;  %13888 = vmatprep.mubr.msk.f32.mxu1 %vm15605_vm0, %v15606_v6 }
0x26e9   : > { %v8826_v18 = vmul.f32 %v15483_v14, %v15479_v19  ;;  %14995 = vmatprep.subr.bf16.mxu1 %v15604_v3 }
0x26eb   : > { %13889 = vmatmul.mubr.msk.f32.vlgmr.msra.gmra.mrb[86].mxu1 %vm1347_vm3, %v8826_v18 }
0x26ec   : > { %14997 = vmatpush3.bf16.msra.mxu1 %v14996_v36  ;;  %13902 = vmatprep.mubr.msk.f32.mxu1 %vm15605_vm0, %v15606_v6 }
0x26ed   : > { %15004 = vmatprep.subr.bf16.mxu1 %v15604_v3 }
0x27ba   : > { %v8733_v37 = vpop.f32.mrb[84].mxu1 }
0x27bb   : > { %v13880_v38 = vpop.f32.mrb[85].mxu1  ;;  %13903 = vmatmul.mubr.msk.f32.vlgmr.msra.gmra.mrb[88].mxu1 %vm1271_vm2, %v8733_v37 }
0x27bc   : > { %15006 = vmatpush3.bf16.msra.mxu1 %v15005_v53  ;;  %13924 = vmatprep.mubr.msk.f32.mxu1 %vm15605_vm0, %v15606_v6 }
0x27bd   : > { %15007 = vmatprep.subr.bf16.mxu1 %v15604_v3 }
0x27be   : > { %v8899_v42 = vpop.f32.mrb[86].mxu1 }
0x27bf   : > { %v13890_v40 = vpop.f32.mrb[87].mxu1  ;;  %13896 = vmatmul.mubr.msk.f32.vlgmr.msra.gmra.mrb[76].mxu0 %vm1271_vm2, %v8899_v42 }
0x27c0   : > { %15009 = vmatpush3.bf16.msra.mxu1 %v15008_v35  ;;  %13913 = vmatprep.mubr.msk.f32.mxu0 %vm15605_vm0, %v15606_v6 }
0x27c1   : > { %13932 = vmatprep.subr.mxu1 %v15606_v6 }
0x27c3   : > { %13925 = vmatmul.mubr.msk.f32.vlgmr.msra.gmra.mrb[90].mxu1 %vm1189_vm1, %v16926_v44  ;;  %v12058_v44 = vld [vmem:[%s18145_s14 + $0x1] ss:$0 sm:$0xff] }
0x27c4   : > { %13934 = vmatprep.mubr.msk.f32.mxu1 %vm15605_vm0, %v15606_v6 }
0x288e   : > { %v9045_v15 = vpop.f32.mrb[88].mxu1 }
0x288f   : > { %v13904_v57 = vpop.f32.mrb[89].mxu1 }
0x2892   : > { %v8972_v48 = vpop.f32.mrb[76].mxu0 }
0x2893   : > { %v9046_v55 = vadd.f32 %v9045_v15, %v8972_v48  ;;  %v13897_v49 = vpop.f32.mrb[77].mxu0 }
0x2895   : > { %v9055_v56 = vadd.f32 %v12041_v41, %v9046_v55 }
0x2896   : > { %v9253_v39 = vpop.f32.mrb[90].mxu1 }
0x2897   : > { %v13926_v50 = vpop.f32.mrb[91].mxu1  ;;  %v9056_v59 = vadd.f32 %v9055_v56, %v17419_v47  ;;  %v17479_v43 = vadd.f32 %v12058_v44, %v9253_v39  ;;  %v12046_v47 = vld [vmem:[%s18144_s19 + $0x20] sm:$0xff]  ;;  %v12062_v39 = vld [vmem:[%s18149_s25 + $0x30] sm:$0xff] }
0x2898   : > { %v14999_v4 = vpack.c.bf16 %v12047_v0, %v12046_v47  ;;  %v12063_v50 = vld [vmem:[%s18149_s25 + $0x38] sm:$0xff] }
0x2899   : > { %v9061_v45 = vsel %vm1189_vm1, %v9056_v59, 0.0 }
0x289a   : > { %9062 = vadd.xlane.f32.xlu1 %v9061_v45  ;;  %15000 = vmatpush3.bf16.msra.mxu0 %v14999_v4 }
0x289b   : > { %15001 = vmatprep.subr.bf16.mxu0 %v15604_v3 }
0x289e   : > { %15003 = vmatpush3.bf16.msra.mxu0 %v15002_v26  ;;  %v12073_v26 = vld [vmem:[%s18150_s29 + $0x1] ss:$0 sm:$0xff] }
0x289f   : > { %13927 = vmatprep.subr.mxu0 %v15606_v6 }
0x28ab   : > { %9430 = vrot.lane.b32.xlu1 %v17479_v43, %s18133_s10 }
0x2927   : > { %v9063_v58 = vpop.xlane.xlu1 %9062 }
0x2928   : > { %v9064_v62 = vmul.f32 0.03125, %v9063_v58  ;;  %v12061_v58 = vld [vmem:[%s18149_s25 + $0x28] sm:$0xff] }
0x292a   : > { %v9065_v28 = vsub.f32 %v9056_v59, %v9064_v62  ;;  %v15011_v59 = vpack.c.bf16 %v12063_v50, %v12062_v39  ;;  %v12085_v39 = vld [vmem:[%s18151_s30 + $0x238] sm:$0xff] }
0x292b   : > { %v9431_v13 = vpop.permute.xlu1 %9430 }
0x292c   : > { %v9066_v46 = vmul.f32 %v9065_v28, %v9065_v28 }
0x292e   : > { %v9067_v2 = vsel %vm1189_vm1, %v9066_v46, 0.0 }
0x292f   : > { %9068 = vadd.xlane.f32.xlu0 %v9067_v2 }
0x29bc   : > { %v9069_v10 = vpop.xlane.xlu0 %9068 }
0x29bd   : > { %v9070_v31 = vmul.f32 0.03125, %v9069_v10 }
0x29bf   : > { %v9071_v11 = vadd.f32 1e-05, %v9070_v31 }
0x29c1   : > { %15484 = vrsqrt.f32 %v9071_v11 }
0x29cb   : > { %v15485_v60 = vpop.eup %15484 }
0x29cc   : > { %v9073_v19 = vmul.f32 %v15485_v60, %v9065_v28 }
0x29ce   : > { %v9080_v22 = vmul.f32 %v12044_v16, %v9073_v19 }
0x29d0   : > { %v17492_v23 = vadd.f32 %v12045_v21, %v9080_v22 }
0x29d2   : > { %13914 = vmatmul.mubr.msk.f32.vlgmr.msra.gmra.mrb[78].mxu0 %vm1189_vm1, %v17492_v23 }
0x29d3   : > { %13928 = vmatpush3.xpose.msk.msra.mxu0 %vm1271_vm2, %v17479_v43  ;;  %13929 = vmatprep.mubr.msk.f32.mxu0 %vm15605_vm0, %v15606_v6 }
0x29d4   : > { %13937 = vmatprep.subr.mxu0 %v15606_v6 }
0x2aa5   : > { %v9170_v27 = vpop.f32.mrb[78].mxu0 }
0x2aa6   : > { %v9171_v34 = vadd.f32 %v12051_v24, %v9170_v27  ;;  %v13915_v54 = vpop.f32.mrb[79].mxu0 }
0x2aa7   : > { %v12079_v54 = vld [vmem:[%s18151_s30 + $0x208] sm:$0xff] }
0x2aa8   : > { %9428 = vrot.lane.b32.xlu0 %v9171_v34, %s18133_s10  ;;  %13930 = vmatmul.mubr.msk.f32.vlgmr.msra.gmra.mrb[80].mxu0 %vm1271_vm2, %v9171_v34  ;;  %s18168_s10 = sld [smem:[#allocation43_spill]] }
0x2aa9   : > { %13938 = vmatpush3.xpose.msk.msra.mxu0 %vm1271_vm2, %v9431_v13  ;;  %13939 = vmatprep.mubr.msk.f32.mxu0 %vm15605_vm0, %v15606_v6  ;;  %v12095_v13 = vld [vmem:[%s18151_s30 + $0x288] sm:$0xff] }
0x2aaa   : > { %15010 = vmatprep.subr.bf16.mxu0 %v15604_v3 }
0x2b1a   : > { %v9429_v14 = vpop.permute.xlu0 %9428 }
0x2b1b   : > { %13940 = vmatmul.mubr.msk.f32.vlgmr.msra.gmra.mrb[82].mxu0 %vm1271_vm2, %v9429_v14  ;;  %v12081_v14 = vld [vmem:[%s18151_s30 + $0x218] sm:$0xff] }
0x2b1c   : > { %13951 = vmatprep.mubr.msk.f32.mxu0 %vm15605_vm0, %v15606_v6  ;;  %15012 = vmatpush3.bf16.msra.mxu0 %v15011_v59  ;;  %v12101_v59 = vld [vmem:[%s18151_s30 + $0x2b8] sm:$0xff] }
0x2b7b   : > { %v9336_v36 = vpop.f32.mrb[80].mxu0 }
0x2b7c   : > { %v9340_v18 = vmul.f32 0.25, %v9336_v36  ;;  %v13931_v12 = vpop.f32.mrb[81].mxu0  ;;  %v15016_v36 = vpack.c.bf16 %v12095_v13, %v12079_v54  ;;  %v12132_v54 = vld [vmem:[%s18151_s30 + $0x3b0] sm:$0xff]  ;;  %v12087_v13 = vld [vmem:[%s18151_s30 + $0x248] sm:$0xff] }
0x2b7d   : > { %v12094_v12 = vld [vmem:[%s18151_s30 + $0x280] sm:$0xff] }
0x2b7e   : > { %v9341_v63 = vsel %vm1347_vm3, %v9340_v18, -inf  ;;  %15017 = vmatprep.subr.bf16.mxu0 %v15016_v36  ;;  %v12089_v36 = vld [vmem:[%s18151_s30 + $0x258] sm:$0xff] }
0x2b7f   : > { %9342 = vmax.xlane.f32.xlu1 %v9341_v63 }
0x2bee   : > { %v9502_v61 = vpop.f32.mrb[82].mxu0 }
0x2bef   : > { %v9506_v17 = vmul.f32 0.25, %v9502_v61  ;;  %v13941_v20 = vpop.f32.mrb[83].mxu0 }
0x2bf0   : > { %v12096_v20 = vld [vmem:[%s18151_s30 + $0x290] sm:$0xff] }
0x2bf1   : > { %v9507_v53 = vsel %vm1347_vm3, %v9506_v17, -inf }
0x2bf2   : > { %9508 = vmax.xlane.f32.xlu0 %v9507_v53 }
0x2c0c   : > { %v9343_v9 = vpop.xlane.xlu1 %9342 }
0x2c0d   : > { %v9344_v1 = vsub.f32 %v9340_v18, %v9343_v9  ;;  %v12078_v18 = vld [vmem:[%s18151_s30 + $0x200] sm:$0xff]  ;;  %v12111_v9 = vld [vmem:[%s18151_s30 + $0x308] sm:$0xff] }
0x2c0e   : > { %v15018_v61 = vpack.c.bf16 %v12094_v12, %v12078_v18 }
0x2c0f   : > { %v9345_v37 = vmul.f32 1.442695, %v9344_v1  ;;  %v12127_v1 = vld [vmem:[%s18151_s30 + $0x388] sm:$0xff] }
0x2c11   : > { %15486 = vpow2.f32 %v9345_v37  ;;  %v12113_v37 = vld [vmem:[%s18151_s30 + $0x318] sm:$0xff] }
0x2c1b   : > { %v15487_v38 = vpop.eup %15486 }
0x2c1c   : > { %v9347_v35 = vsel %vm1347_vm3, %v15487_v38, 0.0 }
0x2c1d   : > { %9348 = vadd.xlane.f32.xlu1 %v9347_v35  ;;  %v12129_v35 = vld [vmem:[%s18151_s30 + $0x398] sm:$0xff] }
0x2c2e   : > { %9352 = vrot.lane.b32.xlu1 %v17479_v43, %s18138_s5  ;;  %s18165_s5 = sld [smem:[#allocation40_spill]] }
0x2c7f   : > { %v9509_v42 = vpop.xlane.xlu0 %9508 }
0x2c80   : > { %v9510_v40 = vsub.f32 %v9506_v17, %v9509_v42  ;;  %v12080_v17 = vld [vmem:[%s18151_s30 + $0x210] sm:$0xff]  ;;  %v12110_v42 = vld [vmem:[%s18151_s30 + $0x300] sm:$0xff] }
0x2c81   : > { %v15026_v53 = vpack.c.bf16 %v12096_v20, %v12080_v17 }
0x2c82   : > { %v9511_v15 = vmul.f32 1.442695, %v9510_v40  ;;  %v12126_v40 = vld [vmem:[%s18151_s30 + $0x380] sm:$0xff] }
0x2c84   : > { %15488 = vpow2.f32 %v9511_v15  ;;  %v15028_v15 = vpack.c.bf16 %v12129_v35, %v12113_v37  ;;  %v12135_v37 = vld [vmem:[%s18151_s30 + $0x3c8] sm:$0xff]  ;;  %v12137_v35 = vld [vmem:[%s18151_s30 + $0x3d8] sm:$0xff] }
0x2c8e   : > { %v15489_v57 = vpop.eup %15488 }
0x2c8f   : > { %v9513_v41 = vsel %vm1347_vm3, %v15489_v57, 0.0 }
0x2c90   : > { %9514 = vadd.xlane.f32.xlu0 %v9513_v41  ;;  %v12112_v41 = vld [vmem:[%s18151_s30 + $0x310] sm:$0xff] }
0x2ca6   : > { %9518 = vrot.lane.b32.xlu0 %v17479_v43, %s18137_s3  ;;  %v12060_v43 = vld [vmem:[%s18149_s25 + $0x20] sm:$0xff]  ;;  %s18166_s3 = sld [smem:[#allocation42_spill]] }
0x2ca7   : > { %v15014_v28 = vpack.c.bf16 %v12061_v58, %v12060_v43 }
0x2caa   : > { %v9349_v48 = vpop.xlane.xlu1 %9348 }
0x2cab   : > { %15490 = vrcp.f32 %v9349_v48  ;;  %v12128_v48 = vld [vmem:[%s18151_s30 + $0x390] sm:$0xff] }
0x2cae   : > { %v9353_v55 = vpop.permute.xlu1 %9352 }
0x2caf   : > { %13933 = vmatpush3.msra.mxu1 %v9353_v55  ;;  %v15030_v55 = vpack.c.bf16 %v12128_v48, %v12112_v41 }
0x2cb0   : > { %13942 = vmatprep.subr.mxu1 %v15606_v6 }
0x2cb5   : > { %v15491_v49 = vpop.eup %15490 }
0x2cb6   : > { %v9351_v56 = vmul.f32 %v15491_v49, %v15487_v38  ;;  %v15020_v38 = vpack.c.bf16 %v12127_v1, %v12111_v9  ;;  %v12083_v49 = vld [vmem:[%s18151_s30 + $0x228] sm:$0xff]  ;;  %v12104_v9 = vld [vmem:[%s18151_s30 + $0x2d0] sm:$0xff] }
0x2cb7   : > { %v12119_v1 = vld [vmem:[%s18151_s30 + $0x348] sm:$0xff] }
0x2cb8   : > { %13935 = vmatmul.mubr.msk.f32.vlgmr.msra.gmra.mrb[92].mxu1 %vm1347_vm3, %v9351_v56  ;;  %v12099_v56 = vld [vmem:[%s18151_s30 + $0x2a8] sm:$0xff]  ;;  %v15052_v41 = vpack.c.bf16 %v12135_v37, %v12119_v1  ;;  %v12154_v37 = vld [vmem:[%s18156_s16 + $0x810] sm:$0xff] }
0x2cb9   : > { %13944 = vmatprep.mubr.msk.f32.mxu1 %vm15605_vm0, %v15606_v6  ;;  %v15032_v50 = vpack.c.bf16 %v12099_v56, %v12083_v49  ;;  %v12136_v49 = vld [vmem:[%s18151_s30 + $0x3d0] sm:$0xff]  ;;  %v12091_v56 = vld [vmem:[%s18151_s30 + $0x268] sm:$0xff] }
0x2d1d   : > { %v9515_v45 = vpop.xlane.xlu0 %9514 }
0x2d1e   : > { %15492 = vrcp.f32 %v9515_v45  ;;  %v15040_v45 = vpack.c.bf16 %v12101_v59, %v12085_v39  ;;  %v12107_v39 = vld [vmem:[%s18151_s30 + $0x2e8] sm:$0xff]  ;;  %v12109_v59 = vld [vmem:[%s18151_s30 + $0x2f8] sm:$0xff] }
0x2d21   : > { %v9519_v44 = vpop.permute.xlu0 %9518 }
0x2d22   : > { %13943 = vmatpush3.msra.mxu1 %v9519_v44 }
0x2d23   : > { %15013 = vmatprep.subr.bf16.mxu1 %v15604_v3 }
0x2d28   : > { %v15493_v62 = vpop.eup %15492 }
0x2d29   : > { %v9517_v46 = vmul.f32 %v15493_v62, %v15489_v57  ;;  %v15022_v57 = vpack.c.bf16 %v12126_v40, %v12110_v42  ;;  %v12076_v62 = vld [vmem:[%s18152_s11 + $0x1] ss:$0 sm:$0xff] }
0x2d2b   : > { %13945 = vmatmul.mubr.msk.f32.vlgmr.msra.gmra.mrb[94].mxu1 %vm1347_vm3, %v9517_v46  ;;  %v12077_v46 = vld [vmem:[%s18154_s2 + $0x1] ss:$0 sm:$0xff] }
0x2d2c   : > { %15015 = vmatpush3.bf16.msra.mxu1 %v15014_v28  ;;  %13958 = vmatprep.mubr.msk.f32.mxu1 %vm15605_vm0, %v15606_v6 }
0x2d8b   : > { %v9424_v2 = vpop.f32.mrb[92].mxu1 }
0x2d8c   : > { %v13936_v47 = vpop.f32.mrb[93].mxu1  ;;  %13959 = vmatmul.mubr.msk.f32.vlgmr.msra.gmra.mrb[96].mxu1 %vm1271_vm2, %v9424_v2  ;;  %v12082_v2 = vld [vmem:[%s18151_s30 + $0x220] sm:$0xff] }
0x2d8d   : > { %10067 = vmatprep.mubr.f32.mxu1 %v15606_v6  ;;  %v12098_v47 = vld [vmem:[%s18151_s30 + $0x2a0] sm:$0xff] }
0x2dfe   : > { %v9590_v0 = vpop.f32.mrb[94].mxu1 }
0x2dff   : > { %v13946_v4 = vpop.f32.mrb[95].mxu1  ;;  %13952 = vmatmul.mubr.msk.f32.vlgmr.msra.gmra.mrb[84].mxu0 %vm1271_vm2, %v9590_v0 }
0x2e00   : > { %9996 = vmatprep.mubr.f32.mxu0 %v15606_v6  ;;  %15019 = vmatpush1.bf16.msra.mxu0 %v15018_v61  ;;  %v12084_v4 = vld [vmem:[%s18151_s30 + $0x230] sm:$0xff]  ;;  %v12102_v61 = vld [vmem:[%s18151_s30 + $0x2c0] sm:$0xff] }
0x2e01   : > { %15021 = vmatprep.subr.bf16.mxu0 %v15020_v38  ;;  %v12121_v38 = vld [vmem:[%s18151_s30 + $0x358] sm:$0xff] }
0x2e02   : > { %v15060_v48 = vpack.c.bf16 %v12137_v35, %v12121_v38  ;;  %v12155_v38 = vld [vmem:[%s18156_s16 + $0x818] sm:$0xff] }
0x2e04   : > { %15023 = vmatpush1.bf16.msra.mxu0 %v15022_v57  ;;  %v12134_v57 = vld [vmem:[%s18151_s30 + $0x3c0] sm:$0xff] }
0x2e05   : > { %15033 = vmatprep.subr.bf16.mxu0 %v15032_v50  ;;  %v12093_v50 = vld [vmem:[%s18151_s30 + $0x278] sm:$0xff] }
0x2e5f   : > { %v9736_v5 = vpop.f32.mrb[96].mxu1 }
0x2e60   : > { %v13960_v7 = vpop.f32.mrb[97].mxu1 }
0x2e61   : > { %v12115_v7 = vld [vmem:[%s18151_s30 + $0x328] sm:$0xff] }
0x2ed2   : > { %v9663_v10 = vpop.f32.mrb[84].mxu0 }
0x2ed3   : > { %v9737_v31 = vadd.f32 %v9736_v5, %v9663_v10  ;;  %v13953_v11 = vpop.f32.mrb[85].mxu0  ;;  %v12100_v5 = vld [vmem:[%s18151_s30 + $0x2b0] sm:$0xff]  ;;  %v12117_v10 = vld [vmem:[%s18151_s30 + $0x338] sm:$0xff] }
0x2ed5   : > { %v9746_v60 = vadd.f32 %v12073_v26, %v9737_v31  ;;  %v12131_v26 = vld [vmem:[%s18151_s30 + $0x3a8] sm:$0xff]  ;;  %v12133_v31 = vld [vmem:[%s18151_s30 + $0x3b8] sm:$0xff] }
0x2ed7   : > { %v9747_v16 = vadd.f32 %v9746_v60, %v17492_v23  ;;  %v12097_v23 = vld [vmem:[%s18151_s30 + $0x298] sm:$0xff]  ;;  %v15034_v60 = vpack.c.bf16 %v12098_v47, %v12082_v2  ;;  %v12108_v2 = vld [vmem:[%s18151_s30 + $0x2f0] sm:$0xff]  ;;  %v12123_v47 = vld [vmem:[%s18151_s30 + $0x368] sm:$0xff] }
0x2ed8   : > { %v15024_v63 = vpack.c.bf16 %v12097_v23, %v12081_v14  ;;  %v12103_v14 = vld [vmem:[%s18151_s30 + $0x2c8] sm:$0xff]  ;;  %v12105_v23 = vld [vmem:[%s18151_s30 + $0x2d8] sm:$0xff] }
0x2ed9   : > { %v9752_v19 = vsel %vm1189_vm1, %v9747_v16, 0.0  ;;  %v15048_v17 = vpack.c.bf16 %v12103_v14, %v12087_v13  ;;  %v15056_v20 = vpack.c.bf16 %v12105_v23, %v12089_v36  ;;  %v12152_v14 = vld [vmem:[%s18156_s16 + $0x800] sm:$0xff]  ;;  %v12153_v36 = vld [vmem:[%s18156_s16 + $0x808] sm:$0xff] }
0x2eda   : > { %9753 = vadd.xlane.f32.xlu1 %v9752_v19  ;;  %15025 = vmatprep.subr.bf16.mxu1 %v15024_v63  ;;  %v12114_v19 = vld [vmem:[%s18151_s30 + $0x320] sm:$0xff] }
0x2edb   : > { %15027 = vmatpush1.bf16.msra.mxu1 %v15026_v53  ;;  %v12086_v63 = vld [vmem:[%s18151_s30 + $0x240] sm:$0xff]  ;;  %v12088_v53 = vld [vmem:[%s18151_s30 + $0x250] sm:$0xff] }
0x2edc   : > { %15029 = vmatprep.subr.bf16.mxu1 %v15028_v15  ;;  %v15050_v42 = vpack.c.bf16 %v12102_v61, %v12086_v63  ;;  %v15058_v40 = vpack.c.bf16 %v12104_v9, %v12088_v53  ;;  %v12118_v15 = vld [vmem:[%s18151_s30 + $0x340] sm:$0xff]  ;;  %v12185_v63 = vld [vmem:[%s18156_s16 + $0x908] sm:$0xff]  ;;  %v12170_v61 = vld [vmem:[%s18156_s16 + $0x890] sm:$0xff]  ;;  %v15082_v9 = vpack.c.bf16 %v12153_v36, %v12152_v14 }
0x2edd   : > { %v12203_v53 = vld [vmem:[%s18156_s16 + $0x998] sm:$0xff]  ;;  %v12193_v14 = vld [vmem:[%s18156_s16 + $0x948] sm:$0xff]  ;;  %v12178_v36 = vld [vmem:[%s18156_s16 + $0x8d0] sm:$0xff] }
0x2edf   : > { %15031 = vmatpush1.bf16.msra.mxu1 %v15030_v55  ;;  %v12120_v55 = vld [vmem:[%s18151_s30 + $0x350] sm:$0xff] }
0x2ee0   : > { %15041 = vmatprep.subr.bf16.mxu1 %v15040_v45  ;;  %v15054_v45 = vpack.c.bf16 %v12134_v57, %v12118_v15  ;;  %v12187_v15 = vld [vmem:[%s18156_s16 + $0x918] sm:$0xff]  ;;  %v12172_v57 = vld [vmem:[%s18156_s16 + $0x8a0] sm:$0xff] }
0x2f67   : > { %v9754_v21 = vpop.xlane.xlu1 %9753 }
0x2f68   : > { %v9755_v22 = vmul.f32 0.03125, %v9754_v21  ;;  %v12130_v21 = vld [vmem:[%s18151_s30 + $0x3a0] sm:$0xff] }
0x2f69   : > { %v15038_v18 = vpack.c.bf16 %v12130_v21, %v12114_v19  ;;  %v12140_v19 = vld [vmem:[%s18151_s30 + $0x3f0] sm:$0xff]  ;;  %v12168_v21 = vld [vmem:[%s18156_s16 + $0x880] sm:$0xff] }
0x2f6a   : > { %v9756_v24 = vsub.f32 %v9747_v16, %v9755_v22  ;;  %v15042_v16 = vpack.c.bf16 %v12100_v5, %v12084_v4  ;;  %v12125_v4 = vld [vmem:[%s18151_s30 + $0x378] sm:$0xff] }
0x2f6b   : > { %v12141_v5 = vld [vmem:[%s18151_s30 + $0x3f8] sm:$0xff] }
0x2f6c   : > { %v9757_v27 = vmul.f32 %v9756_v24, %v9756_v24 }
0x2f6e   : > { %v9758_v34 = vsel %vm1189_vm1, %v9757_v27, 0.0  ;;  %v15044_v27 = vpack.c.bf16 %v12133_v31, %v12117_v10  ;;  %v12122_v10 = vld [vmem:[%s18151_s30 + $0x360] sm:$0xff] }
0x2f6f   : > { %9759 = vadd.xlane.f32.xlu0 %v9758_v34  ;;  %v12116_v34 = vld [vmem:[%s18151_s30 + $0x330] sm:$0xff]  ;;  %v12138_v31 = vld [vmem:[%s18151_s30 + $0x3e0] sm:$0xff] }
0x2f70   : > { %v15046_v12 = vpack.c.bf16 %v12132_v54, %v12116_v34  ;;  %v12201_v34 = vld [vmem:[%s18156_s16 + $0x988] sm:$0xff]  ;;  %v15070_v54 = vpack.c.bf16 %v12138_v31, %v12122_v10  ;;  %v12191_v10 = vld [vmem:[%s18156_s16 + $0x938] sm:$0xff]  ;;  %v12176_v31 = vld [vmem:[%s18156_s16 + $0x8c0] sm:$0xff] }
0x2ffc   : > { %v9760_v44 = vpop.xlane.xlu0 %9759 }
0x2ffd   : > { %v9761_v43 = vmul.f32 0.03125, %v9760_v44  ;;  %v15062_v44 = vpack.c.bf16 %v12136_v49, %v12120_v55  ;;  %v12205_v55 = vld [vmem:[%s18156_s16 + $0x9a8] sm:$0xff]  ;;  %v15086_v49 = vpack.c.bf16 %v12155_v38, %v12154_v37  ;;  %v12195_v37 = vld [vmem:[%s18156_s16 + $0x958] sm:$0xff]  ;;  %v12180_v38 = vld [vmem:[%s18156_s16 + $0x8e0] sm:$0xff] }
0x2fff   : > { %v9762_v58 = vadd.f32 1e-05, %v9761_v43  ;;  %v12090_v43 = vld [vmem:[%s18151_s30 + $0x260] sm:$0xff] }
0x3001   : > { %15494 = vrsqrt.f32 %v9762_v58  ;;  %v12106_v58 = vld [vmem:[%s18151_s30 + $0x2e0] sm:$0xff] }
0x300b   : > { %v15495_v28 = vpop.eup %15494 }
0x300c   : > { %v9764_v0 = vmul.f32 %v15495_v28, %v9756_v24  ;;  %v15036_v24 = vpack.c.bf16 %v12131_v26, %v12115_v7  ;;  %v15072_v28 = vpack.c.bf16 %v12109_v59, %v12093_v50  ;;  %v15066_v7 = vpack.c.bf16 %v12106_v58, %v12090_v43  ;;  %v12157_v50 = vld [vmem:[%s18156_s16 + $0x828] sm:$0xff]  ;;  %v12174_v58 = vld [vmem:[%s18156_s16 + $0x8b0] sm:$0xff] }
0x300d   : > { %v12189_v43 = vld [vmem:[%s18156_s16 + $0x928] sm:$0xff] }
0x300e   : > { %v9771_v11 = vmul.f32 %v12076_v62, %v9764_v0  ;;  %v15064_v62 = vpack.c.bf16 %v12107_v39, %v12091_v56  ;;  %v12139_v0 = vld [vmem:[%s18151_s30 + $0x3e8] sm:$0xff]  ;;  %v12156_v39 = vld [vmem:[%s18156_s16 + $0x820] sm:$0xff] }
0x3010   : > { %v17571_v22 = vadd.f32 %v12077_v46, %v9771_v11  ;;  %v12092_v46 = vld [vmem:[%s18151_s30 + $0x270] sm:$0xff]  ;;  %v15068_v11 = vpack.c.bf16 %v12139_v0, %v12123_v47 }
0x3011   : > { %v15074_v26 = vpack.c.bf16 %v12108_v2, %v12092_v46  ;;  %v12207_v46 = vld [vmem:[%s18156_s16 + $0x9b8] sm:$0xff]  ;;  %v15090_v2 = vpack.c.bf16 %v12157_v50, %v12156_v39  ;;  %v12158_v0 = vld [vmem:[%s18156_s16 + $0x830] sm:$0xff]  ;;  %v12197_v39 = vld [vmem:[%s18156_s16 + $0x968] sm:$0xff] }
0x3012   : > { %12144 = vmatmul.mubr.msk.f32.vlgmr.msra.gmra.mrb[86].mxu0 %vm1189_vm1, %v17571_v22  ;;  %12145 = vmatmul.mubr.msk.f32.vlgmr.msra.gmra.mrb[98].mxu1 %vm1189_vm1, %v17571_v22 }
0x3013   : > { %15035 = vmatpush1.bf16.msra.mxu0 %v15034_v60  ;;  %15043 = vmatpush1.bf16.msra.mxu1 %v15042_v16  ;;  %v15076_v60 = vpack.c.bf16 %v12141_v5, %v12125_v4  ;;  %v12124_v16 = vld [vmem:[%s18151_s30 + $0x370] sm:$0xff]  ;;  %v12159_v4 = vld [vmem:[%s18156_s16 + $0x838] sm:$0xff] }
0x3014   : > { %15037 = vmatprep.subr.bf16.mxu0 %v15036_v24  ;;  %15045 = vmatprep.subr.bf16.mxu1 %v15044_v27  ;;  %v12169_v24 = vld [vmem:[%s18156_s16 + $0x888] sm:$0xff]  ;;  %v12200_v27 = vld [vmem:[%s18156_s16 + $0x980] sm:$0xff]  ;;  %v15078_v13 = vpack.c.bf16 %v12140_v19, %v12124_v16  ;;  %v15094_v19 = vpack.c.bf16 %v12159_v4, %v12158_v0  ;;  %v12198_v0 = vld [vmem:[%s18156_s16 + $0x970] sm:$0xff] }
0x3015   : > { %10138 = vmatprep.mubr.f32.mxu0 %v15606_v6  ;;  %10209 = vmatprep.mubr.f32.mxu1 %v15606_v6  ;;  %v15080_v23 = vpack.c.bf16 %v12169_v24, %v12168_v21  ;;  %v12209_v16 = vld [vmem:[%s18156_s16 + $0x9c8] sm:$0xff]  ;;  %v12160_v24 = vld [vmem:[%s18156_s16 + $0x840] sm:$0xff]  ;;  %v12199_v4 = vld [vmem:[%s18156_s16 + $0x978] sm:$0xff] }
0x3017   : > { %15039 = vmatpush1.bf16.msra.mxu0 %v15038_v18  ;;  %15047 = vmatpush1.bf16.msra.mxu1 %v15046_v12  ;;  %v15112_v18 = vpack.c.bf16 %v12201_v34, %v12200_v27  ;;  %v12184_v12 = vld [vmem:[%s18156_s16 + $0x900] sm:$0xff]  ;;  %v12161_v27 = vld [vmem:[%s18156_s16 + $0x848] sm:$0xff] }
0x3018   : > { %15049 = vmatprep.subr.bf16.mxu0 %v15048_v17  ;;  %15057 = vmatprep.subr.bf16.mxu1 %v15056_v20  ;;  %v12171_v17 = vld [vmem:[%s18156_s16 + $0x898] sm:$0xff]  ;;  %v12202_v20 = vld [vmem:[%s18156_s16 + $0x990] sm:$0xff]  ;;  %v15114_v1 = vpack.c.bf16 %v12185_v63, %v12184_v12  ;;  %v15098_v63 = vpack.c.bf16 %v12161_v27, %v12160_v24 }
0x3019   : > { %v15084_v35 = vpack.c.bf16 %v12171_v17, %v12170_v61  ;;  %v12211_v12 = vld [vmem:[%s18156_s16 + $0x9d8] sm:$0xff]  ;;  %v12162_v17 = vld [vmem:[%s18156_s16 + $0x850] sm:$0xff] }
0x301a   : > { %12146 = vmatmul.mubr.msk.f32.vlgmr.msra.gmra.mrb[88].mxu0 %vm1189_vm1, %v17571_v22  ;;  %12147 = vmatmul.mubr.msk.f32.vlgmr.msra.gmra.mrb[100].mxu1 %vm1189_vm1, %v17571_v22 }
0x301b   : > { %15051 = vmatpush1.bf16.msra.mxu0 %v15050_v42  ;;  %15059 = vmatpush1.bf16.msra.mxu1 %v15058_v40  ;;  %v15116_v42 = vpack.c.bf16 %v12203_v53, %v12202_v20  ;;  %v12186_v40 = vld [vmem:[%s18156_s16 + $0x910] sm:$0xff]  ;;  %v12163_v20 = vld [vmem:[%s18156_s16 + $0x858] sm:$0xff] }
0x301c   : > { %15053 = vmatprep.subr.bf16.mxu0 %v15052_v41  ;;  %15061 = vmatprep.subr.bf16.mxu1 %v15060_v48  ;;  %v12173_v41 = vld [vmem:[%s18156_s16 + $0x8a8] sm:$0xff]  ;;  %v12204_v48 = vld [vmem:[%s18156_s16 + $0x9a0] sm:$0xff]  ;;  %v15118_v56 = vpack.c.bf16 %v12187_v15, %v12186_v40  ;;  %v15102_v15 = vpack.c.bf16 %v12163_v20, %v12162_v17  ;;  %v12234_v17 = vld [vmem:[%s18156_s16 + $0xa90] sm:$0xff] }
0x301d   : > { %10280 = vmatprep.mubr.f32.mxu0 %v15606_v6  ;;  %10351 = vmatprep.mubr.f32.mxu1 %v15606_v6  ;;  %v15088_v59 = vpack.c.bf16 %v12173_v41, %v12172_v57  ;;  %v12213_v40 = vld [vmem:[%s18156_s16 + $0x9e8] sm:$0xff]  ;;  %v12164_v41 = vld [vmem:[%s18156_s16 + $0x860] sm:$0xff] }
0x301f   : > { %15055 = vmatpush1.bf16.msra.mxu0 %v15054_v45  ;;  %15063 = vmatpush1.bf16.msra.mxu1 %v15062_v44  ;;  %v15120_v45 = vpack.c.bf16 %v12205_v55, %v12204_v48  ;;  %v12188_v44 = vld [vmem:[%s18156_s16 + $0x920] sm:$0xff] }
0x3020   : > { %15065 = vmatprep.subr.bf16.mxu0 %v15064_v62  ;;  %15073 = vmatprep.subr.bf16.mxu1 %v15072_v28  ;;  %v12175_v62 = vld [vmem:[%s18156_s16 + $0x8b8] sm:$0xff]  ;;  %v12206_v28 = vld [vmem:[%s18156_s16 + $0x9b0] sm:$0xff]  ;;  %v15122_v47 = vpack.c.bf16 %v12189_v43, %v12188_v44 }
0x3021   : > { %v15092_v5 = vpack.c.bf16 %v12175_v62, %v12174_v58  ;;  %v12183_v44 = vld [vmem:[%s18156_s16 + $0x8f8] sm:$0xff]  ;;  %v12214_v43 = vld [vmem:[%s18156_s16 + $0x9f0] sm:$0xff] }
0x3022   : > { %12148 = vmatmul.mubr.msk.f32.vlgmr.msra.gmra.mrb[90].mxu0 %vm1189_vm1, %v17571_v22  ;;  %12149 = vmatmul.mubr.msk.f32.vlgmr.msra.gmra.mrb[102].mxu1 %vm1189_vm1, %v17571_v22  ;;  %v12215_v62 = vld [vmem:[%s18156_s16 + $0x9f8] sm:$0xff] }
0x3023   : > { %15067 = vmatpush1.bf16.msra.mxu0 %v15066_v7  ;;  %15075 = vmatpush1.bf16.msra.mxu1 %v15074_v26  ;;  %v15124_v7 = vpack.c.bf16 %v12207_v46, %v12206_v28  ;;  %v12190_v26 = vld [vmem:[%s18156_s16 + $0x930] sm:$0xff]  ;;  %v12167_v46 = vld [vmem:[%s18156_s16 + $0x878] sm:$0xff] }
0x3024   : > { %15069 = vmatprep.subr.bf16.mxu0 %v15068_v11  ;;  %15077 = vmatprep.subr.bf16.mxu1 %v15076_v60  ;;  %v12177_v11 = vld [vmem:[%s18156_s16 + $0x8c8] sm:$0xff]  ;;  %v12208_v60 = vld [vmem:[%s18156_s16 + $0x9c0] sm:$0xff]  ;;  %v15126_v21 = vpack.c.bf16 %v12191_v10, %v12190_v26  ;;  %v12166_v28 = vld [vmem:[%s18156_s16 + $0x870] sm:$0xff] }
0x3025   : > { %10422 = vmatprep.mubr.f32.mxu0 %v15606_v6  ;;  %10493 = vmatprep.mubr.f32.mxu1 %v15606_v6  ;;  %v15096_v34 = vpack.c.bf16 %v12177_v11, %v12176_v31  ;;  %v12233_v26 = vld [vmem:[%s18156_s16 + $0xa88] sm:$0xff]  ;;  %v12264_v10 = vld [vmem:[%s18156_s16 + $0xb80] sm:$0xff] }
0x3026   : > { %v12265_v11 = vld [vmem:[%s18156_s16 + $0xb88] sm:$0xff] }
0x3027   : > { %15071 = vmatpush1.bf16.msra.mxu0 %v15070_v54  ;;  %15079 = vmatpush1.bf16.msra.mxu1 %v15078_v13  ;;  %v15128_v54 = vpack.c.bf16 %v12209_v16, %v12208_v60  ;;  %v12192_v13 = vld [vmem:[%s18156_s16 + $0x940] sm:$0xff]  ;;  %v15176_v60 = vpack.c.bf16 %v12265_v11, %v12264_v10  ;;  %v17698_v16 = vld [vmem:[%s18158_s15 + $0x10] sm:$0xff] }
0x3028   : > { %15081 = vmatprep.subr.bf16.mxu0 %v15080_v23  ;;  %15113 = vmatprep.subr.bf16.mxu1 %v15112_v18  ;;  %v12179_v23 = vld [vmem:[%s18156_s16 + $0x8d8] sm:$0xff]  ;;  %v12210_v18 = vld [vmem:[%s18156_s16 + $0x9d0] sm:$0xff]  ;;  %v15130_v61 = vpack.c.bf16 %v12193_v14, %v12192_v13  ;;  %v9856_v24 = vrot.slane %v17698_v16, %v16100_v32  ;;  %v9864_v27 = vrot.slane %v17698_v16, %v16103_v33  ;;  %v12216_v13 = vld [vmem:[%s18156_s16 + $0xa00] sm:$0xff] }
0x3029   : > { %v15100_v53 = vpack.c.bf16 %v12179_v23, %v12178_v36  ;;  %v12217_v14 = vld [vmem:[%s18156_s16 + $0xa08] sm:$0xff]  ;;  %v12252_v10 = vld [vmem:[%s18156_s16 + $0xb20] sm:$0xff]  ;;  %v12238_v11 = vld [vmem:[%s18156_s16 + $0xab0] sm:$0xff] }
0x302a   : > { %12150 = vmatmul.mubr.msk.f32.vlgmr.msra.gmra.mrb[92].mxu0 %vm1189_vm1, %v17571_v22  ;;  %12151 = vmatmul.mubr.msk.f32.vlgmr.msra.gmra.mrb[104].mxu1 %vm1189_vm1, %v17571_v22 }
0x302b   : > { %15083 = vmatpush3.bf16.msra.mxu0 %v15082_v9  ;;  %15115 = vmatpush3.bf16.msra.mxu1 %v15114_v1  ;;  %v15132_v9 = vpack.c.bf16 %v12211_v12, %v12210_v18  ;;  %v12194_v1 = vld [vmem:[%s18156_s16 + $0x950] sm:$0xff] }
0x302c   : > { %15085 = vmatprep.subr.bf16.mxu0 %v15084_v35  ;;  %15117 = vmatprep.subr.bf16.mxu1 %v15116_v42  ;;  %v12181_v35 = vld [vmem:[%s18156_s16 + $0x8e8] sm:$0xff]  ;;  %v12212_v42 = vld [vmem:[%s18156_s16 + $0x9e0] sm:$0xff]  ;;  %v15134_v57 = vpack.c.bf16 %v12195_v37, %v12194_v1  ;;  %v12266_v1 = vld [vmem:[%s18156_s16 + $0xb90] sm:$0xff] }
0x302d   : > { %v15104_v48 = vpack.c.bf16 %v12181_v35, %v12180_v38  ;;  %v15136_v55 = vpack.c.bf16 %v12213_v40, %v12212_v42  ;;  %v12267_v37 = vld [vmem:[%s18156_s16 + $0xb98] sm:$0xff]  ;;  %v15146_v42 = vpack.c.bf16 %v12217_v14, %v12216_v13 }
0x302f   : > { %15087 = vmatpush3.bf16.msra.mxu0 %v15086_v49  ;;  %15119 = vmatpush3.bf16.msra.mxu1 %v15118_v56  ;;  %v12165_v49 = vld [vmem:[%s18156_s16 + $0x868] sm:$0xff]  ;;  %v12196_v56 = vld [vmem:[%s18156_s16 + $0x960] sm:$0xff] }
0x3030   : > { %15089 = vmatprep.subr.bf16.mxu0 %v15088_v59  ;;  %15121 = vmatprep.subr.bf16.mxu1 %v15120_v45  ;;  %v15106_v50 = vpack.c.bf16 %v12165_v49, %v12164_v41  ;;  %v15138_v59 = vpack.c.bf16 %v12197_v39, %v12196_v56  ;;  %v12182_v45 = vld [vmem:[%s18156_s16 + $0x8f0] sm:$0xff]  ;;  %v15180_v49 = vpack.c.bf16 %v12267_v37, %v12266_v1  ;;  %v12251_v39 = vld [vmem:[%s18156_s16 + $0xb18] sm:$0xff] }
0x3031   : > { %v15108_v58 = vpack.c.bf16 %v12183_v44, %v12182_v45  ;;  %v12250_v56 = vld [vmem:[%s18156_s16 + $0xb10] sm:$0xff]  ;;  %v9880_v45 = vrot.slane %v17698_v16, %v16122_v52  ;;  %v12237_v44 = vld [vmem:[%s18156_s16 + $0xaa8] sm:$0xff] }
0x3033   : > { %15091 = vmatpush3.bf16.msra.mxu0 %v15090_v2  ;;  %15123 = vmatpush3.bf16.msra.mxu1 %v15122_v47  ;;  %v15140_v2 = vpack.c.bf16 %v12215_v62, %v12214_v43  ;;  %v15110_v47 = vpack.c.bf16 %v12167_v46, %v12166_v28  ;;  %v12268_v43 = vld [vmem:[%s18156_s16 + $0xba0] sm:$0xff] }
0x3034   : > { %15093 = vmatprep.subr.bf16.mxu0 %v15092_v5  ;;  %15125 = vmatprep.subr.bf16.mxu1 %v15124_v7  ;;  %v15142_v5 = vpack.c.bf16 %v12199_v4, %v12198_v0  ;;  %v12232_v7 = vld [vmem:[%s18156_s16 + $0xa80] sm:$0xff]  ;;  %v12221_v0 = vld [vmem:[%s18156_s16 + $0xa28] sm:$0xff] }
0x3035   : > { %v15144_v31 = vpack.c.bf16 %v12233_v26, %v12232_v7 }
0x3037   : > { %15095 = vmatpush3.bf16.msra.mxu0 %v15094_v19  ;;  %15127 = vmatpush3.bf16.msra.mxu1 %v15126_v21  ;;  %v9852_v19 = vrot.slane %v17698_v16, %v16091_v29  ;;  %v9860_v21 = vrot.slane %v17698_v16, %v16094_v30 }
0x3038   : > { %15097 = vmatprep.subr.bf16.mxu0 %v15096_v34  ;;  %15129 = vmatprep.subr.bf16.mxu1 %v15128_v54 }
0x303b   : > { %15099 = vmatpush3.bf16.msra.mxu0 %v15098_v63  ;;  %15131 = vmatpush3.bf16.msra.mxu1 %v15130_v61  ;;  %v12248_v63 = vld [vmem:[%s18156_s16 + $0xb00] sm:$0xff]  ;;  %v12249_v61 = vld [vmem:[%s18156_s16 + $0xb08] sm:$0xff] }
0x303c   : > { %15101 = vmatprep.subr.bf16.mxu0 %v15100_v53  ;;  %15133 = vmatprep.subr.bf16.mxu1 %v15132_v9  ;;  %v12235_v9 = vld [vmem:[%s18156_s16 + $0xa98] sm:$0xff]  ;;  %v15178_v40 = vpack.c.bf16 %v12249_v61, %v12248_v63  ;;  %v12254_v63 = vld [vmem:[%s18156_s16 + $0xb30] sm:$0xff] }
0x303d   : > { %v12255_v61 = vld [vmem:[%s18156_s16 + $0xb38] sm:$0xff] }
0x303f   : > { %15103 = vmatpush3.bf16.msra.mxu0 %v15102_v15  ;;  %15135 = vmatpush3.bf16.msra.mxu1 %v15134_v57  ;;  %v12218_v15 = vld [vmem:[%s18156_s16 + $0xa10] sm:$0xff]  ;;  %v12219_v57 = vld [vmem:[%s18156_s16 + $0xa18] sm:$0xff] }
0x3040   : > { %15105 = vmatprep.subr.bf16.mxu0 %v15104_v48  ;;  %15137 = vmatprep.subr.bf16.mxu1 %v15136_v55  ;;  %v15148_v55 = vpack.c.bf16 %v12235_v9, %v12234_v17  ;;  %v15150_v46 = vpack.c.bf16 %v12219_v57, %v12218_v15  ;;  %v12240_v17 = vld [vmem:[%s18156_s16 + $0xac0] sm:$0xff]  ;;  %v12273_v9 = vld [vmem:[%s18156_s16 + $0xbc8] sm:$0xff] }
0x3043   : > { %15107 = vmatpush3.bf16.msra.mxu0 %v15106_v50  ;;  %15139 = vmatpush3.bf16.msra.mxu1 %v15138_v59  ;;  %v12236_v50 = vld [vmem:[%s18156_s16 + $0xaa0] sm:$0xff]  ;;  %v9872_v59 = vrot.slane %v17698_v16, %v16119_v51 }
0x3044   : > { %15109 = vmatprep.subr.bf16.mxu0 %v15108_v58  ;;  %15141 = vmatprep.subr.bf16.mxu1 %v15140_v2  ;;  %v12269_v58 = vld [vmem:[%s18156_s16 + $0xba8] sm:$0xff]  ;;  %v15182_v2 = vpack.c.bf16 %v12251_v39, %v12250_v56  ;;  %v15152_v7 = vpack.c.bf16 %v12237_v44, %v12236_v50  ;;  %v12242_v56 = vld [vmem:[%s18156_s16 + $0xad0] sm:$0xff]  ;;  %v12243_v39 = vld [vmem:[%s18156_s16 + $0xad8] sm:$0xff] }
0x3045   : > { %v15184_v26 = vpack.c.bf16 %v12269_v58, %v12268_v43  ;;  %v12274_v50 = vld [vmem:[%s18156_s16 + $0xbd0] sm:$0xff] }
0x3046   : > { %v12226_v58 = vld [vmem:[%s18156_s16 + $0xa50] sm:$0xff] }
0x3047   : > { %15111 = vmatpush3.bf16.msra.mxu0 %v15110_v47  ;;  %15143 = vmatpush3.bf16.msra.mxu1 %v15142_v5  ;;  %v12220_v47 = vld [vmem:[%s18156_s16 + $0xa20] sm:$0xff] }
0x3048   : > { %15145 = vmatprep.subr.bf16.mxu0 %v15144_v31  ;;  %15177 = vmatprep.subr.bf16.mxu1 %v15176_v60  ;;  %v12253_v31 = vld [vmem:[%s18156_s16 + $0xb28] sm:$0xff]  ;;  %v15154_v13 = vpack.c.bf16 %v12221_v0, %v12220_v47  ;;  %v15164_v47 = vpack.c.bf16 %v12243_v39, %v12242_v56 }
0x3049   : > { %v15186_v14 = vpack.c.bf16 %v12253_v31, %v12252_v10  ;;  %v12276_v10 = vld [vmem:[%s18156_s16 + $0xbe0] sm:$0xff]  ;;  %v12277_v31 = vld [vmem:[%s18156_s16 + $0xbe8] sm:$0xff] }
0x304a   : > { %v12297_v56 = vld [vmem:[%s18156_s16 + $0xc88] sm:$0xff] }
0x30e5   : > { %v9998_v34 = vpop.f32.mrb[86].mxu0  ;;  %v10069_v54 = vpop.f32.mrb[98].mxu1 }
0x30e6   : > { %v9999_v36 = vadd.f32 %v9998_v34, %v9852_v19  ;;  %v10070_v23 = vadd.f32 %v10069_v54, %v9860_v21  ;;  %v10000_v18 = vpop.f32.mrb[87].mxu0  ;;  %v10071_v12 = vpop.f32.mrb[99].mxu1  ;;  %v12239_v21 = vld [vmem:[%s18156_s16 + $0xab8] sm:$0xff] }
0x30e7   : > { %v10001_v20 = vadd.f32 %v10000_v18, %v9856_v24  ;;  %v10072_v53 = vadd.f32 %v10071_v12, %v9864_v27  ;;  %v12270_v24 = vld [vmem:[%s18156_s16 + $0xbb0] sm:$0xff]  ;;  %v12271_v27 = vld [vmem:[%s18156_s16 + $0xbb8] sm:$0xff]  ;;  %v15156_v18 = vpack.c.bf16 %v12239_v21, %v12238_v11 }
0x30e8   : > { %v10500_v41 = vmax.f32 %v9999_v36, 0.0  ;;  %v10502_v48 = vmax.f32 %v10070_v23, 0.0  ;;  %v12222_v36 = vld [vmem:[%s18156_s16 + $0xa30] sm:$0xff]  ;;  %v12223_v23 = vld [vmem:[%s18156_s16 + $0xa38] sm:$0xff]  ;;  %v15188_v12 = vpack.c.bf16 %v12271_v27, %v12270_v24  ;;  %v12228_v24 = vld [vmem:[%s18156_s16 + $0xa60] sm:$0xff] }
0x30e9   : > { %v10501_v38 = vmax.f32 %v10001_v20, 0.0  ;;  %v10503_v35 = vmax.f32 %v10072_v53, 0.0  ;;  %v12241_v20 = vld [vmem:[%s18156_s16 + $0xac8] sm:$0xff]  ;;  %v12272_v53 = vld [vmem:[%s18156_s16 + $0xbc0] sm:$0xff] }
0x30ea   : > { %v12229_v27 = vld [vmem:[%s18156_s16 + $0xa68] sm:$0xff] }
0x30eb   : > { %10845 = vmatprep.mubr.f32.mxu0 %v10501_v38  ;;  %10915 = vmatprep.mubr.f32.mxu1 %v10503_v35  ;;  %v15158_v38 = vpack.c.bf16 %v12223_v23, %v12222_v36  ;;  %v15190_v35 = vpack.c.bf16 %v12255_v61, %v12254_v63  ;;  %v15200_v36 = vpack.c.bf16 %v12277_v31, %v12276_v10  ;;  %v12260_v23 = vld [vmem:[%s18156_s16 + $0xb60] sm:$0xff]  ;;  %v12247_v63 = vld [vmem:[%s18156_s16 + $0xaf8] sm:$0xff]  ;;  %v12278_v61 = vld [vmem:[%s18156_s16 + $0xbf0] sm:$0xff] }
0x30ec   : > { %10846 = vmatmul.mubr.f32.vlgmr.msra.gmra.mrb[94].mxu0 %v10500_v41  ;;  %10916 = vmatmul.mubr.f32.vlgmr.msra.gmra.mrb[106].mxu1 %v10502_v48  ;;  %v15160_v41 = vpack.c.bf16 %v12241_v20, %v12240_v17  ;;  %v15192_v48 = vpack.c.bf16 %v12273_v9, %v12272_v53  ;;  %v12279_v17 = vld [vmem:[%s18156_s16 + $0xbf8] sm:$0xff]  ;;  %v9868_v20 = vrot.slane %v17698_v16, %v16192_v25  ;;  %v12330_v10 = vld [vmem:[%s18156_s16 + $0xd90] sm:$0xff] }
0x30ed   : > { %v17728_v62 = vpop.f32.mrb[88].mxu0  ;;  %v17730_v28 = vpop.f32.mrb[100].mxu1  ;;  %15147 = vmatpush3.bf16.msra.mxu0 %v15146_v42  ;;  %15179 = vmatpush3.bf16.msra.mxu1 %v15178_v40  ;;  %v12224_v42 = vld [vmem:[%s18156_s16 + $0xa40] sm:$0xff]  ;;  %v12225_v40 = vld [vmem:[%s18156_s16 + $0xa48] sm:$0xff]  ;;  %v15170_v53 = vpack.c.bf16 %v12229_v27, %v12228_v24  ;;  %v12314_v24 = vld [vmem:[%s18156_s16 + $0xd10] sm:$0xff] }
0x30ee   : > { %v10142_v4 = vpop.f32.mrb[89].mxu0  ;;  %v10213_v5 = vpop.f32.mrb[101].mxu1  ;;  %15149 = vmatprep.subr.bf16.mxu0 %v15148_v55  ;;  %15181 = vmatprep.subr.bf16.mxu1 %v15180_v49  ;;  %v12256_v55 = vld [vmem:[%s18156_s16 + $0xb40] sm:$0xff]  ;;  %v12257_v49 = vld [vmem:[%s18156_s16 + $0xb48] sm:$0xff]  ;;  %v15162_v44 = vpack.c.bf16 %v12225_v40, %v12224_v42  ;;  %v12262_v42 = vld [vmem:[%s18156_s16 + $0xb70] sm:$0xff]  ;;  %v9876_v40 = vrot.slane %v17698_v16, %v16176_v8 }
0x30ef   : > { %v10143_v60 = vadd.f32 %v10142_v4, %v9872_v59  ;;  %v10214_v19 = vadd.f32 %v10213_v5, %v9880_v45  ;;  %v12275_v59 = vld [vmem:[%s18156_s16 + $0xbd8] sm:$0xff]  ;;  %v15194_v43 = vpack.c.bf16 %v12257_v49, %v12256_v55  ;;  %v12258_v4 = vld [vmem:[%s18156_s16 + $0xb50] sm:$0xff]  ;;  %v12296_v49 = vld [vmem:[%s18156_s16 + $0xc80] sm:$0xff] }
0x30f0   : > { %v17765_v45 = vld [vmem:[%s18158_s15 + $0x18] sm:$0xff]  ;;  %v15196_v0 = vpack.c.bf16 %v12275_v59, %v12274_v50  ;;  %v12328_v50 = vld [vmem:[%s18156_s16 + $0xd80] sm:$0xff]  ;;  %v12329_v59 = vld [vmem:[%s18156_s16 + $0xd88] sm:$0xff] }
0x30f1   : > { %v10505_v34 = vmax.f32 %v10143_v60, 0.0  ;;  %v10507_v54 = vmax.f32 %v10214_v19, 0.0  ;;  %15151 = vmatpush3.bf16.msra.mxu0 %v15150_v46  ;;  %15183 = vmatpush3.bf16.msra.mxu1 %v15182_v2  ;;  %v12227_v46 = vld [vmem:[%s18156_s16 + $0xa58] sm:$0xff]  ;;  %v9908_v2 = vrot.slane %v17765_v45, %v16176_v8  ;;  %v9888_v39 = vrot.slane %v17765_v45, %v16100_v32 }
0x30f2   : > { %15153 = vmatprep.subr.bf16.mxu0 %v15152_v7  ;;  %15185 = vmatprep.subr.bf16.mxu1 %v15184_v26  ;;  %v12259_v5 = vld [vmem:[%s18156_s16 + $0xb58] sm:$0xff]  ;;  %v12244_v7 = vld [vmem:[%s18156_s16 + $0xae0] sm:$0xff]  ;;  %v12245_v26 = vld [vmem:[%s18156_s16 + $0xae8] sm:$0xff]  ;;  %v15166_v19 = vpack.c.bf16 %v12227_v46, %v12226_v58  ;;  %v10141_v58 = vadd.f32 %v17728_v62, %v9868_v20  ;;  %v10212_v32 = vadd.f32 %v17730_v28, %v9876_v40 }
0x30f3   : > { %10985 = vmatprep.mubr.f32.mxu0 %v10505_v34  ;;  %11055 = vmatprep.mubr.f32.mxu1 %v10507_v54  ;;  %v15198_v21 = vpack.c.bf16 %v12259_v5, %v12258_v4  ;;  %v12263_v55 = vld [vmem:[%s18156_s16 + $0xb78] sm:$0xff]  ;;  %v15240_v46 = vpack.c.bf16 %v12329_v59, %v12328_v50  ;;  %v12313_v4 = vld [vmem:[%s18156_s16 + $0xd08] sm:$0xff]  ;;  %v12298_v5 = vld [vmem:[%s18156_s16 + $0xc90] sm:$0xff] }
0x30f4   : > { %v15206_v16 = vpack.c.bf16 %v12263_v55, %v12262_v42  ;;  %v12331_v62 = vld [vmem:[%s18156_s16 + $0xd98] sm:$0xff]  ;;  %v10504_v31 = vmax.f32 %v10141_v58, 0.0  ;;  %v12317_v40 = vld [vmem:[%s18156_s16 + $0xd28] sm:$0xff]  ;;  %v12334_v55 = vld [vmem:[%s18156_s16 + $0xdb0] sm:$0xff] }
0x30f5   : > { %v17748_v1 = vpop.f32.mrb[90].mxu0  ;;  %v17750_v37 = vpop.f32.mrb[102].mxu1  ;;  %15155 = vmatpush3.bf16.msra.mxu0 %v15154_v13  ;;  %15187 = vmatpush3.bf16.msra.mxu1 %v15186_v14  ;;  %v15168_v14 = vpack.c.bf16 %v12245_v26, %v12244_v7  ;;  %v12299_v26 = vld [vmem:[%s18156_s16 + $0xc98] sm:$0xff]  ;;  %v12286_v59 = vld [vmem:[%s18156_s16 + $0xc30] sm:$0xff]  ;;  %v12304_v58 = vld [vmem:[%s18156_s16 + $0xcc0] sm:$0xff] }
0x30f6   : > { %v17754_v15 = vpop.f32.mrb[91].mxu0  ;;  %v17756_v57 = vpop.f32.mrb[103].mxu1  ;;  %15157 = vmatprep.subr.bf16.mxu0 %v15156_v18  ;;  %15189 = vmatprep.subr.bf16.mxu1 %v15188_v12  ;;  %v12261_v18 = vld [vmem:[%s18156_s16 + $0xb68] sm:$0xff]  ;;  %v12246_v12 = vld [vmem:[%s18156_s16 + $0xaf0] sm:$0xff]  ;;  %v15212_v27 = vpack.c.bf16 %v12299_v26, %v12298_v5 }
0x30f7   : > { %v15202_v9 = vpack.c.bf16 %v12261_v18, %v12260_v23  ;;  %v12300_v23 = vld [vmem:[%s18156_s16 + $0xca0] sm:$0xff]  ;;  %v12301_v18 = vld [vmem:[%s18156_s16 + $0xca8] sm:$0xff] }
0x30f8   : > { %v12289_v5 = vld [vmem:[%s18156_s16 + $0xc48] sm:$0xff] }
0x30f9   : > { %15159 = vmatpush3.bf16.msra.mxu0 %v15158_v38  ;;  %15191 = vmatpush3.bf16.msra.mxu1 %v15190_v35  ;;  %v12230_v38 = vld [vmem:[%s18156_s16 + $0xa70] sm:$0xff]  ;;  %v12231_v35 = vld [vmem:[%s18156_s16 + $0xa78] sm:$0xff] }
0x30fa   : > { %15161 = vmatprep.subr.bf16.mxu0 %v15160_v41  ;;  %15193 = vmatprep.subr.bf16.mxu1 %v15192_v48  ;;  %v15172_v41 = vpack.c.bf16 %v12247_v63, %v12246_v12  ;;  %v15204_v48 = vpack.c.bf16 %v12279_v17, %v12278_v61  ;;  %v15174_v8 = vpack.c.bf16 %v12231_v35, %v12230_v38  ;;  %v12332_v63 = vld [vmem:[%s18156_s16 + $0xda0] sm:$0xff]  ;;  %v12333_v61 = vld [vmem:[%s18156_s16 + $0xda8] sm:$0xff] }
0x30fb   : > { %v12285_v38 = vld [vmem:[%s18156_s16 + $0xc28] sm:$0xff]  ;;  %v12316_v35 = vld [vmem:[%s18156_s16 + $0xd20] sm:$0xff]  ;;  %v15248_v42 = vpack.c.bf16 %v12333_v61, %v12332_v63 }
0x30fc   : > { %v12341_v63 = vld [vmem:[%s18156_s16 + $0xde8] sm:$0xff] }
0x30fd   : > { %v17777_v11 = vpop.f32.mrb[92].mxu0  ;;  %v10495_v60 = vpop.f32.mrb[104].mxu1  ;;  %15163 = vmatpush3.bf16.msra.mxu0 %v15162_v44  ;;  %15195 = vmatpush3.bf16.msra.mxu1 %v15194_v43  ;;  %v9896_v44 = vrot.slane %v17765_v45, %v16103_v33  ;;  %v15208_v43 = vpack.c.bf16 %v12297_v56, %v12296_v49  ;;  %v10285_v33 = vadd.f32 %v17754_v15, %v9888_v39  ;;  %v12335_v49 = vld [vmem:[%s18156_s16 + $0xdb8] sm:$0xff] }
0x30fe   : > { %v17781_v34 = vadd.f32 %v10495_v60, %v9908_v2  ;;  %v17783_v54 = vpop.f32.mrb[93].mxu0  ;;  %v17785_v13 = vpop.f32.mrb[105].mxu1  ;;  %15165 = vmatprep.subr.bf16.mxu0 %v15164_v47  ;;  %15197 = vmatprep.subr.bf16.mxu1 %v15196_v0  ;;  %v12280_v2 = vld [vmem:[%s18156_s16 + $0xc00] sm:$0xff]  ;;  %v12281_v47 = vld [vmem:[%s18156_s16 + $0xc08] sm:$0xff]  ;;  %v10506_v60 = vmax.f32 %v10212_v32, 0.0  ;;  %v15250_v39 = vpack.c.bf16 %v12317_v40, %v12316_v35  ;;  %v12310_v40 = vld [vmem:[%s18156_s16 + $0xcf0] sm:$0xff] }
0x30ff   : > { %v12312_v0 = vld [vmem:[%s18156_s16 + $0xd00] sm:$0xff]  ;;  %v10356_v7 = vadd.f32 %v17756_v57, %v9896_v44  ;;  %v15210_v28 = vpack.c.bf16 %v12281_v47, %v12280_v2  ;;  %v10509_v57 = vmax.f32 %v10285_v33, 0.0  ;;  %v12287_v44 = vld [vmem:[%s18156_s16 + $0xc38] sm:$0xff]  ;;  %v12305_v32 = vld [vmem:[%s18156_s16 + $0xcc8] sm:$0xff] }
0x3100   : > { %v15242_v15 = vpack.c.bf16 %v12313_v4, %v12312_v0  ;;  %v12337_v2 = vld [vmem:[%s18156_s16 + $0xdc8] sm:$0xff]  ;;  %v15222_v47 = vpack.c.bf16 %v12287_v44, %v12286_v59  ;;  %v15224_v0 = vpack.c.bf16 %v12305_v32, %v12304_v58  ;;  %v12288_v4 = vld [vmem:[%s18156_s16 + $0xc40] sm:$0xff]  ;;  %v12294_v59 = vld [vmem:[%s18156_s16 + $0xc70] sm:$0xff] }
0x3101   : > { %15167 = vmatpush3.bf16.msra.mxu0 %v15166_v19  ;;  %15199 = vmatpush3.bf16.msra.mxu1 %v15198_v21  ;;  %v12282_v19 = vld [vmem:[%s18156_s16 + $0xc10] sm:$0xff]  ;;  %v12283_v21 = vld [vmem:[%s18156_s16 + $0xc18] sm:$0xff]  ;;  %v10511_v12 = vmax.f32 %v10356_v7, 0.0  ;;  %v12320_v7 = vld [vmem:[%s18156_s16 + $0xd40] sm:$0xff] }
0x3102   : > { %15169 = vmatprep.subr.bf16.mxu0 %v15168_v14  ;;  %15201 = vmatprep.subr.bf16.mxu1 %v15200_v36  ;;  %v15244_v14 = vpack.c.bf16 %v12331_v62, %v12330_v10  ;;  %v12315_v36 = vld [vmem:[%s18156_s16 + $0xd18] sm:$0xff]  ;;  %v15214_v17 = vpack.c.bf16 %v12283_v21, %v12282_v19  ;;  %v12321_v10 = vld [vmem:[%s18156_s16 + $0xd48] sm:$0xff]  ;;  %v12306_v62 = vld [vmem:[%s18156_s16 + $0xcd0] sm:$0xff] }
0x3103   : > { %v15246_v20 = vpack.c.bf16 %v12315_v36, %v12314_v24  ;;  %v15258_v19 = vpack.c.bf16 %v12321_v10, %v12320_v7  ;;  %v12290_v24 = vld [vmem:[%s18156_s16 + $0xc50] sm:$0xff]  ;;  %v12323_v36 = vld [vmem:[%s18156_s16 + $0xd58] sm:$0xff]  ;;  %v12360_v32 = vld [vmem:[%s18156_s16 + $0xe80] sm:$0xff] }
0x3104   : > { %v12295_v44 = vld [vmem:[%s18156_s16 + $0xc78] sm:$0xff]  ;;  %v12345_v7 = vld [vmem:[%s18156_s16 + $0xe08] sm:$0xff] }
0x3105   : > { %15171 = vmatpush3.bf16.msra.mxu0 %v15170_v53  ;;  %15203 = vmatpush3.bf16.msra.mxu1 %v15202_v9  ;;  %v15216_v53 = vpack.c.bf16 %v12301_v18, %v12300_v23  ;;  %v12284_v9 = vld [vmem:[%s18156_s16 + $0xc20] sm:$0xff]  ;;  %v12309_v18 = vld [vmem:[%s18156_s16 + $0xce8] sm:$0xff]  ;;  %v12327_v58 = vld [vmem:[%s18156_s16 + $0xd78] sm:$0xff] }
0x3106   : > { %15173 = vmatprep.subr.bf16.mxu0 %v15172_v41  ;;  %15205 = vmatprep.subr.bf16.mxu1 %v15204_v48  ;;  %v12302_v41 = vld [vmem:[%s18156_s16 + $0xcb0] sm:$0xff]  ;;  %v12303_v48 = vld [vmem:[%s18156_s16 + $0xcb8] sm:$0xff]  ;;  %v15218_v56 = vpack.c.bf16 %v12285_v38, %v12284_v9  ;;  %v12308_v23 = vld [vmem:[%s18156_s16 + $0xce0] sm:$0xff] }
0x3107   : > { %v15220_v50 = vpack.c.bf16 %v12303_v48, %v12302_v41  ;;  %v12293_v9 = vld [vmem:[%s18156_s16 + $0xc68] sm:$0xff]  ;;  %v12324_v38 = vld [vmem:[%s18156_s16 + $0xd60] sm:$0xff]  ;;  %v12311_v41 = vld [vmem:[%s18156_s16 + $0xcf8] sm:$0xff] }
0x3108   : > { %v12342_v48 = vld [vmem:[%s18156_s16 + $0xdf0] sm:$0xff] }
0x3109   : > { %15175 = vmatpush3.bf16.msra.mxu0 %v15174_v8  ;;  %15207 = vmatpush3.bf16.msra.mxu1 %v15206_v16  ;;  %v12318_v8 = vld [vmem:[%s18156_s16 + $0xd30] sm:$0xff]  ;;  %v15252_v16 = vpack.c.bf16 %v12335_v49, %v12334_v55  ;;  %v12343_v55 = vld [vmem:[%s18156_s16 + $0xdf8] sm:$0xff] }
0x310a   : > { %15209 = vmatprep.subr.bf16.mxu0 %v15208_v43  ;;  %15241 = vmatprep.subr.bf16.mxu1 %v15240_v46  ;;  %v12319_v43 = vld [vmem:[%s18156_s16 + $0xd38] sm:$0xff]  ;;  %v12336_v46 = vld [vmem:[%s18156_s16 + $0xdc0] sm:$0xff] }
0x310b   : > { %v15254_v33 = vpack.c.bf16 %v12319_v43, %v12318_v8  ;;  %v15256_v26 = vpack.c.bf16 %v12337_v2, %v12336_v46  ;;  %v12326_v8 = vld [vmem:[%s18156_s16 + $0xd70] sm:$0xff]  ;;  %v15268_v43 = vpack.c.bf16 %v12343_v55, %v12342_v48  ;;  %v12361_v46 = vld [vmem:[%s18156_s16 + $0xe88] sm:$0xff]  ;;  %v12392_v2 = vld [vmem:[%s18156_s16 + $0xf80] sm:$0xff] }
0x310c   : > { %10986 = vmatmul.mubr.f32.vlgmr.msra.gmra.mrb[96].mxu0 %v10504_v31  ;;  %11056 = vmatmul.mubr.f32.vlgmr.msra.gmra.mrb[108].mxu1 %v10506_v60  ;;  %v12338_v31 = vld [vmem:[%s18156_s16 + $0xdd0] sm:$0xff]  ;;  %v12339_v60 = vld [vmem:[%s18156_s16 + $0xdd8] sm:$0xff]  ;;  %v12381_v48 = vld [vmem:[%s18156_s16 + $0xf28] sm:$0xff] }
0x310d   : > { %15211 = vmatpush3.bf16.msra.mxu0 %v15210_v28  ;;  %11125 = vmatprep.mubr.f32.mxu0 %v10509_v57  ;;  %v12307_v28 = vld [vmem:[%s18156_s16 + $0xcd8] sm:$0xff]  ;;  %v12366_v55 = vld [vmem:[%s18156_s16 + $0xeb0] sm:$0xff] }
0x310e   : > { %15243 = vmatpush3.bf16.msra.mxu1 %v15242_v15  ;;  %11195 = vmatprep.mubr.f32.mxu1 %v10511_v12  ;;  %v15226_v15 = vpack.c.bf16 %v12289_v5, %v12288_v4  ;;  %v15228_v21 = vpack.c.bf16 %v12307_v28, %v12306_v62  ;;  %v12291_v57 = vld [vmem:[%s18156_s16 + $0xc58] sm:$0xff]  ;;  %v12340_v12 = vld [vmem:[%s18156_s16 + $0xde0] sm:$0xff]  ;;  %v15270_v4 = vpack.c.bf16 %v12327_v58, %v12326_v8  ;;  %v12377_v62 = vld [vmem:[%s18156_s16 + $0xf08] sm:$0xff] }
0x310f   : > { %15213 = vmatprep.subr.bf16.mxu0 %v15212_v27  ;;  %15245 = vmatprep.subr.bf16.mxu1 %v15244_v14  ;;  %v12322_v27 = vld [vmem:[%s18156_s16 + $0xd50] sm:$0xff]  ;;  %v15260_v14 = vpack.c.bf16 %v12339_v60, %v12338_v31  ;;  %v15230_v61 = vpack.c.bf16 %v12291_v57, %v12290_v24  ;;  %v15264_v35 = vpack.c.bf16 %v12341_v63, %v12340_v12  ;;  %v12363_v31 = vld [vmem:[%s18156_s16 + $0xe98] sm:$0xff] }
0x3110   : > { %v15272_v5 = vpack.c.bf16 %v12361_v46, %v12360_v32  ;;  %v12346_v57 = vld [vmem:[%s18156_s16 + $0xe10] sm:$0xff]  ;;  %v12383_v32 = vld [vmem:[%s18156_s16 + $0xf38] sm:$0xff]  ;;  %v12368_v46 = vld [vmem:[%s18156_s16 + $0xec0] sm:$0xff] }
0x3111   : > { %15215 = vmatpush3.bf16.msra.mxu0 %v15214_v17  ;;  %v15262_v17 = vpack.c.bf16 %v12323_v36, %v12322_v27  ;;  %v12347_v27 = vld [vmem:[%s18156_s16 + $0xe18] sm:$0xff]  ;;  %v12350_v8 = vld [vmem:[%s18156_s16 + $0xe30] sm:$0xff] }
0x3112   : > { %15247 = vmatpush3.bf16.msra.mxu1 %v15246_v20  ;;  %15217 = vmatprep.subr.bf16.mxu0 %v15216_v53  ;;  %v15232_v20 = vpack.c.bf16 %v12309_v18, %v12308_v23  ;;  %v12292_v53 = vld [vmem:[%s18156_s16 + $0xc60] sm:$0xff]  ;;  %v12379_v23 = vld [vmem:[%s18156_s16 + $0xf18] sm:$0xff]  ;;  %v12365_v18 = vld [vmem:[%s18156_s16 + $0xea8] sm:$0xff] }
0x3113   : > { %15249 = vmatprep.subr.bf16.mxu1 %v15248_v42  ;;  %v12325_v42 = vld [vmem:[%s18156_s16 + $0xd68] sm:$0xff]  ;;  %v15234_v49 = vpack.c.bf16 %v12293_v9, %v12292_v53  ;;  %v15278_v53 = vpack.c.bf16 %v12347_v27, %v12346_v57  ;;  %v12372_v57 = vld [vmem:[%s18156_s16 + $0xee0] sm:$0xff] }
0x3114   : > { %v12373_v27 = vld [vmem:[%s18156_s16 + $0xee8] sm:$0xff] }
0x3115   : > { %15219 = vmatpush3.bf16.msra.mxu0 %v15218_v56  ;;  %v9884_v56 = vrot.slane %v17765_v45, %v16091_v29  ;;  %v9904_v29 = vrot.slane %v17765_v45, %v16119_v51  ;;  %v12344_v51 = vld [vmem:[%s18156_s16 + $0xe00] sm:$0xff] }
0x3116   : > { %15251 = vmatpush3.bf16.msra.mxu1 %v15250_v39  ;;  %15221 = vmatprep.subr.bf16.mxu0 %v15220_v50  ;;  %v15266_v39 = vpack.c.bf16 %v12325_v42, %v12324_v38  ;;  %v15236_v50 = vpack.c.bf16 %v12311_v41, %v12310_v40  ;;  %v12349_v42 = vld [vmem:[%s18156_s16 + $0xe28] sm:$0xff]  ;;  %v12380_v40 = vld [vmem:[%s18156_s16 + $0xf20] sm:$0xff] }
0x3117   : > { %15253 = vmatprep.subr.bf16.mxu1 %v15252_v16  ;;  %v9892_v16 = vrot.slane %v17765_v45, %v16094_v30  ;;  %v15238_v30 = vpack.c.bf16 %v12295_v44, %v12294_v59  ;;  %v10427_v28 = vadd.f32 %v17783_v54, %v9904_v29  ;;  %v12378_v54 = vld [vmem:[%s18156_s16 + $0xf10] sm:$0xff]  ;;  %v15314_v59 = vpack.c.bf16 %v12381_v48, %v12380_v40  ;;  %v12369_v29 = vld [vmem:[%s18156_s16 + $0xec8] sm:$0xff] }
0x3118   : > { %v15310_v9 = vpack.c.bf16 %v12379_v23, %v12378_v54  ;;  %v12404_v54 = vld [vmem:[%s18156_s16 + $0xfe0] sm:$0xff]  ;;  %v12358_v48 = vld [vmem:[%s18156_s16 + $0xe70] sm:$0xff] }
0x3119   : > { %15223 = vmatpush3.bf16.msra.mxu0 %v15222_v47  ;;  %v12393_v47 = vld [vmem:[%s18156_s16 + $0xf88] sm:$0xff]  ;;  %v10513_v12 = vmax.f32 %v10427_v28, 0.0  ;;  %v12403_v28 = vld [vmem:[%s18156_s16 + $0xfd8] sm:$0xff] }
0x311a   : > { %15255 = vmatpush3.bf16.msra.mxu1 %v15254_v33  ;;  %15225 = vmatprep.subr.bf16.mxu0 %v15224_v0  ;;  %v9912_v33 = vrot.slane %v17765_v45, %v16122_v52  ;;  %v10283_v0 = vadd.f32 %v17748_v1, %v9884_v56  ;;  %v15304_v10 = vpack.c.bf16 %v12393_v47, %v12392_v2  ;;  %v12376_v52 = vld [vmem:[%s18156_s16 + $0xf00] sm:$0xff]  ;;  %v12362_v1 = vld [vmem:[%s18156_s16 + $0xe90] sm:$0xff]  ;;  %v12401_v47 = vld [vmem:[%s18156_s16 + $0xfc8] sm:$0xff] }
0x311b   : > { %15257 = vmatprep.subr.bf16.mxu1 %v15256_v26  ;;  %v10354_v26 = vadd.f32 %v17750_v37, %v9892_v16  ;;  %v12395_v37 = vld [vmem:[%s18156_s16 + $0xf98] sm:$0xff]  ;;  %v15306_v24 = vpack.c.bf16 %v12377_v62, %v12376_v52  ;;  %v15276_v36 = vpack.c.bf16 %v12363_v31, %v12362_v1  ;;  %v12398_v56 = vld [vmem:[%s18156_s16 + $0xfb0] sm:$0xff]  ;;  %v12400_v2 = vld [vmem:[%s18156_s16 + $0xfc0] sm:$0xff] }
0x311c   : > { %v10498_v60 = vadd.f32 %v17785_v13, %v9912_v33  ;;  %v12364_v13 = vld [vmem:[%s18156_s16 + $0xea0] sm:$0xff]  ;;  %v12351_v16 = vld [vmem:[%s18156_s16 + $0xe38] sm:$0xff]  ;;  %v12402_v62 = vld [vmem:[%s18156_s16 + $0xfd0] sm:$0xff] }
0x311d   : > { %15227 = vmatpush3.bf16.msra.mxu0 %v15226_v15  ;;  %v15274_v15 = vpack.c.bf16 %v12345_v7, %v12344_v51  ;;  %v15280_v38 = vpack.c.bf16 %v12365_v18, %v12364_v13  ;;  %v15286_v33 = vpack.c.bf16 %v12351_v16, %v12350_v8  ;;  %v12384_v51 = vld [vmem:[%s18156_s16 + $0xf40] sm:$0xff]  ;;  %v15320_v7 = vpack.c.bf16 %v12401_v47, %v12400_v2  ;;  %v12371_v52 = vld [vmem:[%s18156_s16 + $0xed8] sm:$0xff] }
0x311e   : > { %15259 = vmatpush3.bf16.msra.mxu1 %v15258_v19  ;;  %15229 = vmatprep.subr.bf16.mxu0 %v15228_v21  ;;  %v12394_v19 = vld [vmem:[%s18156_s16 + $0xf90] sm:$0xff]  ;;  %v10508_v21 = vmax.f32 %v10283_v0, 0.0  ;;  %v15288_v0 = vpack.c.bf16 %v12369_v29, %v12368_v46  ;;  %v15296_v13 = vpack.c.bf16 %v12373_v27, %v12372_v57  ;;  %v12356_v18 = vld [vmem:[%s18156_s16 + $0xe60] sm:$0xff] }
0x311f   : > { %15261 = vmatprep.subr.bf16.mxu1 %v15260_v14  ;;  %v10510_v14 = vmax.f32 %v10354_v26, 0.0  ;;  %v15308_v63 = vpack.c.bf16 %v12395_v37, %v12394_v19  ;;  %v12385_v26 = vld [vmem:[%s18156_s16 + $0xf48] sm:$0xff]  ;;  %v12355_v19 = vld [vmem:[%s18156_s16 + $0xe58] sm:$0xff]  ;;  %v12386_v37 = vld [vmem:[%s18156_s16 + $0xf50] sm:$0xff] }
0x3120   : > { %v15322_v31 = vpack.c.bf16 %v12385_v26, %v12384_v51 }
0x3121   : > { %15231 = vmatpush3.bf16.msra.mxu0 %v15230_v61  ;;  %v12396_v61 = vld [vmem:[%s18156_s16 + $0xfa0] sm:$0xff] }
0x3122   : > { %15263 = vmatpush3.bf16.msra.mxu1 %v15262_v17  ;;  %15233 = vmatprep.subr.bf16.mxu0 %v15232_v20  ;;  %v12397_v17 = vld [vmem:[%s18156_s16 + $0xfa8] sm:$0xff]  ;;  %v10515_v20 = vmax.f32 %v10498_v60, 0.0 }
0x3123   : > { %15265 = vmatprep.subr.bf16.mxu1 %v15264_v35  ;;  %v12348_v35 = vld [vmem:[%s18156_s16 + $0xe20] sm:$0xff]  ;;  %v15312_v41 = vpack.c.bf16 %v12397_v17, %v12396_v61  ;;  %v12389_v17 = vld [vmem:[%s18156_s16 + $0xf68] sm:$0xff] }
0x3125   : > { %15235 = vmatpush3.bf16.msra.mxu0 %v15234_v49  ;;  %v12367_v49 = vld [vmem:[%s18156_s16 + $0xeb8] sm:$0xff] }
0x3126   : > { %15267 = vmatpush3.bf16.msra.mxu1 %v15266_v39  ;;  %15237 = vmatprep.subr.bf16.mxu0 %v15236_v50  ;;  %v12399_v39 = vld [vmem:[%s18156_s16 + $0xfb8] sm:$0xff]  ;;  %v15282_v50 = vpack.c.bf16 %v12349_v42, %v12348_v35  ;;  %v15284_v44 = vpack.c.bf16 %v12367_v49, %v12366_v55  ;;  %v9900_v42 = vrot.slane %v17765_v45, %v16192_v25  ;;  %v10514_v45 = vmax.f32 %v17781_v34, 0.0 }
0x3127   : > { %15269 = vmatprep.subr.bf16.mxu1 %v15268_v43  ;;  %v12382_v43 = vld [vmem:[%s18156_s16 + $0xf30] sm:$0xff]  ;;  %v15316_v58 = vpack.c.bf16 %v12399_v39, %v12398_v56  ;;  %v12359_v55 = vld [vmem:[%s18156_s16 + $0xe78] sm:$0xff] }
0x3128   : > { %v12390_v56 = vld [vmem:[%s18156_s16 + $0xf70] sm:$0xff]  ;;  %v12391_v39 = vld [vmem:[%s18156_s16 + $0xf78] sm:$0xff] }
0x3129   : > { %15239 = vmatpush3.bf16.msra.mxu0 %v15238_v30  ;;  %v15318_v30 = vpack.c.bf16 %v12383_v32, %v12382_v43  ;;  %v12409_v43 = vld [vmem:[%s18160_s20 + $0x1] ss:$0 sm:$0xff] }
0x312a   : > { %15271 = vmatpush3.bf16.msra.mxu1 %v15270_v4  ;;  %15273 = vmatprep.subr.bf16.mxu0 %v15272_v5  ;;  %v12352_v4 = vld [vmem:[%s18156_s16 + $0xe40] sm:$0xff]  ;;  %v12353_v5 = vld [vmem:[%s18156_s16 + $0xe48] sm:$0xff] }
0x312b   : > { %15305 = vmatprep.subr.bf16.mxu1 %v15304_v10  ;;  %v12370_v10 = vld [vmem:[%s18156_s16 + $0xed0] sm:$0xff]  ;;  %v15290_v1 = vpack.c.bf16 %v12353_v5, %v12352_v4 }
0x312c   : > { %11126 = vmatmul.mubr.f32.vlgmr.msra.gmra.mrb[98].mxu0 %v10508_v21  ;;  %v15292_v60 = vpack.c.bf16 %v12371_v52, %v12370_v10  ;;  %v15324_v21 = vpack.c.bf16 %v12403_v28, %v12402_v62 }
0x312d   : > { %11196 = vmatmul.mubr.f32.vlgmr.msra.gmra.mrb[110].mxu1 %v10510_v14  ;;  %15275 = vmatpush3.bf16.msra.mxu0 %v15274_v15  ;;  %v12354_v15 = vld [vmem:[%s18156_s16 + $0xe50] sm:$0xff]  ;;  %v12405_v14 = vld [vmem:[%s18156_s16 + $0xfe8] sm:$0xff] }
0x312e   : > { %11265 = vmatprep.mubr.f32.mxu0 %v10513_v12  ;;  %15307 = vmatpush3.bf16.msra.mxu1 %v15306_v24  ;;  %v12387_v24 = vld [vmem:[%s18156_s16 + $0xf58] sm:$0xff]  ;;  %v12357_v12 = vld [vmem:[%s18156_s16 + $0xe68] sm:$0xff]  ;;  %v15328_v61 = vpack.c.bf16 %v12405_v14, %v12404_v54 }
0x312f   : > { %11335 = vmatprep.mubr.f32.mxu1 %v10515_v20  ;;  %15277 = vmatprep.subr.bf16.mxu0 %v15276_v36  ;;  %v15294_v36 = vpack.c.bf16 %v12355_v19, %v12354_v15  ;;  %v15326_v23 = vpack.c.bf16 %v12387_v24, %v12386_v37  ;;  %v12374_v20 = vld [vmem:[%s18156_s16 + $0xef0] sm:$0xff]  ;;  %v15298_v35 = vpack.c.bf16 %v12357_v12, %v12356_v18 }
0x3130   : > { %15309 = vmatprep.subr.bf16.mxu1 %v15308_v63  ;;  %v12388_v63 = vld [vmem:[%s18156_s16 + $0xf60] sm:$0xff] }
0x3131   : > { %15279 = vmatpush3.bf16.msra.mxu0 %v15278_v53  ;;  %v12375_v53 = vld [vmem:[%s18156_s16 + $0xef8] sm:$0xff]  ;;  %v15330_v40 = vpack.c.bf16 %v12389_v17, %v12388_v63 }
0x3132   : > { %15311 = vmatpush3.bf16.msra.mxu1 %v15310_v9  ;;  %15281 = vmatprep.subr.bf16.mxu0 %v15280_v38  ;;  %v12406_v9 = vld [vmem:[%s18156_s16 + $0xff0] sm:$0xff]  ;;  %v12407_v38 = vld [vmem:[%s18156_s16 + $0xff8] sm:$0xff] }
0x3133   : > { %15313 = vmatprep.subr.bf16.mxu1 %v15312_v41  ;;  %v15300_v41 = vpack.c.bf16 %v12375_v53, %v12374_v20  ;;  %v15332_v49 = vpack.c.bf16 %v12407_v38, %v12406_v9  ;;  %v12412_v20 = vld [vmem:[%s18162_s0 + $0x1] ss:$0 sm:$0xff]  ;;  %s1172_s0 = scalar_lea.vmem [#allocation2], %s1171_s1 }
0x3134   : > { %v12413_v53 = vld [vmem:[%s18164_s12 + $0x1] ss:$0 sm:$0xff]  ;;  %s11496_s2 = sshll.u32 %s1172_s0, 4  ;;  %s17978_s2 = int_to_ptr.vmem [resolvable:$true] %s11496_s2 }
0x3135   : > { %15283 = vmatpush3.bf16.msra.mxu0 %v15282_v50  ;;  %v15302_v50 = vpack.c.bf16 %v12359_v55, %v12358_v48  ;;  %s15501_s6 = scalar_lea.vmem %s17978_s2, 16 }
0x3136   : > { %15315 = vmatpush3.bf16.msra.mxu1 %v15314_v59  ;;  %15285 = vmatprep.subr.bf16.mxu0 %v15284_v44  ;;  %v10425_v59 = vadd.f32 %v17777_v11, %v9900_v42  ;;  %v15334_v44 = vpack.c.bf16 %v12391_v39, %v12390_v56  ;;  %v11403_v56 = vld [vmem:[%s18110_s4 + $0x8] sm:$0xff]  ;;  %p15502_p11 = scmp.ne.s32.totalorder %s17978_s2, %s15501_s6 }
0x3137   : > { %15317 = vmatprep.subr.bf16.mxu1 %v15316_v58 }
0x3138   : > { %v10512_v25 = vmax.f32 %v10425_v59, 0.0  ;;  %v11405_v59 = vld [vmem:[%s18110_s4 + $0x18] sm:$0xff]  ;;  %p15503_p12 = pnand %p15502_p11, %p15856_p5 }
0x3139   : > { %15287 = vmatpush3.bf16.msra.mxu0 %v15286_v33 }
0x313a   : > { %15319 = vmatpush3.bf16.msra.mxu1 %v15318_v30  ;;  %15289 = vmatprep.subr.bf16.mxu0 %v15288_v0  ;;  %p15504_p13 = pneg %p15503_p12 }
0x313b   : > { %15321 = vmatprep.subr.bf16.mxu1 %v15320_v7 }
0x313d   : > { %15291 = vmatpush3.bf16.msra.mxu0 %v15290_v1 }
0x313e   : > { %15323 = vmatpush3.bf16.msra.mxu1 %v15322_v31  ;;  %15293 = vmatprep.subr.bf16.mxu0 %v15292_v60 }
0x313f   : > { %15325 = vmatprep.subr.bf16.mxu1 %v15324_v21 }
0x3141   : > { %15295 = vmatpush3.bf16.msra.mxu0 %v15294_v36 }
0x3142   : > { %15327 = vmatpush3.bf16.msra.mxu1 %v15326_v23  ;;  %15297 = vmatprep.subr.bf16.mxu0 %v15296_v13 }
0x3143   : > { %15329 = vmatprep.subr.bf16.mxu1 %v15328_v61 }
0x3145   : > { %15299 = vmatpush3.bf16.msra.mxu0 %v15298_v35 }
0x3146   : > { %15331 = vmatpush3.bf16.msra.mxu1 %v15330_v40  ;;  %15301 = vmatprep.subr.bf16.mxu0 %v15300_v41 }
0x3147   : > { %15333 = vmatprep.subr.bf16.mxu1 %v15332_v49  ;;  %v11402_v49 = vld [vmem:[%s18110_s4] sm:$0xff] }
0x3148   : > { %v15337_v39 = vpack.c.bf16 %v11403_v56, %v11402_v49 }
0x3149   : > { %15303 = vmatpush3.bf16.msra.mxu0 %v15302_v50  ;;  %v11404_v50 = vld [vmem:[%s18110_s4 + $0x10] sm:$0xff]  ;;  %s17976_s4 = scalar_lea.hbm %s18168_s10, %s12417_s26 }
0x314a   : > { %15335 = vmatpush3.bf16.msra.mxu1 %v15334_v44  ;;  %15336 = vmatprep.subr.bf16.mxu0 %v15604_v3  ;;  %v15340_v44 = vpack.c.bf16 %v11405_v59, %v11404_v50 }
0x314c   : > { %11266 = vmatmul.mubr.f32.vlgmr.msra.gmra.mrb[100].mxu0 %v10512_v25 }
0x314d   : > { %11336 = vmatmul.mubr.f32.vlgmr.msra.gmra.mrb[112].mxu1 %v10514_v45  ;;  %13969 = vmatprep.mubr.msk.f32.mxu0 %vm15605_vm0, %v15606_v6 }
0x314e   : > { %15338 = vmatpush3.bf16.msra.mxu0 %v15337_v39 }
0x314f   : > { %15339 = vmatprep.subr.bf16.mxu0 %v15604_v3 }
0x3152   : > { %15341 = vmatpush3.bf16.msra.mxu0 %v15340_v44 }
0x31bf   : > { %v13416_v8 = vpop.f32.mrb[94].mxu0  ;;  %v13451_v16 = vpop.f32.mrb[106].mxu1 }
0x31c0   : > { %v13417_v11 = vpop.f32.mrb[95].mxu0  ;;  %v13452_v58 = vpop.f32.mrb[107].mxu1 }
0x31c1   : > { %v13418_v32 = vadd.f32 %v13417_v11, %v13416_v8  ;;  %v13453_v46 = vadd.f32 %v13452_v58, %v13451_v16  ;;  %v12415_v58 = vld [vmem:[%s15801_s27] ss:$0 sm:$0xff] }
0x31c3   : > { %v10848_v29 = vadd.f32 %v13418_v32, %v12409_v43  ;;  %v12414_v43 = vld [vmem:[%s18165_s5] ss:$0 sm:$0xff]  ;;  %s11484_s5 = scalar_lea.sflag [#allocation3], %s1171_s1 }
0x31c5   : > { %v10918_v2 = vadd.f32 %v13453_v46, %v10848_v29 }
0x31df   : > { %v13486_v47 = vpop.f32.mrb[96].mxu0  ;;  %v13521_v33 = vpop.f32.mrb[108].mxu1 }
0x31e0   : > { %v13487_v30 = vpop.f32.mrb[97].mxu0  ;;  %v13522_v0 = vpop.f32.mrb[109].mxu1 }
0x31e1   : > { %v13488_v4 = vadd.f32 %v13487_v30, %v13486_v47  ;;  %v13523_v34 = vadd.f32 %v13522_v0, %v13521_v33 }
0x31e3   : > { %v10988_v5 = vadd.f32 %v13488_v4, %v10918_v2  ;;  %v11406_v2 = vld [vmem:[%s18166_s3] sm:$0x1]  ;;  %s15612_s3 = smov [#allocation2]  }
0x31e4   : > { %s15505_s22 = sshll.u32 %s15612_s3, 4  ;;  %s15506_s22 = int_to_ptr.vmem [resolvable:$false] %s15505_s22 }
0x31e5   : > { %v11058_v51 = vadd.f32 %v13523_v34, %v10988_v5  ;;  %s15507_s7 = scalar_lea.vmem %s15506_s22, 32  ;;  %p15508_p0 = scmp.lt.s32.totalorder %s17978_s2, %s15506_s22 }
0x31e6   : > { %p15509_p1 = scmp.lt.s32.totalorder %s15507_s7, %s15501_s6 }
0x31e8   : > { %p15510_p2 = por %p15509_p1, %p15508_p0 }
0x31ea   : > { %p15511_p3 = pnand %p15510_p2, %p15504_p13 }
0x31ff   : > { %v13556_v7 = vpop.f32.mrb[98].mxu0 }
0x3200   : > { %v13591_v26 = vpop.f32.mrb[110].mxu1  ;;  %v13557_v6 = vpop.f32.mrb[99].mxu0 }
0x3201   : > { %v13558_v10 = vadd.f32 %v13557_v6, %v13556_v7  ;;  %v13592_v52 = vpop.f32.mrb[111].mxu1 }
0x3202   : > { %v13593_v62 = vadd.f32 %v13592_v52, %v13591_v26 }
0x3203   : > { %v11128_v28 = vadd.f32 %v13558_v10, %v11058_v51 }
0x3205   : > { %v11198_v1 = vadd.f32 %v13593_v62, %v11128_v28 }
0x321f   : > { %v13626_v31 = vpop.f32.mrb[100].mxu0 }
0x3220   : > { %v13661_v60 = vpop.f32.mrb[112].mxu1  ;;  %v13627_v15 = vpop.f32.mrb[101].mxu0 }
0x3221   : > { %v13628_v19 = vadd.f32 %v13627_v15, %v13626_v31  ;;  %v13662_v37 = vpop.f32.mrb[113].mxu1 }
0x3222   : > { %v13663_v21 = vadd.f32 %v13662_v37, %v13661_v60 }
0x3223   : > { %v11268_v24 = vadd.f32 %v13628_v19, %v11198_v1 }
0x3225   : > { %v11338_v57 = vadd.f32 %v13663_v21, %v11268_v24 }
0x3227   : > { %v11341_v27 = vadd.f32 %v11338_v57, %v17571_v22 }
0x3229   : > { %v11346_v54 = vsel %vm1189_vm1, %v11341_v27, 0.0 }
0x322a   : > { %11347 = vadd.xlane.f32.xlu1 %v11346_v54 }
0x32b7   : > { %v11348_v14 = vpop.xlane.xlu1 %11347 }
0x32b8   : > { %v11349_v36 = vmul.f32 0.03125, %v11348_v14 }
0x32ba   : > { %v11350_v23 = vsub.f32 %v11341_v27, %v11349_v36 }
0x32bc   : > { %v11351_v13 = vmul.f32 %v11350_v23, %v11350_v23 }
0x32be   : > { %v11352_v18 = vsel %vm1189_vm1, %v11351_v13, 0.0 }
0x32bf   : > { %11353 = vadd.xlane.f32.xlu0 %v11352_v18 }
0x334c   : > { %v11354_v12 = vpop.xlane.xlu0 %11353 }
0x334d   : > { %v11355_v63 = vmul.f32 0.03125, %v11354_v12 }
0x334f   : > { %v11356_v61 = vadd.f32 1e-05, %v11355_v63 }
0x3351   : > { %15496 = vrsqrt.f32 %v11356_v61 }
0x335b   : > { %v15497_v17 = vpop.eup %15496 }
0x335c   : > { %v11358_v22 = vmul.f32 %v15497_v17, %v11350_v23 }
0x335e   : > { %v11365_v9 = vmul.f32 %v12412_v20, %v11358_v22 }
0x3360   : > { %v11372_v38 = vadd.f32 %v12413_v53, %v11365_v9 }
0x3362   : > { %v11375_v35 = vsel %vm1189_vm1, %v11372_v38, 0.0 }
0x3363   : > { %11376 = vadd.xlane.f32.xlu1 %v11375_v35 }
0x33f0   : > { %v11377_v42 = vpop.xlane.xlu1 %11376 }
0x33f1   : > { %v11378_v40 = vmul.f32 0.03125, %v11377_v42 }
0x33f3   : > { %v11379_v41 = vsub.f32 %v11372_v38, %v11378_v40 }
0x33f5   : > { %v11380_v48 = vmul.f32 %v11379_v41, %v11379_v41 }
0x33f7   : > { %v11381_v55 = vsel %vm1189_vm1, %v11380_v48, 0.0 }
0x33f8   : > { %11382 = vadd.xlane.f32.xlu0 %v11381_v55 }
0x3485   : > { %v11383_v25 = vpop.xlane.xlu0 %11382 }
0x3486   : > { %v11384_v45 = vmul.f32 0.03125, %v11383_v25 }
0x3488   : > { %v11385_v8 = vadd.f32 1e-05, %v11384_v45 }
0x348a   : > { %15498 = vrsqrt.f32 %v11385_v8 }
0x3494   : > { %v15499_v16 = vpop.eup %15498 }
0x3495   : > { %v11387_v11 = vmul.f32 %v15499_v16, %v11379_v41 }
0x3497   : > { %v11394_v32 = vmul.f32 %v12414_v43, %v11387_v11 }
0x3499   : > { %v11401_v46 = vadd.f32 %v12415_v58, %v11394_v32 }
0x349b   : > { %v11408_v29 = vrot.slane %v11401_v46, 7 }
0x349d   : > { %13970 = vmatmul.mubr.msk.f32.vlgmr.msra.gmra.mrb[102].mxu0 %vm1189_vm1, %v11408_v29 }
0x3570   : > { %v11477_v3 = vpop.f32.mrb[102].mxu0 }
0x3571   : > { %v11478_v47 = vadd.f32 %v11477_v3, %v11406_v2  ;;  %v13971_v33 = vpop.f32.mrb[103].mxu0 }
0x3573   : > { %11482 = vst.msk [vmem:[%s1172_s0] sm:$0x1] %vm11481_vm4, %v11478_v47 }
0x3574   : > { %15514 = shalt.err (!%p15511_p3)
}
0x3575   : > { %s15515_s0 = scalar_lea.hbm %s17976_s4, 16  ;;  %s15519_s1 = scalar_lea.hbm %s18168_s10, 32 }
0x3576   : > { %p15516_p4 = scmp.ne.s32.totalorder %s17976_s4, %s15515_s0  ;;  %p15520_p9 = scmp.lt.u32.totalorder %s17976_s4, %s18168_s10 }
0x3577   : > { %p15521_p10 = scmp.lt.u32.totalorder %s15519_s1, %s15515_s0  ;;  %p15523_p12 = scmp.lt.u32.totalorder %s15515_s0, %s17976_s4 }
0x3578   : > { %p15517_p7 = pnand %p15516_p4, %p15856_p5 }
0x3579   : > { %p15522_p11 = por %p15521_p10, %p15520_p9 }
0x357a   : > { %p15518_p8 = pneg %p15517_p7 }
0x357b   : > { %p15524_p0 = por %p15523_p12, %p15522_p11 }
0x357d   : > { %p15525_p13 = pnand %p15524_p0, %p15518_p8 }
0x357f   : > { %15528 = shalt.err (!%p15525_p13)
}
0x3580   : > { %15342 = dma.vmem_to_hbm [thread:$0]  (%p15856_p5), %s17978_s2, 16, %s17976_s4, %s11484_s5  }
0x3581 PF: > { %s18170_s6 = sld [smem:[#allocation44_spill]]  ;;  %p15348_p1 = scmp.ge.s32.totalorder %s15563_s28, 2 }
0x3583   : > { %p15345_p2 = pnand %p15348_p1, %p15860_p6 }
0x3587   : > { %s11508_s26 = sand.u32 1, %s18170_s6  }
0x3588   : > { %s11509_s3 = scalar_lea.sflag [#allocation3], %s11508_s26 }
0x3589   : > { %15546 = dma.done.wait (!%p15345_p2), %s11509_s3, 16  }
0x358a   : > { %15548 = vsyncadd (!%p15345_p2), %s11509_s3, 4294967280  ;;  %s18172_s28 = sld [smem:[#allocation47_spill]]  ;;  %s18173_s0 = sld [smem:[#allocation45_spill]] }
0x358b   : > { %s18174_s26 = sld [smem:[#allocation48_spill]]  ;;  %s18175_s22 = smov %s15555_s23 }
0x3590   : > { %p89_p3 = scmp.ge.s32.totalorder %s18172_s28, 4   ;;  %s18176_s23 = smov %s18173_s0 }
0x3592   :  { %91 = sbr.rel (!%p89_p3) target bundleno = 97 (0x61), region = 282 }
0x3599   :  { %11513 = vsyncpa [#allocation3], 1 }
0x359a   :  { %11515 = vsyncpa [#allocation3 + $0x1], 1 }

</bundles_post_ra>
